<compile_context>
chip_gen: v7x
topology: tpu7x:2x2x1
jax: 0.10.0
libtpu: 0.0.40
codegen_flags: <defaults>
</compile_context>

<pallas_src>
import functools

import jax
import jax.numpy as jnp
from jax.experimental import pallas as pl
from jax.experimental.pallas import tpu as pltpu

K_FEATURES = 44944            # 212 * 212 * 1 (Linear in_features)
HIDDEN = 128
OUT = 2
OUT_PAD = 128                 # pad fc output cols -> lane-dense stores in-kernel

TK = 22528                    # K tile: multiple of 128 (lane) and 8 (sublane)
K_PAD = 45056                 # 2 * TK (one-time zero pad of 112 rows of W1)


def _tensorcores_per_chip():
    """2 on v7x (two TensorCores per chip), 1 on v5e/v6e/unknown."""
    try:
        kind = jax.devices()[0].device_kind.lower()
    except Exception:
        return 1
    return 2 if "v7" in kind else 1


def _mlp_fused_kernel(x_ref, w1_ref, b1_ref, w2_ref, b2_ref, out_ref, acc_ref):
    """Single-core path: accumulate x @ W1 over k, fuse bias+ReLU+fc at last k."""
    k = pl.program_id(0)

    @pl.when(k == 0)
    def _():
        acc_ref[...] = jnp.zeros_like(acc_ref)

    acc_ref[...] += jnp.dot(
        x_ref[...].astype(jnp.bfloat16), w1_ref[...],
        preferred_element_type=jnp.float32,
    )

    @pl.when(k == pl.num_programs(0) - 1)
    def _():
        h = jnp.maximum(acc_ref[...] + b1_ref[...], 0.0)
        out_ref[...] = (
            jnp.dot(h, w2_ref[...], preferred_element_type=jnp.float32)
            + b2_ref[...]
        )


def _x_w1_partial_kernel(x_ref, w1_ref, out_ref):
    """v7x path: each split accumulates its partial x @ W1 into its output block."""
    k = pl.program_id(1)

    @pl.when(k == 0)
    def _():
        out_ref[...] = jnp.zeros_like(out_ref)

    out_ref[...] += jnp.dot(
        x_ref[...].astype(jnp.bfloat16), w1_ref[...],
        preferred_element_type=jnp.float32,
    )


def prepare_params(w1, b1, w2, b2):
    """One-time parameter prep (call OUTSIDE the per-step jitted forward):
    zero-pad W1 along K and cast to bf16 (f32 accumulation keeps accuracy);
    zero-pad W2/b2 to 128 output columns for lane-dense in-kernel stores."""
    w1p = jnp.pad(w1, ((0, K_PAD - K_FEATURES), (0, 0))).astype(jnp.bfloat16)
    b1p = b1.reshape(1, HIDDEN)
    w2p = jnp.pad(w2, ((0, 0), (0, OUT_PAD - OUT)))                 # (128, 128)
    b2p = jnp.pad(b2, (0, OUT_PAD - OUT)).reshape(1, OUT_PAD)       # (1, 128)
    return w1p, b1p, w2p, b2p


@functools.partial(jax.jit, static_argnames=("num_splits",))
def cnn_forward(x_nchw, w1p, b1p, w2p, b2p, *, num_splits=1):
    """x_nchw: (B, 1, 212, 212) float32. Prepped params from prepare_params().
    Returns (B, 2) float32."""
    b = x_nchw.shape[0]
    x = x_nchw.reshape(b, -1)                    # same as torch x.reshape(B,-1)
    assert x.shape[1] == K_FEATURES
    # Tiny per-call pad of activations only (~0.36 MB; W1 is pre-padded).
    x_p = jnp.pad(x, ((0, 0), (0, K_PAD - K_FEATURES)))

    cost = pl.CostEstimate(
        flops=2 * b * K_PAD * HIDDEN + 2 * b * HIDDEN * OUT_PAD,
        transcendentals=0,
        bytes_accessed=(K_PAD * HIDDEN * 2          # bf16 W1 stream (dominant)
                        + b * K_PAD * 4             # f32 x stream
                        + b * OUT_PAD * 4           # output
                        + (HIDDEN + HIDDEN * OUT_PAD + OUT_PAD) * 4),
    )

    if num_splits == 1:
        # Single-TensorCore chips (v5e/v6e): one kernel does everything.
        kb = K_PAD // TK
        out = pl.pallas_call(
            _mlp_fused_kernel,
            out_shape=jax.ShapeDtypeStruct((b, OUT_PAD), jnp.float32),
            grid_spec=pltpu.PrefetchScalarGridSpec(
                num_scalar_prefetch=0,
                grid=(kb,),
                in_specs=[
                    pl.BlockSpec((b, TK), lambda k: (0, k)),
                    pl.BlockSpec((TK, HIDDEN), lambda k: (k, 0)),
                    pl.BlockSpec((1, HIDDEN), lambda k: (0, 0)),
                    pl.BlockSpec((HIDDEN, OUT_PAD), lambda k: (0, 0)),
                    pl.BlockSpec((1, OUT_PAD), lambda k: (0, 0)),
                ],
                out_specs=pl.BlockSpec((b, OUT_PAD), lambda k: (0, 0)),
                scratch_shapes=[pltpu.VMEM((b, HIDDEN), jnp.float32)],
            ),
            compiler_params=pltpu.CompilerParams(
                dimension_semantics=("arbitrary",),
                vmem_limit_bytes=32 * 1024 * 1024,
            ),
            cost_estimate=cost,
        )(x_p, w1p, b1p, w2p, b2p)
        return out[:, :OUT]

    # v7x: split the K reduction over a leading "parallel" axis so each of the
    # two TensorCores streams half of W1 (megacore sharding via
    # dimension_semantics); wrapper sums the partials and applies the epilogue.
    assert K_PAD % (TK * num_splits) == 0
    kb_per_split = K_PAD // TK // num_splits
    partial = pl.pallas_call(
        _x_w1_partial_kernel,
        out_shape=jax.ShapeDtypeStruct((num_splits, b, HIDDEN), jnp.float32),
        grid_spec=pltpu.PrefetchScalarGridSpec(
            num_scalar_prefetch=0,
            grid=(num_splits, kb_per_split),
            in_specs=[
                pl.BlockSpec((b, TK),
                             lambda c, k: (0, c * kb_per_split + k)),
                pl.BlockSpec((TK, HIDDEN),
                             lambda c, k: (c * kb_per_split + k, 0)),
            ],
            out_specs=pl.BlockSpec((None, b, HIDDEN), lambda c, k: (c, 0, 0)),
        ),
        compiler_params=pltpu.CompilerParams(
            dimension_semantics=("parallel", "arbitrary"),
            vmem_limit_bytes=32 * 1024 * 1024,
        ),
        cost_estimate=cost,
    )(x_p, w1p)

    # Tiny epilogue (KB-sized): combine splits, bias, ReLU, final fc.
    h = jnp.maximum(partial.sum(axis=0) + b1p, 0.0)
    return (h @ w2p + b2p)[:, :OUT]


def _init_params(key):
    """Deterministic init mirroring nn.Linear default (uniform +-1/sqrt(fan_in))."""
    k1, k2, k3, k4 = jax.random.split(key, 4)
    bound1 = 1.0 / jnp.sqrt(jnp.float32(K_FEATURES))
    bound2 = 1.0 / jnp.sqrt(jnp.float32(HIDDEN))
    w1 = jax.random.uniform(k1, (K_FEATURES, HIDDEN), jnp.float32, -bound1, bound1)
    b1 = jax.random.uniform(k2, (HIDDEN,), jnp.float32, -bound1, bound1)
    w2 = jax.random.uniform(k3, (HIDDEN, OUT), jnp.float32, -bound2, bound2)
    b2 = jax.random.uniform(k4, (OUT,), jnp.float32, -bound2, bound2)
    return w1, b1, w2, b2


if __name__ == "__main__":
    key = jax.random.PRNGKey(0)
    kx, kp = jax.random.split(key)

    batch = 2   # throughput scales ~linearly with batch; kernel parameterized by it
    x = jax.random.normal(kx, (batch, 1, 212, 212), jnp.float32)   # NCHW
    w1, b1, w2, b2 = _init_params(kp)

    # One-time prep outside the jitted forward (no per-call W1 pad/cast).
    w1p, b1p, w2p, b2p = prepare_params(w1, b1, w2, b2)

    num_splits = _tensorcores_per_chip()
    out = jax.block_until_ready(
        cnn_forward(x, w1p, b1p, w2p, b2p, num_splits=num_splits))
    assert out.shape == (batch, OUT)

    xf = x.reshape(batch, -1)
    # (1) Precision-matched reference (bf16 inputs, f32 accumulation): validates
    #     the kernel mechanics (tiling / accumulation / epilogue).
    h_m = jnp.maximum(
        jnp.dot(xf.astype(jnp.bfloat16), w1.astype(jnp.bfloat16),
                preferred_element_type=jnp.float32) + b1, 0.0)
    ref_matched = h_m @ w2 + b2
    assert jnp.allclose(out, ref_matched, atol=1e-2, rtol=1e-2), (out, ref_matched)

    # (2) Full-f32 module reference: validates that bf16 weight streaming keeps
    #     accuracy (expect <~1% relative error over the K~45k reduction).
    ref_f32 = jnp.maximum(xf @ w1 + b1, 0.0) @ w2 + b2
    assert jnp.allclose(out, ref_f32, atol=6e-2, rtol=6e-2), (out, ref_f32)

    print("KERNEL_OK")
</pallas_src>

<mosaic_0001>
module attributes {stable_mosaic.version = 11 : i64} {
  func.func @_mlp_fused_kernel(%arg0: i32, %arg1: memref<2x22528xf32, #tpu.memory_space<vmem>>, %arg2: memref<22528x128xbf16, #tpu.memory_space<vmem>>, %arg3: memref<1x128xf32, #tpu.memory_space<vmem>>, %arg4: memref<128x128xf32, #tpu.memory_space<vmem>>, %arg5: memref<1x128xf32, #tpu.memory_space<vmem>>, %arg6: memref<2x128xf32, #tpu.memory_space<vmem>>, %arg7: memref<2x128xf32, #tpu.memory_space<vmem>>) attributes {dimension_semantics = [#tpu.dimension_semantics<arbitrary>], iteration_bounds = array<i64: 2>, scalar_prefetch = 0 : i64, scratch_operands = 1 : i64, tpu.core_type = #tpu.core_type<tc>, window_params = [{transform_indices = @transform_0, window_bounds = array<i64: 2, 22528>}, {transform_indices = @transform_1, window_bounds = array<i64: 22528, 128>}, {pipeline_mode = #tpu.pipeline_mode<synchronous>, transform_indices = @transform_2, window_bounds = array<i64: 1, 128>}, {pipeline_mode = #tpu.pipeline_mode<synchronous>, transform_indices = @transform_3, window_bounds = array<i64: 128, 128>}, {pipeline_mode = #tpu.pipeline_mode<synchronous>, transform_indices = @transform_4, window_bounds = array<i64: 1, 128>}, {pipeline_mode = #tpu.pipeline_mode<synchronous>, transform_indices = @transform_5, window_bounds = array<i64: 2, 128>}]} {
    %c0_i32 = arith.constant 0 : i32
    %0 = arith.cmpi eq, %arg0, %c0_i32 : i32
    %1 = arith.extui %0 : i1 to i32
    %c0_i32_0 = arith.constant 0 : i32
    %2 = arith.cmpi ne, %1, %c0_i32_0 : i32
    scf.if %2 {
      %cst_9 = arith.constant 0.000000e+00 : f32
      %13 = vector.broadcast %cst_9 : f32 to vector<2x128xf32>
      %c0_10 = arith.constant 0 : index
      %c0_11 = arith.constant 0 : index
      %14 = vector.load %arg7[%c0_10, %c0_11] : memref<2x128xf32, #tpu.memory_space<vmem>>, vector<2x128xf32>
      tpu.vector_store %arg7[%c0_10, %c0_11], %13 {strides = array<i32>} : memref<2x128xf32, #tpu.memory_space<vmem>>, vector<2x128xf32>,
    } else {
    }
    %c0 = arith.constant 0 : index
    %c0_1 = arith.constant 0 : index
    %3 = vector.load %arg7[%c0, %c0_1] : memref<2x128xf32, #tpu.memory_space<vmem>>, vector<2x128xf32>
    %c0_2 = arith.constant 0 : index
    %c0_3 = arith.constant 0 : index
    %4 = vector.load %arg1[%c0_2, %c0_3] : memref<2x22528xf32, #tpu.memory_space<vmem>>, vector<2x22528xf32>
    %5 = arith.truncf %4 : vector<2x22528xf32> to vector<2x22528xbf16>
    %c0_4 = arith.constant 0 : index
    %c0_5 = arith.constant 0 : index
    %6 = vector.load %arg2[%c0_4, %c0_5] : memref<22528x128xbf16, #tpu.memory_space<vmem>>, vector<22528x128xbf16>
    %cst = arith.constant dense<0.000000e+00> : vector<2x128xf32>
    %7 = tpu.matmul %5, %6, %cst {dimension_numbers = #tpu.dot_dimension_numbers<[1], [0], [0], [1], [0, 0, 1, 1], [], []>} : vector<2x22528xbf16>, vector<22528x128xbf16>, vector<2x128xf32> -> vector<2x128xf32>
    %8 = arith.addf %3, %7 : vector<2x128xf32>
    %c0_6 = arith.constant 0 : index
    %c0_7 = arith.constant 0 : index
    %9 = vector.load %arg7[%c0_6, %c0_7] : memref<2x128xf32, #tpu.memory_space<vmem>>, vector<2x128xf32>
    tpu.vector_store %arg7[%c0_6, %c0_7], %8 {strides = array<i32>} : memref<2x128xf32, #tpu.memory_space<vmem>>, vector<2x128xf32>,
    %c1_i32 = arith.constant 1 : i32
    %10 = arith.cmpi eq, %arg0, %c1_i32 : i32
    %11 = arith.extui %10 : i1 to i32
    %c0_i32_8 = arith.constant 0 : i32
    %12 = arith.cmpi ne, %11, %c0_i32_8 : i32
    scf.if %12 {
      %c0_9 = arith.constant 0 : index
      %c0_10 = arith.constant 0 : index
      %13 = vector.load %arg7[%c0_9, %c0_10] : memref<2x128xf32, #tpu.memory_space<vmem>>, vector<2x128xf32>
      %c0_11 = arith.constant 0 : index
      %c0_12 = arith.constant 0 : index
      %14 = vector.load %arg3[%c0_11, %c0_12] : memref<1x128xf32, #tpu.memory_space<vmem>>, vector<1x128xf32>
      %15 = vector.broadcast %14 : vector<1x128xf32> to vector<2x128xf32>
      %16 = arith.addf %13, %15 : vector<2x128xf32>
      %cst_13 = arith.constant 0.000000e+00 : f32
      %17 = vector.broadcast %cst_13 : f32 to vector<2x128xf32>
      %18 = arith.maximumf %16, %17 : vector<2x128xf32>
      %c0_14 = arith.constant 0 : index
      %c0_15 = arith.constant 0 : index
      %19 = vector.load %arg4[%c0_14, %c0_15] : memref<128x128xf32, #tpu.memory_space<vmem>>, vector<128x128xf32>
      %cst_16 = arith.constant dense<0.000000e+00> : vector<2x128xf32>
      %20 = tpu.matmul %18, %19, %cst_16 {dimension_numbers = #tpu.dot_dimension_numbers<[1], [0], [0], [1], [0, 0, 1, 1], [], []>} : vector<2x128xf32>, vector<128x128xf32>, vector<2x128xf32> -> vector<2x128xf32>
      %c0_17 = arith.constant 0 : index
      %c0_18 = arith.constant 0 : index
      %21 = vector.load %arg5[%c0_17, %c0_18] : memref<1x128xf32, #tpu.memory_space<vmem>>, vector<1x128xf32>
      %22 = vector.broadcast %21 : vector<1x128xf32> to vector<2x128xf32>
      %23 = arith.addf %20, %22 : vector<2x128xf32>
      %c0_19 = arith.constant 0 : index
      %c0_20 = arith.constant 0 : index
      %24 = vector.load %arg6[%c0_19, %c0_20] : memref<2x128xf32, #tpu.memory_space<vmem>>, vector<2x128xf32>
      tpu.vector_store %arg6[%c0_19, %c0_20], %23 {strides = array<i32>} : memref<2x128xf32, #tpu.memory_space<vmem>>, vector<2x128xf32>,
    } else {
    }
    return
  }
  func.func @transform_0(%arg0: i32) -> (i32, i32) {
    %c0_i32 = arith.constant 0 : i32
    %c0_i32_0 = arith.constant 0 : i32
    return %c0_i32, %arg0 : i32, i32
  }
  func.func @transform_1(%arg0: i32) -> (i32, i32) {
    %c0_i32 = arith.constant 0 : i32
    %c0_i32_0 = arith.constant 0 : i32
    return %arg0, %c0_i32 : i32, i32
  }
  func.func @transform_2(%arg0: i32) -> (i32, i32) {
    %c0_i32 = arith.constant 0 : i32
    %c0_i32_0 = arith.constant 0 : i32
    %c0_i32_1 = arith.constant 0 : i32
    return %c0_i32, %c0_i32_0 : i32, i32
  }
  func.func @transform_3(%arg0: i32) -> (i32, i32) {
    %c0_i32 = arith.constant 0 : i32
    %c0_i32_0 = arith.constant 0 : i32
    %c0_i32_1 = arith.constant 0 : i32
    return %c0_i32, %c0_i32_0 : i32, i32
  }
  func.func @transform_4(%arg0: i32) -> (i32, i32) {
    %c0_i32 = arith.constant 0 : i32
    %c0_i32_0 = arith.constant 0 : i32
    %c0_i32_1 = arith.constant 0 : i32
    return %c0_i32, %c0_i32_0 : i32, i32
  }
  func.func @transform_5(%arg0: i32) -> (i32, i32) {
    %c0_i32 = arith.constant 0 : i32
    %c0_i32_0 = arith.constant 0 : i32
    %c0_i32_1 = arith.constant 0 : i32
    return %c0_i32, %c0_i32_0 : i32, i32
  }
}

</mosaic_0001>

<bundles_post_ra>
// kernel: cnn_forward.1
= control target key start
LH: loop header
LB: loop body
LE: loop exit
PB: predicated region body
PF: predicated region fallthrough
CT: control target
= control target key end

     0   :  { %10 = vsyncpa [#allocation4], 0  ;;  %s23574_s0 = inlined_call_operand.vmem [shape: f32[2,45056], index: 0, kind: input, shape index: {}]   ;;  %s23575_s1 = inlined_call_operand.hbm [shape: bf16[45056,128], index: 1, kind: input, shape index: {}]   ;;  %s23576_s2 = inlined_call_operand.hbm [shape: f32[1,128], index: 2, kind: input, shape index: {}]   ;;  %s23577_s3 = inlined_call_operand.hbm [shape: f32[128,128], index: 3, kind: input, shape index: {}]   ;;  %s23578_s4 = inlined_call_operand.hbm [shape: f32[1,128], index: 4, kind: input, shape index: {}]   ;;  %s23579_s5 = inlined_call_operand.hbm [shape: f32[2,128], index: 5, kind: output, shape index: {}]  }
   0x1   :  { %12 = vsyncpa [#allocation4 + $0x1], 0 }
   0x2   :  { %13 = vsyncpa [#allocation7], 0 }
   0x3   :  { %14 = vsyncpa [#allocation10], 0 }
   0x4   :  { %15 = vsyncpa [#allocation5], 0  ;;  %s21694_s18 = smov 0   ;;  %s21696_s19 = smov 0  }
   0x5   :  { %s21698_s20 = smov 0   ;;  %s21700_s21 = smov 0  }
   0x6 LB: > { %s21713_s22 = sadd.s32 4294967295, %s21648_s21   ;;  %p67_p0 = scmp.ne.s32.totalorder %s21640_s19, %s21636_s18  ;;  %s21648_s21 = sphi %s21700_s21, %s23598_s21   ;;  %s21644_s20 = sphi %s21698_s20, %s23597_s20   ;;  %s21640_s19 = sphi %s21696_s19, %s23596_s19   ;;  %s21636_s18 = sphi %s21694_s18, %s23595_s18  }
   0x7   : > { %p23580_p1 = scmp.eq.s32.totalorder %s21713_s22, 0  ;;  %p16482_p2 = scmp.ge.s32.totalorder %s21648_s21, 1 }
   0x8   : > { %p162_p3 = scmp.lt.s32.totalorder %s21648_s21, 3  ;;  %s21650_s25 = smov [#allocation6]  }
   0x9   : > { %p21722_p5 = por %p23580_p1, %p67_p0  ;;  %s175_s26 = sshll.u32 %s21650_s25, 4  ;;  %s176_s26 = int_to_ptr.vmem [resolvable:$true] %s175_s26 }
   0xa   : > { %p21726_p6 = pnand %p16482_p2, %p162_p3  ;;  %s21651_s27 = smov [#allocation8]  }
   0xb   : > { %s23583_s23 = scalar_select %p21722_p5, 1, 0 }
   0xc   : > { %s23584_s24 = scalar_select %p21726_p6, 1, 0 }
   0xd   : > { %p19942_p7 = pneg %p21726_p6  ;;  %s185_s28 = sshll.u32 %s21651_s27, 4  ;;  %s21738_s28 = int_to_ptr.vmem [resolvable:$true] %s185_s28 }
   0xe   : > { %s21652_s30 = smov [#allocation9]   ;;  %s21462_s9 = scalar_lea.hbm %s23576_s2, 16 }
   0xf   : > { %p21734_p8 = pnand %p19942_p7, %p23580_p1  ;;  %s21740_s6 = sshll.u32 %s21652_s30, 4  ;;  %s200_s6 = int_to_ptr.vmem [resolvable:$true] %s21740_s6 }
  0x10   : > { %p21463_p9 = scmp.ne.s32.totalorder %s23576_s2, %s21462_s9  ;;  %p21469_p13 = scmp.lt.u32.totalorder %s21462_s9, %s23576_s2 }
  0x11   : > { %p21750_p10 = pneg %p21734_p8 }
  0x13   : > { %p21465_p11 = pnand %p21750_p10, %p21463_p9 }
  0x15   : > { %p21466_p12 = pneg %p21465_p11 }
  0x17   : > { %p21471_p0 = pnand %p21469_p13, %p21466_p12 }
  0x19   : > { %21474 = shalt.err (!%p21471_p0)
}
  0x1a   : > { %s21475_s15 = scalar_lea.vmem %s176_s26, 16  ;;  %s21482_s16 = scalar_lea.vmem %s176_s26, 32 }
  0x1b   : > { %p21476_p2 = scmp.ne.s32.totalorder %s176_s26, %s21475_s15  ;;  %p21483_p4 = scmp.lt.s32.totalorder %s176_s26, %s176_s26 }
  0x1c   : > { %p21484_p1 = scmp.lt.s32.totalorder %s21482_s16, %s21475_s15 }
  0x1d   : > { %p21478_p3 = pnand %p21476_p2, %p21750_p10 }
  0x1e   : > { %p21485_p5 = por %p21484_p1, %p21483_p4 }
  0x1f   : > { %p21479_p7 = pneg %p21478_p3 }
  0x21   : > { %p21486_p6 = pnand %p21485_p5, %p21479_p7 }
  0x23   : > { %21489 = shalt.err (!%p21486_p6)
}
  0x24   : > { %19945 = dma.hbm_to_vmem [thread:$0]  (!%p21734_p8), %s23576_s2, 16, %s176_s26, [#allocation7]  }
  0x25   : > { %s21490_s30 = scalar_lea.hbm %s23577_s3, 2048 }
  0x26   : > { %p21491_p9 = scmp.ne.s32.totalorder %s23577_s3, %s21490_s30  ;;  %p21497_p4 = scmp.lt.u32.totalorder %s21490_s30, %s23577_s3 }
  0x28   : > { %p21493_p11 = pnand %p21491_p9, %p21750_p10 }
  0x2a   : > { %p21494_p1 = pneg %p21493_p11 }
  0x2c   : > { %p21499_p5 = pnand %p21497_p4, %p21494_p1 }
  0x2e   : > { %21502 = shalt.err (!%p21499_p5)
}
  0x2f   : > { %s21503_s26 = scalar_lea.vmem %s21738_s28, 2048  ;;  %p21511_p0 = scmp.lt.s32.totalorder %s21738_s28, %s21738_s28 }
  0x30   : > { %p21504_p6 = scmp.ne.s32.totalorder %s21738_s28, %s21503_s26  ;;  %p21512_p2 = scmp.lt.s32.totalorder %s21503_s26, %s21503_s26 }
  0x32   : > { %p21506_p12 = pnand %p21504_p6, %p21750_p10  ;;  %p21513_p3 = por %p21512_p2, %p21511_p0 }
  0x34   : > { %p21507_p13 = pneg %p21506_p12 }
  0x36   : > { %p21514_p7 = pnand %p21513_p3, %p21507_p13 }
  0x38   : > { %21517 = shalt.err (!%p21514_p7)
}
  0x39   : > { %s21653_s11 = smov 128   ;;  %s21654_s13 = smov 8  }
  0x3a   : > { %19948 = dma.hbm_to_vmem [thread:$0]  (!%p21734_p8), %s23577_s3, 2048, %s21738_s28, [#allocation7], %s21653_s11, %s21653_s11, %s21654_s13  }
  0x3b   : > { %s21518_s18 = scalar_lea.hbm %s23578_s4, 16 }
  0x3c   : > { %p21519_p9 = scmp.ne.s32.totalorder %s23578_s4, %s21518_s18  ;;  %p21525_p4 = scmp.lt.u32.totalorder %s21518_s18, %s23578_s4 }
  0x3e   : > { %p21521_p11 = pnand %p21519_p9, %p21750_p10 }
  0x40   : > { %p21522_p1 = pneg %p21521_p11 }
  0x42   : > { %p21527_p5 = pnand %p21525_p4, %p21522_p1 }
  0x44   : > { %21530 = shalt.err (!%p21527_p5)
}
  0x45   : > { %s21531_s8 = scalar_lea.vmem %s200_s6, 16  ;;  %s21538_s28 = scalar_lea.vmem %s200_s6, 32 }
  0x46   : > { %p21532_p6 = scmp.ne.s32.totalorder %s200_s6, %s21531_s8  ;;  %p21539_p0 = scmp.lt.s32.totalorder %s200_s6, %s200_s6 }
  0x47   : > { %p21540_p2 = scmp.lt.s32.totalorder %s21538_s28, %s21531_s8 }
  0x48   : > { %p21534_p12 = pnand %p21532_p6, %p21750_p10 }
  0x49   : > { %p21541_p3 = por %p21540_p2, %p21539_p0 }
  0x4a   : > { %p21535_p13 = pneg %p21534_p12 }
  0x4c   : > { %p21542_p7 = pnand %p21541_p3, %p21535_p13 }
  0x4e   : > { %21545 = shalt.err (!%p21542_p7)
}
  0x4f   : > { %19951 = dma.hbm_to_vmem [thread:$0]  (!%p21734_p8), %s23578_s4, 16, %s200_s6, [#allocation10]  }
  0x50   : > { %s21809_s12 = sadd.s32 1, %s21648_s21   ;;  %s54_s11 = sadd.s32 1, %s21644_s20 }
  0x51   : > { %s51_s26 = ssub.s32 %s21648_s21, %s21809_s12  ;;  %p61_p9 = scmp.ne.s32.totalorder %s21644_s20, %s21640_s19 }
  0x52   : > { %p52_p10 = scmp.eq.s32.totalorder %s51_s26, 0  ;;  %p62_p11 = scmp.eq.s32.totalorder %s21648_s21, 0 }
  0x53   : > { %p19959_p1 = scmp.lt.s32.totalorder %s21648_s21, 2  ;;  %s219_s13 = sand.u32 1, %s21644_s20  }
  0x54   : > { %s21819_s29 = scalar_select %p52_p10, %s21644_s20, %s54_s11  }
  0x55   : > { %p63_p4 = por %p62_p11, %p61_p9  ;;  %s19922_s14 = smul.u32 11264, %s219_s13 }
  0x56   : > { %s17909_s15 = smul.u32 180224, %s21648_s21  ;;  %s21834_s21 = scalar_lea.sflag [#allocation4], %s219_s13 }
  0x57   : > { %p21823_p5 = pnand %p19959_p1, %p63_p4  ;;  %s223_s25 = scalar_lea.vmem [#allocation3], %s19922_s14 }
  0x58   : > { %s21830_s18 = scalar_lea.hbm %s23575_s1, %s17909_s15  ;;  %s230_s27 = sshll.u32 %s223_s25, 4  ;;  %s21832_s27 = int_to_ptr.vmem [resolvable:$true] %s230_s27 }
  0x59   : > { %s21546_s30 = scalar_lea.hbm %s21830_s18, 180224  ;;  %p21548_p6 = pneg %p21823_p5 }
  0x5a   : > { %p21547_p8 = scmp.ne.s32.totalorder %s21830_s18, %s21546_s30  ;;  %s21551_s28 = scalar_lea.hbm %s23575_s1, 360448 }
  0x5b   : > { %p21552_p0 = scmp.lt.u32.totalorder %s21830_s18, %s23575_s1  ;;  %p21553_p2 = scmp.lt.u32.totalorder %s21551_s28, %s21546_s30 }
  0x5c   : > { %p21549_p12 = pnand %p21548_p6, %p21547_p8  ;;  %p21555_p7 = scmp.lt.u32.totalorder %s21546_s30, %s21830_s18 }
  0x5d   : > { %p21554_p3 = por %p21553_p2, %p21552_p0 }
  0x5e   : > { %p21550_p13 = pneg %p21549_p12 }
  0x5f   : > { %p21556_p10 = por %p21555_p7, %p21554_p3 }
  0x61   : > { %p21557_p9 = pnand %p21556_p10, %p21550_p13 }
  0x63   : > { %21560 = shalt.err (!%p21557_p9)
}
  0x64   : > { %s21561_s26 = scalar_lea.vmem %s21832_s27, 180224  ;;  %s21655_s11 = smov [#allocation3]  }
  0x65   : > { %p21562_p11 = scmp.ne.s32.totalorder %s21832_s27, %s21561_s26  ;;  %s21566_s13 = sshll.u32 %s21655_s11, 4  ;;  %s21567_s13 = int_to_ptr.vmem [resolvable:$false] %s21566_s13 }
  0x66   : > { %s21568_s14 = scalar_lea.vmem %s21567_s13, 360448  ;;  %p21569_p8 = scmp.lt.s32.totalorder %s21832_s27, %s21567_s13 }
  0x67   : > { %p21564_p1 = pnand %p21562_p11, %p21548_p6  ;;  %p21570_p12 = scmp.lt.s32.totalorder %s21568_s14, %s21561_s26 }
  0x69   : > { %p21565_p4 = pneg %p21564_p1  ;;  %p21571_p0 = por %p21570_p12, %p21569_p8 }
  0x6b   : > { %p21572_p2 = pnand %p21571_p0, %p21565_p4 }
  0x6d   : > { %21575 = shalt.err (!%p21572_p2)
}
  0x6e   : > { %s21656_s15 = smov 64   ;;  %s21657_s6 = smov 4  }
  0x6f   : > { %19955 = dma.hbm_to_vmem [thread:$0]  (!%p21823_p5), %s21830_s18, 180224, %s21832_s27, %s21834_s21, %s21656_s15, %s21656_s15, %s21657_s6  }
  0x70   : > { %p23588_p6 = scmp.ne.s32.totalorder %s23584_s24, 0 }
  0x71   : > { %s244_s17 = sand.u32 (!%p23588_p6), 1, %s21640_s19   ;;  %p23589_p13 = scmp.ne.s32.totalorder (!%p23588_p6), %s23583_s23, 0 }
  0x72   : > { %242 = sbr.rel (%p23588_p6) target bundleno = 2020 (0x7e4), region = 40  ;;  %s245_s30 = scalar_lea.sflag (!%p23588_p6), [#allocation4], %s244_s17 }
  0x73   : > { %s19923_s25 = smul.u32 (!%p23588_p6), 11264, %s244_s17 }
  0x75   : > { %s21865_s7 = scalar_lea.vmem (!%p23588_p6), [#allocation3], %s19923_s25 }
  0x79   : > { %21619 = dma.done.wait (%p23589_p13), %s245_s30, 180224  }
  0x7a   : > { %21621 = vsyncadd (%p23589_p13), %s245_s30, 4294787072  ;;  %p23590_p3 = scmp.eq.s32.totalorder %s21713_s22, 0 }
  0x7c   : > { %21623 = dma.done.wait (%p23590_p3), [#allocation7], 2064   ;;  %p23591_p5 = pmov %p23590_p3 }
  0x7d   : > { %p23592_p7 = pmov %p23590_p3 }
  0x7e   : > { %21625 = vsyncadd (%p23591_p5), [#allocation7], 4294965232 }
  0x7f   : > { %21627 = dma.done.wait (%p23592_p7), [#allocation10], 16   ;;  %p23593_p10 = pmov %p23590_p3 }
  0x80   : > { %s287_s24 = smul.u32 176, %s21713_s22  ;;  %p23594_p11 = scmp.ne.s32.totalorder %s21713_s22, 0 }
  0x81   : > { %21629 = vsyncadd (%p23593_p10), [#allocation10], 4294967280  ;;  %v21658_v0 = vmov (!%p23594_p11), 0.0  }
  0x82   : > { %p288_p9 = scmp.lt.s32.totalorder %s287_s24, 351  ;;  %298 = sbr.rel (%p23594_p11) target bundleno = 137 (0x89), region = 60  ;;  %299 = vst [vmem:[#allocation2] sm:$0x3] (!%p23594_p11), %v21658_v0 }
  0x84   : > { %s23600_s24 = smov (!%p288_p9, %s287_s24), 351 }
  0x85   : > { %s16492_s16 = sshll.u32 %s23600_s24, 1 }
  0x86   : > { %s21883_s27 = scalar_lea.vmem %s23574_s0, %s16492_s16 }
  0x89 PF: > { %v20010_v1 = vld [vmem:[%s21865_s7 + $0x40] sm:$0xff]   ;;  %v20014_v5 = vld [vmem:[%s21865_s7 + $0x48] sm:$0xff]   ;;  %v20018_v9 = vld [vmem:[%s21865_s7 + $0x50] sm:$0xff]   ;;  %v393_v29 = vlaneseq  ;;  %v21659_v37 = vmov 1983009808   ;;  %p17902_p1 = scmp.ne.s32.totalorder %s21713_s22, 1 }
  0x8a   : > { %v20011_v2 = vld [vmem:[%s21865_s7 + $0xc0] sm:$0xff]   ;;  %17910 = vmatprep.subr.bf16.mxu0 %v20010_v1  ;;  %v20015_v6 = vld [vmem:[%s21865_s7 + $0xc8] sm:$0xff]   ;;  %v20019_v10 = vld [vmem:[%s21865_s7 + $0xd0] sm:$0xff]   ;;  %v391_v38 = vunpack.c.l.s4 %v21659_v37  ;;  %vm21661_vm0 = vmmov (!%p17902_p1), 0  }
  0x8b   : > { %v20012_v3 = vld [vmem:[%s21865_s7] sm:$0xff]   ;;  %17932 = vmatprep.subr.bf16.mxu1 %v20011_v2  ;;  %v20016_v7 = vld [vmem:[%s21865_s7 + $0x8] sm:$0xff]   ;;  %v20020_v11 = vld [vmem:[%s21865_s7 + $0x10] sm:$0xff]   ;;  %v394_v34 = vshrl.u32 %v393_v29, 7 }
  0x8c   : > { %v20013_v4 = vld [vmem:[%s21865_s7 + $0x80] sm:$0xff]   ;;  %17911 = vmatpush3.bf16.msra.mxu0 %v20012_v3  ;;  %v20017_v8 = vld [vmem:[%s21865_s7 + $0x88] sm:$0xff]   ;;  %v20021_v12 = vld [vmem:[%s21865_s7 + $0x90] sm:$0xff]   ;;  %v392_v40 = vunpack.c.0.s8 %v391_v38 }
  0x8d   : > { %17933 = vmatpush3.bf16.msra.mxu1 %v20013_v4  ;;  %17912 = vmatprep.subr.bf16.mxu0 %v20014_v5  ;;  %v20022_v13 = vld [vmem:[%s21865_s7 + $0x58] sm:$0xff]   ;;  %v20026_v17 = vld [vmem:[%s21865_s7 + $0x60] sm:$0xff]   ;;  %v20030_v21 = vld [vmem:[%s21865_s7 + $0x68] sm:$0xff]  }
  0x8e   : > { %17934 = vmatprep.subr.bf16.mxu1 %v20015_v6  ;;  %v20023_v14 = vld [vmem:[%s21865_s7 + $0xd8] sm:$0xff]   ;;  %v20027_v18 = vld [vmem:[%s21865_s7 + $0xe0] sm:$0xff]   ;;  %v20031_v22 = vld [vmem:[%s21865_s7 + $0xe8] sm:$0xff]   ;;  %v21922_v42 = vsub.s32 %v392_v40, %v394_v34 }
  0x8f   : > { %v20024_v15 = vld [vmem:[%s21865_s7 + $0x18] sm:$0xff]   ;;  %v20028_v19 = vld [vmem:[%s21865_s7 + $0x20] sm:$0xff]   ;;  %v20032_v23 = vld [vmem:[%s21865_s7 + $0x28] sm:$0xff]  }
  0x90   : > { %17913 = vmatpush3.bf16.msra.mxu0 %v20016_v7  ;;  %v20025_v16 = vld [vmem:[%s21865_s7 + $0x98] sm:$0xff]   ;;  %v20029_v20 = vld [vmem:[%s21865_s7 + $0xa0] sm:$0xff]   ;;  %v20033_v24 = vld [vmem:[%s21865_s7 + $0xa8] sm:$0xff]  }
  0x91   : > { %17935 = vmatpush3.bf16.msra.mxu1 %v20017_v8  ;;  %17914 = vmatprep.subr.bf16.mxu0 %v20018_v9  ;;  %v20034_v25 = vld [vmem:[%s21865_s7 + $0x70] sm:$0xff]   ;;  %v20038_v30 = vld [vmem:[%s21865_s7 + $0x78] sm:$0xff]   ;;  %v20043_v36 = vld [vmem:[%s21865_s7 + $0x140] sm:$0xff]  }
  0x92   : > { %17936 = vmatprep.subr.bf16.mxu1 %v20019_v10  ;;  %v20035_v26 = vld [vmem:[%s21865_s7 + $0xf0] sm:$0xff]   ;;  %v20039_v31 = vld [vmem:[%s21865_s7 + $0xf8] sm:$0xff]   ;;  %v20044_v39 = vld [vmem:[%s21865_s7 + $0x1c0] sm:$0xff]  }
  0x93   : > { %v20036_v27 = vld [vmem:[%s21865_s7 + $0x30] sm:$0xff]   ;;  %v20040_v32 = vld [vmem:[%s21865_s7 + $0x38] sm:$0xff]   ;;  %v20045_v47 = vld [vmem:[%s21865_s7 + $0x100] sm:$0xff]  }
  0x94   : > { %17915 = vmatpush3.bf16.msra.mxu0 %v20020_v11  ;;  %v20037_v28 = vld [vmem:[%s21865_s7 + $0xb0] sm:$0xff]   ;;  %v20041_v33 = vld [vmem:[%s21865_s7 + $0xb8] sm:$0xff]   ;;  %v20046_v50 = vld [vmem:[%s21865_s7 + $0x180] sm:$0xff]  }
  0x95   : > { %17937 = vmatpush3.bf16.msra.mxu1 %v20021_v12  ;;  %17916 = vmatprep.subr.bf16.mxu0 %v20022_v13  ;;  %v301_v35 = vld [vmem:[%s21883_s27] sm:$0xff]  ;;  %v20047_v53 = vld [vmem:[%s21865_s7 + $0x148] sm:$0xff]   ;;  %v20051_v57 = vld [vmem:[%s21865_s7 + $0x150] sm:$0xff]  }
  0x96   : > { %17938 = vmatprep.subr.bf16.mxu1 %v20023_v14  ;;  %v389_v41 = vcombine.high %v301_v35, %v301_v35  ;;  %v396_v43 = vrot.slane %v301_v35, %v21922_v42  ;;  %v20048_v54 = vld [vmem:[%s21865_s7 + $0x1c8] sm:$0xff]   ;;  %v20052_v58 = vld [vmem:[%s21865_s7 + $0x1d0] sm:$0xff]   ;;  %v20055_v61 = vld [vmem:[%s21865_s7 + $0x158] sm:$0xff]  }
  0x97   : > { %v20049_v55 = vld [vmem:[%s21865_s7 + $0x108] sm:$0xff]   ;;  %v20053_v59 = vld [vmem:[%s21865_s7 + $0x110] sm:$0xff]   ;;  %v20056_v62 = vld [vmem:[%s21865_s7 + $0x1d8] sm:$0xff]  }
  0x98   : > { %17917 = vmatpush3.bf16.msra.mxu0 %v20024_v15  ;;  %v403_v44 = vrot.slane %v389_v41, %v21922_v42  ;;  %v404_v45 = vcombine.high %v396_v43, %v396_v43  ;;  %v1313_v48 = vpack.c.bf16 %v396_v43, %v396_v43  ;;  %v20050_v56 = vld [vmem:[%s21865_s7 + $0x188] sm:$0xff]   ;;  %v20054_v60 = vld [vmem:[%s21865_s7 + $0x190] sm:$0xff]   ;;  %v20057_v63 = vld [vmem:[%s21865_s7 + $0x118] sm:$0xff]  }
  0x99   : > { %17939 = vmatpush3.bf16.msra.mxu1 %v20025_v16  ;;  %17918 = vmatprep.subr.bf16.mxu0 %v20026_v17  ;;  %v20058_v0 = vld [vmem:[%s21865_s7 + $0x198] sm:$0xff]   ;;  %v20059_v1 = vld [vmem:[%s21865_s7 + $0x160] sm:$0xff]   ;;  %v20063_v5 = vld [vmem:[%s21865_s7 + $0x168] sm:$0xff]  }
  0x9a   : > { %17940 = vmatprep.subr.bf16.mxu1 %v20027_v18  ;;  %v405_v46 = vcombine.high %v403_v44, %v403_v44  ;;  %v1315_v49 = vpack.c.bf16 %v403_v44, %v403_v44  ;;  %v1314_v51 = vpack.c.bf16 %v404_v45, %v404_v45  ;;  %v20060_v2 = vld [vmem:[%s21865_s7 + $0x1e0] sm:$0xff]   ;;  %v20064_v6 = vld [vmem:[%s21865_s7 + $0x1e8] sm:$0xff]   ;;  %v20067_v9 = vld [vmem:[%s21865_s7 + $0x170] sm:$0xff]  }
  0x9b   : > { %v20061_v3 = vld [vmem:[%s21865_s7 + $0x120] sm:$0xff]   ;;  %v20065_v7 = vld [vmem:[%s21865_s7 + $0x128] sm:$0xff]   ;;  %v20068_v10 = vld [vmem:[%s21865_s7 + $0x1f0] sm:$0xff]  }
  0x9c   : > { %17919 = vmatpush3.bf16.msra.mxu0 %v20028_v19  ;;  %v1316_v52 = vpack.c.bf16 %v405_v46, %v405_v46  ;;  %12785 = vmatprep.mubr.bf16.mxu0 %v1314_v51  ;;  %v20062_v4 = vld [vmem:[%s21865_s7 + $0x1a0] sm:$0xff]   ;;  %v20066_v8 = vld [vmem:[%s21865_s7 + $0x1a8] sm:$0xff]   ;;  %v20069_v12 = vld [vmem:[%s21865_s7 + $0x130] sm:$0xff]  }
  0x9d   : > { %17941 = vmatpush3.bf16.msra.mxu1 %v20029_v20  ;;  %17920 = vmatprep.subr.bf16.mxu0 %v20030_v21  ;;  %v302_v11 = vld [vmem:[%s21883_s27 + $0x8] sm:$0xff]  ;;  %v20070_v15 = vld [vmem:[%s21865_s7 + $0x1b0] sm:$0xff]   ;;  %v20071_v16 = vld [vmem:[%s21865_s7 + $0x178] sm:$0xff]  }
  0x9e   : > { %17942 = vmatprep.subr.bf16.mxu1 %v20031_v22  ;;  %12825 = vmatprep.mubr.bf16.mxu1 %v1316_v52  ;;  %v413_v13 = vrot.slane %v302_v11, %v21922_v42  ;;  %v406_v14 = vcombine.high %v302_v11, %v302_v11  ;;  %v20072_v19 = vld [vmem:[%s21865_s7 + $0x1f8] sm:$0xff]   ;;  %v20083_v34 = vld [vmem:[%s21865_s7 + $0x288] sm:$0xff]   ;;  %v20084_v35 = vld [vmem:[%s21865_s7 + $0x250] sm:$0xff]  }
  0x9f   : > { %v20073_v20 = vld [vmem:[%s21865_s7 + $0x138] sm:$0xff]   ;;  %v20086_v37 = vld [vmem:[%s21865_s7 + $0x210] sm:$0xff]   ;;  %v20092_v44 = vld [vmem:[%s21865_s7 + $0x260] sm:$0xff]  }
  0xa0   : > { %17921 = vmatpush3.bf16.msra.mxu0 %v20032_v23  ;;  %v421_v17 = vcombine.high %v413_v13, %v413_v13  ;;  %v420_v18 = vrot.slane %v406_v14, %v21922_v42  ;;  %v20074_v23 = vld [vmem:[%s21865_s7 + $0x1b8] sm:$0xff]   ;;  %v20087_v38 = vld [vmem:[%s21865_s7 + $0x290] sm:$0xff]   ;;  %v20093_v45 = vld [vmem:[%s21865_s7 + $0x2e0] sm:$0xff]  }
  0xa1   : > { %17943 = vmatpush3.bf16.msra.mxu1 %v20033_v24  ;;  %17922 = vmatprep.subr.bf16.mxu0 %v20034_v25  ;;  %v20076_v25 = vld [vmem:[%s21865_s7 + $0x240] sm:$0xff]   ;;  %v20089_v40 = vld [vmem:[%s21865_s7 + $0x2d8] sm:$0xff]   ;;  %v20099_v51 = vld [vmem:[%s21865_s7 + $0x2a8] sm:$0xff]  }
  0xa2   : > { %17944 = vmatprep.subr.bf16.mxu1 %v20035_v26  ;;  %v1318_v21 = vpack.c.bf16 %v421_v17, %v421_v17  ;;  %v422_v22 = vcombine.high %v420_v18, %v420_v18  ;;  %v20077_v26 = vld [vmem:[%s21865_s7 + $0x2c0] sm:$0xff]   ;;  %v1319_v29 = vpack.c.bf16 %v420_v18, %v420_v18  ;;  %v20090_v41 = vld [vmem:[%s21865_s7 + $0x218] sm:$0xff]   ;;  %v20100_v52 = vld [vmem:[%s21865_s7 + $0x270] sm:$0xff]  }
  0xa3   : > { %v20091_v43 = vld [vmem:[%s21865_s7 + $0x298] sm:$0xff]   ;;  %v20094_v46 = vld [vmem:[%s21865_s7 + $0x220] sm:$0xff]   ;;  %v20114_v11 = vld [vmem:[%s21865_s7 + $0x3c8] sm:$0xff]  }
  0xa4   : > { %17923 = vmatpush3.bf16.msra.mxu0 %v20036_v27  ;;  %v1320_v24 = vpack.c.bf16 %v422_v22, %v422_v22  ;;  %v20078_v27 = vld [vmem:[%s21865_s7 + $0x200] sm:$0xff]   ;;  %v20117_v14 = vld [vmem:[%s21865_s7 + $0x350] sm:$0xff]   ;;  %v20121_v18 = vld [vmem:[%s21865_s7 + $0x358] sm:$0xff]  }
  0xa5   : > { %17945 = vmatpush3.bf16.msra.mxu1 %v20037_v28  ;;  %17924 = vmatprep.subr.bf16.mxu0 %v20038_v30  ;;  %v1317_v28 = vpack.c.bf16 %v413_v13, %v413_v13  ;;  %v20079_v30 = vld [vmem:[%s21865_s7 + $0x280] sm:$0xff]   ;;  %v20116_v13 = vld [vmem:[%s21865_s7 + $0x388] sm:$0xff]   ;;  %v20120_v17 = vld [vmem:[%s21865_s7 + $0x390] sm:$0xff]  }
  0xa6   : > { %17946 = vmatprep.subr.bf16.mxu1 %v20039_v31  ;;  %v20080_v31 = vld [vmem:[%s21865_s7 + $0x248] sm:$0xff]   ;;  %v20125_v22 = vld [vmem:[%s21865_s7 + $0x360] sm:$0xff]  }
  0xa8   : > { %17925 = vmatpush3.bf16.msra.mxu0 %v20040_v32  ;;  %v20081_v32 = vld [vmem:[%s21865_s7 + $0x2c8] sm:$0xff]  }
  0xa9   : > { %17947 = vmatpush3.bf16.msra.mxu1 %v20041_v33  ;;  %17954 = vmatprep.subr.bf16.mxu0 %v20043_v36  ;;  %v20082_v33 = vld [vmem:[%s21865_s7 + $0x208] sm:$0xff]   ;;  %v20085_v36 = vld [vmem:[%s21865_s7 + $0x2d0] sm:$0xff]  }
  0xaa   : > { %17976 = vmatprep.subr.bf16.mxu1 %v20044_v39  ;;  %v20088_v39 = vld [vmem:[%s21865_s7 + $0x258] sm:$0xff]  }
  0xab   : > { %12786 = vmatmul.mubr.bf16.vlgmr.msra.gmra.mrb[0].mxu0 %v1313_v48  ;;  %v20096_v48 = vld [vmem:[%s21865_s7 + $0x268] sm:$0xff]  }
  0xac   : > { %12826 = vmatmul.mubr.bf16.vlgmr.msra.gmra.mrb[0].mxu1 %v1315_v49  ;;  %17955 = vmatpush3.bf16.msra.mxu0 %v20045_v47  ;;  %v20095_v47 = vld [vmem:[%s21865_s7 + $0x2a0] sm:$0xff]   ;;  %v20097_v49 = vld [vmem:[%s21865_s7 + $0x2e8] sm:$0xff]  }
  0xad   : > { %17977 = vmatpush3.bf16.msra.mxu1 %v20046_v50  ;;  %17956 = vmatprep.subr.bf16.mxu0 %v20047_v53  ;;  %v20098_v50 = vld [vmem:[%s21865_s7 + $0x228] sm:$0xff]   ;;  %v20101_v53 = vld [vmem:[%s21865_s7 + $0x2f0] sm:$0xff]  }
  0xae   : > { %17978 = vmatprep.subr.bf16.mxu1 %v20048_v54  ;;  %12865 = vmatprep.mubr.bf16.mxu0 %v1318_v21  ;;  %v303_v54 = vld [vmem:[%s21883_s27 + $0x10] sm:$0xff]  ;;  %v20124_v21 = vld [vmem:[%s21865_s7 + $0x398] sm:$0xff]  }
  0xaf   : > { %12905 = vmatprep.mubr.bf16.mxu1 %v1320_v24  ;;  %v20127_v24 = vld [vmem:[%s21865_s7 + $0x320] sm:$0xff]  }
  0xb0   : > { %17957 = vmatpush3.bf16.msra.mxu0 %v20049_v55  ;;  %v20102_v55 = vld [vmem:[%s21865_s7 + $0x230] sm:$0xff]  }
  0xb1   : > { %17979 = vmatpush3.bf16.msra.mxu1 %v20050_v56  ;;  %17958 = vmatprep.subr.bf16.mxu0 %v20051_v57  ;;  %v430_v56 = vrot.slane %v303_v54, %v21922_v42  ;;  %v423_v57 = vcombine.high %v303_v54, %v303_v54  ;;  %v20147_v54 = vld [vmem:[%s21865_s7 + $0x4c8] sm:$0xff]  }
  0xb2   : > { %17980 = vmatprep.subr.bf16.mxu1 %v20052_v58  ;;  %v20103_v58 = vld [vmem:[%s21865_s7 + $0x2b0] sm:$0xff]  }
  0xb4   : > { %17959 = vmatpush3.bf16.msra.mxu0 %v20053_v59  ;;  %v20104_v59 = vld [vmem:[%s21865_s7 + $0x278] sm:$0xff]  }
  0xb5   : > { %17981 = vmatpush3.bf16.msra.mxu1 %v20054_v60  ;;  %17960 = vmatprep.subr.bf16.mxu0 %v20055_v61  ;;  %v438_v60 = vcombine.high %v430_v56, %v430_v56  ;;  %v437_v61 = vrot.slane %v423_v57, %v21922_v42  ;;  %v20150_v57 = vld [vmem:[%s21865_s7 + $0x450] sm:$0xff]  }
  0xb6   : > { %17982 = vmatprep.subr.bf16.mxu1 %v20056_v62  ;;  %v20105_v62 = vld [vmem:[%s21865_s7 + $0x2f8] sm:$0xff]  }
  0xb8   : > { %17961 = vmatpush3.bf16.msra.mxu0 %v20057_v63  ;;  %v20106_v63 = vld [vmem:[%s21865_s7 + $0x238] sm:$0xff]  }
  0xb9   : > { %17983 = vmatpush3.bf16.msra.mxu1 %v20058_v0  ;;  %17962 = vmatprep.subr.bf16.mxu0 %v20059_v1  ;;  %v1322_v0 = vpack.c.bf16 %v438_v60, %v438_v60  ;;  %v439_v1 = vcombine.high %v437_v61, %v437_v61  ;;  %v20153_v60 = vld [vmem:[%s21865_s7 + $0x490] sm:$0xff]  }
  0xba   : > { %17984 = vmatprep.subr.bf16.mxu1 %v20060_v2  ;;  %v20107_v2 = vld [vmem:[%s21865_s7 + $0x2b8] sm:$0xff]  }
  0xbc   : > { %17963 = vmatpush3.bf16.msra.mxu0 %v20061_v3  ;;  %v1324_v3 = vpack.c.bf16 %v439_v1, %v439_v1  ;;  %v20158_v1 = vld [vmem:[%s21865_s7 + $0x460] sm:$0xff]  }
  0xbd   : > { %17985 = vmatpush3.bf16.msra.mxu1 %v20062_v4  ;;  %17964 = vmatprep.subr.bf16.mxu0 %v20063_v5  ;;  %v20109_v4 = vld [vmem:[%s21865_s7 + $0x340] sm:$0xff]  }
  0xbe   : > { %17986 = vmatprep.subr.bf16.mxu1 %v20064_v6  ;;  %v20110_v5 = vld [vmem:[%s21865_s7 + $0x3c0] sm:$0xff]  }
  0xbf   : > { %v20111_v6 = vld [vmem:[%s21865_s7 + $0x300] sm:$0xff]  }
  0xc0   : > { %17965 = vmatpush3.bf16.msra.mxu0 %v20065_v7  ;;  %v1321_v7 = vpack.c.bf16 %v430_v56, %v430_v56  ;;  %v20149_v56 = vld [vmem:[%s21865_s7 + $0x488] sm:$0xff]  }
  0xc1   : > { %17987 = vmatpush3.bf16.msra.mxu1 %v20066_v8  ;;  %17966 = vmatprep.subr.bf16.mxu0 %v20067_v9  ;;  %v1323_v8 = vpack.c.bf16 %v437_v61, %v437_v61  ;;  %v20112_v9 = vld [vmem:[%s21865_s7 + $0x380] sm:$0xff]   ;;  %v20154_v61 = vld [vmem:[%s21865_s7 + $0x458] sm:$0xff]  }
  0xc2   : > { %17988 = vmatprep.subr.bf16.mxu1 %v20068_v10  ;;  %v20113_v10 = vld [vmem:[%s21865_s7 + $0x348] sm:$0xff]  }
  0xc4   : > { %17967 = vmatpush3.bf16.msra.mxu0 %v20069_v12  ;;  %v20115_v12 = vld [vmem:[%s21865_s7 + $0x308] sm:$0xff]  }
  0xc5   : > { %17989 = vmatpush3.bf16.msra.mxu1 %v20070_v15  ;;  %17968 = vmatprep.subr.bf16.mxu0 %v20071_v16  ;;  %v20118_v15 = vld [vmem:[%s21865_s7 + $0x3d0] sm:$0xff]  }
  0xc6   : > { %17990 = vmatprep.subr.bf16.mxu1 %v20072_v19  ;;  %v20119_v16 = vld [vmem:[%s21865_s7 + $0x310] sm:$0xff]   ;;  %v20122_v19 = vld [vmem:[%s21865_s7 + $0x3d8] sm:$0xff]  }
  0xc8   : > { %17969 = vmatpush3.bf16.msra.mxu0 %v20073_v20  ;;  %v20123_v20 = vld [vmem:[%s21865_s7 + $0x318] sm:$0xff]  }
  0xc9   : > { %17991 = vmatpush3.bf16.msra.mxu1 %v20074_v23  ;;  %17998 = vmatprep.subr.bf16.mxu0 %v20076_v25  ;;  %v20126_v23 = vld [vmem:[%s21865_s7 + $0x3e0] sm:$0xff]  }
  0xca   : > { %18020 = vmatprep.subr.bf16.mxu1 %v20077_v26  ;;  %v20128_v25 = vld [vmem:[%s21865_s7 + $0x3a0] sm:$0xff]   ;;  %v20129_v26 = vld [vmem:[%s21865_s7 + $0x368] sm:$0xff]  }
  0xcb   : > { %12866 = vmatmul.mubr.bf16.vlgmr.msra.gmra.mrb[4].mxu0 %v1317_v28  ;;  %v20131_v28 = vld [vmem:[%s21865_s7 + $0x328] sm:$0xff]  }
  0xcc   : > { %12906 = vmatmul.mubr.bf16.vlgmr.msra.gmra.mrb[4].mxu1 %v1319_v29  ;;  %17999 = vmatpush3.bf16.msra.mxu0 %v20078_v27  ;;  %v20130_v27 = vld [vmem:[%s21865_s7 + $0x3e8] sm:$0xff]  }
  0xcd   : > { %18021 = vmatpush3.bf16.msra.mxu1 %v20079_v30  ;;  %18000 = vmatprep.subr.bf16.mxu0 %v20080_v31  ;;  %v20132_v29 = vld [vmem:[%s21865_s7 + $0x3a8] sm:$0xff]   ;;  %v20133_v30 = vld [vmem:[%s21865_s7 + $0x370] sm:$0xff]  }
  0xce   : > { %18022 = vmatprep.subr.bf16.mxu1 %v20081_v32  ;;  %12945 = vmatprep.mubr.bf16.mxu0 %v1322_v0  ;;  %v20134_v31 = vld [vmem:[%s21865_s7 + $0x3f0] sm:$0xff]   ;;  %v20157_v0 = vld [vmem:[%s21865_s7 + $0x498] sm:$0xff]  }
  0xcf   : > { %12985 = vmatprep.mubr.bf16.mxu1 %v1324_v3  ;;  %v20135_v32 = vld [vmem:[%s21865_s7 + $0x330] sm:$0xff]   ;;  %v20160_v3 = vld [vmem:[%s21865_s7 + $0x420] sm:$0xff]  }
  0xd0   : > { %18001 = vmatpush3.bf16.msra.mxu0 %v20082_v33  ;;  %v304_v33 = vld [vmem:[%s21883_s27 + $0x18] sm:$0xff] }
  0xd1   : > { %18023 = vmatpush3.bf16.msra.mxu1 %v20083_v34  ;;  %18002 = vmatprep.subr.bf16.mxu0 %v20084_v35  ;;  %v20136_v34 = vld [vmem:[%s21865_s7 + $0x3b0] sm:$0xff]   ;;  %v447_v35 = vrot.slane %v304_v33, %v21922_v42 }
  0xd2   : > { %18024 = vmatprep.subr.bf16.mxu1 %v20085_v36  ;;  %v440_v36 = vcombine.high %v304_v33, %v304_v33  ;;  %v20181_v33 = vld [vmem:[%s21865_s7 + $0x508] sm:$0xff]  }
  0xd4   : > { %18003 = vmatpush3.bf16.msra.mxu0 %v20086_v37  ;;  %v20137_v37 = vld [vmem:[%s21865_s7 + $0x378] sm:$0xff]  }
  0xd5   : > { %18025 = vmatpush3.bf16.msra.mxu1 %v20087_v38  ;;  %18004 = vmatprep.subr.bf16.mxu0 %v20088_v39  ;;  %v20138_v38 = vld [vmem:[%s21865_s7 + $0x3f8] sm:$0xff]   ;;  %v455_v39 = vcombine.high %v447_v35, %v447_v35 }
  0xd6   : > { %18026 = vmatprep.subr.bf16.mxu1 %v20089_v40  ;;  %v454_v40 = vrot.slane %v440_v36, %v21922_v42  ;;  %v20184_v36 = vld [vmem:[%s21865_s7 + $0x5d0] sm:$0xff]  }
  0xd8   : > { %18005 = vmatpush3.bf16.msra.mxu0 %v20090_v41  ;;  %v20139_v41 = vld [vmem:[%s21865_s7 + $0x338] sm:$0xff]  }
  0xd9   : > { %18027 = vmatpush3.bf16.msra.mxu1 %v20091_v43  ;;  %18006 = vmatprep.subr.bf16.mxu0 %v20092_v44  ;;  %v20140_v43 = vld [vmem:[%s21865_s7 + $0x3b8] sm:$0xff]   ;;  %v1326_v44 = vpack.c.bf16 %v455_v39, %v455_v39 }
  0xda   : > { %18028 = vmatprep.subr.bf16.mxu1 %v20093_v45  ;;  %v456_v45 = vcombine.high %v454_v40, %v454_v40  ;;  %v20187_v39 = vld [vmem:[%s21865_s7 + $0x558] sm:$0xff]  }
  0xdc   : > { %18007 = vmatpush3.bf16.msra.mxu0 %v20094_v46  ;;  %v20142_v46 = vld [vmem:[%s21865_s7 + $0x440] sm:$0xff]  }
  0xdd   : > { %18029 = vmatpush3.bf16.msra.mxu1 %v20095_v47  ;;  %18008 = vmatprep.subr.bf16.mxu0 %v20096_v48  ;;  %v1328_v47 = vpack.c.bf16 %v456_v45, %v456_v45  ;;  %v20143_v48 = vld [vmem:[%s21865_s7 + $0x4c0] sm:$0xff]  }
  0xde   : > { %18030 = vmatprep.subr.bf16.mxu1 %v20097_v49  ;;  %v20144_v49 = vld [vmem:[%s21865_s7 + $0x400] sm:$0xff]  }
  0xdf   : > { %v20192_v45 = vld [vmem:[%s21865_s7 + $0x5e0] sm:$0xff]  }
  0xe0   : > { %18009 = vmatpush3.bf16.msra.mxu0 %v20098_v50  ;;  %v1325_v50 = vpack.c.bf16 %v447_v35, %v447_v35  ;;  %v20183_v35 = vld [vmem:[%s21865_s7 + $0x550] sm:$0xff]  }
  0xe1   : > { %18031 = vmatpush3.bf16.msra.mxu1 %v20099_v51  ;;  %18010 = vmatprep.subr.bf16.mxu0 %v20100_v52  ;;  %v1327_v51 = vpack.c.bf16 %v454_v40, %v454_v40  ;;  %v20145_v52 = vld [vmem:[%s21865_s7 + $0x480] sm:$0xff]   ;;  %v20188_v40 = vld [vmem:[%s21865_s7 + $0x5d8] sm:$0xff]  }
  0xe2   : > { %18032 = vmatprep.subr.bf16.mxu1 %v20101_v53  ;;  %v20146_v53 = vld [vmem:[%s21865_s7 + $0x448] sm:$0xff]  }
  0xe4   : > { %18011 = vmatpush3.bf16.msra.mxu0 %v20102_v55  ;;  %v20148_v55 = vld [vmem:[%s21865_s7 + $0x408] sm:$0xff]  }
  0xe5   : > { %18033 = vmatpush3.bf16.msra.mxu1 %v20103_v58  ;;  %18012 = vmatprep.subr.bf16.mxu0 %v20104_v59  ;;  %v20151_v58 = vld [vmem:[%s21865_s7 + $0x4d0] sm:$0xff]  }
  0xe6   : > { %18034 = vmatprep.subr.bf16.mxu1 %v20105_v62  ;;  %v20152_v59 = vld [vmem:[%s21865_s7 + $0x410] sm:$0xff]   ;;  %v20155_v62 = vld [vmem:[%s21865_s7 + $0x4d8] sm:$0xff]  }
  0xe8   : > { %18013 = vmatpush3.bf16.msra.mxu0 %v20106_v63  ;;  %v20156_v63 = vld [vmem:[%s21865_s7 + $0x418] sm:$0xff]  }
  0xe9   : > { %18035 = vmatpush3.bf16.msra.mxu1 %v20107_v2  ;;  %18042 = vmatprep.subr.bf16.mxu0 %v20109_v4  ;;  %v20159_v2 = vld [vmem:[%s21865_s7 + $0x4e0] sm:$0xff]  }
  0xea   : > { %18064 = vmatprep.subr.bf16.mxu1 %v20110_v5  ;;  %v20161_v4 = vld [vmem:[%s21865_s7 + $0x4a0] sm:$0xff]   ;;  %v20162_v5 = vld [vmem:[%s21865_s7 + $0x468] sm:$0xff]  }
  0xeb   : > { %12946 = vmatmul.mubr.bf16.vlgmr.msra.gmra.mrb[8].mxu0 %v1321_v7  ;;  %v20164_v7 = vld [vmem:[%s21865_s7 + $0x428] sm:$0xff]  }
  0xec   : > { %12986 = vmatmul.mubr.bf16.vlgmr.msra.gmra.mrb[8].mxu1 %v1323_v8  ;;  %18043 = vmatpush3.bf16.msra.mxu0 %v20111_v6  ;;  %v20163_v6 = vld [vmem:[%s21865_s7 + $0x4e8] sm:$0xff]  }
  0xed   : > { %18065 = vmatpush3.bf16.msra.mxu1 %v20112_v9  ;;  %18044 = vmatprep.subr.bf16.mxu0 %v20113_v10  ;;  %v20165_v8 = vld [vmem:[%s21865_s7 + $0x4a8] sm:$0xff]   ;;  %v20166_v9 = vld [vmem:[%s21865_s7 + $0x470] sm:$0xff]  }
  0xee   : > { %18066 = vmatprep.subr.bf16.mxu1 %v20114_v11  ;;  %13025 = vmatprep.mubr.bf16.mxu0 %v1326_v44  ;;  %v20167_v10 = vld [vmem:[%s21865_s7 + $0x4f0] sm:$0xff]   ;;  %v20191_v44 = vld [vmem:[%s21865_s7 + $0x560] sm:$0xff]  }
  0xef   : > { %13065 = vmatprep.mubr.bf16.mxu1 %v1328_v47  ;;  %v20168_v11 = vld [vmem:[%s21865_s7 + $0x430] sm:$0xff]   ;;  %v20194_v47 = vld [vmem:[%s21865_s7 + $0x5a0] sm:$0xff]  }
  0xf0   : > { %18045 = vmatpush3.bf16.msra.mxu0 %v20115_v12  ;;  %v305_v12 = vld [vmem:[%s21883_s27 + $0x20] sm:$0xff] }
  0xf1   : > { %18067 = vmatpush3.bf16.msra.mxu1 %v20116_v13  ;;  %18046 = vmatprep.subr.bf16.mxu0 %v20117_v14  ;;  %v20169_v13 = vld [vmem:[%s21865_s7 + $0x4b0] sm:$0xff]   ;;  %v464_v14 = vrot.slane %v305_v12, %v21922_v42 }
  0xf2   : > { %18068 = vmatprep.subr.bf16.mxu1 %v20118_v15  ;;  %v457_v15 = vcombine.high %v305_v12, %v305_v12  ;;  %v20214_v12 = vld [vmem:[%s21865_s7 + $0x608] sm:$0xff]  }
  0xf4   : > { %18047 = vmatpush3.bf16.msra.mxu0 %v20119_v16  ;;  %v20170_v16 = vld [vmem:[%s21865_s7 + $0x478] sm:$0xff]  }
  0xf5   : > { %18069 = vmatpush3.bf16.msra.mxu1 %v20120_v17  ;;  %18048 = vmatprep.subr.bf16.mxu0 %v20121_v18  ;;  %v20171_v17 = vld [vmem:[%s21865_s7 + $0x4f8] sm:$0xff]   ;;  %v472_v18 = vcombine.high %v464_v14, %v464_v14 }
  0xf6   : > { %18070 = vmatprep.subr.bf16.mxu1 %v20122_v19  ;;  %v471_v19 = vrot.slane %v457_v15, %v21922_v42  ;;  %v20217_v15 = vld [vmem:[%s21865_s7 + $0x6d0] sm:$0xff]  }
  0xf8   : > { %18049 = vmatpush3.bf16.msra.mxu0 %v20123_v20  ;;  %v20172_v20 = vld [vmem:[%s21865_s7 + $0x438] sm:$0xff]  }
  0xf9   : > { %18071 = vmatpush3.bf16.msra.mxu1 %v20124_v21  ;;  %18050 = vmatprep.subr.bf16.mxu0 %v20125_v22  ;;  %v20173_v21 = vld [vmem:[%s21865_s7 + $0x4b8] sm:$0xff]   ;;  %v1330_v22 = vpack.c.bf16 %v472_v18, %v472_v18 }
  0xfa   : > { %18072 = vmatprep.subr.bf16.mxu1 %v20126_v23  ;;  %v473_v23 = vcombine.high %v471_v19, %v471_v19  ;;  %v20220_v18 = vld [vmem:[%s21865_s7 + $0x658] sm:$0xff]  }
  0xfc   : > { %18051 = vmatpush3.bf16.msra.mxu0 %v20127_v24  ;;  %v20175_v24 = vld [vmem:[%s21865_s7 + $0x540] sm:$0xff]  }
  0xfd   : > { %18073 = vmatpush3.bf16.msra.mxu1 %v20128_v25  ;;  %18052 = vmatprep.subr.bf16.mxu0 %v20129_v26  ;;  %v1332_v25 = vpack.c.bf16 %v473_v23, %v473_v23  ;;  %v20176_v26 = vld [vmem:[%s21865_s7 + $0x5c0] sm:$0xff]  }
  0xfe   : > { %18074 = vmatprep.subr.bf16.mxu1 %v20130_v27  ;;  %v20177_v27 = vld [vmem:[%s21865_s7 + $0x500] sm:$0xff]  }
  0xff   : > { %v20225_v23 = vld [vmem:[%s21865_s7 + $0x6e0] sm:$0xff]  }
 0x100   : > { %18053 = vmatpush3.bf16.msra.mxu0 %v20131_v28  ;;  %v1329_v28 = vpack.c.bf16 %v464_v14, %v464_v14  ;;  %v20216_v14 = vld [vmem:[%s21865_s7 + $0x650] sm:$0xff]  }
 0x101   : > { %18075 = vmatpush3.bf16.msra.mxu1 %v20132_v29  ;;  %18054 = vmatprep.subr.bf16.mxu0 %v20133_v30  ;;  %v1331_v29 = vpack.c.bf16 %v471_v19, %v471_v19  ;;  %v20178_v30 = vld [vmem:[%s21865_s7 + $0x580] sm:$0xff]   ;;  %v20221_v19 = vld [vmem:[%s21865_s7 + $0x6d8] sm:$0xff]  }
 0x102   : > { %18076 = vmatprep.subr.bf16.mxu1 %v20134_v31  ;;  %v20179_v31 = vld [vmem:[%s21865_s7 + $0x548] sm:$0xff]  }
 0x104   : > { %18055 = vmatpush3.bf16.msra.mxu0 %v20135_v32  ;;  %v20180_v32 = vld [vmem:[%s21865_s7 + $0x5c8] sm:$0xff]  }
 0x105   : > { %18077 = vmatpush3.bf16.msra.mxu1 %v20136_v34  ;;  %18056 = vmatprep.subr.bf16.mxu0 %v20137_v37  ;;  %v20182_v34 = vld [vmem:[%s21865_s7 + $0x588] sm:$0xff]   ;;  %v20185_v37 = vld [vmem:[%s21865_s7 + $0x510] sm:$0xff]  }
 0x106   : > { %18078 = vmatprep.subr.bf16.mxu1 %v20138_v38  ;;  %v20186_v38 = vld [vmem:[%s21865_s7 + $0x590] sm:$0xff]  }
 0x108   : > { %18057 = vmatpush3.bf16.msra.mxu0 %v20139_v41  ;;  %v20189_v41 = vld [vmem:[%s21865_s7 + $0x518] sm:$0xff]  }
 0x109   : > { %18079 = vmatpush3.bf16.msra.mxu1 %v20140_v43  ;;  %18086 = vmatprep.subr.bf16.mxu0 %v20142_v46  ;;  %v20190_v43 = vld [vmem:[%s21865_s7 + $0x598] sm:$0xff]   ;;  %v20193_v46 = vld [vmem:[%s21865_s7 + $0x520] sm:$0xff]  }
 0x10a   : > { %18108 = vmatprep.subr.bf16.mxu1 %v20143_v48  ;;  %v20195_v48 = vld [vmem:[%s21865_s7 + $0x568] sm:$0xff]  }
 0x10b   : > { %13026 = vmatmul.mubr.bf16.vlgmr.msra.gmra.mrb[12].mxu0 %v1325_v50  ;;  %v20197_v50 = vld [vmem:[%s21865_s7 + $0x528] sm:$0xff]  }
 0x10c   : > { %13066 = vmatmul.mubr.bf16.vlgmr.msra.gmra.mrb[12].mxu1 %v1327_v51  ;;  %18087 = vmatpush3.bf16.msra.mxu0 %v20144_v49  ;;  %v20196_v49 = vld [vmem:[%s21865_s7 + $0x5e8] sm:$0xff]  }
 0x10d   : > { %18109 = vmatpush3.bf16.msra.mxu1 %v20145_v52  ;;  %18088 = vmatprep.subr.bf16.mxu0 %v20146_v53  ;;  %v20198_v51 = vld [vmem:[%s21865_s7 + $0x5a8] sm:$0xff]   ;;  %v20199_v52 = vld [vmem:[%s21865_s7 + $0x570] sm:$0xff]  }
 0x10e   : > { %18110 = vmatprep.subr.bf16.mxu1 %v20147_v54  ;;  %13105 = vmatprep.mubr.bf16.mxu0 %v1330_v22  ;;  %v20200_v53 = vld [vmem:[%s21865_s7 + $0x5f0] sm:$0xff]   ;;  %v20224_v22 = vld [vmem:[%s21865_s7 + $0x660] sm:$0xff]  }
 0x10f   : > { %13145 = vmatprep.mubr.bf16.mxu1 %v1332_v25  ;;  %v20201_v54 = vld [vmem:[%s21865_s7 + $0x530] sm:$0xff]   ;;  %v20227_v25 = vld [vmem:[%s21865_s7 + $0x6a0] sm:$0xff]  }
 0x110   : > { %18089 = vmatpush3.bf16.msra.mxu0 %v20148_v55  ;;  %v306_v55 = vld [vmem:[%s21883_s27 + $0x28] sm:$0xff] }
 0x111   : > { %18111 = vmatpush3.bf16.msra.mxu1 %v20149_v56  ;;  %18090 = vmatprep.subr.bf16.mxu0 %v20150_v57  ;;  %v20202_v56 = vld [vmem:[%s21865_s7 + $0x5b0] sm:$0xff]   ;;  %v481_v57 = vrot.slane %v306_v55, %v21922_v42 }
 0x112   : > { %18112 = vmatprep.subr.bf16.mxu1 %v20151_v58  ;;  %v474_v58 = vcombine.high %v306_v55, %v306_v55  ;;  %v20247_v55 = vld [vmem:[%s21865_s7 + $0x708] sm:$0xff]  }
 0x114   : > { %18091 = vmatpush3.bf16.msra.mxu0 %v20152_v59  ;;  %v20203_v59 = vld [vmem:[%s21865_s7 + $0x578] sm:$0xff]  }
 0x115   : > { %18113 = vmatpush3.bf16.msra.mxu1 %v20153_v60  ;;  %18092 = vmatprep.subr.bf16.mxu0 %v20154_v61  ;;  %v20204_v60 = vld [vmem:[%s21865_s7 + $0x5f8] sm:$0xff]   ;;  %v489_v61 = vcombine.high %v481_v57, %v481_v57 }
 0x116   : > { %18114 = vmatprep.subr.bf16.mxu1 %v20155_v62  ;;  %v488_v62 = vrot.slane %v474_v58, %v21922_v42  ;;  %v20250_v58 = vld [vmem:[%s21865_s7 + $0x7d0] sm:$0xff]  }
 0x118   : > { %18093 = vmatpush3.bf16.msra.mxu0 %v20156_v63  ;;  %v20205_v63 = vld [vmem:[%s21865_s7 + $0x538] sm:$0xff]  }
 0x119   : > { %18115 = vmatpush3.bf16.msra.mxu1 %v20157_v0  ;;  %18094 = vmatprep.subr.bf16.mxu0 %v20158_v1  ;;  %v20206_v0 = vld [vmem:[%s21865_s7 + $0x5b8] sm:$0xff]   ;;  %v1334_v1 = vpack.c.bf16 %v489_v61, %v489_v61 }
 0x11a   : > { %18116 = vmatprep.subr.bf16.mxu1 %v20159_v2  ;;  %v490_v2 = vcombine.high %v488_v62, %v488_v62  ;;  %v20253_v61 = vld [vmem:[%s21865_s7 + $0x758] sm:$0xff]  }
 0x11c   : > { %18095 = vmatpush3.bf16.msra.mxu0 %v20160_v3  ;;  %v20208_v3 = vld [vmem:[%s21865_s7 + $0x640] sm:$0xff]  }
 0x11d   : > { %18117 = vmatpush3.bf16.msra.mxu1 %v20161_v4  ;;  %18096 = vmatprep.subr.bf16.mxu0 %v20162_v5  ;;  %v1336_v4 = vpack.c.bf16 %v490_v2, %v490_v2  ;;  %v20209_v5 = vld [vmem:[%s21865_s7 + $0x6c0] sm:$0xff]  }
 0x11e   : > { %18118 = vmatprep.subr.bf16.mxu1 %v20163_v6  ;;  %v20210_v6 = vld [vmem:[%s21865_s7 + $0x600] sm:$0xff]  }
 0x11f   : > { %v20258_v2 = vld [vmem:[%s21865_s7 + $0x7e0] sm:$0xff]  }
 0x120   : > { %18097 = vmatpush3.bf16.msra.mxu0 %v20164_v7  ;;  %v1333_v7 = vpack.c.bf16 %v481_v57, %v481_v57  ;;  %v20249_v57 = vld [vmem:[%s21865_s7 + $0x750] sm:$0xff]  }
 0x121   : > { %18119 = vmatpush3.bf16.msra.mxu1 %v20165_v8  ;;  %18098 = vmatprep.subr.bf16.mxu0 %v20166_v9  ;;  %v1335_v8 = vpack.c.bf16 %v488_v62, %v488_v62  ;;  %v20211_v9 = vld [vmem:[%s21865_s7 + $0x680] sm:$0xff]   ;;  %v20254_v62 = vld [vmem:[%s21865_s7 + $0x7d8] sm:$0xff]  }
 0x122   : > { %18120 = vmatprep.subr.bf16.mxu1 %v20167_v10  ;;  %v20212_v10 = vld [vmem:[%s21865_s7 + $0x648] sm:$0xff]  }
 0x124   : > { %18099 = vmatpush3.bf16.msra.mxu0 %v20168_v11  ;;  %v20213_v11 = vld [vmem:[%s21865_s7 + $0x6c8] sm:$0xff]  }
 0x125   : > { %18121 = vmatpush3.bf16.msra.mxu1 %v20169_v13  ;;  %18100 = vmatprep.subr.bf16.mxu0 %v20170_v16  ;;  %v20215_v13 = vld [vmem:[%s21865_s7 + $0x688] sm:$0xff]   ;;  %v20218_v16 = vld [vmem:[%s21865_s7 + $0x610] sm:$0xff]  }
 0x126   : > { %18122 = vmatprep.subr.bf16.mxu1 %v20171_v17  ;;  %v20219_v17 = vld [vmem:[%s21865_s7 + $0x690] sm:$0xff]  }
 0x128   : > { %18101 = vmatpush3.bf16.msra.mxu0 %v20172_v20  ;;  %v20222_v20 = vld [vmem:[%s21865_s7 + $0x618] sm:$0xff]  }
 0x129   : > { %18123 = vmatpush3.bf16.msra.mxu1 %v20173_v21  ;;  %18130 = vmatprep.subr.bf16.mxu0 %v20175_v24  ;;  %v20223_v21 = vld [vmem:[%s21865_s7 + $0x698] sm:$0xff]   ;;  %v20226_v24 = vld [vmem:[%s21865_s7 + $0x620] sm:$0xff]  }
 0x12a   : > { %18152 = vmatprep.subr.bf16.mxu1 %v20176_v26  ;;  %v20228_v26 = vld [vmem:[%s21865_s7 + $0x668] sm:$0xff]  }
 0x12b   : > { %13106 = vmatmul.mubr.bf16.vlgmr.msra.gmra.mrb[16].mxu0 %v1329_v28  ;;  %v20230_v28 = vld [vmem:[%s21865_s7 + $0x628] sm:$0xff]  }
 0x12c   : > { %13146 = vmatmul.mubr.bf16.vlgmr.msra.gmra.mrb[16].mxu1 %v1331_v29  ;;  %18131 = vmatpush3.bf16.msra.mxu0 %v20177_v27  ;;  %v20229_v27 = vld [vmem:[%s21865_s7 + $0x6e8] sm:$0xff]  }
 0x12d   : > { %18153 = vmatpush3.bf16.msra.mxu1 %v20178_v30  ;;  %18132 = vmatprep.subr.bf16.mxu0 %v20179_v31  ;;  %v20231_v29 = vld [vmem:[%s21865_s7 + $0x6a8] sm:$0xff]   ;;  %v20232_v30 = vld [vmem:[%s21865_s7 + $0x670] sm:$0xff]  }
 0x12e   : > { %18154 = vmatprep.subr.bf16.mxu1 %v20180_v32  ;;  %13185 = vmatprep.mubr.bf16.mxu0 %v1334_v1  ;;  %v20233_v31 = vld [vmem:[%s21865_s7 + $0x6f0] sm:$0xff]   ;;  %v20257_v1 = vld [vmem:[%s21865_s7 + $0x760] sm:$0xff]  }
 0x12f   : > { %13225 = vmatprep.mubr.bf16.mxu1 %v1336_v4  ;;  %v20234_v32 = vld [vmem:[%s21865_s7 + $0x630] sm:$0xff]   ;;  %v20260_v4 = vld [vmem:[%s21865_s7 + $0x7a0] sm:$0xff]  }
 0x130   : > { %18133 = vmatpush3.bf16.msra.mxu0 %v20181_v33  ;;  %v20235_v33 = vld [vmem:[%s21865_s7 + $0x6b0] sm:$0xff]  }
 0x131   : > { %18155 = vmatpush3.bf16.msra.mxu1 %v20182_v34  ;;  %18134 = vmatprep.subr.bf16.mxu0 %v20183_v35  ;;  %v307_v34 = vld [vmem:[%s21883_s27 + $0x30] sm:$0xff]  ;;  %v20236_v35 = vld [vmem:[%s21865_s7 + $0x678] sm:$0xff]  }
 0x132   : > { %18156 = vmatprep.subr.bf16.mxu1 %v20184_v36  ;;  %v498_v36 = vrot.slane %v307_v34, %v21922_v42 }
 0x134   : > { %18135 = vmatpush3.bf16.msra.mxu0 %v20185_v37  ;;  %v491_v37 = vcombine.high %v307_v34, %v307_v34  ;;  %v20274_v34 = vld [vmem:[%s21865_s7 + $0x840] sm:$0xff]  }
 0x135   : > { %18157 = vmatpush3.bf16.msra.mxu1 %v20186_v38  ;;  %18136 = vmatprep.subr.bf16.mxu0 %v20187_v39  ;;  %v20237_v38 = vld [vmem:[%s21865_s7 + $0x6f8] sm:$0xff]  }
 0x136   : > { %18158 = vmatprep.subr.bf16.mxu1 %v20188_v40  ;;  %v20238_v39 = vld [vmem:[%s21865_s7 + $0x638] sm:$0xff]   ;;  %v506_v40 = vcombine.high %v498_v36, %v498_v36 }
 0x138   : > { %18137 = vmatpush3.bf16.msra.mxu0 %v20189_v41  ;;  %v505_v41 = vrot.slane %v491_v37, %v21922_v42  ;;  %v20276_v37 = vld [vmem:[%s21865_s7 + $0x800] sm:$0xff]  }
 0x139   : > { %18159 = vmatpush3.bf16.msra.mxu1 %v20190_v43  ;;  %18138 = vmatprep.subr.bf16.mxu0 %v20191_v44  ;;  %v20239_v43 = vld [vmem:[%s21865_s7 + $0x6b8] sm:$0xff]   ;;  %v1338_v44 = vpack.c.bf16 %v506_v40, %v506_v40 }
 0x13a   : > { %18160 = vmatprep.subr.bf16.mxu1 %v20192_v45  ;;  %v507_v45 = vcombine.high %v505_v41, %v505_v41 }
 0x13c   : > { %18139 = vmatpush3.bf16.msra.mxu0 %v20193_v46  ;;  %v20241_v46 = vld [vmem:[%s21865_s7 + $0x740] sm:$0xff]  }
 0x13d   : > { %18161 = vmatpush3.bf16.msra.mxu1 %v20194_v47  ;;  %18140 = vmatprep.subr.bf16.mxu0 %v20195_v48  ;;  %v20242_v47 = vld [vmem:[%s21865_s7 + $0x7c0] sm:$0xff]   ;;  %v1340_v48 = vpack.c.bf16 %v507_v45, %v507_v45  ;;  %v20280_v45 = vld [vmem:[%s21865_s7 + $0x808] sm:$0xff]  }
 0x13e   : > { %18162 = vmatprep.subr.bf16.mxu1 %v20196_v49  ;;  %v20243_v49 = vld [vmem:[%s21865_s7 + $0x700] sm:$0xff]  }
 0x140   : > { %18141 = vmatpush3.bf16.msra.mxu0 %v20197_v50  ;;  %v1337_v50 = vpack.c.bf16 %v498_v36, %v498_v36  ;;  %v20275_v36 = vld [vmem:[%s21865_s7 + $0x8c0] sm:$0xff]  }
 0x141   : > { %18163 = vmatpush3.bf16.msra.mxu1 %v20198_v51  ;;  %18142 = vmatprep.subr.bf16.mxu0 %v20199_v52  ;;  %v1339_v51 = vpack.c.bf16 %v505_v41, %v505_v41  ;;  %v20244_v52 = vld [vmem:[%s21865_s7 + $0x780] sm:$0xff]  }
 0x142   : > { %18164 = vmatprep.subr.bf16.mxu1 %v20200_v53  ;;  %v20245_v53 = vld [vmem:[%s21865_s7 + $0x748] sm:$0xff]   ;;  %v20277_v41 = vld [vmem:[%s21865_s7 + $0x880] sm:$0xff]  }
 0x144   : > { %18143 = vmatpush3.bf16.msra.mxu0 %v20201_v54  ;;  %v20246_v54 = vld [vmem:[%s21865_s7 + $0x7c8] sm:$0xff]  }
 0x145   : > { %18165 = vmatpush3.bf16.msra.mxu1 %v20202_v56  ;;  %18144 = vmatprep.subr.bf16.mxu0 %v20203_v59  ;;  %v20248_v56 = vld [vmem:[%s21865_s7 + $0x788] sm:$0xff]   ;;  %v20251_v59 = vld [vmem:[%s21865_s7 + $0x710] sm:$0xff]  }
 0x146   : > { %18166 = vmatprep.subr.bf16.mxu1 %v20204_v60  ;;  %v20252_v60 = vld [vmem:[%s21865_s7 + $0x790] sm:$0xff]  }
 0x148   : > { %18145 = vmatpush3.bf16.msra.mxu0 %v20205_v63  ;;  %v20255_v63 = vld [vmem:[%s21865_s7 + $0x718] sm:$0xff]  }
 0x149   : > { %18167 = vmatpush3.bf16.msra.mxu1 %v20206_v0  ;;  %18174 = vmatprep.subr.bf16.mxu0 %v20208_v3  ;;  %v20256_v0 = vld [vmem:[%s21865_s7 + $0x798] sm:$0xff]   ;;  %v20259_v3 = vld [vmem:[%s21865_s7 + $0x720] sm:$0xff]  }
 0x14a   : > { %18196 = vmatprep.subr.bf16.mxu1 %v20209_v5  ;;  %v20261_v5 = vld [vmem:[%s21865_s7 + $0x768] sm:$0xff]  }
 0x14b   : > { %13186 = vmatmul.mubr.bf16.vlgmr.msra.gmra.mrb[20].mxu0 %v1333_v7  ;;  %v20263_v7 = vld [vmem:[%s21865_s7 + $0x728] sm:$0xff]  }
 0x14c   : > { %13226 = vmatmul.mubr.bf16.vlgmr.msra.gmra.mrb[20].mxu1 %v1335_v8  ;;  %18175 = vmatpush3.bf16.msra.mxu0 %v20210_v6  ;;  %v20262_v6 = vld [vmem:[%s21865_s7 + $0x7e8] sm:$0xff]  }
 0x14d   : > { %18197 = vmatpush3.bf16.msra.mxu1 %v20211_v9  ;;  %18176 = vmatprep.subr.bf16.mxu0 %v20212_v10  ;;  %v20264_v8 = vld [vmem:[%s21865_s7 + $0x7a8] sm:$0xff]   ;;  %v20265_v9 = vld [vmem:[%s21865_s7 + $0x770] sm:$0xff]  }
 0x14e   : > { %18198 = vmatprep.subr.bf16.mxu1 %v20213_v11  ;;  %13265 = vmatprep.mubr.bf16.mxu0 %v1338_v44  ;;  %v20266_v10 = vld [vmem:[%s21865_s7 + $0x7f0] sm:$0xff]   ;;  %v20279_v44 = vld [vmem:[%s21865_s7 + $0x8c8] sm:$0xff]  }
 0x14f   : > { %13305 = vmatprep.mubr.bf16.mxu1 %v1340_v48  ;;  %v20283_v48 = vld [vmem:[%s21865_s7 + $0x8d0] sm:$0xff]  }
 0x150   : > { %18177 = vmatpush3.bf16.msra.mxu0 %v20214_v12 }
 0x151   : > { %18199 = vmatpush3.bf16.msra.mxu1 %v20215_v13  ;;  %18178 = vmatprep.subr.bf16.mxu0 %v20216_v14  ;;  %v20267_v13 = vld [vmem:[%s21865_s7 + $0x730] sm:$0xff]  }
 0x152   : > { %18200 = vmatprep.subr.bf16.mxu1 %v20217_v15  ;;  %v20268_v14 = vld [vmem:[%s21865_s7 + $0x7b0] sm:$0xff]  }
 0x154   : > { %18179 = vmatpush3.bf16.msra.mxu0 %v20218_v16 }
 0x155   : > { %18201 = vmatpush3.bf16.msra.mxu1 %v20219_v17  ;;  %18180 = vmatprep.subr.bf16.mxu0 %v20220_v18  ;;  %v20269_v17 = vld [vmem:[%s21865_s7 + $0x778] sm:$0xff]  }
 0x156   : > { %18202 = vmatprep.subr.bf16.mxu1 %v20221_v19  ;;  %v20270_v18 = vld [vmem:[%s21865_s7 + $0x7f8] sm:$0xff]  }
 0x157   : > { %v308_v19 = vld [vmem:[%s21883_s27 + $0x38] sm:$0xff] }
 0x158   : > { %18181 = vmatpush3.bf16.msra.mxu0 %v20222_v20 }
 0x159   : > { %18203 = vmatpush3.bf16.msra.mxu1 %v20223_v21  ;;  %18182 = vmatprep.subr.bf16.mxu0 %v20224_v22 }
 0x15a   : > { %18204 = vmatprep.subr.bf16.mxu1 %v20225_v23 }
 0x15c   : > { %18183 = vmatpush3.bf16.msra.mxu0 %v20226_v24  ;;  %v515_v24 = vrot.slane %v308_v19, %v21922_v42 }
 0x15d   : > { %18205 = vmatpush3.bf16.msra.mxu1 %v20227_v25  ;;  %18184 = vmatprep.subr.bf16.mxu0 %v20228_v26 }
 0x15e   : > { %18206 = vmatprep.subr.bf16.mxu1 %v20229_v27  ;;  %v508_v27 = vcombine.high %v308_v19, %v308_v19  ;;  %v20304_v19 = vld [vmem:[%s21865_s7 + $0x838] sm:$0xff]  }
 0x160   : > { %18185 = vmatpush3.bf16.msra.mxu0 %v20230_v28 }
 0x161   : > { %18207 = vmatpush3.bf16.msra.mxu1 %v20231_v29  ;;  %18186 = vmatprep.subr.bf16.mxu0 %v20232_v30  ;;  %v20271_v29 = vld [vmem:[%s21865_s7 + $0x738] sm:$0xff]   ;;  %v523_v30 = vcombine.high %v515_v24, %v515_v24 }
 0x162   : > { %18208 = vmatprep.subr.bf16.mxu1 %v20233_v31  ;;  %v20272_v31 = vld [vmem:[%s21865_s7 + $0x7b8] sm:$0xff]  }
 0x164   : > { %18187 = vmatpush3.bf16.msra.mxu0 %v20234_v32  ;;  %v522_v32 = vrot.slane %v508_v27, %v21922_v42  ;;  %v20308_v27 = vld [vmem:[%s21865_s7 + $0x9c0] sm:$0xff]  }
 0x165   : > { %18209 = vmatpush3.bf16.msra.mxu1 %v20235_v33  ;;  %18188 = vmatprep.subr.bf16.mxu0 %v20236_v35  ;;  %v1342_v33 = vpack.c.bf16 %v523_v30, %v523_v30 }
 0x166   : > { %18210 = vmatprep.subr.bf16.mxu1 %v20237_v38  ;;  %v524_v35 = vcombine.high %v522_v32, %v522_v32  ;;  %v1343_v40 = vpack.c.bf16 %v522_v32, %v522_v32  ;;  %v20310_v32 = vld [vmem:[%s21865_s7 + $0x980] sm:$0xff]  }
 0x168   : > { %18189 = vmatpush3.bf16.msra.mxu0 %v20238_v39  ;;  %v1344_v38 = vpack.c.bf16 %v524_v35, %v524_v35  ;;  %v1341_v39 = vpack.c.bf16 %v515_v24, %v515_v24  ;;  %v20307_v24 = vld [vmem:[%s21865_s7 + $0x940] sm:$0xff]   ;;  %v20313_v35 = vld [vmem:[%s21865_s7 + $0x908] sm:$0xff]  }
 0x169   : > { %18211 = vmatpush3.bf16.msra.mxu1 %v20239_v43  ;;  %18218 = vmatprep.subr.bf16.mxu0 %v20241_v46  ;;  %v20278_v43 = vld [vmem:[%s21865_s7 + $0x848] sm:$0xff]  }
 0x16a   : > { %18240 = vmatprep.subr.bf16.mxu1 %v20242_v47  ;;  %v20281_v46 = vld [vmem:[%s21865_s7 + $0x888] sm:$0xff]   ;;  %v20282_v47 = vld [vmem:[%s21865_s7 + $0x850] sm:$0xff]  }
 0x16b   : > { %13266 = vmatmul.mubr.bf16.vlgmr.msra.gmra.mrb[24].mxu0 %v1337_v50  ;;  %v20285_v50 = vld [vmem:[%s21865_s7 + $0x890] sm:$0xff]  }
 0x16c   : > { %13306 = vmatmul.mubr.bf16.vlgmr.msra.gmra.mrb[24].mxu1 %v1339_v51  ;;  %18219 = vmatpush3.bf16.msra.mxu0 %v20243_v49  ;;  %v20284_v49 = vld [vmem:[%s21865_s7 + $0x810] sm:$0xff]   ;;  %v20286_v51 = vld [vmem:[%s21865_s7 + $0x858] sm:$0xff]  }
 0x16d   : > { %18241 = vmatpush3.bf16.msra.mxu1 %v20244_v52  ;;  %18220 = vmatprep.subr.bf16.mxu0 %v20245_v53  ;;  %v20287_v52 = vld [vmem:[%s21865_s7 + $0x8d8] sm:$0xff]  }
 0x16e   : > { %18242 = vmatprep.subr.bf16.mxu1 %v20246_v54  ;;  %13345 = vmatprep.mubr.bf16.mxu0 %v1342_v33  ;;  %v20288_v53 = vld [vmem:[%s21865_s7 + $0x818] sm:$0xff]   ;;  %v20311_v33 = vld [vmem:[%s21865_s7 + $0x948] sm:$0xff]  }
 0x16f   : > { %13385 = vmatprep.mubr.bf16.mxu1 %v1344_v38  ;;  %v20289_v54 = vld [vmem:[%s21865_s7 + $0x898] sm:$0xff]   ;;  %v20316_v38 = vld [vmem:[%s21865_s7 + $0x9d0] sm:$0xff]  }
 0x170   : > { %18221 = vmatpush3.bf16.msra.mxu0 %v20247_v55  ;;  %v20290_v55 = vld [vmem:[%s21865_s7 + $0x860] sm:$0xff]  }
 0x171   : > { %18243 = vmatpush3.bf16.msra.mxu1 %v20248_v56  ;;  %18222 = vmatprep.subr.bf16.mxu0 %v20249_v57  ;;  %v20291_v56 = vld [vmem:[%s21865_s7 + $0x8e0] sm:$0xff]  }
 0x172   : > { %18244 = vmatprep.subr.bf16.mxu1 %v20250_v58  ;;  %v20292_v57 = vld [vmem:[%s21865_s7 + $0x820] sm:$0xff]  }
 0x173   : > { %v20293_v58 = vld [vmem:[%s21865_s7 + $0x8a0] sm:$0xff]  }
 0x174   : > { %18223 = vmatpush3.bf16.msra.mxu0 %v20251_v59  ;;  %v20294_v59 = vld [vmem:[%s21865_s7 + $0x868] sm:$0xff]  }
 0x175   : > { %18245 = vmatpush3.bf16.msra.mxu1 %v20252_v60  ;;  %18224 = vmatprep.subr.bf16.mxu0 %v20253_v61  ;;  %v20295_v60 = vld [vmem:[%s21865_s7 + $0x8e8] sm:$0xff]  }
 0x176   : > { %18246 = vmatprep.subr.bf16.mxu1 %v20254_v62  ;;  %v20296_v61 = vld [vmem:[%s21865_s7 + $0x828] sm:$0xff]  }
 0x177   : > { %v20297_v62 = vld [vmem:[%s21865_s7 + $0x8a8] sm:$0xff]  }
 0x178   : > { %18225 = vmatpush3.bf16.msra.mxu0 %v20255_v63  ;;  %v20298_v63 = vld [vmem:[%s21865_s7 + $0x870] sm:$0xff]  }
 0x179   : > { %18247 = vmatpush3.bf16.msra.mxu1 %v20256_v0  ;;  %18226 = vmatprep.subr.bf16.mxu0 %v20257_v1  ;;  %v20299_v0 = vld [vmem:[%s21865_s7 + $0x8f0] sm:$0xff]  }
 0x17a   : > { %18248 = vmatprep.subr.bf16.mxu1 %v20258_v2 }
 0x17c   : > { %18227 = vmatpush3.bf16.msra.mxu0 %v20259_v3  ;;  %v20300_v3 = vld [vmem:[%s21865_s7 + $0x830] sm:$0xff]  }
 0x17d   : > { %18249 = vmatpush3.bf16.msra.mxu1 %v20260_v4  ;;  %18228 = vmatprep.subr.bf16.mxu0 %v20261_v5  ;;  %v20301_v4 = vld [vmem:[%s21865_s7 + $0x8b0] sm:$0xff]  }
 0x17e   : > { %18250 = vmatprep.subr.bf16.mxu1 %v20262_v6  ;;  %v17926_v11 = vpop.f32.mrb[0].mxu0 }
 0x17f   : > { %v17948_v12 = vpop.f32.mrb[0].mxu1  ;;  %v17927_v15 = vpop.f32.mrb[1].mxu0 }
 0x180   : > { %v17949_v16 = vpop.f32.mrb[1].mxu1  ;;  %v17928_v20 = vadd.f32 %v17927_v15, %v17926_v11  ;;  %v17929_v22 = vpop.f32.mrb[2].mxu0  ;;  %18229 = vmatpush3.bf16.msra.mxu0 %v20263_v7  ;;  %v20302_v7 = vld [vmem:[%s21865_s7 + $0x878] sm:$0xff]  }
 0x181   : > { %v17950_v21 = vadd.f32 %v17949_v16, %v17948_v12  ;;  %v17951_v23 = vpop.f32.mrb[2].mxu1  ;;  %18251 = vmatpush3.bf16.msra.mxu1 %v20264_v8  ;;  %v17930_v25 = vpop.f32.mrb[3].mxu0  ;;  %18230 = vmatprep.subr.bf16.mxu0 %v20265_v9  ;;  %v20303_v12 = vld [vmem:[%s21865_s7 + $0x8f8] sm:$0xff]  }
 0x182   : > { %v17952_v26 = vpop.f32.mrb[3].mxu1  ;;  %18252 = vmatprep.subr.bf16.mxu1 %v20266_v10 }
 0x183   : > { %v22166_v28 = vadd.f32 %v17950_v21, %v17928_v20  ;;  %v20305_v20 = vld [vmem:[%s21865_s7 + $0x8b8] sm:$0xff]  }
 0x184   : > { %18231 = vmatpush3.bf16.msra.mxu0 %v20267_v13  ;;  %v309_v13 = vld [vmem:[%s21883_s27 + $0x40] sm:$0xff] }
 0x185   : > { %18253 = vmatpush3.bf16.msra.mxu1 %v20268_v14  ;;  %18232 = vmatprep.subr.bf16.mxu0 %v20269_v17  ;;  %v532_v16 = vrot.slane %v309_v13, %v21922_v42  ;;  %v525_v17 = vcombine.high %v309_v13, %v309_v13 }
 0x186   : > { %18254 = vmatprep.subr.bf16.mxu1 %v20270_v18 }
 0x187   : > { %v540_v21 = vcombine.high %v532_v16, %v532_v16  ;;  %v539_v22 = vrot.slane %v525_v17, %v21922_v42  ;;  %v1345_v30 = vpack.c.bf16 %v532_v16, %v532_v16  ;;  %v20341_v16 = vld [vmem:[%s21865_s7 + $0xac0] sm:$0xff]  }
 0x188   : > { %18233 = vmatpush3.bf16.msra.mxu0 %v20271_v29 }
 0x189   : > { %18255 = vmatpush3.bf16.msra.mxu1 %v20272_v31  ;;  %18262 = vmatprep.subr.bf16.mxu0 %v20274_v34  ;;  %v1346_v25 = vpack.c.bf16 %v540_v21, %v540_v21  ;;  %v541_v26 = vcombine.high %v539_v22, %v539_v22  ;;  %v1347_v31 = vpack.c.bf16 %v539_v22, %v539_v22  ;;  %v20312_v34 = vld [vmem:[%s21865_s7 + $0x9c8] sm:$0xff]   ;;  %v20343_v22 = vld [vmem:[%s21865_s7 + $0xa80] sm:$0xff]  }
 0x18a   : > { %18284 = vmatprep.subr.bf16.mxu1 %v20275_v36  ;;  %v20314_v36 = vld [vmem:[%s21865_s7 + $0x988] sm:$0xff]  }
 0x18b   : > { %13346 = vmatmul.mubr.bf16.vlgmr.msra.gmra.mrb[28].mxu0 %v1341_v39  ;;  %v1348_v29 = vpack.c.bf16 %v541_v26, %v541_v26  ;;  %v20317_v39 = vld [vmem:[%s21865_s7 + $0x910] sm:$0xff]   ;;  %v20346_v26 = vld [vmem:[%s21865_s7 + $0xa08] sm:$0xff]  }
 0x18c   : > { %13386 = vmatmul.mubr.bf16.vlgmr.msra.gmra.mrb[28].mxu1 %v1343_v40  ;;  %18263 = vmatpush3.bf16.msra.mxu0 %v20276_v37  ;;  %v20315_v37 = vld [vmem:[%s21865_s7 + $0x950] sm:$0xff]  }
 0x18d   : > { %18285 = vmatpush3.bf16.msra.mxu1 %v20277_v41  ;;  %18264 = vmatprep.subr.bf16.mxu0 %v20278_v43  ;;  %v20318_v40 = vld [vmem:[%s21865_s7 + $0x990] sm:$0xff]   ;;  %v20319_v41 = vld [vmem:[%s21865_s7 + $0x958] sm:$0xff]  }
 0x18e   : > { %18286 = vmatprep.subr.bf16.mxu1 %v20279_v44  ;;  %13425 = vmatprep.mubr.bf16.mxu0 %v1346_v25  ;;  %v20320_v43 = vld [vmem:[%s21865_s7 + $0x9d8] sm:$0xff]   ;;  %v20345_v25 = vld [vmem:[%s21865_s7 + $0xac8] sm:$0xff]  }
 0x18f   : > { %13465 = vmatprep.mubr.bf16.mxu1 %v1348_v29  ;;  %v20321_v44 = vld [vmem:[%s21865_s7 + $0x918] sm:$0xff]   ;;  %v20349_v29 = vld [vmem:[%s21865_s7 + $0xad0] sm:$0xff]  }
 0x190   : > { %18265 = vmatpush3.bf16.msra.mxu0 %v20280_v45  ;;  %v20322_v45 = vld [vmem:[%s21865_s7 + $0x998] sm:$0xff]  }
 0x191   : > { %18287 = vmatpush3.bf16.msra.mxu1 %v20281_v46  ;;  %18266 = vmatprep.subr.bf16.mxu0 %v20282_v47  ;;  %v20323_v46 = vld [vmem:[%s21865_s7 + $0x960] sm:$0xff]  }
 0x192   : > { %18288 = vmatprep.subr.bf16.mxu1 %v20283_v48  ;;  %v20324_v47 = vld [vmem:[%s21865_s7 + $0x9e0] sm:$0xff]  }
 0x193   : > { %v20325_v48 = vld [vmem:[%s21865_s7 + $0x920] sm:$0xff]  }
 0x194   : > { %18267 = vmatpush3.bf16.msra.mxu0 %v20284_v49  ;;  %v20326_v49 = vld [vmem:[%s21865_s7 + $0x9a0] sm:$0xff]  }
 0x195   : > { %18289 = vmatpush3.bf16.msra.mxu1 %v20285_v50  ;;  %18268 = vmatprep.subr.bf16.mxu0 %v20286_v51  ;;  %v20327_v50 = vld [vmem:[%s21865_s7 + $0x968] sm:$0xff]  }
 0x196   : > { %18290 = vmatprep.subr.bf16.mxu1 %v20287_v52  ;;  %v20328_v51 = vld [vmem:[%s21865_s7 + $0x9e8] sm:$0xff]  }
 0x197   : > { %v20329_v52 = vld [vmem:[%s21865_s7 + $0x928] sm:$0xff]  }
 0x198   : > { %18269 = vmatpush3.bf16.msra.mxu0 %v20288_v53  ;;  %v20330_v53 = vld [vmem:[%s21865_s7 + $0x9a8] sm:$0xff]  }
 0x199   : > { %18291 = vmatpush3.bf16.msra.mxu1 %v20289_v54  ;;  %18270 = vmatprep.subr.bf16.mxu0 %v20290_v55  ;;  %v20331_v54 = vld [vmem:[%s21865_s7 + $0x970] sm:$0xff]  }
 0x19a   : > { %18292 = vmatprep.subr.bf16.mxu1 %v20291_v56  ;;  %v20332_v55 = vld [vmem:[%s21865_s7 + $0x9f0] sm:$0xff]  }
 0x19c   : > { %18271 = vmatpush3.bf16.msra.mxu0 %v20292_v57 }
 0x19d   : > { %18293 = vmatpush3.bf16.msra.mxu1 %v20293_v58  ;;  %18272 = vmatprep.subr.bf16.mxu0 %v20294_v59  ;;  %v20333_v58 = vld [vmem:[%s21865_s7 + $0x930] sm:$0xff]  }
 0x19e   : > { %18294 = vmatprep.subr.bf16.mxu1 %v20295_v60  ;;  %v17970_v1 = vpop.f32.mrb[4].mxu0  ;;  %v20334_v59 = vld [vmem:[%s21865_s7 + $0x9b0] sm:$0xff]  }
 0x19f   : > { %v17992_v2 = vpop.f32.mrb[4].mxu1  ;;  %v17971_v5 = vpop.f32.mrb[5].mxu0 }
 0x1a0   : > { %v17993_v6 = vpop.f32.mrb[5].mxu1  ;;  %v17972_v8 = vadd.f32 %v17971_v5, %v17970_v1  ;;  %v17973_v10 = vpop.f32.mrb[6].mxu0  ;;  %18273 = vmatpush3.bf16.msra.mxu0 %v20296_v61 }
 0x1a1   : > { %v17994_v9 = vadd.f32 %v17993_v6, %v17992_v2  ;;  %v17995_v11 = vpop.f32.mrb[6].mxu1  ;;  %18295 = vmatpush3.bf16.msra.mxu1 %v20297_v62  ;;  %v17974_v14 = vpop.f32.mrb[7].mxu0  ;;  %18274 = vmatprep.subr.bf16.mxu0 %v20298_v63  ;;  %v20335_v2 = vld [vmem:[%s21865_s7 + $0x978] sm:$0xff]  }
 0x1a2   : > { %v17996_v15 = vpop.f32.mrb[7].mxu1  ;;  %18296 = vmatprep.subr.bf16.mxu1 %v20299_v0  ;;  %v12868_v18 = vadd.f32 %v17972_v8, %v22166_v28  ;;  %v20309_v28 = vld [vmem:[%s21865_s7 + $0x900] sm:$0xff]   ;;  %v20337_v8 = vld [vmem:[%s21865_s7 + $0x938] sm:$0xff]  }
 0x1a3   : > { %v20340_v15 = vld [vmem:[%s21865_s7 + $0xa40] sm:$0xff]  }
 0x1a4   : > { %v22207_v23 = vadd.f32 %v17994_v9, %v12868_v18  ;;  %18275 = vmatpush3.bf16.msra.mxu0 %v20300_v3  ;;  %v20336_v3 = vld [vmem:[%s21865_s7 + $0x9f8] sm:$0xff]  }
 0x1a5   : > { %18297 = vmatpush3.bf16.msra.mxu1 %v20301_v4  ;;  %18276 = vmatprep.subr.bf16.mxu0 %v20302_v7  ;;  %v310_v7 = vld [vmem:[%s21883_s27 + $0x48] sm:$0xff] }
 0x1a6   : > { %18298 = vmatprep.subr.bf16.mxu1 %v20303_v12  ;;  %v549_v9 = vrot.slane %v310_v7, %v21922_v42  ;;  %v542_v10 = vcombine.high %v310_v7, %v310_v7  ;;  %v20338_v12 = vld [vmem:[%s21865_s7 + $0x9b8] sm:$0xff]   ;;  %v20374_v7 = vld [vmem:[%s21865_s7 + $0xbc0] sm:$0xff]  }
 0x1a8   : > { %18277 = vmatpush3.bf16.msra.mxu0 %v20304_v19  ;;  %v557_v13 = vcombine.high %v549_v9, %v549_v9  ;;  %v556_v14 = vrot.slane %v542_v10, %v21922_v42  ;;  %v1349_v19 = vpack.c.bf16 %v549_v9, %v549_v9  ;;  %v20375_v9 = vld [vmem:[%s21865_s7 + $0xb00] sm:$0xff]  }
 0x1a9   : > { %18299 = vmatpush3.bf16.msra.mxu1 %v20305_v20  ;;  %18306 = vmatprep.subr.bf16.mxu0 %v20307_v24  ;;  %v20342_v20 = vld [vmem:[%s21865_s7 + $0xa00] sm:$0xff]   ;;  %v20344_v24 = vld [vmem:[%s21865_s7 + $0xa48] sm:$0xff]  }
 0x1aa   : > { %18328 = vmatprep.subr.bf16.mxu1 %v20308_v27  ;;  %v1350_v17 = vpack.c.bf16 %v557_v13, %v557_v13  ;;  %v558_v18 = vcombine.high %v556_v14, %v556_v14  ;;  %v1351_v21 = vpack.c.bf16 %v556_v14, %v556_v14  ;;  %v20347_v27 = vld [vmem:[%s21865_s7 + $0xa88] sm:$0xff]  }
 0x1ab   : > { %13426 = vmatmul.mubr.bf16.vlgmr.msra.gmra.mrb[32].mxu0 %v1345_v30  ;;  %v20350_v30 = vld [vmem:[%s21865_s7 + $0xa10] sm:$0xff]   ;;  %v20377_v14 = vld [vmem:[%s21865_s7 + $0xb48] sm:$0xff]  }
 0x1ac   : > { %13466 = vmatmul.mubr.bf16.vlgmr.msra.gmra.mrb[32].mxu1 %v1347_v31  ;;  %18307 = vmatpush3.bf16.msra.mxu0 %v20309_v28  ;;  %v20348_v28 = vld [vmem:[%s21865_s7 + $0xa50] sm:$0xff]  }
 0x1ad   : > { %18329 = vmatpush3.bf16.msra.mxu1 %v20310_v32  ;;  %18308 = vmatprep.subr.bf16.mxu0 %v20311_v33  ;;  %v20351_v31 = vld [vmem:[%s21865_s7 + $0xa90] sm:$0xff]   ;;  %v20352_v32 = vld [vmem:[%s21865_s7 + $0xa58] sm:$0xff]  }
 0x1ae   : > { %18330 = vmatprep.subr.bf16.mxu1 %v20312_v34  ;;  %13505 = vmatprep.mubr.bf16.mxu0 %v1350_v17  ;;  %v20353_v33 = vld [vmem:[%s21865_s7 + $0xad8] sm:$0xff]   ;;  %v20379_v17 = vld [vmem:[%s21865_s7 + $0xb08] sm:$0xff]  }
 0x1af   : > { %v20354_v34 = vld [vmem:[%s21865_s7 + $0xa18] sm:$0xff]  }
 0x1b0   : > { %18309 = vmatpush3.bf16.msra.mxu0 %v20313_v35  ;;  %v20355_v35 = vld [vmem:[%s21865_s7 + $0xa98] sm:$0xff]  }
 0x1b1   : > { %18331 = vmatpush3.bf16.msra.mxu1 %v20314_v36  ;;  %18310 = vmatprep.subr.bf16.mxu0 %v20315_v37  ;;  %v20356_v36 = vld [vmem:[%s21865_s7 + $0xa60] sm:$0xff]  }
 0x1b2   : > { %18332 = vmatprep.subr.bf16.mxu1 %v20316_v38  ;;  %v20357_v37 = vld [vmem:[%s21865_s7 + $0xae0] sm:$0xff]  }
 0x1b3   : > { %v20358_v38 = vld [vmem:[%s21865_s7 + $0xa20] sm:$0xff]  }
 0x1b4   : > { %18311 = vmatpush3.bf16.msra.mxu0 %v20317_v39  ;;  %v20359_v39 = vld [vmem:[%s21865_s7 + $0xaa0] sm:$0xff]  }
 0x1b5   : > { %18333 = vmatpush3.bf16.msra.mxu1 %v20318_v40  ;;  %18312 = vmatprep.subr.bf16.mxu0 %v20319_v41  ;;  %v20360_v40 = vld [vmem:[%s21865_s7 + $0xa68] sm:$0xff]  }
 0x1b6   : > { %18334 = vmatprep.subr.bf16.mxu1 %v20320_v43  ;;  %v20361_v41 = vld [vmem:[%s21865_s7 + $0xae8] sm:$0xff]  }
 0x1b7   : > { %v20362_v43 = vld [vmem:[%s21865_s7 + $0xa28] sm:$0xff]  }
 0x1b8   : > { %18313 = vmatpush3.bf16.msra.mxu0 %v20321_v44  ;;  %v20363_v44 = vld [vmem:[%s21865_s7 + $0xaa8] sm:$0xff]  }
 0x1b9   : > { %18335 = vmatpush3.bf16.msra.mxu1 %v20322_v45  ;;  %18314 = vmatprep.subr.bf16.mxu0 %v20323_v46  ;;  %v20364_v45 = vld [vmem:[%s21865_s7 + $0xa70] sm:$0xff]  }
 0x1ba   : > { %18336 = vmatprep.subr.bf16.mxu1 %v20324_v47 }
 0x1bc   : > { %18315 = vmatpush3.bf16.msra.mxu0 %v20325_v48  ;;  %v20365_v48 = vld [vmem:[%s21865_s7 + $0xaf0] sm:$0xff]  }
 0x1bd   : > { %18337 = vmatpush3.bf16.msra.mxu1 %v20326_v49  ;;  %18316 = vmatprep.subr.bf16.mxu0 %v20327_v50  ;;  %v20366_v49 = vld [vmem:[%s21865_s7 + $0xa30] sm:$0xff]  }
 0x1be   : > { %18338 = vmatprep.subr.bf16.mxu1 %v20328_v51  ;;  %v18014_v56 = vpop.f32.mrb[8].mxu0 }
 0x1bf   : > { %v18036_v57 = vpop.f32.mrb[8].mxu1  ;;  %v18015_v60 = vpop.f32.mrb[9].mxu0 }
 0x1c0   : > { %v18037_v61 = vpop.f32.mrb[9].mxu1  ;;  %v18016_v62 = vadd.f32 %v18015_v60, %v18014_v56  ;;  %v18017_v0 = vpop.f32.mrb[10].mxu0  ;;  %18317 = vmatpush3.bf16.msra.mxu0 %v20329_v52  ;;  %v20367_v52 = vld [vmem:[%s21865_s7 + $0xab0] sm:$0xff]  }
 0x1c1   : > { %v18038_v63 = vadd.f32 %v18037_v61, %v18036_v57  ;;  %v18039_v1 = vpop.f32.mrb[10].mxu1  ;;  %18339 = vmatpush3.bf16.msra.mxu1 %v20330_v53  ;;  %v18018_v4 = vpop.f32.mrb[11].mxu0  ;;  %18318 = vmatprep.subr.bf16.mxu0 %v20331_v54  ;;  %v20368_v57 = vld [vmem:[%s21865_s7 + $0xa78] sm:$0xff]  }
 0x1c2   : > { %v18040_v5 = vpop.f32.mrb[11].mxu1  ;;  %18340 = vmatprep.subr.bf16.mxu1 %v20332_v55  ;;  %v12948_v6 = vadd.f32 %v18016_v62, %v22207_v23  ;;  %v1352_v23 = vpack.c.bf16 %v558_v18, %v558_v18  ;;  %v20370_v62 = vld [vmem:[%s21865_s7 + $0xa38] sm:$0xff]   ;;  %v20373_v4 = vld [vmem:[%s21865_s7 + $0xb40] sm:$0xff]   ;;  %v20380_v18 = vld [vmem:[%s21865_s7 + $0xb88] sm:$0xff]  }
 0x1c3   : > { %v20371_v1 = vld [vmem:[%s21865_s7 + $0xab8] sm:$0xff]  }
 0x1c4   : > { %v22243_v11 = vadd.f32 %v18038_v63, %v12948_v6  ;;  %18319 = vmatpush3.bf16.msra.mxu0 %v20333_v58  ;;  %13545 = vmatprep.mubr.bf16.mxu1 %v1352_v23  ;;  %v20369_v58 = vld [vmem:[%s21865_s7 + $0xaf8] sm:$0xff]   ;;  %v311_v63 = vld [vmem:[%s21883_s27 + $0x50] sm:$0xff] }
 0x1c5   : > { %18341 = vmatpush3.bf16.msra.mxu1 %v20334_v59  ;;  %18320 = vmatprep.subr.bf16.mxu0 %v20335_v2  ;;  %v566_v2 = vrot.slane %v311_v63, %v21922_v42  ;;  %v20385_v23 = vld [vmem:[%s21865_s7 + $0xb58] sm:$0xff]  }
 0x1c6   : > { %18342 = vmatprep.subr.bf16.mxu1 %v20336_v3  ;;  %v559_v3 = vcombine.high %v311_v63, %v311_v63 }
 0x1c7   : > { %v574_v5 = vcombine.high %v566_v2, %v566_v2 }
 0x1c8   : > { %18321 = vmatpush3.bf16.msra.mxu0 %v20337_v8  ;;  %v573_v6 = vrot.slane %v559_v3, %v21922_v42  ;;  %v1353_v8 = vpack.c.bf16 %v566_v2, %v566_v2  ;;  %v20408_v2 = vld [vmem:[%s21865_s7 + $0xc00] sm:$0xff]  }
 0x1c9   : > { %18343 = vmatpush3.bf16.msra.mxu1 %v20338_v12  ;;  %18350 = vmatprep.subr.bf16.mxu0 %v20340_v15  ;;  %v1354_v10 = vpack.c.bf16 %v574_v5, %v574_v5  ;;  %v20376_v12 = vld [vmem:[%s21865_s7 + $0xb80] sm:$0xff]  }
 0x1ca   : > { %18372 = vmatprep.subr.bf16.mxu1 %v20341_v16  ;;  %v1355_v13 = vpack.c.bf16 %v573_v6, %v573_v6  ;;  %v20378_v16 = vld [vmem:[%s21865_s7 + $0xbc8] sm:$0xff]  }
 0x1cb   : > { %13506 = vmatmul.mubr.bf16.vlgmr.msra.gmra.mrb[36].mxu0 %v1349_v19  ;;  %v20381_v19 = vld [vmem:[%s21865_s7 + $0xb50] sm:$0xff]  }
 0x1cc   : > { %13546 = vmatmul.mubr.bf16.vlgmr.msra.gmra.mrb[36].mxu1 %v1351_v21  ;;  %18351 = vmatpush3.bf16.msra.mxu0 %v20342_v20  ;;  %v20382_v20 = vld [vmem:[%s21865_s7 + $0xbd0] sm:$0xff]  }
 0x1cd   : > { %18373 = vmatpush3.bf16.msra.mxu1 %v20343_v22  ;;  %18352 = vmatprep.subr.bf16.mxu0 %v20344_v24  ;;  %v20383_v21 = vld [vmem:[%s21865_s7 + $0xb10] sm:$0xff]   ;;  %v20386_v24 = vld [vmem:[%s21865_s7 + $0xbd8] sm:$0xff]  }
 0x1ce   : > { %18374 = vmatprep.subr.bf16.mxu1 %v20345_v25  ;;  %13585 = vmatprep.mubr.bf16.mxu0 %v1354_v10  ;;  %v20384_v22 = vld [vmem:[%s21865_s7 + $0xb90] sm:$0xff]   ;;  %v20387_v25 = vld [vmem:[%s21865_s7 + $0xb18] sm:$0xff]   ;;  %v20413_v10 = vld [vmem:[%s21865_s7 + $0xc88] sm:$0xff]  }
 0x1d0   : > { %18353 = vmatpush3.bf16.msra.mxu0 %v20346_v26  ;;  %v20388_v26 = vld [vmem:[%s21865_s7 + $0xb98] sm:$0xff]  }
 0x1d1   : > { %18375 = vmatpush3.bf16.msra.mxu1 %v20347_v27  ;;  %18354 = vmatprep.subr.bf16.mxu0 %v20348_v28  ;;  %v20389_v27 = vld [vmem:[%s21865_s7 + $0xb60] sm:$0xff]  }
 0x1d2   : > { %18376 = vmatprep.subr.bf16.mxu1 %v20349_v29  ;;  %v20390_v28 = vld [vmem:[%s21865_s7 + $0xbe0] sm:$0xff]  }
 0x1d3   : > { %v20391_v29 = vld [vmem:[%s21865_s7 + $0xb20] sm:$0xff]  }
 0x1d4   : > { %18355 = vmatpush3.bf16.msra.mxu0 %v20350_v30  ;;  %v20392_v30 = vld [vmem:[%s21865_s7 + $0xba0] sm:$0xff]  }
 0x1d5   : > { %18377 = vmatpush3.bf16.msra.mxu1 %v20351_v31  ;;  %18356 = vmatprep.subr.bf16.mxu0 %v20352_v32  ;;  %v20393_v31 = vld [vmem:[%s21865_s7 + $0xb68] sm:$0xff]  }
 0x1d6   : > { %18378 = vmatprep.subr.bf16.mxu1 %v20353_v33  ;;  %v20394_v32 = vld [vmem:[%s21865_s7 + $0xbe8] sm:$0xff]  }
 0x1d7   : > { %v20395_v33 = vld [vmem:[%s21865_s7 + $0xb28] sm:$0xff]  }
 0x1d8   : > { %18357 = vmatpush3.bf16.msra.mxu0 %v20354_v34  ;;  %v20396_v34 = vld [vmem:[%s21865_s7 + $0xba8] sm:$0xff]  }
 0x1d9   : > { %18379 = vmatpush3.bf16.msra.mxu1 %v20355_v35  ;;  %18358 = vmatprep.subr.bf16.mxu0 %v20356_v36  ;;  %v20397_v35 = vld [vmem:[%s21865_s7 + $0xb70] sm:$0xff]  }
 0x1da   : > { %18380 = vmatprep.subr.bf16.mxu1 %v20357_v37 }
 0x1dc   : > { %18359 = vmatpush3.bf16.msra.mxu0 %v20358_v38  ;;  %v20398_v38 = vld [vmem:[%s21865_s7 + $0xbf0] sm:$0xff]  }
 0x1dd   : > { %18381 = vmatpush3.bf16.msra.mxu1 %v20359_v39  ;;  %18360 = vmatprep.subr.bf16.mxu0 %v20360_v40  ;;  %v20399_v39 = vld [vmem:[%s21865_s7 + $0xb30] sm:$0xff]  }
 0x1de   : > { %v18058_v46 = vpop.f32.mrb[12].mxu0  ;;  %18382 = vmatprep.subr.bf16.mxu1 %v20361_v41 }
 0x1df   : > { %v18080_v47 = vpop.f32.mrb[12].mxu1  ;;  %v18059_v50 = vpop.f32.mrb[13].mxu0 }
 0x1e0   : > { %v18081_v51 = vpop.f32.mrb[13].mxu1  ;;  %v18060_v53 = vadd.f32 %v18059_v50, %v18058_v46  ;;  %v18061_v55 = vpop.f32.mrb[14].mxu0  ;;  %18361 = vmatpush3.bf16.msra.mxu0 %v20362_v43 }
 0x1e1   : > { %v18082_v54 = vadd.f32 %v18081_v51, %v18080_v47  ;;  %v18083_v56 = vpop.f32.mrb[14].mxu1  ;;  %18383 = vmatpush3.bf16.msra.mxu1 %v20363_v44  ;;  %v18062_v59 = vpop.f32.mrb[15].mxu0  ;;  %18362 = vmatprep.subr.bf16.mxu0 %v20364_v45  ;;  %v20400_v47 = vld [vmem:[%s21865_s7 + $0xbb0] sm:$0xff]  }
 0x1e2   : > { %v18084_v60 = vpop.f32.mrb[15].mxu1  ;;  %v13028_v61 = vadd.f32 %v18060_v53, %v22243_v11  ;;  %18384 = vmatprep.subr.bf16.mxu1 %v20365_v48  ;;  %v575_v11 = vcombine.high %v573_v6, %v573_v6  ;;  %v20401_v48 = vld [vmem:[%s21865_s7 + $0xb78] sm:$0xff]   ;;  %v20409_v6 = vld [vmem:[%s21865_s7 + $0xc80] sm:$0xff]  }
 0x1e3   : > { %v20403_v53 = vld [vmem:[%s21865_s7 + $0xb38] sm:$0xff]  }
 0x1e4   : > { %v22280_v0 = vadd.f32 %v18082_v54, %v13028_v61  ;;  %18363 = vmatpush3.bf16.msra.mxu0 %v20366_v49  ;;  %v1356_v15 = vpack.c.bf16 %v575_v11, %v575_v11  ;;  %v312_v55 = vld [vmem:[%s21883_s27 + $0x58] sm:$0xff] }
 0x1e5   : > { %18385 = vmatpush3.bf16.msra.mxu1 %v20367_v52  ;;  %18364 = vmatprep.subr.bf16.mxu0 %v20368_v57  ;;  %v20402_v52 = vld [vmem:[%s21865_s7 + $0xbf8] sm:$0xff]   ;;  %v583_v56 = vrot.slane %v312_v55, %v21922_v42  ;;  %v576_v57 = vcombine.high %v312_v55, %v312_v55  ;;  %v20415_v11 = vld [vmem:[%s21865_s7 + $0xcd0] sm:$0xff]   ;;  %v20441_v55 = vld [vmem:[%s21865_s7 + $0xd00] sm:$0xff]  }
 0x1e6   : > { %18386 = vmatprep.subr.bf16.mxu1 %v20369_v58  ;;  %13625 = vmatprep.mubr.bf16.mxu1 %v1356_v15  ;;  %v20406_v58 = vld [vmem:[%s21865_s7 + $0xc40] sm:$0xff]   ;;  %v20404_v59 = vld [vmem:[%s21865_s7 + $0xbb8] sm:$0xff]  }
 0x1e7   : > { %v591_v60 = vcombine.high %v583_v56, %v583_v56  ;;  %v590_v61 = vrot.slane %v576_v57, %v21922_v42  ;;  %v1357_v63 = vpack.c.bf16 %v583_v56, %v583_v56  ;;  %v20419_v15 = vld [vmem:[%s21865_s7 + $0xcd8] sm:$0xff]  }
 0x1e8   : > { %18365 = vmatpush3.bf16.msra.mxu0 %v20370_v62  ;;  %v20407_v62 = vld [vmem:[%s21865_s7 + $0xcc0] sm:$0xff]  }
 0x1e9   : > { %18387 = vmatpush3.bf16.msra.mxu1 %v20371_v1  ;;  %18394 = vmatprep.subr.bf16.mxu0 %v20373_v4  ;;  %v592_v1 = vcombine.high %v590_v61, %v590_v61  ;;  %v1359_v3 = vpack.c.bf16 %v590_v61, %v590_v61  ;;  %v20410_v4 = vld [vmem:[%s21865_s7 + $0xc48] sm:$0xff]  }
 0x1ea   : > { %18416 = vmatprep.subr.bf16.mxu1 %v20374_v7  ;;  %v20411_v7 = vld [vmem:[%s21865_s7 + $0xcc8] sm:$0xff]  }
 0x1eb   : > { %13586 = vmatmul.mubr.bf16.vlgmr.msra.gmra.mrb[40].mxu0 %v1353_v8  ;;  %v1360_v5 = vpack.c.bf16 %v592_v1, %v592_v1  ;;  %v20412_v8 = vld [vmem:[%s21865_s7 + $0xc08] sm:$0xff]   ;;  %v20447_v1 = vld [vmem:[%s21865_s7 + $0xd50] sm:$0xff]  }
 0x1ec   : > { %18395 = vmatpush3.bf16.msra.mxu0 %v20375_v9  ;;  %13626 = vmatmul.mubr.bf16.vlgmr.msra.gmra.mrb[40].mxu1 %v1355_v13  ;;  %v20414_v9 = vld [vmem:[%s21865_s7 + $0xc50] sm:$0xff]   ;;  %v20418_v13 = vld [vmem:[%s21865_s7 + $0xc58] sm:$0xff]  }
 0x1ed   : > { %18396 = vmatprep.subr.bf16.mxu0 %v20377_v14  ;;  %18417 = vmatpush3.bf16.msra.mxu1 %v20376_v12  ;;  %v20416_v12 = vld [vmem:[%s21865_s7 + $0xc10] sm:$0xff]  }
 0x1ee   : > { %18418 = vmatprep.subr.bf16.mxu1 %v20378_v16  ;;  %13705 = vmatprep.mubr.bf16.mxu1 %v1360_v5  ;;  %v20417_v14 = vld [vmem:[%s21865_s7 + $0xc90] sm:$0xff]   ;;  %v20420_v16 = vld [vmem:[%s21865_s7 + $0xc18] sm:$0xff]  }
 0x1ef   : > { %v20451_v5 = vld [vmem:[%s21865_s7 + $0xd58] sm:$0xff]  }
 0x1f0   : > { %18397 = vmatpush3.bf16.msra.mxu0 %v20379_v17  ;;  %v20422_v17 = vld [vmem:[%s21865_s7 + $0xc60] sm:$0xff]  }
 0x1f1   : > { %18398 = vmatprep.subr.bf16.mxu0 %v20381_v19  ;;  %18419 = vmatpush3.bf16.msra.mxu1 %v20380_v18  ;;  %v20421_v18 = vld [vmem:[%s21865_s7 + $0xc98] sm:$0xff]   ;;  %v20423_v19 = vld [vmem:[%s21865_s7 + $0xce0] sm:$0xff]  }
 0x1f2   : > { %18420 = vmatprep.subr.bf16.mxu1 %v20382_v20  ;;  %v20424_v20 = vld [vmem:[%s21865_s7 + $0xc20] sm:$0xff]  }
 0x1f4   : > { %18399 = vmatpush3.bf16.msra.mxu0 %v20383_v21  ;;  %v20426_v21 = vld [vmem:[%s21865_s7 + $0xc68] sm:$0xff]  }
 0x1f5   : > { %18400 = vmatprep.subr.bf16.mxu0 %v20385_v23  ;;  %18421 = vmatpush3.bf16.msra.mxu1 %v20384_v22  ;;  %v20425_v22 = vld [vmem:[%s21865_s7 + $0xca0] sm:$0xff]   ;;  %v20427_v23 = vld [vmem:[%s21865_s7 + $0xce8] sm:$0xff]  }
 0x1f6   : > { %18422 = vmatprep.subr.bf16.mxu1 %v20386_v24  ;;  %v20428_v24 = vld [vmem:[%s21865_s7 + $0xc28] sm:$0xff]  }
 0x1f8   : > { %18401 = vmatpush3.bf16.msra.mxu0 %v20387_v25 }
 0x1f9   : > { %18402 = vmatprep.subr.bf16.mxu0 %v20389_v27  ;;  %18423 = vmatpush3.bf16.msra.mxu1 %v20388_v26  ;;  %v20429_v27 = vld [vmem:[%s21865_s7 + $0xca8] sm:$0xff]  }
 0x1fa   : > { %18424 = vmatprep.subr.bf16.mxu1 %v20390_v28  ;;  %v20430_v28 = vld [vmem:[%s21865_s7 + $0xc70] sm:$0xff]  }
 0x1fc   : > { %18403 = vmatpush3.bf16.msra.mxu0 %v20391_v29 }
 0x1fd   : > { %18404 = vmatprep.subr.bf16.mxu0 %v20393_v31  ;;  %18425 = vmatpush3.bf16.msra.mxu1 %v20392_v30 }
 0x1fe   : > { %v18102_v36 = vpop.f32.mrb[16].mxu0  ;;  %18426 = vmatprep.subr.bf16.mxu1 %v20394_v32 }
 0x1ff   : > { %v18124_v37 = vpop.f32.mrb[16].mxu1  ;;  %v18103_v40 = vpop.f32.mrb[17].mxu0 }
 0x200   : > { %v18125_v41 = vpop.f32.mrb[17].mxu1  ;;  %v18104_v43 = vadd.f32 %v18103_v40, %v18102_v36  ;;  %v18105_v45 = vpop.f32.mrb[18].mxu0  ;;  %18405 = vmatpush3.bf16.msra.mxu0 %v20395_v33  ;;  %v20432_v36 = vld [vmem:[%s21865_s7 + $0xc30] sm:$0xff]  }
 0x201   : > { %v18126_v44 = vadd.f32 %v18125_v41, %v18124_v37  ;;  %v18127_v46 = vpop.f32.mrb[18].mxu1  ;;  %v18106_v49 = vpop.f32.mrb[19].mxu0  ;;  %18406 = vmatprep.subr.bf16.mxu0 %v20397_v35  ;;  %18427 = vmatpush3.bf16.msra.mxu1 %v20396_v34  ;;  %v20431_v35 = vld [vmem:[%s21865_s7 + $0xcf0] sm:$0xff]   ;;  %v20434_v41 = vld [vmem:[%s21865_s7 + $0xc78] sm:$0xff]  }
 0x202   : > { %v18128_v50 = vpop.f32.mrb[19].mxu1  ;;  %v13108_v51 = vadd.f32 %v18104_v43, %v22280_v0  ;;  %18428 = vmatprep.subr.bf16.mxu1 %v20398_v38  ;;  %v1358_v0 = vpack.c.bf16 %v591_v60, %v591_v60  ;;  %v20435_v43 = vld [vmem:[%s21865_s7 + $0xcf8] sm:$0xff]   ;;  %v20439_v49 = vld [vmem:[%s21865_s7 + $0xd40] sm:$0xff]   ;;  %v20443_v60 = vld [vmem:[%s21865_s7 + $0xd48] sm:$0xff]  }
 0x203   : > { %v20436_v45 = vld [vmem:[%s21865_s7 + $0xc38] sm:$0xff]  }
 0x204   : > { %v22317_v54 = vadd.f32 %v18126_v44, %v13108_v51  ;;  %18407 = vmatpush3.bf16.msra.mxu0 %v20399_v39  ;;  %13665 = vmatprep.mubr.bf16.mxu0 %v1358_v0  ;;  %v20433_v39 = vld [vmem:[%s21865_s7 + $0xcb0] sm:$0xff]   ;;  %v313_v46 = vld [vmem:[%s21883_s27 + $0x60] sm:$0xff]  ;;  %v20446_v0 = vld [vmem:[%s21865_s7 + $0xd88] sm:$0xff]  }
 0x205   : > { %18408 = vmatprep.subr.bf16.mxu0 %v20401_v48  ;;  %18429 = vmatpush3.bf16.msra.mxu1 %v20400_v47  ;;  %v600_v47 = vrot.slane %v313_v46, %v21922_v42  ;;  %v593_v48 = vcombine.high %v313_v46, %v313_v46  ;;  %v20437_v50 = vld [vmem:[%s21865_s7 + $0xcb8] sm:$0xff]  }
 0x206   : > { %18430 = vmatprep.subr.bf16.mxu1 %v20402_v52 }
 0x207   : > { %v608_v51 = vcombine.high %v600_v47, %v600_v47  ;;  %v607_v52 = vrot.slane %v593_v48, %v21922_v42  ;;  %v20474_v48 = vld [vmem:[%s21865_s7 + $0xe00] sm:$0xff]  }
 0x208   : > { %18409 = vmatpush3.bf16.msra.mxu0 %v20403_v53  ;;  %v20440_v53 = vld [vmem:[%s21865_s7 + $0xdc0] sm:$0xff]  }
 0x209   : > { %18438 = vmatprep.subr.bf16.mxu0 %v20406_v58  ;;  %18431 = vmatpush3.bf16.msra.mxu1 %v20404_v59  ;;  %v1362_v56 = vpack.c.bf16 %v608_v51, %v608_v51  ;;  %v609_v57 = vcombine.high %v607_v52, %v607_v52  ;;  %v20442_v58 = vld [vmem:[%s21865_s7 + $0xd80] sm:$0xff]   ;;  %v1363_v59 = vpack.c.bf16 %v607_v52, %v607_v52 }
 0x20a   : > { %18460 = vmatprep.subr.bf16.mxu1 %v20407_v62  ;;  %v20444_v62 = vld [vmem:[%s21865_s7 + $0xdc8] sm:$0xff]   ;;  %v20475_v52 = vld [vmem:[%s21865_s7 + $0xe80] sm:$0xff]  }
 0x20b   : > { %13666 = vmatmul.mubr.bf16.vlgmr.msra.gmra.mrb[44].mxu0 %v1357_v63  ;;  %v1364_v61 = vpack.c.bf16 %v609_v57, %v609_v57  ;;  %v20445_v63 = vld [vmem:[%s21865_s7 + $0xd08] sm:$0xff]   ;;  %v20481_v57 = vld [vmem:[%s21865_s7 + $0xed0] sm:$0xff]  }
 0x20c   : > { %18439 = vmatpush3.bf16.msra.mxu0 %v20408_v2  ;;  %13706 = vmatmul.mubr.bf16.vlgmr.msra.gmra.mrb[44].mxu1 %v1359_v3  ;;  %v20448_v2 = vld [vmem:[%s21865_s7 + $0xdd0] sm:$0xff]  }
 0x20d   : > { %18440 = vmatprep.subr.bf16.mxu0 %v20410_v4  ;;  %18461 = vmatpush3.bf16.msra.mxu1 %v20409_v6  ;;  %v20449_v3 = vld [vmem:[%s21865_s7 + $0xd10] sm:$0xff]   ;;  %v20452_v6 = vld [vmem:[%s21865_s7 + $0xdd8] sm:$0xff]  }
 0x20e   : > { %18462 = vmatprep.subr.bf16.mxu1 %v20411_v7  ;;  %13745 = vmatprep.mubr.bf16.mxu0 %v1362_v56  ;;  %v20450_v4 = vld [vmem:[%s21865_s7 + $0xd90] sm:$0xff]   ;;  %v20453_v7 = vld [vmem:[%s21865_s7 + $0xd18] sm:$0xff]   ;;  %v20479_v56 = vld [vmem:[%s21865_s7 + $0xe88] sm:$0xff]  }
 0x20f   : > { %13785 = vmatprep.mubr.bf16.mxu1 %v1364_v61  ;;  %v20485_v61 = vld [vmem:[%s21865_s7 + $0xed8] sm:$0xff]  }
 0x210   : > { %18441 = vmatpush3.bf16.msra.mxu0 %v20412_v8  ;;  %v20454_v8 = vld [vmem:[%s21865_s7 + $0xd98] sm:$0xff]  }
 0x211   : > { %18442 = vmatprep.subr.bf16.mxu0 %v20414_v9  ;;  %18463 = vmatpush3.bf16.msra.mxu1 %v20413_v10  ;;  %v20455_v9 = vld [vmem:[%s21865_s7 + $0xd60] sm:$0xff]  }
 0x212   : > { %18464 = vmatprep.subr.bf16.mxu1 %v20415_v11  ;;  %v20456_v10 = vld [vmem:[%s21865_s7 + $0xde0] sm:$0xff]  }
 0x213   : > { %v20457_v11 = vld [vmem:[%s21865_s7 + $0xd20] sm:$0xff]  }
 0x214   : > { %18443 = vmatpush3.bf16.msra.mxu0 %v20416_v12  ;;  %v20458_v12 = vld [vmem:[%s21865_s7 + $0xda0] sm:$0xff]  }
 0x215   : > { %18444 = vmatprep.subr.bf16.mxu0 %v20418_v13  ;;  %18465 = vmatpush3.bf16.msra.mxu1 %v20417_v14  ;;  %v20459_v13 = vld [vmem:[%s21865_s7 + $0xd68] sm:$0xff]  }
 0x216   : > { %18466 = vmatprep.subr.bf16.mxu1 %v20419_v15  ;;  %v20460_v14 = vld [vmem:[%s21865_s7 + $0xde8] sm:$0xff]  }
 0x217   : > { %v20461_v15 = vld [vmem:[%s21865_s7 + $0xd28] sm:$0xff]  }
 0x218   : > { %18445 = vmatpush3.bf16.msra.mxu0 %v20420_v16 }
 0x219   : > { %18446 = vmatprep.subr.bf16.mxu0 %v20422_v17  ;;  %18467 = vmatpush3.bf16.msra.mxu1 %v20421_v18  ;;  %v20462_v18 = vld [vmem:[%s21865_s7 + $0xda8] sm:$0xff]  }
 0x21a   : > { %18468 = vmatprep.subr.bf16.mxu1 %v20423_v19  ;;  %v20463_v19 = vld [vmem:[%s21865_s7 + $0xd70] sm:$0xff]  }
 0x21c   : > { %18447 = vmatpush3.bf16.msra.mxu0 %v20424_v20 }
 0x21d   : > { %18448 = vmatprep.subr.bf16.mxu0 %v20426_v21  ;;  %18469 = vmatpush3.bf16.msra.mxu1 %v20425_v22 }
 0x21e   : > { %v18146_v25 = vpop.f32.mrb[20].mxu0  ;;  %18470 = vmatprep.subr.bf16.mxu1 %v20427_v23 }
 0x21f   : > { %v18168_v26 = vpop.f32.mrb[20].mxu1  ;;  %v18147_v29 = vpop.f32.mrb[21].mxu0 }
 0x220   : > { %v18169_v30 = vpop.f32.mrb[21].mxu1  ;;  %v18148_v31 = vadd.f32 %v18147_v29, %v18146_v25  ;;  %v18149_v33 = vpop.f32.mrb[22].mxu0  ;;  %18449 = vmatpush3.bf16.msra.mxu0 %v20428_v24 }
 0x221   : > { %v18170_v32 = vadd.f32 %v18169_v30, %v18168_v26  ;;  %v18171_v34 = vpop.f32.mrb[22].mxu1  ;;  %v18150_v37 = vpop.f32.mrb[23].mxu0  ;;  %18450 = vmatprep.subr.bf16.mxu0 %v20430_v28  ;;  %18471 = vmatpush3.bf16.msra.mxu1 %v20429_v27  ;;  %v20464_v26 = vld [vmem:[%s21865_s7 + $0xdf0] sm:$0xff]  }
 0x222   : > { %v18172_v38 = vpop.f32.mrb[23].mxu1  ;;  %v13188_v40 = vadd.f32 %v18148_v31, %v22317_v54  ;;  %18472 = vmatprep.subr.bf16.mxu1 %v20431_v35  ;;  %v1361_v54 = vpack.c.bf16 %v600_v47, %v600_v47  ;;  %v20465_v27 = vld [vmem:[%s21865_s7 + $0xd30] sm:$0xff]   ;;  %v20468_v34 = vld [vmem:[%s21865_s7 + $0xdf8] sm:$0xff]  }
 0x223   : > { %v20466_v31 = vld [vmem:[%s21865_s7 + $0xdb0] sm:$0xff]   ;;  %v20469_v35 = vld [vmem:[%s21865_s7 + $0xd38] sm:$0xff]  }
 0x224   : > { %v22354_v44 = vadd.f32 %v18170_v32, %v13188_v40  ;;  %18451 = vmatpush3.bf16.msra.mxu0 %v20432_v36  ;;  %v20467_v32 = vld [vmem:[%s21865_s7 + $0xd78] sm:$0xff]   ;;  %v314_v36 = vld [vmem:[%s21883_s27 + $0x68] sm:$0xff] }
 0x225   : > { %18452 = vmatprep.subr.bf16.mxu0 %v20434_v41  ;;  %18473 = vmatpush3.bf16.msra.mxu1 %v20433_v39  ;;  %v617_v37 = vrot.slane %v314_v36, %v21922_v42  ;;  %v610_v38 = vcombine.high %v314_v36, %v314_v36  ;;  %v20472_v39 = vld [vmem:[%s21865_s7 + $0xe40] sm:$0xff]   ;;  %v20470_v40 = vld [vmem:[%s21865_s7 + $0xdb8] sm:$0xff]  }
 0x226   : > { %18474 = vmatprep.subr.bf16.mxu1 %v20435_v43  ;;  %v20507_v36 = vld [vmem:[%s21865_s7 + $0xf00] sm:$0xff]  }
 0x227   : > { %v625_v41 = vcombine.high %v617_v37, %v617_v37  ;;  %v624_v43 = vrot.slane %v610_v38, %v21922_v42 }
 0x228   : > { %18453 = vmatpush3.bf16.msra.mxu0 %v20436_v45  ;;  %v1365_v45 = vpack.c.bf16 %v617_v37, %v617_v37 }
 0x229   : > { %18482 = vmatprep.subr.bf16.mxu0 %v20439_v49  ;;  %18475 = vmatpush3.bf16.msra.mxu1 %v20437_v50  ;;  %v1366_v46 = vpack.c.bf16 %v625_v41, %v625_v41  ;;  %v626_v47 = vcombine.high %v624_v43, %v624_v43  ;;  %v1367_v49 = vpack.c.bf16 %v624_v43, %v624_v43  ;;  %v20476_v50 = vld [vmem:[%s21865_s7 + $0xe48] sm:$0xff]  }
 0x22a   : > { %18504 = vmatprep.subr.bf16.mxu1 %v20440_v53  ;;  %v20477_v53 = vld [vmem:[%s21865_s7 + $0xec8] sm:$0xff]  }
 0x22b   : > { %13746 = vmatmul.mubr.bf16.vlgmr.msra.gmra.mrb[48].mxu0 %v1361_v54  ;;  %v1368_v51 = vpack.c.bf16 %v626_v47, %v626_v47  ;;  %v20478_v54 = vld [vmem:[%s21865_s7 + $0xe08] sm:$0xff]   ;;  %v20513_v47 = vld [vmem:[%s21865_s7 + $0xf50] sm:$0xff]  }
 0x22c   : > { %18483 = vmatpush3.bf16.msra.mxu0 %v20441_v55  ;;  %13786 = vmatmul.mubr.bf16.vlgmr.msra.gmra.mrb[48].mxu1 %v1363_v59  ;;  %v20480_v55 = vld [vmem:[%s21865_s7 + $0xe50] sm:$0xff]   ;;  %v20484_v59 = vld [vmem:[%s21865_s7 + $0xe58] sm:$0xff]   ;;  %v20509_v41 = vld [vmem:[%s21865_s7 + $0xf48] sm:$0xff]  }
 0x22d   : > { %18484 = vmatprep.subr.bf16.mxu0 %v20443_v60  ;;  %18505 = vmatpush3.bf16.msra.mxu1 %v20442_v58  ;;  %v20482_v58 = vld [vmem:[%s21865_s7 + $0xe10] sm:$0xff]  }
 0x22e   : > { %18506 = vmatprep.subr.bf16.mxu1 %v20444_v62  ;;  %13825 = vmatprep.mubr.bf16.mxu0 %v1366_v46  ;;  %v20483_v60 = vld [vmem:[%s21865_s7 + $0xe90] sm:$0xff]   ;;  %v20486_v62 = vld [vmem:[%s21865_s7 + $0xe18] sm:$0xff]   ;;  %v20512_v46 = vld [vmem:[%s21865_s7 + $0xf88] sm:$0xff]  }
 0x22f   : > { %13865 = vmatprep.mubr.bf16.mxu1 %v1368_v51  ;;  %v20517_v51 = vld [vmem:[%s21865_s7 + $0xf58] sm:$0xff]  }
 0x230   : > { %18485 = vmatpush3.bf16.msra.mxu0 %v20445_v63  ;;  %v20488_v63 = vld [vmem:[%s21865_s7 + $0xe60] sm:$0xff]  }
 0x231   : > { %18486 = vmatprep.subr.bf16.mxu0 %v20447_v1  ;;  %18507 = vmatpush3.bf16.msra.mxu1 %v20446_v0  ;;  %v20487_v0 = vld [vmem:[%s21865_s7 + $0xe98] sm:$0xff]   ;;  %v20489_v1 = vld [vmem:[%s21865_s7 + $0xee0] sm:$0xff]  }
 0x232   : > { %18508 = vmatprep.subr.bf16.mxu1 %v20448_v2  ;;  %v20490_v2 = vld [vmem:[%s21865_s7 + $0xe20] sm:$0xff]  }
 0x234   : > { %18487 = vmatpush3.bf16.msra.mxu0 %v20449_v3  ;;  %v20492_v3 = vld [vmem:[%s21865_s7 + $0xe68] sm:$0xff]  }
 0x235   : > { %18488 = vmatprep.subr.bf16.mxu0 %v20451_v5  ;;  %18509 = vmatpush3.bf16.msra.mxu1 %v20450_v4  ;;  %v20491_v4 = vld [vmem:[%s21865_s7 + $0xea0] sm:$0xff]  }
 0x236   : > { %18510 = vmatprep.subr.bf16.mxu1 %v20452_v6 }
 0x238   : > { %18489 = vmatpush3.bf16.msra.mxu0 %v20453_v7  ;;  %v20493_v7 = vld [vmem:[%s21865_s7 + $0xee8] sm:$0xff]  }
 0x239   : > { %18490 = vmatprep.subr.bf16.mxu0 %v20455_v9  ;;  %18511 = vmatpush3.bf16.msra.mxu1 %v20454_v8  ;;  %v20494_v8 = vld [vmem:[%s21865_s7 + $0xe28] sm:$0xff]  }
 0x23a   : > { %18512 = vmatprep.subr.bf16.mxu1 %v20456_v10 }
 0x23c   : > { %18491 = vmatpush3.bf16.msra.mxu0 %v20457_v11  ;;  %v20495_v11 = vld [vmem:[%s21865_s7 + $0xea8] sm:$0xff]  }
 0x23d   : > { %18492 = vmatprep.subr.bf16.mxu0 %v20459_v13  ;;  %18513 = vmatpush3.bf16.msra.mxu1 %v20458_v12 }
 0x23e   : > { %v18190_v16 = vpop.f32.mrb[24].mxu0  ;;  %18514 = vmatprep.subr.bf16.mxu1 %v20460_v14 }
 0x23f   : > { %v18212_v17 = vpop.f32.mrb[24].mxu1  ;;  %v18191_v20 = vpop.f32.mrb[25].mxu0 }
 0x240   : > { %v18213_v21 = vpop.f32.mrb[25].mxu1  ;;  %v18192_v22 = vadd.f32 %v18191_v20, %v18190_v16  ;;  %v18193_v24 = vpop.f32.mrb[26].mxu0  ;;  %18493 = vmatpush3.bf16.msra.mxu0 %v20461_v15  ;;  %v20496_v16 = vld [vmem:[%s21865_s7 + $0xe70] sm:$0xff]  }
 0x241   : > { %v18214_v23 = vadd.f32 %v18213_v21, %v18212_v17  ;;  %v18215_v25 = vpop.f32.mrb[26].mxu1  ;;  %v18194_v28 = vpop.f32.mrb[27].mxu0  ;;  %18494 = vmatprep.subr.bf16.mxu0 %v20463_v19  ;;  %18515 = vmatpush3.bf16.msra.mxu1 %v20462_v18  ;;  %v20497_v17 = vld [vmem:[%s21865_s7 + $0xef0] sm:$0xff]   ;;  %v20500_v24 = vld [vmem:[%s21865_s7 + $0xe78] sm:$0xff]  }
 0x242   : > { %v18216_v29 = vpop.f32.mrb[27].mxu1  ;;  %v13268_v30 = vadd.f32 %v18192_v22, %v22354_v44  ;;  %18516 = vmatprep.subr.bf16.mxu1 %v20464_v26  ;;  %v20473_v44 = vld [vmem:[%s21865_s7 + $0xec0] sm:$0xff]   ;;  %v20498_v21 = vld [vmem:[%s21865_s7 + $0xe30] sm:$0xff]   ;;  %v20501_v25 = vld [vmem:[%s21865_s7 + $0xef8] sm:$0xff]  }
 0x243   : > { %v20499_v22 = vld [vmem:[%s21865_s7 + $0xeb0] sm:$0xff]   ;;  %v20502_v26 = vld [vmem:[%s21865_s7 + $0xe38] sm:$0xff]  }
 0x244   : > { %v22391_v33 = vadd.f32 %v18214_v23, %v13268_v30  ;;  %18495 = vmatpush3.bf16.msra.mxu0 %v20465_v27  ;;  %v315_v27 = vld [vmem:[%s21883_s27 + $0x70] sm:$0xff]  ;;  %v20505_v30 = vld [vmem:[%s21865_s7 + $0xf40] sm:$0xff]  }
 0x245   : > { %18496 = vmatprep.subr.bf16.mxu0 %v20467_v32  ;;  %18517 = vmatpush3.bf16.msra.mxu1 %v20466_v31  ;;  %v634_v28 = vrot.slane %v315_v27, %v21922_v42  ;;  %v627_v29 = vcombine.high %v315_v27, %v315_v27  ;;  %v20503_v31 = vld [vmem:[%s21865_s7 + $0xeb8] sm:$0xff]   ;;  %v20540_v27 = vld [vmem:[%s21865_s7 + $0x1000] sm:$0xff]  }
 0x246   : > { %18518 = vmatprep.subr.bf16.mxu1 %v20468_v34  ;;  %v20506_v34 = vld [vmem:[%s21865_s7 + $0xfc0] sm:$0xff]  }
 0x247   : > { %v642_v32 = vcombine.high %v634_v28, %v634_v28 }
 0x248   : > { %18497 = vmatpush3.bf16.msra.mxu0 %v20469_v35  ;;  %v1369_v35 = vpack.c.bf16 %v634_v28, %v634_v28 }
 0x249   : > { %18526 = vmatprep.subr.bf16.mxu0 %v20472_v39  ;;  %18519 = vmatpush3.bf16.msra.mxu1 %v20470_v40  ;;  %v1370_v37 = vpack.c.bf16 %v642_v32, %v642_v32  ;;  %v20508_v39 = vld [vmem:[%s21865_s7 + $0xf80] sm:$0xff]   ;;  %v20542_v32 = vld [vmem:[%s21865_s7 + $0x1048] sm:$0xff]  }
 0x24a   : > { %18548 = vmatprep.subr.bf16.mxu1 %v20473_v44  ;;  %v20510_v44 = vld [vmem:[%s21865_s7 + $0xfc8] sm:$0xff]  }
 0x24b   : > { %13826 = vmatmul.mubr.bf16.vlgmr.msra.gmra.mrb[52].mxu0 %v1365_v45  ;;  %v20511_v45 = vld [vmem:[%s21865_s7 + $0xf08] sm:$0xff]  }
 0x24c   : > { %18527 = vmatpush3.bf16.msra.mxu0 %v20474_v48  ;;  %13866 = vmatmul.mubr.bf16.vlgmr.msra.gmra.mrb[52].mxu1 %v1367_v49  ;;  %v20514_v48 = vld [vmem:[%s21865_s7 + $0xfd0] sm:$0xff]  }
 0x24d   : > { %18528 = vmatprep.subr.bf16.mxu0 %v20476_v50  ;;  %18549 = vmatpush3.bf16.msra.mxu1 %v20475_v52  ;;  %v20515_v49 = vld [vmem:[%s21865_s7 + $0xf10] sm:$0xff]   ;;  %v20518_v52 = vld [vmem:[%s21865_s7 + $0xfd8] sm:$0xff]  }
 0x24e   : > { %18550 = vmatprep.subr.bf16.mxu1 %v20477_v53  ;;  %13905 = vmatprep.mubr.bf16.mxu0 %v1370_v37  ;;  %v20516_v50 = vld [vmem:[%s21865_s7 + $0xf90] sm:$0xff]   ;;  %v20519_v53 = vld [vmem:[%s21865_s7 + $0xf18] sm:$0xff]  }
 0x24f   : > { %v20546_v37 = vld [vmem:[%s21865_s7 + $0x1050] sm:$0xff]  }
 0x250   : > { %18529 = vmatpush3.bf16.msra.mxu0 %v20478_v54  ;;  %v20520_v54 = vld [vmem:[%s21865_s7 + $0xf98] sm:$0xff]  }
 0x251   : > { %18530 = vmatprep.subr.bf16.mxu0 %v20480_v55  ;;  %18551 = vmatpush3.bf16.msra.mxu1 %v20479_v56  ;;  %v20521_v55 = vld [vmem:[%s21865_s7 + $0xf60] sm:$0xff]  }
 0x252   : > { %18552 = vmatprep.subr.bf16.mxu1 %v20481_v57  ;;  %v20522_v56 = vld [vmem:[%s21865_s7 + $0xfe0] sm:$0xff]  }
 0x253   : > { %v20523_v57 = vld [vmem:[%s21865_s7 + $0xf20] sm:$0xff]  }
 0x254   : > { %18531 = vmatpush3.bf16.msra.mxu0 %v20482_v58  ;;  %v20524_v58 = vld [vmem:[%s21865_s7 + $0xfa0] sm:$0xff]  }
 0x255   : > { %18532 = vmatprep.subr.bf16.mxu0 %v20484_v59  ;;  %18553 = vmatpush3.bf16.msra.mxu1 %v20483_v60  ;;  %v20525_v59 = vld [vmem:[%s21865_s7 + $0xf68] sm:$0xff]  }
 0x256   : > { %18554 = vmatprep.subr.bf16.mxu1 %v20485_v61 }
 0x258   : > { %18533 = vmatpush3.bf16.msra.mxu0 %v20486_v62  ;;  %v20526_v62 = vld [vmem:[%s21865_s7 + $0xfe8] sm:$0xff]  }
 0x259   : > { %18534 = vmatprep.subr.bf16.mxu0 %v20488_v63  ;;  %18555 = vmatpush3.bf16.msra.mxu1 %v20487_v0  ;;  %v20527_v63 = vld [vmem:[%s21865_s7 + $0xf28] sm:$0xff]  }
 0x25a   : > { %18556 = vmatprep.subr.bf16.mxu1 %v20489_v1 }
 0x25c   : > { %18535 = vmatpush3.bf16.msra.mxu0 %v20490_v2 }
 0x25d   : > { %18536 = vmatprep.subr.bf16.mxu0 %v20492_v3  ;;  %18557 = vmatpush3.bf16.msra.mxu1 %v20491_v4 }
 0x25e   : > { %v18234_v5 = vpop.f32.mrb[28].mxu0  ;;  %18558 = vmatprep.subr.bf16.mxu1 %v20493_v7  ;;  %v20529_v7 = vld [vmem:[%s21865_s7 + $0xf70] sm:$0xff]  }
 0x25f   : > { %v18256_v6 = vpop.f32.mrb[28].mxu1  ;;  %v18235_v9 = vpop.f32.mrb[29].mxu0 }
 0x260   : > { %v18257_v10 = vpop.f32.mrb[29].mxu1  ;;  %v18236_v12 = vadd.f32 %v18235_v9, %v18234_v5  ;;  %v18237_v14 = vpop.f32.mrb[30].mxu0  ;;  %18537 = vmatpush3.bf16.msra.mxu0 %v20494_v8 }
 0x261   : > { %v18258_v13 = vadd.f32 %v18257_v10, %v18256_v6  ;;  %v18259_v15 = vpop.f32.mrb[30].mxu1  ;;  %v18238_v18 = vpop.f32.mrb[31].mxu0  ;;  %18538 = vmatprep.subr.bf16.mxu0 %v20496_v16  ;;  %18559 = vmatpush3.bf16.msra.mxu1 %v20495_v11  ;;  %v20528_v6 = vld [vmem:[%s21865_s7 + $0xfa8] sm:$0xff]   ;;  %v20530_v11 = vld [vmem:[%s21865_s7 + $0xff0] sm:$0xff]   ;;  %v20534_v16 = vld [vmem:[%s21865_s7 + $0xff8] sm:$0xff]  }
 0x262   : > { %v18260_v19 = vpop.f32.mrb[31].mxu1  ;;  %v13348_v20 = vadd.f32 %v18236_v12, %v22391_v33  ;;  %18560 = vmatprep.subr.bf16.mxu1 %v20497_v17  ;;  %v641_v33 = vrot.slane %v627_v29, %v21922_v42  ;;  %v20531_v12 = vld [vmem:[%s21865_s7 + $0xf30] sm:$0xff]   ;;  %v20533_v15 = vld [vmem:[%s21865_s7 + $0xf78] sm:$0xff]  }
 0x263   : > { %v20532_v14 = vld [vmem:[%s21865_s7 + $0xfb0] sm:$0xff]   ;;  %v20535_v17 = vld [vmem:[%s21865_s7 + $0xf38] sm:$0xff]  }
 0x264   : > { %v22428_v23 = vadd.f32 %v18258_v13, %v13348_v20  ;;  %18539 = vmatpush3.bf16.msra.mxu0 %v20498_v21  ;;  %v643_v38 = vcombine.high %v641_v33, %v641_v33  ;;  %v1371_v40 = vpack.c.bf16 %v641_v33, %v641_v33  ;;  %v316_v18 = vld [vmem:[%s21883_s27 + $0x78] sm:$0xff]  ;;  %v20538_v21 = vld [vmem:[%s21865_s7 + $0x1040] sm:$0xff]  }
 0x265   : > { %18540 = vmatprep.subr.bf16.mxu0 %v20500_v24  ;;  %18561 = vmatpush3.bf16.msra.mxu1 %v20499_v22  ;;  %v651_v19 = vrot.slane %v316_v18, %v21922_v42  ;;  %v644_v20 = vcombine.high %v316_v18, %v316_v18  ;;  %v20536_v22 = vld [vmem:[%s21865_s7 + $0xfb8] sm:$0xff]   ;;  %v20573_v18 = vld [vmem:[%s21865_s7 + $0x1100] sm:$0xff]  }
 0x266   : > { %18562 = vmatprep.subr.bf16.mxu1 %v20501_v25  ;;  %v1372_v43 = vpack.c.bf16 %v643_v38, %v643_v38  ;;  %v20539_v25 = vld [vmem:[%s21865_s7 + $0x10c0] sm:$0xff]   ;;  %v20547_v38 = vld [vmem:[%s21865_s7 + $0x10d0] sm:$0xff]  }
 0x267   : > { %v658_v24 = vrot.slane %v644_v20, %v21922_v42 }
 0x268   : > { %18541 = vmatpush3.bf16.msra.mxu0 %v20502_v26  ;;  %13945 = vmatprep.mubr.bf16.mxu1 %v1372_v43  ;;  %v1373_v26 = vpack.c.bf16 %v651_v19, %v651_v19  ;;  %v20551_v43 = vld [vmem:[%s21865_s7 + $0x10d8] sm:$0xff]  }
 0x269   : > { %18570 = vmatprep.subr.bf16.mxu0 %v20505_v30  ;;  %18563 = vmatpush3.bf16.msra.mxu1 %v20503_v31  ;;  %v660_v29 = vcombine.high %v658_v24, %v658_v24  ;;  %v20541_v30 = vld [vmem:[%s21865_s7 + $0x1080] sm:$0xff]   ;;  %v1375_v31 = vpack.c.bf16 %v658_v24, %v658_v24 }
 0x26a   : > { %18592 = vmatprep.subr.bf16.mxu1 %v20506_v34  ;;  %v20543_v34 = vld [vmem:[%s21865_s7 + $0x10c8] sm:$0xff]  }
 0x26b   : > { %13906 = vmatmul.mubr.bf16.vlgmr.msra.gmra.mrb[56].mxu0 %v1369_v35  ;;  %v1376_v33 = vpack.c.bf16 %v660_v29, %v660_v29  ;;  %v20544_v35 = vld [vmem:[%s21865_s7 + $0x1008] sm:$0xff]   ;;  %v20580_v29 = vld [vmem:[%s21865_s7 + $0x11d0] sm:$0xff]  }
 0x26c   : > { %18571 = vmatpush3.bf16.msra.mxu0 %v20507_v36  ;;  %13946 = vmatmul.mubr.bf16.vlgmr.msra.gmra.mrb[56].mxu1 %v1371_v40  ;;  %v20545_v36 = vld [vmem:[%s21865_s7 + $0x1088] sm:$0xff]   ;;  %v20549_v40 = vld [vmem:[%s21865_s7 + $0x1090] sm:$0xff]  }
 0x26d   : > { %18572 = vmatprep.subr.bf16.mxu0 %v20509_v41  ;;  %18593 = vmatpush3.bf16.msra.mxu1 %v20508_v39  ;;  %v20548_v39 = vld [vmem:[%s21865_s7 + $0x1010] sm:$0xff]   ;;  %v20550_v41 = vld [vmem:[%s21865_s7 + $0x1058] sm:$0xff]  }
 0x26e   : > { %18594 = vmatprep.subr.bf16.mxu1 %v20510_v44  ;;  %14025 = vmatprep.mubr.bf16.mxu1 %v1376_v33  ;;  %v20552_v44 = vld [vmem:[%s21865_s7 + $0x1018] sm:$0xff]  }
 0x26f   : > { %v20584_v33 = vld [vmem:[%s21865_s7 + $0x11d8] sm:$0xff]  }
 0x270   : > { %18573 = vmatpush3.bf16.msra.mxu0 %v20511_v45  ;;  %v20553_v45 = vld [vmem:[%s21865_s7 + $0x1098] sm:$0xff]  }
 0x271   : > { %18574 = vmatprep.subr.bf16.mxu0 %v20513_v47  ;;  %18595 = vmatpush3.bf16.msra.mxu1 %v20512_v46  ;;  %v20554_v46 = vld [vmem:[%s21865_s7 + $0x1060] sm:$0xff]  }
 0x272   : > { %18596 = vmatprep.subr.bf16.mxu1 %v20514_v48  ;;  %v20555_v47 = vld [vmem:[%s21865_s7 + $0x10e0] sm:$0xff]  }
 0x273   : > { %v20556_v48 = vld [vmem:[%s21865_s7 + $0x1020] sm:$0xff]  }
 0x274   : > { %18575 = vmatpush3.bf16.msra.mxu0 %v20515_v49  ;;  %v20557_v49 = vld [vmem:[%s21865_s7 + $0x10a0] sm:$0xff]  }
 0x275   : > { %18576 = vmatprep.subr.bf16.mxu0 %v20517_v51  ;;  %18597 = vmatpush3.bf16.msra.mxu1 %v20516_v50  ;;  %v20558_v51 = vld [vmem:[%s21865_s7 + $0x1068] sm:$0xff]  }
 0x276   : > { %18598 = vmatprep.subr.bf16.mxu1 %v20518_v52 }
 0x278   : > { %18577 = vmatpush3.bf16.msra.mxu0 %v20519_v53 }
 0x279   : > { %18578 = vmatprep.subr.bf16.mxu0 %v20521_v55  ;;  %18599 = vmatpush3.bf16.msra.mxu1 %v20520_v54  ;;  %v20559_v54 = vld [vmem:[%s21865_s7 + $0x10e8] sm:$0xff]  }
 0x27a   : > { %18600 = vmatprep.subr.bf16.mxu1 %v20522_v56  ;;  %v20560_v55 = vld [vmem:[%s21865_s7 + $0x1028] sm:$0xff]  }
 0x27c   : > { %18579 = vmatpush3.bf16.msra.mxu0 %v20523_v57 }
 0x27d   : > { %18580 = vmatprep.subr.bf16.mxu0 %v20525_v59  ;;  %18601 = vmatpush3.bf16.msra.mxu1 %v20524_v58 }
 0x27e   : > { %v18278_v60 = vpop.f32.mrb[32].mxu0  ;;  %18602 = vmatprep.subr.bf16.mxu1 %v20526_v62 }
 0x27f   : > { %v18300_v61 = vpop.f32.mrb[32].mxu1  ;;  %v18279_v0 = vpop.f32.mrb[33].mxu0 }
 0x280   : > { %v18301_v1 = vpop.f32.mrb[33].mxu1  ;;  %v18280_v2 = vadd.f32 %v18279_v0, %v18278_v60  ;;  %v18281_v4 = vpop.f32.mrb[34].mxu0  ;;  %18581 = vmatpush3.bf16.msra.mxu0 %v20527_v63  ;;  %v20562_v63 = vld [vmem:[%s21865_s7 + $0x1070] sm:$0xff]  }
 0x281   : > { %v18302_v3 = vadd.f32 %v18301_v1, %v18300_v61  ;;  %v18303_v5 = vpop.f32.mrb[34].mxu1  ;;  %v18282_v8 = vpop.f32.mrb[35].mxu0  ;;  %18582 = vmatprep.subr.bf16.mxu0 %v20529_v7  ;;  %18603 = vmatpush3.bf16.msra.mxu1 %v20528_v6  ;;  %v20561_v61 = vld [vmem:[%s21865_s7 + $0x10a8] sm:$0xff]   ;;  %v20564_v4 = vld [vmem:[%s21865_s7 + $0x1030] sm:$0xff]   ;;  %v20566_v6 = vld [vmem:[%s21865_s7 + $0x1078] sm:$0xff]  }
 0x282   : > { %v18304_v9 = vpop.f32.mrb[35].mxu1  ;;  %v13428_v10 = vadd.f32 %v18280_v2, %v22428_v23  ;;  %18604 = vmatprep.subr.bf16.mxu1 %v20530_v11  ;;  %v659_v23 = vcombine.high %v651_v19, %v651_v19  ;;  %v20563_v2 = vld [vmem:[%s21865_s7 + $0x10f0] sm:$0xff]   ;;  %v20567_v7 = vld [vmem:[%s21865_s7 + $0x10f8] sm:$0xff]  }
 0x283   : > { %v20565_v5 = vld [vmem:[%s21865_s7 + $0x10b0] sm:$0xff]   ;;  %v20568_v8 = vld [vmem:[%s21865_s7 + $0x1038] sm:$0xff]  }
 0x284   : > { %v22465_v13 = vadd.f32 %v18302_v3, %v13428_v10  ;;  %18583 = vmatpush3.bf16.msra.mxu0 %v20531_v12  ;;  %v1374_v28 = vpack.c.bf16 %v659_v23, %v659_v23  ;;  %v317_v9 = vld [vmem:[%s21883_s27 + $0x80] sm:$0xff]  ;;  %v20575_v23 = vld [vmem:[%s21865_s7 + $0x1148] sm:$0xff]  }
 0x285   : > { %18584 = vmatprep.subr.bf16.mxu0 %v20533_v15  ;;  %18605 = vmatpush3.bf16.msra.mxu1 %v20532_v14  ;;  %v20569_v10 = vld [vmem:[%s21865_s7 + $0x10b8] sm:$0xff]   ;;  %v668_v11 = vrot.slane %v317_v9, %v21922_v42  ;;  %v661_v12 = vcombine.high %v317_v9, %v317_v9 }
 0x286   : > { %18606 = vmatprep.subr.bf16.mxu1 %v20534_v16  ;;  %13985 = vmatprep.mubr.bf16.mxu0 %v1374_v28  ;;  %v20572_v16 = vld [vmem:[%s21865_s7 + $0x11c0] sm:$0xff]   ;;  %v20579_v28 = vld [vmem:[%s21865_s7 + $0x1150] sm:$0xff]  }
 0x287   : > { %v676_v14 = vcombine.high %v668_v11, %v668_v11  ;;  %v675_v15 = vrot.slane %v661_v12, %v21922_v42 }
 0x288   : > { %18585 = vmatpush3.bf16.msra.mxu0 %v20535_v17  ;;  %v1377_v17 = vpack.c.bf16 %v668_v11, %v668_v11  ;;  %v20606_v11 = vld [vmem:[%s21865_s7 + $0x1200] sm:$0xff]  }
 0x289   : > { %18614 = vmatprep.subr.bf16.mxu0 %v20538_v21  ;;  %18607 = vmatpush3.bf16.msra.mxu1 %v20536_v22  ;;  %v1378_v19 = vpack.c.bf16 %v676_v14, %v676_v14  ;;  %v677_v20 = vcombine.high %v675_v15, %v675_v15  ;;  %v20574_v21 = vld [vmem:[%s21865_s7 + $0x1180] sm:$0xff]   ;;  %v1379_v22 = vpack.c.bf16 %v675_v15, %v675_v15 }
 0x28a   : > { %18636 = vmatprep.subr.bf16.mxu1 %v20539_v25  ;;  %v20576_v25 = vld [vmem:[%s21865_s7 + $0x11c8] sm:$0xff]   ;;  %v20607_v15 = vld [vmem:[%s21865_s7 + $0x1280] sm:$0xff]  }
 0x28b   : > { %13986 = vmatmul.mubr.bf16.vlgmr.msra.gmra.mrb[60].mxu0 %v1373_v26  ;;  %v1380_v24 = vpack.c.bf16 %v677_v20, %v677_v20  ;;  %v20577_v26 = vld [vmem:[%s21865_s7 + $0x1108] sm:$0xff]   ;;  %v20613_v20 = vld [vmem:[%s21865_s7 + $0x12d0] sm:$0xff]  }
 0x28c   : > { %18615 = vmatpush3.bf16.msra.mxu0 %v20540_v27  ;;  %14026 = vmatmul.mubr.bf16.vlgmr.msra.gmra.mrb[60].mxu1 %v1375_v31  ;;  %v20578_v27 = vld [vmem:[%s21865_s7 + $0x1188] sm:$0xff]   ;;  %v20582_v31 = vld [vmem:[%s21865_s7 + $0x1190] sm:$0xff]  }
 0x28d   : > { %18616 = vmatprep.subr.bf16.mxu0 %v20542_v32  ;;  %18637 = vmatpush3.bf16.msra.mxu1 %v20541_v30  ;;  %v20581_v30 = vld [vmem:[%s21865_s7 + $0x1110] sm:$0xff]   ;;  %v20583_v32 = vld [vmem:[%s21865_s7 + $0x1158] sm:$0xff]  }
 0x28e   : > { %18638 = vmatprep.subr.bf16.mxu1 %v20543_v34  ;;  %14065 = vmatprep.mubr.bf16.mxu0 %v1378_v19  ;;  %v20585_v34 = vld [vmem:[%s21865_s7 + $0x1118] sm:$0xff]   ;;  %v20611_v19 = vld [vmem:[%s21865_s7 + $0x1288] sm:$0xff]  }
 0x28f   : > { %14105 = vmatprep.mubr.bf16.mxu1 %v1380_v24  ;;  %v20617_v24 = vld [vmem:[%s21865_s7 + $0x12d8] sm:$0xff]  }
 0x290   : > { %18617 = vmatpush3.bf16.msra.mxu0 %v20544_v35  ;;  %v20586_v35 = vld [vmem:[%s21865_s7 + $0x1198] sm:$0xff]  }
 0x291   : > { %18618 = vmatprep.subr.bf16.mxu0 %v20546_v37  ;;  %18639 = vmatpush3.bf16.msra.mxu1 %v20545_v36  ;;  %v20587_v36 = vld [vmem:[%s21865_s7 + $0x1160] sm:$0xff]  }
 0x292   : > { %18640 = vmatprep.subr.bf16.mxu1 %v20547_v38  ;;  %v20588_v37 = vld [vmem:[%s21865_s7 + $0x11e0] sm:$0xff]  }
 0x293   : > { %v20589_v38 = vld [vmem:[%s21865_s7 + $0x1120] sm:$0xff]  }
 0x294   : > { %18619 = vmatpush3.bf16.msra.mxu0 %v20548_v39  ;;  %v20590_v39 = vld [vmem:[%s21865_s7 + $0x11a0] sm:$0xff]  }
 0x295   : > { %18620 = vmatprep.subr.bf16.mxu0 %v20550_v41  ;;  %18641 = vmatpush3.bf16.msra.mxu1 %v20549_v40  ;;  %v20591_v41 = vld [vmem:[%s21865_s7 + $0x1168] sm:$0xff]  }
 0x296   : > { %18642 = vmatprep.subr.bf16.mxu1 %v20551_v43 }
 0x298   : > { %18621 = vmatpush3.bf16.msra.mxu0 %v20552_v44  ;;  %v20592_v44 = vld [vmem:[%s21865_s7 + $0x11e8] sm:$0xff]  }
 0x299   : > { %18622 = vmatprep.subr.bf16.mxu0 %v20554_v46  ;;  %18643 = vmatpush3.bf16.msra.mxu1 %v20553_v45 }
 0x29a   : > { %18644 = vmatprep.subr.bf16.mxu1 %v20555_v47 }
 0x29c   : > { %18623 = vmatpush3.bf16.msra.mxu0 %v20556_v48 }
 0x29d   : > { %18624 = vmatprep.subr.bf16.mxu0 %v20558_v51  ;;  %18645 = vmatpush3.bf16.msra.mxu1 %v20557_v49  ;;  %v20593_v49 = vld [vmem:[%s21865_s7 + $0x1128] sm:$0xff]  }
 0x29e   : > { %v18322_v50 = vpop.f32.mrb[36].mxu0  ;;  %18646 = vmatprep.subr.bf16.mxu1 %v20559_v54 }
 0x29f   : > { %v18344_v52 = vpop.f32.mrb[36].mxu1  ;;  %v18323_v53 = vpop.f32.mrb[37].mxu0 }
 0x2a0   : > { %v18324_v56 = vadd.f32 %v18323_v53, %v18322_v50  ;;  %v18345_v57 = vpop.f32.mrb[37].mxu1  ;;  %v18325_v58 = vpop.f32.mrb[38].mxu0  ;;  %18625 = vmatpush3.bf16.msra.mxu0 %v20560_v55  ;;  %v20594_v50 = vld [vmem:[%s21865_s7 + $0x11a8] sm:$0xff]   ;;  %v20595_v55 = vld [vmem:[%s21865_s7 + $0x1170] sm:$0xff]  }
 0x2a1   : > { %v18346_v59 = vadd.f32 %v18345_v57, %v18344_v52  ;;  %v18347_v60 = vpop.f32.mrb[38].mxu1  ;;  %v18326_v62 = vpop.f32.mrb[39].mxu0  ;;  %18626 = vmatprep.subr.bf16.mxu0 %v20562_v63  ;;  %18647 = vmatpush3.bf16.msra.mxu1 %v20561_v61  ;;  %v20596_v57 = vld [vmem:[%s21865_s7 + $0x11f0] sm:$0xff]   ;;  %v20601_v63 = vld [vmem:[%s21865_s7 + $0x1138] sm:$0xff]  }
 0x2a2   : > { %v13508_v0 = vadd.f32 %v18324_v56, %v22465_v13  ;;  %v18348_v1 = vpop.f32.mrb[39].mxu1  ;;  %18648 = vmatprep.subr.bf16.mxu1 %v20563_v2  ;;  %v20571_v13 = vld [vmem:[%s21865_s7 + $0x1140] sm:$0xff]   ;;  %v20599_v60 = vld [vmem:[%s21865_s7 + $0x1178] sm:$0xff]   ;;  %v20598_v61 = vld [vmem:[%s21865_s7 + $0x11b0] sm:$0xff]  }
 0x2a3   : > { %v20600_v62 = vld [vmem:[%s21865_s7 + $0x11f8] sm:$0xff]  }
 0x2a4   : > { %v22502_v3 = vadd.f32 %v18346_v59, %v13508_v0  ;;  %18627 = vmatpush3.bf16.msra.mxu0 %v20564_v4  ;;  %v20597_v59 = vld [vmem:[%s21865_s7 + $0x1130] sm:$0xff]   ;;  %v318_v0 = vld [vmem:[%s21883_s27 + $0x88] sm:$0xff]  ;;  %v20602_v4 = vld [vmem:[%s21865_s7 + $0x11b8] sm:$0xff]  }
 0x2a5   : > { %18628 = vmatprep.subr.bf16.mxu0 %v20566_v6  ;;  %18649 = vmatpush3.bf16.msra.mxu1 %v20565_v5  ;;  %v685_v1 = vrot.slane %v318_v0, %v21922_v42  ;;  %v678_v2 = vcombine.high %v318_v0, %v318_v0 }
 0x2a6   : > { %18650 = vmatprep.subr.bf16.mxu1 %v20567_v7  ;;  %v20605_v7 = vld [vmem:[%s21865_s7 + $0x12c0] sm:$0xff]  }
 0x2a7   : > { %v693_v5 = vcombine.high %v685_v1, %v685_v1  ;;  %v692_v6 = vrot.slane %v678_v2, %v21922_v42  ;;  %v20639_v2 = vld [vmem:[%s21865_s7 + $0x1300] sm:$0xff]  }
 0x2a8   : > { %18629 = vmatpush3.bf16.msra.mxu0 %v20568_v8  ;;  %v1381_v8 = vpack.c.bf16 %v685_v1, %v685_v1 }
 0x2a9   : > { %18658 = vmatprep.subr.bf16.mxu0 %v20571_v13  ;;  %18651 = vmatpush3.bf16.msra.mxu1 %v20569_v10  ;;  %v1382_v9 = vpack.c.bf16 %v693_v5, %v693_v5  ;;  %v694_v10 = vcombine.high %v692_v6, %v692_v6  ;;  %v1383_v12 = vpack.c.bf16 %v692_v6, %v692_v6  ;;  %v20608_v13 = vld [vmem:[%s21865_s7 + $0x1248] sm:$0xff]   ;;  %v20640_v6 = vld [vmem:[%s21865_s7 + $0x1380] sm:$0xff]  }
 0x2aa   : > { %18680 = vmatprep.subr.bf16.mxu1 %v20572_v16  ;;  %v20609_v16 = vld [vmem:[%s21865_s7 + $0x12c8] sm:$0xff]  }
 0x2ab   : > { %14066 = vmatmul.mubr.bf16.vlgmr.msra.gmra.mrb[64].mxu0 %v1377_v17  ;;  %v1384_v14 = vpack.c.bf16 %v694_v10, %v694_v10  ;;  %v20610_v17 = vld [vmem:[%s21865_s7 + $0x1208] sm:$0xff]  }
 0x2ac   : > { %18659 = vmatpush3.bf16.msra.mxu0 %v20573_v18  ;;  %14106 = vmatmul.mubr.bf16.vlgmr.msra.gmra.mrb[64].mxu1 %v1379_v22  ;;  %v20612_v18 = vld [vmem:[%s21865_s7 + $0x1250] sm:$0xff]   ;;  %v20616_v22 = vld [vmem:[%s21865_s7 + $0x1258] sm:$0xff]   ;;  %v20644_v10 = vld [vmem:[%s21865_s7 + $0x1388] sm:$0xff]  }
 0x2ad   : > { %18660 = vmatprep.subr.bf16.mxu0 %v20575_v23  ;;  %18681 = vmatpush3.bf16.msra.mxu1 %v20574_v21  ;;  %v20614_v21 = vld [vmem:[%s21865_s7 + $0x1210] sm:$0xff]  }
 0x2ae   : > { %18682 = vmatprep.subr.bf16.mxu1 %v20576_v25  ;;  %14145 = vmatprep.mubr.bf16.mxu0 %v1382_v9  ;;  %v20615_v23 = vld [vmem:[%s21865_s7 + $0x1290] sm:$0xff]   ;;  %v20618_v25 = vld [vmem:[%s21865_s7 + $0x1218] sm:$0xff]  }
 0x2af   : > { %14185 = vmatprep.mubr.bf16.mxu1 %v1384_v14  ;;  %v20645_v9 = vld [vmem:[%s21865_s7 + $0x1350] sm:$0xff]  }
 0x2b0   : > { %18661 = vmatpush3.bf16.msra.mxu0 %v20577_v26  ;;  %v20620_v26 = vld [vmem:[%s21865_s7 + $0x1260] sm:$0xff]   ;;  %v20648_v14 = vld [vmem:[%s21865_s7 + $0x1390] sm:$0xff]  }
 0x2b1   : > { %18662 = vmatprep.subr.bf16.mxu0 %v20579_v28  ;;  %18683 = vmatpush3.bf16.msra.mxu1 %v20578_v27  ;;  %v20619_v27 = vld [vmem:[%s21865_s7 + $0x1298] sm:$0xff]   ;;  %v20621_v28 = vld [vmem:[%s21865_s7 + $0x12e0] sm:$0xff]  }
 0x2b2   : > { %18684 = vmatprep.subr.bf16.mxu1 %v20580_v29  ;;  %v20622_v29 = vld [vmem:[%s21865_s7 + $0x1220] sm:$0xff]  }
 0x2b4   : > { %18663 = vmatpush3.bf16.msra.mxu0 %v20581_v30 }
 0x2b5   : > { %18664 = vmatprep.subr.bf16.mxu0 %v20583_v32  ;;  %18685 = vmatpush3.bf16.msra.mxu1 %v20582_v31  ;;  %v20624_v31 = vld [vmem:[%s21865_s7 + $0x1268] sm:$0xff]   ;;  %v20623_v32 = vld [vmem:[%s21865_s7 + $0x12a0] sm:$0xff]  }
 0x2b6   : > { %18686 = vmatprep.subr.bf16.mxu1 %v20584_v33 }
 0x2b8   : > { %18665 = vmatpush3.bf16.msra.mxu0 %v20585_v34 }
 0x2b9   : > { %18666 = vmatprep.subr.bf16.mxu0 %v20587_v36  ;;  %18687 = vmatpush3.bf16.msra.mxu1 %v20586_v35  ;;  %v20625_v36 = vld [vmem:[%s21865_s7 + $0x12e8] sm:$0xff]  }
 0x2ba   : > { %18688 = vmatprep.subr.bf16.mxu1 %v20588_v37 }
 0x2bc   : > { %18667 = vmatpush3.bf16.msra.mxu0 %v20589_v38  ;;  %v20626_v38 = vld [vmem:[%s21865_s7 + $0x1228] sm:$0xff]  }
 0x2bd   : > { %18668 = vmatprep.subr.bf16.mxu0 %v20591_v41  ;;  %18689 = vmatpush3.bf16.msra.mxu1 %v20590_v39 }
 0x2be   : > { %v18366_v40 = vpop.f32.mrb[40].mxu0  ;;  %18690 = vmatprep.subr.bf16.mxu1 %v20592_v44 }
 0x2bf   : > { %v18367_v43 = vpop.f32.mrb[41].mxu0  ;;  %v18388_v45 = vpop.f32.mrb[40].mxu1 }
 0x2c0   : > { %v18368_v46 = vadd.f32 %v18367_v43, %v18366_v40  ;;  %v18369_v47 = vpop.f32.mrb[42].mxu0  ;;  %v18389_v48 = vpop.f32.mrb[41].mxu1  ;;  %18669 = vmatpush3.bf16.msra.mxu0 %v20593_v49  ;;  %v20627_v40 = vld [vmem:[%s21865_s7 + $0x12a8] sm:$0xff]  }
 0x2c1   : > { %v18370_v51 = vpop.f32.mrb[43].mxu0  ;;  %v18390_v53 = vadd.f32 %v18389_v48, %v18388_v45  ;;  %v18391_v54 = vpop.f32.mrb[42].mxu1  ;;  %18670 = vmatprep.subr.bf16.mxu0 %v20595_v55  ;;  %18691 = vmatpush3.bf16.msra.mxu1 %v20594_v50  ;;  %v20629_v48 = vld [vmem:[%s21865_s7 + $0x12f0] sm:$0xff]  }
 0x2c2   : > { %v13588_v52 = vadd.f32 %v18368_v46, %v22502_v3  ;;  %v18392_v56 = vpop.f32.mrb[43].mxu1  ;;  %18692 = vmatprep.subr.bf16.mxu1 %v20596_v57  ;;  %v20604_v3 = vld [vmem:[%s21865_s7 + $0x1240] sm:$0xff]   ;;  %v20628_v46 = vld [vmem:[%s21865_s7 + $0x1270] sm:$0xff]   ;;  %v20634_v54 = vld [vmem:[%s21865_s7 + $0x1238] sm:$0xff]  }
 0x2c3   : > { %v20630_v50 = vld [vmem:[%s21865_s7 + $0x1230] sm:$0xff]  }
 0x2c4   : > { %v22540_v58 = vadd.f32 %v18390_v53, %v13588_v52  ;;  %18671 = vmatpush3.bf16.msra.mxu0 %v20597_v59  ;;  %v20631_v51 = vld [vmem:[%s21865_s7 + $0x12b0] sm:$0xff]   ;;  %v20632_v52 = vld [vmem:[%s21865_s7 + $0x1278] sm:$0xff]  }
 0x2c5   : > { %18672 = vmatprep.subr.bf16.mxu0 %v20599_v60  ;;  %18693 = vmatpush3.bf16.msra.mxu1 %v20598_v61  ;;  %v20633_v53 = vld [vmem:[%s21865_s7 + $0x12f8] sm:$0xff]   ;;  %v319_v55 = vld [vmem:[%s21883_s27 + $0x90] sm:$0xff] }
 0x2c6   : > { %18694 = vmatprep.subr.bf16.mxu1 %v20600_v62  ;;  %v702_v56 = vrot.slane %v319_v55, %v21922_v42  ;;  %v695_v57 = vcombine.high %v319_v55, %v319_v55  ;;  %v20635_v59 = vld [vmem:[%s21865_s7 + $0x12b8] sm:$0xff]   ;;  %v20638_v62 = vld [vmem:[%s21865_s7 + $0x13c0] sm:$0xff]  }
 0x2c7   : > { %v20672_v55 = vld [vmem:[%s21865_s7 + $0x1400] sm:$0xff]  }
 0x2c8   : > { %18673 = vmatpush3.bf16.msra.mxu0 %v20601_v63  ;;  %v710_v60 = vcombine.high %v702_v56, %v702_v56  ;;  %v709_v61 = vrot.slane %v695_v57, %v21922_v42  ;;  %v1385_v63 = vpack.c.bf16 %v702_v56, %v702_v56 }
 0x2c9   : > { %18702 = vmatprep.subr.bf16.mxu0 %v20604_v3  ;;  %18695 = vmatpush3.bf16.msra.mxu1 %v20602_v4  ;;  %v20641_v4 = vld [vmem:[%s21865_s7 + $0x1348] sm:$0xff]  }
 0x2ca   : > { %18724 = vmatprep.subr.bf16.mxu1 %v20605_v7  ;;  %v1386_v0 = vpack.c.bf16 %v710_v60, %v710_v60  ;;  %v711_v1 = vcombine.high %v709_v61, %v709_v61  ;;  %v1387_v3 = vpack.c.bf16 %v709_v61, %v709_v61  ;;  %v20642_v7 = vld [vmem:[%s21865_s7 + $0x13c8] sm:$0xff]  }
 0x2cb   : > { %14146 = vmatmul.mubr.bf16.vlgmr.msra.gmra.mrb[68].mxu0 %v1381_v8  ;;  %v20643_v8 = vld [vmem:[%s21865_s7 + $0x1308] sm:$0xff]  }
 0x2cc   : > { %18703 = vmatpush3.bf16.msra.mxu0 %v20606_v11  ;;  %14186 = vmatmul.mubr.bf16.vlgmr.msra.gmra.mrb[68].mxu1 %v1383_v12  ;;  %v1388_v5 = vpack.c.bf16 %v711_v1, %v711_v1  ;;  %v20646_v11 = vld [vmem:[%s21865_s7 + $0x13d0] sm:$0xff]   ;;  %v20674_v60 = vld [vmem:[%s21865_s7 + $0x1448] sm:$0xff]  }
 0x2cd   : > { %18704 = vmatprep.subr.bf16.mxu0 %v20608_v13  ;;  %18725 = vmatpush3.bf16.msra.mxu1 %v20607_v15  ;;  %v20647_v12 = vld [vmem:[%s21865_s7 + $0x1310] sm:$0xff]   ;;  %v20649_v13 = vld [vmem:[%s21865_s7 + $0x1358] sm:$0xff]  }
 0x2ce   : > { %18726 = vmatprep.subr.bf16.mxu1 %v20609_v16  ;;  %14225 = vmatprep.mubr.bf16.mxu0 %v1386_v0  ;;  %v20650_v15 = vld [vmem:[%s21865_s7 + $0x13d8] sm:$0xff]   ;;  %v20677_v0 = vld [vmem:[%s21865_s7 + $0x1488] sm:$0xff]   ;;  %v20678_v1 = vld [vmem:[%s21865_s7 + $0x1450] sm:$0xff]  }
 0x2cf   : > { %14265 = vmatprep.mubr.bf16.mxu1 %v1388_v5  ;;  %v20651_v16 = vld [vmem:[%s21865_s7 + $0x1318] sm:$0xff]  }
 0x2d0   : > { %18705 = vmatpush3.bf16.msra.mxu0 %v20610_v17  ;;  %v20653_v17 = vld [vmem:[%s21865_s7 + $0x1360] sm:$0xff]   ;;  %v20682_v5 = vld [vmem:[%s21865_s7 + $0x1458] sm:$0xff]  }
 0x2d1   : > { %18706 = vmatprep.subr.bf16.mxu0 %v20612_v18  ;;  %18727 = vmatpush3.bf16.msra.mxu1 %v20611_v19  ;;  %v20652_v18 = vld [vmem:[%s21865_s7 + $0x1398] sm:$0xff]   ;;  %v20654_v19 = vld [vmem:[%s21865_s7 + $0x13e0] sm:$0xff]  }
 0x2d2   : > { %18728 = vmatprep.subr.bf16.mxu1 %v20613_v20  ;;  %v20655_v20 = vld [vmem:[%s21865_s7 + $0x1320] sm:$0xff]  }
 0x2d4   : > { %18707 = vmatpush3.bf16.msra.mxu0 %v20614_v21 }
 0x2d5   : > { %18708 = vmatprep.subr.bf16.mxu0 %v20616_v22  ;;  %18729 = vmatpush3.bf16.msra.mxu1 %v20615_v23  ;;  %v20657_v22 = vld [vmem:[%s21865_s7 + $0x1368] sm:$0xff]   ;;  %v20656_v23 = vld [vmem:[%s21865_s7 + $0x13a0] sm:$0xff]  }
 0x2d6   : > { %18730 = vmatprep.subr.bf16.mxu1 %v20617_v24 }
 0x2d8   : > { %18709 = vmatpush3.bf16.msra.mxu0 %v20618_v25 }
 0x2d9   : > { %18710 = vmatprep.subr.bf16.mxu0 %v20620_v26  ;;  %18731 = vmatpush3.bf16.msra.mxu1 %v20619_v27  ;;  %v20658_v27 = vld [vmem:[%s21865_s7 + $0x13e8] sm:$0xff]  }
 0x2da   : > { %18732 = vmatprep.subr.bf16.mxu1 %v20621_v28 }
 0x2dc   : > { %18711 = vmatpush3.bf16.msra.mxu0 %v20622_v29  ;;  %v20659_v29 = vld [vmem:[%s21865_s7 + $0x1328] sm:$0xff]  }
 0x2dd   : > { %18712 = vmatprep.subr.bf16.mxu0 %v20624_v31  ;;  %18733 = vmatpush3.bf16.msra.mxu1 %v20623_v32  ;;  %v20660_v31 = vld [vmem:[%s21865_s7 + $0x13a8] sm:$0xff]  }
 0x2de   : > { %v18410_v30 = vpop.f32.mrb[44].mxu0  ;;  %18734 = vmatprep.subr.bf16.mxu1 %v20625_v36  ;;  %v20661_v36 = vld [vmem:[%s21865_s7 + $0x1370] sm:$0xff]  }
 0x2df   : > { %v18411_v33 = vpop.f32.mrb[45].mxu0  ;;  %v18432_v34 = vpop.f32.mrb[44].mxu1 }
 0x2e0   : > { %v18412_v35 = vadd.f32 %v18411_v33, %v18410_v30  ;;  %v18413_v37 = vpop.f32.mrb[46].mxu0  ;;  %v18433_v39 = vpop.f32.mrb[45].mxu1  ;;  %18713 = vmatpush3.bf16.msra.mxu0 %v20626_v38  ;;  %v20662_v38 = vld [vmem:[%s21865_s7 + $0x13f0] sm:$0xff]  }
 0x2e1   : > { %v18414_v41 = vpop.f32.mrb[47].mxu0  ;;  %v18434_v44 = vadd.f32 %v18433_v39, %v18432_v34  ;;  %v18435_v45 = vpop.f32.mrb[46].mxu1  ;;  %18714 = vmatprep.subr.bf16.mxu0 %v20628_v46  ;;  %18735 = vmatpush3.bf16.msra.mxu1 %v20627_v40  ;;  %v20663_v40 = vld [vmem:[%s21865_s7 + $0x1330] sm:$0xff]  }
 0x2e2   : > { %v13668_v43 = vadd.f32 %v18412_v35, %v22540_v58  ;;  %v18436_v47 = vpop.f32.mrb[47].mxu1  ;;  %18736 = vmatprep.subr.bf16.mxu1 %v20629_v48  ;;  %v20637_v58 = vld [vmem:[%s21865_s7 + $0x1340] sm:$0xff]   ;;  %v20664_v41 = vld [vmem:[%s21865_s7 + $0x13b0] sm:$0xff]   ;;  %v20667_v45 = vld [vmem:[%s21865_s7 + $0x1338] sm:$0xff]  }
 0x2e3   : > { %v320_v46 = vld [vmem:[%s21883_s27 + $0x98] sm:$0xff] }
 0x2e4   : > { %v22578_v49 = vadd.f32 %v18434_v44, %v13668_v43  ;;  %18715 = vmatpush3.bf16.msra.mxu0 %v20630_v50  ;;  %v20665_v43 = vld [vmem:[%s21865_s7 + $0x1378] sm:$0xff]   ;;  %v719_v48 = vrot.slane %v320_v46, %v21922_v42  ;;  %v20670_v50 = vld [vmem:[%s21865_s7 + $0x1440] sm:$0xff]  }
 0x2e5   : > { %18716 = vmatprep.subr.bf16.mxu0 %v20632_v52  ;;  %18737 = vmatpush3.bf16.msra.mxu1 %v20631_v51  ;;  %v20666_v44 = vld [vmem:[%s21865_s7 + $0x13f8] sm:$0xff]  }
 0x2e6   : > { %18738 = vmatprep.subr.bf16.mxu1 %v20633_v53  ;;  %v20668_v47 = vld [vmem:[%s21865_s7 + $0x13b8] sm:$0xff]   ;;  %v727_v51 = vcombine.high %v719_v48, %v719_v48  ;;  %v20671_v53 = vld [vmem:[%s21865_s7 + $0x14c0] sm:$0xff]  }
 0x2e8   : > { %18717 = vmatpush3.bf16.msra.mxu0 %v20634_v54  ;;  %v1389_v54 = vpack.c.bf16 %v719_v48, %v719_v48  ;;  %v1390_v56 = vpack.c.bf16 %v727_v51, %v727_v51  ;;  %v20707_v51 = vld [vmem:[%s21865_s7 + $0x1548] sm:$0xff]  }
 0x2e9   : > { %18746 = vmatprep.subr.bf16.mxu0 %v20637_v58  ;;  %18739 = vmatpush3.bf16.msra.mxu1 %v20635_v59  ;;  %v20673_v58 = vld [vmem:[%s21865_s7 + $0x1480] sm:$0xff]  }
 0x2ea   : > { %18768 = vmatprep.subr.bf16.mxu1 %v20638_v62  ;;  %v20675_v62 = vld [vmem:[%s21865_s7 + $0x14c8] sm:$0xff]  }
 0x2eb   : > { %14226 = vmatmul.mubr.bf16.vlgmr.msra.gmra.mrb[72].mxu0 %v1385_v63  ;;  %v20676_v63 = vld [vmem:[%s21865_s7 + $0x1408] sm:$0xff]  }
 0x2ec   : > { %18747 = vmatpush3.bf16.msra.mxu0 %v20639_v2  ;;  %14266 = vmatmul.mubr.bf16.vlgmr.msra.gmra.mrb[72].mxu1 %v1387_v3  ;;  %v20679_v2 = vld [vmem:[%s21865_s7 + $0x14d0] sm:$0xff]  }
 0x2ed   : > { %18748 = vmatprep.subr.bf16.mxu0 %v20641_v4  ;;  %18769 = vmatpush3.bf16.msra.mxu1 %v20640_v6  ;;  %v20680_v3 = vld [vmem:[%s21865_s7 + $0x1410] sm:$0xff]   ;;  %v20683_v6 = vld [vmem:[%s21865_s7 + $0x14d8] sm:$0xff]  }
 0x2ee   : > { %18770 = vmatprep.subr.bf16.mxu1 %v20642_v7  ;;  %14305 = vmatprep.mubr.bf16.mxu0 %v1390_v56  ;;  %v20681_v4 = vld [vmem:[%s21865_s7 + $0x1490] sm:$0xff]   ;;  %v20684_v7 = vld [vmem:[%s21865_s7 + $0x1418] sm:$0xff]  }
 0x2ef   : > { %v20711_v56 = vld [vmem:[%s21865_s7 + $0x1550] sm:$0xff]  }
 0x2f0   : > { %18749 = vmatpush3.bf16.msra.mxu0 %v20643_v8  ;;  %v20685_v8 = vld [vmem:[%s21865_s7 + $0x1498] sm:$0xff]  }
 0x2f1   : > { %18750 = vmatprep.subr.bf16.mxu0 %v20645_v9  ;;  %18771 = vmatpush3.bf16.msra.mxu1 %v20644_v10  ;;  %v20686_v9 = vld [vmem:[%s21865_s7 + $0x1460] sm:$0xff]  }
 0x2f2   : > { %18772 = vmatprep.subr.bf16.mxu1 %v20646_v11  ;;  %v20687_v10 = vld [vmem:[%s21865_s7 + $0x14e0] sm:$0xff]  }
 0x2f3   : > { %v20688_v11 = vld [vmem:[%s21865_s7 + $0x1420] sm:$0xff]  }
 0x2f4   : > { %18751 = vmatpush3.bf16.msra.mxu0 %v20647_v12  ;;  %v20689_v12 = vld [vmem:[%s21865_s7 + $0x14a0] sm:$0xff]  }
 0x2f5   : > { %18752 = vmatprep.subr.bf16.mxu0 %v20649_v13  ;;  %18773 = vmatpush3.bf16.msra.mxu1 %v20648_v14  ;;  %v20690_v13 = vld [vmem:[%s21865_s7 + $0x1468] sm:$0xff]  }
 0x2f6   : > { %18774 = vmatprep.subr.bf16.mxu1 %v20650_v15  ;;  %v20691_v15 = vld [vmem:[%s21865_s7 + $0x14e8] sm:$0xff]  }
 0x2f8   : > { %18753 = vmatpush3.bf16.msra.mxu0 %v20651_v16 }
 0x2f9   : > { %18754 = vmatprep.subr.bf16.mxu0 %v20653_v17  ;;  %18775 = vmatpush3.bf16.msra.mxu1 %v20652_v18  ;;  %v20692_v17 = vld [vmem:[%s21865_s7 + $0x1428] sm:$0xff]  }
 0x2fa   : > { %18776 = vmatprep.subr.bf16.mxu1 %v20654_v19 }
 0x2fc   : > { %18755 = vmatpush3.bf16.msra.mxu0 %v20655_v20 }
 0x2fd   : > { %18756 = vmatprep.subr.bf16.mxu0 %v20657_v22  ;;  %18777 = vmatpush3.bf16.msra.mxu1 %v20656_v23  ;;  %v20693_v22 = vld [vmem:[%s21865_s7 + $0x14a8] sm:$0xff]  }
 0x2fe   : > { %v18454_v21 = vpop.f32.mrb[48].mxu0  ;;  %18778 = vmatprep.subr.bf16.mxu1 %v20658_v27 }
 0x2ff   : > { %v18455_v24 = vpop.f32.mrb[49].mxu0  ;;  %v18476_v25 = vpop.f32.mrb[48].mxu1 }
 0x300   : > { %v18456_v26 = vadd.f32 %v18455_v24, %v18454_v21  ;;  %v18457_v28 = vpop.f32.mrb[50].mxu0  ;;  %v18477_v30 = vpop.f32.mrb[49].mxu1  ;;  %18757 = vmatpush3.bf16.msra.mxu0 %v20659_v29  ;;  %v20694_v24 = vld [vmem:[%s21865_s7 + $0x1470] sm:$0xff]  }
 0x301   : > { %v18458_v32 = vpop.f32.mrb[51].mxu0  ;;  %v18478_v34 = vadd.f32 %v18477_v30, %v18476_v25  ;;  %v18479_v35 = vpop.f32.mrb[50].mxu1  ;;  %18758 = vmatprep.subr.bf16.mxu0 %v20661_v36  ;;  %18779 = vmatpush3.bf16.msra.mxu1 %v20660_v31  ;;  %v20695_v28 = vld [vmem:[%s21865_s7 + $0x14f0] sm:$0xff]   ;;  %v321_v36 = vld [vmem:[%s21883_s27 + $0xa0] sm:$0xff] }
 0x302   : > { %v13748_v33 = vadd.f32 %v18456_v26, %v22578_v49  ;;  %v18480_v37 = vpop.f32.mrb[51].mxu1  ;;  %18780 = vmatprep.subr.bf16.mxu1 %v20662_v38  ;;  %v712_v49 = vcombine.high %v320_v46, %v320_v46  ;;  %v20696_v30 = vld [vmem:[%s21865_s7 + $0x1430] sm:$0xff]   ;;  %v20698_v32 = vld [vmem:[%s21865_s7 + $0x1478] sm:$0xff]   ;;  %v729_v38 = vcombine.high %v321_v36, %v321_v36  ;;  %v20705_v46 = vld [vmem:[%s21865_s7 + $0x1500] sm:$0xff]  }
 0x303   : > { %v20700_v35 = vld [vmem:[%s21865_s7 + $0x1438] sm:$0xff]   ;;  %v736_v37 = vrot.slane %v321_v36, %v21922_v42  ;;  %v20738_v36 = vld [vmem:[%s21865_s7 + $0x1600] sm:$0xff]  }
 0x304   : > { %v22616_v39 = vadd.f32 %v18478_v34, %v13748_v33  ;;  %18759 = vmatpush3.bf16.msra.mxu0 %v20663_v40  ;;  %v726_v52 = vrot.slane %v712_v49, %v21922_v42  ;;  %v20697_v33 = vld [vmem:[%s21865_s7 + $0x14b0] sm:$0xff]   ;;  %v20699_v34 = vld [vmem:[%s21865_s7 + $0x14f8] sm:$0xff]   ;;  %v20706_v49 = vld [vmem:[%s21865_s7 + $0x1580] sm:$0xff]  }
 0x305   : > { %18760 = vmatprep.subr.bf16.mxu0 %v20665_v43  ;;  %18781 = vmatpush3.bf16.msra.mxu1 %v20664_v41  ;;  %v20701_v40 = vld [vmem:[%s21865_s7 + $0x14b8] sm:$0xff]   ;;  %v744_v41 = vcombine.high %v736_v37, %v736_v37  ;;  %v743_v43 = vrot.slane %v729_v38, %v21922_v42 }
 0x306   : > { %18782 = vmatprep.subr.bf16.mxu1 %v20666_v44  ;;  %v728_v57 = vcombine.high %v726_v52, %v726_v52  ;;  %v1391_v59 = vpack.c.bf16 %v726_v52, %v726_v52  ;;  %v20704_v44 = vld [vmem:[%s21865_s7 + $0x15c0] sm:$0xff]  }
 0x307   : > { %v745_v48 = vcombine.high %v743_v43, %v743_v43 }
 0x308   : > { %18761 = vmatpush3.bf16.msra.mxu0 %v20667_v45  ;;  %v1392_v61 = vpack.c.bf16 %v728_v57, %v728_v57  ;;  %v1393_v45 = vpack.c.bf16 %v736_v37, %v736_v37  ;;  %v20712_v57 = vld [vmem:[%s21865_s7 + $0x15d0] sm:$0xff]  }
 0x309   : > { %18790 = vmatprep.subr.bf16.mxu0 %v20670_v50  ;;  %18783 = vmatpush3.bf16.msra.mxu1 %v20668_v47  ;;  %v1394_v47 = vpack.c.bf16 %v744_v41, %v744_v41  ;;  %v1395_v50 = vpack.c.bf16 %v743_v43, %v743_v43  ;;  %v1396_v52 = vpack.c.bf16 %v745_v48, %v745_v48  ;;  %v20740_v41 = vld [vmem:[%s21865_s7 + $0x1648] sm:$0xff]   ;;  %v20745_v48 = vld [vmem:[%s21865_s7 + $0x16d0] sm:$0xff]  }
 0x30a   : > { %18812 = vmatprep.subr.bf16.mxu1 %v20671_v53  ;;  %14345 = vmatprep.mubr.bf16.mxu1 %v1392_v61  ;;  %v20708_v53 = vld [vmem:[%s21865_s7 + $0x15c8] sm:$0xff]   ;;  %v20716_v61 = vld [vmem:[%s21865_s7 + $0x15d8] sm:$0xff]  }
 0x30b   : > { %14306 = vmatmul.mubr.bf16.vlgmr.msra.gmra.mrb[76].mxu0 %v1389_v54  ;;  %v20709_v54 = vld [vmem:[%s21865_s7 + $0x1508] sm:$0xff]  }
 0x30c   : > { %18791 = vmatpush3.bf16.msra.mxu0 %v20672_v55  ;;  %14346 = vmatmul.mubr.bf16.vlgmr.msra.gmra.mrb[76].mxu1 %v1391_v59  ;;  %v20710_v55 = vld [vmem:[%s21865_s7 + $0x1588] sm:$0xff]   ;;  %v20714_v59 = vld [vmem:[%s21865_s7 + $0x1590] sm:$0xff]  }
 0x30d   : > { %18792 = vmatprep.subr.bf16.mxu0 %v20674_v60  ;;  %18813 = vmatpush3.bf16.msra.mxu1 %v20673_v58  ;;  %v20713_v58 = vld [vmem:[%s21865_s7 + $0x1510] sm:$0xff]   ;;  %v20715_v60 = vld [vmem:[%s21865_s7 + $0x1558] sm:$0xff]  }
 0x30e   : > { %18814 = vmatprep.subr.bf16.mxu1 %v20675_v62  ;;  %14385 = vmatprep.mubr.bf16.mxu0 %v1394_v47  ;;  %v20717_v62 = vld [vmem:[%s21865_s7 + $0x1518] sm:$0xff]   ;;  %v20744_v47 = vld [vmem:[%s21865_s7 + $0x1650] sm:$0xff]  }
 0x30f   : > { %14425 = vmatprep.mubr.bf16.mxu1 %v1396_v52  ;;  %v20749_v52 = vld [vmem:[%s21865_s7 + $0x16d8] sm:$0xff]  }
 0x310   : > { %18793 = vmatpush3.bf16.msra.mxu0 %v20676_v63  ;;  %v20718_v63 = vld [vmem:[%s21865_s7 + $0x1598] sm:$0xff]  }
 0x311   : > { %18794 = vmatprep.subr.bf16.mxu0 %v20678_v1  ;;  %18815 = vmatpush3.bf16.msra.mxu1 %v20677_v0  ;;  %v20719_v0 = vld [vmem:[%s21865_s7 + $0x1560] sm:$0xff]  }
 0x312   : > { %18816 = vmatprep.subr.bf16.mxu1 %v20679_v2  ;;  %v20720_v1 = vld [vmem:[%s21865_s7 + $0x15e0] sm:$0xff]  }
 0x313   : > { %v20721_v2 = vld [vmem:[%s21865_s7 + $0x1520] sm:$0xff]  }
 0x314   : > { %18795 = vmatpush3.bf16.msra.mxu0 %v20680_v3  ;;  %v20722_v3 = vld [vmem:[%s21865_s7 + $0x15a0] sm:$0xff]  }
 0x315   : > { %18796 = vmatprep.subr.bf16.mxu0 %v20682_v5  ;;  %18817 = vmatpush3.bf16.msra.mxu1 %v20681_v4  ;;  %v20723_v4 = vld [vmem:[%s21865_s7 + $0x1568] sm:$0xff]  }
 0x316   : > { %18818 = vmatprep.subr.bf16.mxu1 %v20683_v6  ;;  %v20724_v6 = vld [vmem:[%s21865_s7 + $0x15e8] sm:$0xff]  }
 0x318   : > { %18797 = vmatpush3.bf16.msra.mxu0 %v20684_v7 }
 0x319   : > { %18798 = vmatprep.subr.bf16.mxu0 %v20686_v9  ;;  %18819 = vmatpush3.bf16.msra.mxu1 %v20685_v8  ;;  %v20725_v8 = vld [vmem:[%s21865_s7 + $0x1528] sm:$0xff]  }
 0x31a   : > { %18820 = vmatprep.subr.bf16.mxu1 %v20687_v10 }
 0x31c   : > { %18799 = vmatpush3.bf16.msra.mxu0 %v20688_v11 }
 0x31d   : > { %18800 = vmatprep.subr.bf16.mxu0 %v20690_v13  ;;  %18821 = vmatpush3.bf16.msra.mxu1 %v20689_v12  ;;  %v20726_v12 = vld [vmem:[%s21865_s7 + $0x15a8] sm:$0xff]   ;;  %v20727_v13 = vld [vmem:[%s21865_s7 + $0x1570] sm:$0xff]  }
 0x31e   : > { %v18498_v14 = vpop.f32.mrb[52].mxu0  ;;  %18822 = vmatprep.subr.bf16.mxu1 %v20691_v15 }
 0x31f   : > { %v18499_v16 = vpop.f32.mrb[53].mxu0  ;;  %v18520_v18 = vpop.f32.mrb[52].mxu1 }
 0x320   : > { %v18500_v19 = vadd.f32 %v18499_v16, %v18498_v14  ;;  %v18501_v20 = vpop.f32.mrb[54].mxu0  ;;  %v18521_v21 = vpop.f32.mrb[53].mxu1  ;;  %18801 = vmatpush3.bf16.msra.mxu0 %v20692_v17 }
 0x321   : > { %v18502_v23 = vpop.f32.mrb[55].mxu0  ;;  %v18522_v26 = vadd.f32 %v18521_v21, %v18520_v18  ;;  %v18523_v27 = vpop.f32.mrb[54].mxu1  ;;  %18802 = vmatprep.subr.bf16.mxu0 %v20694_v24  ;;  %18823 = vmatpush3.bf16.msra.mxu1 %v20693_v22  ;;  %v20729_v21 = vld [vmem:[%s21865_s7 + $0x1530] sm:$0xff]   ;;  %v20731_v24 = vld [vmem:[%s21865_s7 + $0x1578] sm:$0xff]  }
 0x322   : > { %v13828_v25 = vadd.f32 %v18500_v19, %v22616_v39  ;;  %v18524_v29 = vpop.f32.mrb[55].mxu1  ;;  %18824 = vmatprep.subr.bf16.mxu1 %v20695_v28  ;;  %v20703_v39 = vld [vmem:[%s21865_s7 + $0x1540] sm:$0xff]   ;;  %v20728_v19 = vld [vmem:[%s21865_s7 + $0x15f0] sm:$0xff]  }
 0x323   : > { %v20730_v23 = vld [vmem:[%s21865_s7 + $0x15b0] sm:$0xff]   ;;  %v322_v27 = vld [vmem:[%s21883_s27 + $0xa8] sm:$0xff] }
 0x324   : > { %v22655_v31 = vadd.f32 %v18522_v26, %v13828_v25  ;;  %18803 = vmatpush3.bf16.msra.mxu0 %v20696_v30  ;;  %v20732_v25 = vld [vmem:[%s21865_s7 + $0x15f8] sm:$0xff]   ;;  %v753_v28 = vrot.slane %v322_v27, %v21922_v42  ;;  %v746_v29 = vcombine.high %v322_v27, %v322_v27  ;;  %v20736_v30 = vld [vmem:[%s21865_s7 + $0x1640] sm:$0xff]  }
 0x325   : > { %18804 = vmatprep.subr.bf16.mxu0 %v20698_v32  ;;  %18825 = vmatpush3.bf16.msra.mxu1 %v20697_v33  ;;  %v20733_v26 = vld [vmem:[%s21865_s7 + $0x1538] sm:$0xff]   ;;  %v20771_v27 = vld [vmem:[%s21865_s7 + $0x1700] sm:$0xff]  }
 0x326   : > { %18826 = vmatprep.subr.bf16.mxu1 %v20699_v34  ;;  %v761_v32 = vcombine.high %v753_v28, %v753_v28  ;;  %v760_v33 = vrot.slane %v746_v29, %v21922_v42  ;;  %v20737_v34 = vld [vmem:[%s21865_s7 + $0x16c0] sm:$0xff]  }
 0x328   : > { %18805 = vmatpush3.bf16.msra.mxu0 %v20700_v35  ;;  %v1397_v35 = vpack.c.bf16 %v753_v28, %v753_v28  ;;  %v1398_v37 = vpack.c.bf16 %v761_v32, %v761_v32  ;;  %v762_v38 = vcombine.high %v760_v33, %v760_v33  ;;  %v20773_v32 = vld [vmem:[%s21865_s7 + $0x1748] sm:$0xff]  }
 0x329   : > { %18834 = vmatprep.subr.bf16.mxu0 %v20703_v39  ;;  %18827 = vmatpush3.bf16.msra.mxu1 %v20701_v40  ;;  %v20739_v39 = vld [vmem:[%s21865_s7 + $0x1680] sm:$0xff]   ;;  %v1399_v40 = vpack.c.bf16 %v760_v33, %v760_v33 }
 0x32a   : > { %18856 = vmatprep.subr.bf16.mxu1 %v20704_v44  ;;  %v1400_v43 = vpack.c.bf16 %v762_v38, %v762_v38  ;;  %v20741_v44 = vld [vmem:[%s21865_s7 + $0x16c8] sm:$0xff]   ;;  %v20778_v38 = vld [vmem:[%s21865_s7 + $0x17d0] sm:$0xff]  }
 0x32b   : > { %14386 = vmatmul.mubr.bf16.vlgmr.msra.gmra.mrb[80].mxu0 %v1393_v45  ;;  %v20742_v45 = vld [vmem:[%s21865_s7 + $0x1608] sm:$0xff]  }
 0x32c   : > { %18835 = vmatpush3.bf16.msra.mxu0 %v20705_v46  ;;  %14426 = vmatmul.mubr.bf16.vlgmr.msra.gmra.mrb[80].mxu1 %v1395_v50  ;;  %v20743_v46 = vld [vmem:[%s21865_s7 + $0x1688] sm:$0xff]   ;;  %v20747_v50 = vld [vmem:[%s21865_s7 + $0x1690] sm:$0xff]  }
 0x32d   : > { %18836 = vmatprep.subr.bf16.mxu0 %v20707_v51  ;;  %18857 = vmatpush3.bf16.msra.mxu1 %v20706_v49  ;;  %v20746_v49 = vld [vmem:[%s21865_s7 + $0x1610] sm:$0xff]   ;;  %v20748_v51 = vld [vmem:[%s21865_s7 + $0x1658] sm:$0xff]  }
 0x32e   : > { %18858 = vmatprep.subr.bf16.mxu1 %v20708_v53  ;;  %14465 = vmatprep.mubr.bf16.mxu0 %v1398_v37  ;;  %v20750_v53 = vld [vmem:[%s21865_s7 + $0x1618] sm:$0xff]   ;;  %v20777_v37 = vld [vmem:[%s21865_s7 + $0x1750] sm:$0xff]  }
 0x32f   : > { %14505 = vmatprep.mubr.bf16.mxu1 %v1400_v43  ;;  %v20782_v43 = vld [vmem:[%s21865_s7 + $0x17d8] sm:$0xff]  }
 0x330   : > { %18837 = vmatpush3.bf16.msra.mxu0 %v20709_v54  ;;  %v20751_v54 = vld [vmem:[%s21865_s7 + $0x1698] sm:$0xff]  }
 0x331   : > { %18838 = vmatprep.subr.bf16.mxu0 %v20711_v56  ;;  %18859 = vmatpush3.bf16.msra.mxu1 %v20710_v55  ;;  %v20752_v55 = vld [vmem:[%s21865_s7 + $0x1660] sm:$0xff]  }
 0x332   : > { %18860 = vmatprep.subr.bf16.mxu1 %v20712_v57  ;;  %v20753_v56 = vld [vmem:[%s21865_s7 + $0x16e0] sm:$0xff]  }
 0x333   : > { %v20754_v57 = vld [vmem:[%s21865_s7 + $0x1620] sm:$0xff]  }
 0x334   : > { %18839 = vmatpush3.bf16.msra.mxu0 %v20713_v58  ;;  %v20755_v58 = vld [vmem:[%s21865_s7 + $0x16a0] sm:$0xff]  }
 0x335   : > { %18840 = vmatprep.subr.bf16.mxu0 %v20715_v60  ;;  %18861 = vmatpush3.bf16.msra.mxu1 %v20714_v59  ;;  %v20756_v59 = vld [vmem:[%s21865_s7 + $0x1668] sm:$0xff]  }
 0x336   : > { %18862 = vmatprep.subr.bf16.mxu1 %v20716_v61  ;;  %v20757_v61 = vld [vmem:[%s21865_s7 + $0x16e8] sm:$0xff]  }
 0x338   : > { %18841 = vmatpush3.bf16.msra.mxu0 %v20717_v62 }
 0x339   : > { %18842 = vmatprep.subr.bf16.mxu0 %v20719_v0  ;;  %18863 = vmatpush3.bf16.msra.mxu1 %v20718_v63  ;;  %v20758_v63 = vld [vmem:[%s21865_s7 + $0x1628] sm:$0xff]  }
 0x33a   : > { %18864 = vmatprep.subr.bf16.mxu1 %v20720_v1 }
 0x33c   : > { %18843 = vmatpush3.bf16.msra.mxu0 %v20721_v2 }
 0x33d   : > { %18844 = vmatprep.subr.bf16.mxu0 %v20723_v4  ;;  %18865 = vmatpush3.bf16.msra.mxu1 %v20722_v3  ;;  %v20759_v3 = vld [vmem:[%s21865_s7 + $0x16a8] sm:$0xff]   ;;  %v20760_v4 = vld [vmem:[%s21865_s7 + $0x1670] sm:$0xff]  }
 0x33e   : > { %v18542_v5 = vpop.f32.mrb[56].mxu0  ;;  %18866 = vmatprep.subr.bf16.mxu1 %v20724_v6 }
 0x33f   : > { %v18543_v7 = vpop.f32.mrb[57].mxu0  ;;  %v18564_v9 = vpop.f32.mrb[56].mxu1 }
 0x340   : > { %v18544_v10 = vadd.f32 %v18543_v7, %v18542_v5  ;;  %v18545_v11 = vpop.f32.mrb[58].mxu0  ;;  %v18565_v14 = vpop.f32.mrb[57].mxu1  ;;  %18845 = vmatpush3.bf16.msra.mxu0 %v20725_v8 }
 0x341   : > { %v18546_v15 = vpop.f32.mrb[59].mxu0  ;;  %v18566_v17 = vadd.f32 %v18565_v14, %v18564_v9  ;;  %v18567_v18 = vpop.f32.mrb[58].mxu1  ;;  %18846 = vmatprep.subr.bf16.mxu0 %v20727_v13  ;;  %18867 = vmatpush3.bf16.msra.mxu1 %v20726_v12  ;;  %v20762_v12 = vld [vmem:[%s21865_s7 + $0x1630] sm:$0xff]  }
 0x342   : > { %v13908_v16 = vadd.f32 %v18544_v10, %v22655_v31  ;;  %v18568_v20 = vpop.f32.mrb[59].mxu1  ;;  %18868 = vmatprep.subr.bf16.mxu1 %v20728_v19  ;;  %v20734_v31 = vld [vmem:[%s21865_s7 + $0x15b8] sm:$0xff]   ;;  %v20761_v10 = vld [vmem:[%s21865_s7 + $0x16f0] sm:$0xff]  }
 0x343   : > { %v20763_v14 = vld [vmem:[%s21865_s7 + $0x16b0] sm:$0xff]   ;;  %v20764_v15 = vld [vmem:[%s21865_s7 + $0x1678] sm:$0xff]  }
 0x344   : > { %v22693_v22 = vadd.f32 %v18566_v17, %v13908_v16  ;;  %18847 = vmatpush3.bf16.msra.mxu0 %v20729_v21  ;;  %v20765_v16 = vld [vmem:[%s21865_s7 + $0x16f8] sm:$0xff]   ;;  %v323_v18 = vld [vmem:[%s21883_s27 + $0xb0] sm:$0xff] }
 0x345   : > { %18848 = vmatprep.subr.bf16.mxu0 %v20731_v24  ;;  %18869 = vmatpush3.bf16.msra.mxu1 %v20730_v23  ;;  %v20766_v17 = vld [vmem:[%s21865_s7 + $0x1638] sm:$0xff]   ;;  %v770_v20 = vrot.slane %v323_v18, %v21922_v42  ;;  %v763_v21 = vcombine.high %v323_v18, %v323_v18  ;;  %v20804_v18 = vld [vmem:[%s21865_s7 + $0x1800] sm:$0xff]  }
 0x346   : > { %18870 = vmatprep.subr.bf16.mxu1 %v20732_v25  ;;  %v20767_v19 = vld [vmem:[%s21865_s7 + $0x16b8] sm:$0xff]   ;;  %v20770_v25 = vld [vmem:[%s21865_s7 + $0x17c0] sm:$0xff]  }
 0x347   : > { %v778_v23 = vcombine.high %v770_v20, %v770_v20  ;;  %v777_v24 = vrot.slane %v763_v21, %v21922_v42  ;;  %v20805_v21 = vld [vmem:[%s21865_s7 + $0x1880] sm:$0xff]  }
 0x348   : > { %18849 = vmatpush3.bf16.msra.mxu0 %v20733_v26  ;;  %v1401_v26 = vpack.c.bf16 %v770_v20, %v770_v20 }
 0x349   : > { %18878 = vmatprep.subr.bf16.mxu0 %v20736_v30  ;;  %18871 = vmatpush3.bf16.msra.mxu1 %v20734_v31  ;;  %v1402_v28 = vpack.c.bf16 %v778_v23, %v778_v23  ;;  %v779_v29 = vcombine.high %v777_v24, %v777_v24  ;;  %v20772_v30 = vld [vmem:[%s21865_s7 + $0x1780] sm:$0xff]   ;;  %v1403_v31 = vpack.c.bf16 %v777_v24, %v777_v24  ;;  %v20806_v23 = vld [vmem:[%s21865_s7 + $0x1848] sm:$0xff]  }
 0x34a   : > { %18900 = vmatprep.subr.bf16.mxu1 %v20737_v34  ;;  %v20774_v34 = vld [vmem:[%s21865_s7 + $0x17c8] sm:$0xff]  }
 0x34b   : > { %14466 = vmatmul.mubr.bf16.vlgmr.msra.gmra.mrb[84].mxu0 %v1397_v35  ;;  %v1404_v33 = vpack.c.bf16 %v779_v29, %v779_v29  ;;  %v20775_v35 = vld [vmem:[%s21865_s7 + $0x1708] sm:$0xff]   ;;  %v20811_v29 = vld [vmem:[%s21865_s7 + $0x18d0] sm:$0xff]  }
 0x34c   : > { %18879 = vmatpush3.bf16.msra.mxu0 %v20738_v36  ;;  %14506 = vmatmul.mubr.bf16.vlgmr.msra.gmra.mrb[84].mxu1 %v1399_v40  ;;  %v20776_v36 = vld [vmem:[%s21865_s7 + $0x1788] sm:$0xff]   ;;  %v20780_v40 = vld [vmem:[%s21865_s7 + $0x1790] sm:$0xff]  }
 0x34d   : > { %18880 = vmatprep.subr.bf16.mxu0 %v20740_v41  ;;  %18901 = vmatpush3.bf16.msra.mxu1 %v20739_v39  ;;  %v20779_v39 = vld [vmem:[%s21865_s7 + $0x1710] sm:$0xff]   ;;  %v20781_v41 = vld [vmem:[%s21865_s7 + $0x1758] sm:$0xff]  }
 0x34e   : > { %18902 = vmatprep.subr.bf16.mxu1 %v20741_v44  ;;  %14545 = vmatprep.mubr.bf16.mxu0 %v1402_v28  ;;  %v20783_v44 = vld [vmem:[%s21865_s7 + $0x1718] sm:$0xff]   ;;  %v20810_v28 = vld [vmem:[%s21865_s7 + $0x1850] sm:$0xff]  }
 0x34f   : > { %14585 = vmatprep.mubr.bf16.mxu1 %v1404_v33  ;;  %v20815_v33 = vld [vmem:[%s21865_s7 + $0x18d8] sm:$0xff]  }
 0x350   : > { %18881 = vmatpush3.bf16.msra.mxu0 %v20742_v45  ;;  %v20784_v45 = vld [vmem:[%s21865_s7 + $0x1798] sm:$0xff]  }
 0x351   : > { %18882 = vmatprep.subr.bf16.mxu0 %v20744_v47  ;;  %18903 = vmatpush3.bf16.msra.mxu1 %v20743_v46  ;;  %v20785_v46 = vld [vmem:[%s21865_s7 + $0x1760] sm:$0xff]  }
 0x352   : > { %18904 = vmatprep.subr.bf16.mxu1 %v20745_v48  ;;  %v20786_v47 = vld [vmem:[%s21865_s7 + $0x17e0] sm:$0xff]  }
 0x353   : > { %v20787_v48 = vld [vmem:[%s21865_s7 + $0x1720] sm:$0xff]  }
 0x354   : > { %18883 = vmatpush3.bf16.msra.mxu0 %v20746_v49  ;;  %v20788_v49 = vld [vmem:[%s21865_s7 + $0x17a0] sm:$0xff]  }
 0x355   : > { %18884 = vmatprep.subr.bf16.mxu0 %v20748_v51  ;;  %18905 = vmatpush3.bf16.msra.mxu1 %v20747_v50  ;;  %v20789_v50 = vld [vmem:[%s21865_s7 + $0x1768] sm:$0xff]  }
 0x356   : > { %18906 = vmatprep.subr.bf16.mxu1 %v20749_v52  ;;  %v20790_v52 = vld [vmem:[%s21865_s7 + $0x17e8] sm:$0xff]  }
 0x358   : > { %18885 = vmatpush3.bf16.msra.mxu0 %v20750_v53 }
 0x359   : > { %18886 = vmatprep.subr.bf16.mxu0 %v20752_v55  ;;  %18907 = vmatpush3.bf16.msra.mxu1 %v20751_v54  ;;  %v20791_v54 = vld [vmem:[%s21865_s7 + $0x1728] sm:$0xff]  }
 0x35a   : > { %18908 = vmatprep.subr.bf16.mxu1 %v20753_v56 }
 0x35c   : > { %18887 = vmatpush3.bf16.msra.mxu0 %v20754_v57 }
 0x35d   : > { %18888 = vmatprep.subr.bf16.mxu0 %v20756_v59  ;;  %18909 = vmatpush3.bf16.msra.mxu1 %v20755_v58  ;;  %v20792_v59 = vld [vmem:[%s21865_s7 + $0x17a8] sm:$0xff]  }
 0x35e   : > { %v18586_v60 = vpop.f32.mrb[60].mxu0  ;;  %18910 = vmatprep.subr.bf16.mxu1 %v20757_v61  ;;  %v20793_v61 = vld [vmem:[%s21865_s7 + $0x1770] sm:$0xff]  }
 0x35f   : > { %v18587_v62 = vpop.f32.mrb[61].mxu0  ;;  %v18608_v0 = vpop.f32.mrb[60].mxu1 }
 0x360   : > { %v18588_v1 = vadd.f32 %v18587_v62, %v18586_v60  ;;  %v18589_v2 = vpop.f32.mrb[62].mxu0  ;;  %v18609_v5 = vpop.f32.mrb[61].mxu1  ;;  %18889 = vmatpush3.bf16.msra.mxu0 %v20758_v63 }
 0x361   : > { %v18590_v6 = vpop.f32.mrb[63].mxu0  ;;  %v18610_v8 = vadd.f32 %v18609_v5, %v18608_v0  ;;  %v18611_v9 = vpop.f32.mrb[62].mxu1  ;;  %18890 = vmatprep.subr.bf16.mxu0 %v20760_v4  ;;  %18911 = vmatpush3.bf16.msra.mxu1 %v20759_v3  ;;  %v20795_v3 = vld [vmem:[%s21865_s7 + $0x1730] sm:$0xff]   ;;  %v20797_v5 = vld [vmem:[%s21865_s7 + $0x1778] sm:$0xff]  }
 0x362   : > { %v13988_v7 = vadd.f32 %v18588_v1, %v22693_v22  ;;  %v18612_v11 = vpop.f32.mrb[63].mxu1  ;;  %18912 = vmatprep.subr.bf16.mxu1 %v20761_v10  ;;  %v20769_v22 = vld [vmem:[%s21865_s7 + $0x1740] sm:$0xff]   ;;  %v20794_v1 = vld [vmem:[%s21865_s7 + $0x17f0] sm:$0xff]  }
 0x363   : > { %v20796_v6 = vld [vmem:[%s21865_s7 + $0x17b0] sm:$0xff]  }
 0x364   : > { %v22731_v13 = vadd.f32 %v18610_v8, %v13988_v7  ;;  %18891 = vmatpush3.bf16.msra.mxu0 %v20762_v12  ;;  %v20798_v7 = vld [vmem:[%s21865_s7 + $0x17f8] sm:$0xff]   ;;  %v20802_v12 = vld [vmem:[%s21865_s7 + $0x1840] sm:$0xff]  }
 0x365   : > { %18892 = vmatprep.subr.bf16.mxu0 %v20764_v15  ;;  %18913 = vmatpush3.bf16.msra.mxu1 %v20763_v14  ;;  %v20799_v8 = vld [vmem:[%s21865_s7 + $0x1738] sm:$0xff]  }
 0x366   : > { %18914 = vmatprep.subr.bf16.mxu1 %v20765_v16  ;;  %v324_v9 = vld [vmem:[%s21883_s27 + $0xb8] sm:$0xff]  ;;  %v20803_v16 = vld [vmem:[%s21865_s7 + $0x18c0] sm:$0xff]  }
 0x367   : > { %v787_v10 = vrot.slane %v324_v9, %v21922_v42  ;;  %v780_v11 = vcombine.high %v324_v9, %v324_v9  ;;  %v20837_v9 = vld [vmem:[%s21865_s7 + $0x1900] sm:$0xff]  }
 0x368   : > { %18893 = vmatpush3.bf16.msra.mxu0 %v20766_v17 }
 0x369   : > { %18922 = vmatprep.subr.bf16.mxu0 %v20769_v22  ;;  %18915 = vmatpush3.bf16.msra.mxu1 %v20767_v19  ;;  %v795_v14 = vcombine.high %v787_v10, %v787_v10  ;;  %v794_v15 = vrot.slane %v780_v11, %v21922_v42  ;;  %v1405_v17 = vpack.c.bf16 %v787_v10, %v787_v10 }
 0x36a   : > { %18944 = vmatprep.subr.bf16.mxu1 %v20770_v25  ;;  %v20807_v25 = vld [vmem:[%s21865_s7 + $0x18c8] sm:$0xff]  }
 0x36b   : > { %14546 = vmatmul.mubr.bf16.vlgmr.msra.gmra.mrb[88].mxu0 %v1401_v26  ;;  %v1406_v19 = vpack.c.bf16 %v795_v14, %v795_v14  ;;  %v796_v20 = vcombine.high %v794_v15, %v794_v15  ;;  %v1407_v22 = vpack.c.bf16 %v794_v15, %v794_v15  ;;  %v20808_v26 = vld [vmem:[%s21865_s7 + $0x1808] sm:$0xff]  }
 0x36c   : > { %18923 = vmatpush3.bf16.msra.mxu0 %v20771_v27  ;;  %14586 = vmatmul.mubr.bf16.vlgmr.msra.gmra.mrb[88].mxu1 %v1403_v31  ;;  %v20809_v27 = vld [vmem:[%s21865_s7 + $0x1888] sm:$0xff]   ;;  %v20813_v31 = vld [vmem:[%s21865_s7 + $0x1890] sm:$0xff]  }
 0x36d   : > { %18924 = vmatprep.subr.bf16.mxu0 %v20773_v32  ;;  %18945 = vmatpush3.bf16.msra.mxu1 %v20772_v30  ;;  %v1408_v24 = vpack.c.bf16 %v796_v20, %v796_v20  ;;  %v20812_v30 = vld [vmem:[%s21865_s7 + $0x1810] sm:$0xff]   ;;  %v20814_v32 = vld [vmem:[%s21865_s7 + $0x1858] sm:$0xff]   ;;  %v20839_v14 = vld [vmem:[%s21865_s7 + $0x1948] sm:$0xff]  }
 0x36e   : > { %18946 = vmatprep.subr.bf16.mxu1 %v20774_v34  ;;  %14625 = vmatprep.mubr.bf16.mxu0 %v1406_v19  ;;  %v20816_v34 = vld [vmem:[%s21865_s7 + $0x1818] sm:$0xff]   ;;  %v20843_v19 = vld [vmem:[%s21865_s7 + $0x1950] sm:$0xff]  }
 0x36f   : > { %14665 = vmatprep.mubr.bf16.mxu1 %v1408_v24  ;;  %v20844_v20 = vld [vmem:[%s21865_s7 + $0x19d0] sm:$0xff]   ;;  %v20848_v24 = vld [vmem:[%s21865_s7 + $0x19d8] sm:$0xff]  }
 0x370   : > { %18925 = vmatpush3.bf16.msra.mxu0 %v20775_v35  ;;  %v20817_v35 = vld [vmem:[%s21865_s7 + $0x1898] sm:$0xff]  }
 0x371   : > { %18926 = vmatprep.subr.bf16.mxu0 %v20777_v37  ;;  %18947 = vmatpush3.bf16.msra.mxu1 %v20776_v36  ;;  %v20818_v36 = vld [vmem:[%s21865_s7 + $0x1860] sm:$0xff]  }
 0x372   : > { %18948 = vmatprep.subr.bf16.mxu1 %v20778_v38  ;;  %v20819_v37 = vld [vmem:[%s21865_s7 + $0x18e0] sm:$0xff]  }
 0x373   : > { %v20820_v38 = vld [vmem:[%s21865_s7 + $0x1820] sm:$0xff]  }
 0x374   : > { %18927 = vmatpush3.bf16.msra.mxu0 %v20779_v39  ;;  %v20821_v39 = vld [vmem:[%s21865_s7 + $0x18a0] sm:$0xff]  }
 0x375   : > { %18928 = vmatprep.subr.bf16.mxu0 %v20781_v41  ;;  %18949 = vmatpush3.bf16.msra.mxu1 %v20780_v40  ;;  %v20822_v40 = vld [vmem:[%s21865_s7 + $0x1868] sm:$0xff]  }
 0x376   : > { %18950 = vmatprep.subr.bf16.mxu1 %v20782_v43  ;;  %v20823_v43 = vld [vmem:[%s21865_s7 + $0x18e8] sm:$0xff]  }
 0x378   : > { %18929 = vmatpush3.bf16.msra.mxu0 %v20783_v44 }
 0x379   : > { %18930 = vmatprep.subr.bf16.mxu0 %v20785_v46  ;;  %18951 = vmatpush3.bf16.msra.mxu1 %v20784_v45  ;;  %v20824_v45 = vld [vmem:[%s21865_s7 + $0x1828] sm:$0xff]  }
 0x37a   : > { %18952 = vmatprep.subr.bf16.mxu1 %v20786_v47 }
 0x37c   : > { %18931 = vmatpush3.bf16.msra.mxu0 %v20787_v48 }
 0x37d   : > { %18932 = vmatprep.subr.bf16.mxu0 %v20789_v50  ;;  %18953 = vmatpush3.bf16.msra.mxu1 %v20788_v49  ;;  %v20825_v49 = vld [vmem:[%s21865_s7 + $0x18a8] sm:$0xff]   ;;  %v20826_v50 = vld [vmem:[%s21865_s7 + $0x1870] sm:$0xff]  }
 0x37e   : > { %v18630_v51 = vpop.f32.mrb[64].mxu0  ;;  %18954 = vmatprep.subr.bf16.mxu1 %v20790_v52 }
 0x37f   : > { %v18631_v53 = vpop.f32.mrb[65].mxu0  ;;  %v18652_v55 = vpop.f32.mrb[64].mxu1 }
 0x380   : > { %v18632_v56 = vadd.f32 %v18631_v53, %v18630_v51  ;;  %v18633_v57 = vpop.f32.mrb[66].mxu0  ;;  %v18653_v58 = vpop.f32.mrb[65].mxu1  ;;  %18933 = vmatpush3.bf16.msra.mxu0 %v20791_v54 }
 0x381   : > { %v18634_v60 = vpop.f32.mrb[67].mxu0  ;;  %v18654_v63 = vadd.f32 %v18653_v58, %v18652_v55  ;;  %v18655_v0 = vpop.f32.mrb[66].mxu1  ;;  %18934 = vmatprep.subr.bf16.mxu0 %v20793_v61  ;;  %18955 = vmatpush3.bf16.msra.mxu1 %v20792_v59  ;;  %v20828_v58 = vld [vmem:[%s21865_s7 + $0x1830] sm:$0xff]   ;;  %v20830_v61 = vld [vmem:[%s21865_s7 + $0x1878] sm:$0xff]  }
 0x382   : > { %v14068_v62 = vadd.f32 %v18632_v56, %v22731_v13  ;;  %v18656_v2 = vpop.f32.mrb[67].mxu1  ;;  %18956 = vmatprep.subr.bf16.mxu1 %v20794_v1  ;;  %v20800_v13 = vld [vmem:[%s21865_s7 + $0x17b8] sm:$0xff]   ;;  %v20827_v56 = vld [vmem:[%s21865_s7 + $0x18f0] sm:$0xff]  }
 0x383   : > { %v20829_v60 = vld [vmem:[%s21865_s7 + $0x18b0] sm:$0xff]   ;;  %v325_v0 = vld [vmem:[%s21883_s27 + $0xc0] sm:$0xff] }
 0x384   : > { %v22769_v4 = vadd.f32 %v18654_v63, %v14068_v62  ;;  %18935 = vmatpush3.bf16.msra.mxu0 %v20795_v3  ;;  %v20831_v62 = vld [vmem:[%s21865_s7 + $0x18f8] sm:$0xff]   ;;  %v804_v1 = vrot.slane %v325_v0, %v21922_v42  ;;  %v797_v2 = vcombine.high %v325_v0, %v325_v0  ;;  %v20835_v3 = vld [vmem:[%s21865_s7 + $0x1940] sm:$0xff]  }
 0x385   : > { %18936 = vmatprep.subr.bf16.mxu0 %v20797_v5  ;;  %18957 = vmatpush3.bf16.msra.mxu1 %v20796_v6  ;;  %v20832_v63 = vld [vmem:[%s21865_s7 + $0x1838] sm:$0xff]   ;;  %v20870_v0 = vld [vmem:[%s21865_s7 + $0x1a00] sm:$0xff]  }
 0x386   : > { %18958 = vmatprep.subr.bf16.mxu1 %v20798_v7  ;;  %v812_v5 = vcombine.high %v804_v1, %v804_v1  ;;  %v811_v6 = vrot.slane %v797_v2, %v21922_v42  ;;  %v20836_v7 = vld [vmem:[%s21865_s7 + $0x19c0] sm:$0xff]  }
 0x388   : > { %18937 = vmatpush3.bf16.msra.mxu0 %v20799_v8  ;;  %v1409_v8 = vpack.c.bf16 %v804_v1, %v804_v1  ;;  %v1410_v10 = vpack.c.bf16 %v812_v5, %v812_v5  ;;  %v813_v11 = vcombine.high %v811_v6, %v811_v6  ;;  %v20872_v5 = vld [vmem:[%s21865_s7 + $0x1a48] sm:$0xff]  }
 0x389   : > { %18966 = vmatprep.subr.bf16.mxu0 %v20802_v12  ;;  %18959 = vmatpush3.bf16.msra.mxu1 %v20800_v13  ;;  %v20838_v12 = vld [vmem:[%s21865_s7 + $0x1980] sm:$0xff]   ;;  %v1411_v13 = vpack.c.bf16 %v811_v6, %v811_v6 }
 0x38a   : > { %18988 = vmatprep.subr.bf16.mxu1 %v20803_v16  ;;  %v1412_v15 = vpack.c.bf16 %v813_v11, %v813_v11  ;;  %v20840_v16 = vld [vmem:[%s21865_s7 + $0x19c8] sm:$0xff]   ;;  %v20877_v11 = vld [vmem:[%s21865_s7 + $0x1ad0] sm:$0xff]  }
 0x38b   : > { %14626 = vmatmul.mubr.bf16.vlgmr.msra.gmra.mrb[92].mxu0 %v1405_v17  ;;  %v20841_v17 = vld [vmem:[%s21865_s7 + $0x1908] sm:$0xff]  }
 0x38c   : > { %18967 = vmatpush3.bf16.msra.mxu0 %v20804_v18  ;;  %14666 = vmatmul.mubr.bf16.vlgmr.msra.gmra.mrb[92].mxu1 %v1407_v22  ;;  %v20842_v18 = vld [vmem:[%s21865_s7 + $0x1988] sm:$0xff]   ;;  %v20846_v22 = vld [vmem:[%s21865_s7 + $0x1990] sm:$0xff]  }
 0x38d   : > { %18968 = vmatprep.subr.bf16.mxu0 %v20806_v23  ;;  %18989 = vmatpush3.bf16.msra.mxu1 %v20805_v21  ;;  %v20845_v21 = vld [vmem:[%s21865_s7 + $0x1910] sm:$0xff]   ;;  %v20847_v23 = vld [vmem:[%s21865_s7 + $0x1958] sm:$0xff]  }
 0x38e   : > { %18990 = vmatprep.subr.bf16.mxu1 %v20807_v25  ;;  %14705 = vmatprep.mubr.bf16.mxu0 %v1410_v10  ;;  %v20849_v25 = vld [vmem:[%s21865_s7 + $0x1918] sm:$0xff]   ;;  %v20876_v10 = vld [vmem:[%s21865_s7 + $0x1a50] sm:$0xff]  }
 0x38f   : > { %14745 = vmatprep.mubr.bf16.mxu1 %v1412_v15  ;;  %v20881_v15 = vld [vmem:[%s21865_s7 + $0x1ad8] sm:$0xff]  }
 0x390   : > { %18969 = vmatpush3.bf16.msra.mxu0 %v20808_v26  ;;  %v20850_v26 = vld [vmem:[%s21865_s7 + $0x1998] sm:$0xff]  }
 0x391   : > { %18970 = vmatprep.subr.bf16.mxu0 %v20810_v28  ;;  %18991 = vmatpush3.bf16.msra.mxu1 %v20809_v27  ;;  %v20851_v27 = vld [vmem:[%s21865_s7 + $0x1960] sm:$0xff]  }
 0x392   : > { %18992 = vmatprep.subr.bf16.mxu1 %v20811_v29  ;;  %v20852_v28 = vld [vmem:[%s21865_s7 + $0x19e0] sm:$0xff]  }
 0x393   : > { %v20853_v29 = vld [vmem:[%s21865_s7 + $0x1920] sm:$0xff]  }
 0x394   : > { %18971 = vmatpush3.bf16.msra.mxu0 %v20812_v30  ;;  %v20854_v30 = vld [vmem:[%s21865_s7 + $0x19a0] sm:$0xff]  }
 0x395   : > { %18972 = vmatprep.subr.bf16.mxu0 %v20814_v32  ;;  %18993 = vmatpush3.bf16.msra.mxu1 %v20813_v31  ;;  %v20855_v31 = vld [vmem:[%s21865_s7 + $0x1968] sm:$0xff]  }
 0x396   : > { %18994 = vmatprep.subr.bf16.mxu1 %v20815_v33  ;;  %v20856_v33 = vld [vmem:[%s21865_s7 + $0x19e8] sm:$0xff]  }
 0x398   : > { %18973 = vmatpush3.bf16.msra.mxu0 %v20816_v34 }
 0x399   : > { %18974 = vmatprep.subr.bf16.mxu0 %v20818_v36  ;;  %18995 = vmatpush3.bf16.msra.mxu1 %v20817_v35  ;;  %v20857_v35 = vld [vmem:[%s21865_s7 + $0x1928] sm:$0xff]  }
 0x39a   : > { %18996 = vmatprep.subr.bf16.mxu1 %v20819_v37 }
 0x39c   : > { %18975 = vmatpush3.bf16.msra.mxu0 %v20820_v38 }
 0x39d   : > { %18976 = vmatprep.subr.bf16.mxu0 %v20822_v40  ;;  %18997 = vmatpush3.bf16.msra.mxu1 %v20821_v39  ;;  %v20858_v39 = vld [vmem:[%s21865_s7 + $0x19a8] sm:$0xff]   ;;  %v20859_v40 = vld [vmem:[%s21865_s7 + $0x1970] sm:$0xff]  }
 0x39e   : > { %v18674_v41 = vpop.f32.mrb[68].mxu0  ;;  %18998 = vmatprep.subr.bf16.mxu1 %v20823_v43 }
 0x39f   : > { %v18675_v44 = vpop.f32.mrb[69].mxu0  ;;  %v18696_v46 = vpop.f32.mrb[68].mxu1 }
 0x3a0   : > { %v18676_v47 = vadd.f32 %v18675_v44, %v18674_v41  ;;  %v18677_v48 = vpop.f32.mrb[70].mxu0  ;;  %v18697_v51 = vpop.f32.mrb[69].mxu1  ;;  %18977 = vmatpush3.bf16.msra.mxu0 %v20824_v45 }
 0x3a1   : > { %v18678_v52 = vpop.f32.mrb[71].mxu0  ;;  %v18698_v54 = vadd.f32 %v18697_v51, %v18696_v46  ;;  %v18699_v55 = vpop.f32.mrb[70].mxu1  ;;  %18978 = vmatprep.subr.bf16.mxu0 %v20826_v50  ;;  %18999 = vmatpush3.bf16.msra.mxu1 %v20825_v49  ;;  %v20861_v49 = vld [vmem:[%s21865_s7 + $0x1930] sm:$0xff]  }
 0x3a2   : > { %v14148_v53 = vadd.f32 %v18676_v47, %v22769_v4  ;;  %v18700_v57 = vpop.f32.mrb[71].mxu1  ;;  %19000 = vmatprep.subr.bf16.mxu1 %v20827_v56  ;;  %v20833_v4 = vld [vmem:[%s21865_s7 + $0x18b8] sm:$0xff]   ;;  %v20860_v47 = vld [vmem:[%s21865_s7 + $0x19f0] sm:$0xff]   ;;  %v326_v55 = vld [vmem:[%s21883_s27 + $0xc8] sm:$0xff] }
 0x3a3   : > { %v20862_v51 = vld [vmem:[%s21865_s7 + $0x19b0] sm:$0xff]   ;;  %v20863_v52 = vld [vmem:[%s21865_s7 + $0x1978] sm:$0xff]   ;;  %v821_v57 = vrot.slane %v326_v55, %v21922_v42 }
 0x3a4   : > { %v22807_v59 = vadd.f32 %v18698_v54, %v14148_v53  ;;  %18979 = vmatpush3.bf16.msra.mxu0 %v20828_v58  ;;  %v20864_v53 = vld [vmem:[%s21865_s7 + $0x19f8] sm:$0xff]   ;;  %v814_v58 = vcombine.high %v326_v55, %v326_v55  ;;  %v20903_v55 = vld [vmem:[%s21865_s7 + $0x1b00] sm:$0xff]  }
 0x3a5   : > { %18980 = vmatprep.subr.bf16.mxu0 %v20830_v61  ;;  %19001 = vmatpush3.bf16.msra.mxu1 %v20829_v60  ;;  %v20865_v54 = vld [vmem:[%s21865_s7 + $0x1938] sm:$0xff]   ;;  %v829_v60 = vcombine.high %v821_v57, %v821_v57 }
 0x3a6   : > { %19002 = vmatprep.subr.bf16.mxu1 %v20831_v62  ;;  %v20866_v56 = vld [vmem:[%s21865_s7 + $0x19b8] sm:$0xff]   ;;  %v828_v61 = vrot.slane %v814_v58, %v21922_v42  ;;  %v20869_v62 = vld [vmem:[%s21865_s7 + $0x1ac0] sm:$0xff]  }
 0x3a7   : > { %v1414_v1 = vpack.c.bf16 %v829_v60, %v829_v60  ;;  %v20904_v58 = vld [vmem:[%s21865_s7 + $0x1b80] sm:$0xff]   ;;  %v20905_v60 = vld [vmem:[%s21865_s7 + $0x1b48] sm:$0xff]  }
 0x3a8   : > { %18981 = vmatpush3.bf16.msra.mxu0 %v20832_v63  ;;  %v1413_v63 = vpack.c.bf16 %v821_v57, %v821_v57  ;;  %v830_v2 = vcombine.high %v828_v61, %v828_v61 }
 0x3a9   : > { %19010 = vmatprep.subr.bf16.mxu0 %v20835_v3  ;;  %19003 = vmatpush3.bf16.msra.mxu1 %v20833_v4  ;;  %v20871_v3 = vld [vmem:[%s21865_s7 + $0x1a80] sm:$0xff]   ;;  %v1415_v4 = vpack.c.bf16 %v828_v61, %v828_v61 }
 0x3aa   : > { %19032 = vmatprep.subr.bf16.mxu1 %v20836_v7  ;;  %v1416_v6 = vpack.c.bf16 %v830_v2, %v830_v2  ;;  %v20873_v7 = vld [vmem:[%s21865_s7 + $0x1ac8] sm:$0xff]   ;;  %v20910_v2 = vld [vmem:[%s21865_s7 + $0x1bd0] sm:$0xff]  }
 0x3ab   : > { %14706 = vmatmul.mubr.bf16.vlgmr.msra.gmra.mrb[96].mxu0 %v1409_v8  ;;  %v20874_v8 = vld [vmem:[%s21865_s7 + $0x1a08] sm:$0xff]  }
 0x3ac   : > { %19011 = vmatpush3.bf16.msra.mxu0 %v20837_v9  ;;  %14746 = vmatmul.mubr.bf16.vlgmr.msra.gmra.mrb[96].mxu1 %v1411_v13  ;;  %v20875_v9 = vld [vmem:[%s21865_s7 + $0x1a88] sm:$0xff]   ;;  %v20879_v13 = vld [vmem:[%s21865_s7 + $0x1a90] sm:$0xff]  }
 0x3ad   : > { %19012 = vmatprep.subr.bf16.mxu0 %v20839_v14  ;;  %19033 = vmatpush3.bf16.msra.mxu1 %v20838_v12  ;;  %v20878_v12 = vld [vmem:[%s21865_s7 + $0x1a10] sm:$0xff]   ;;  %v20880_v14 = vld [vmem:[%s21865_s7 + $0x1a58] sm:$0xff]  }
 0x3ae   : > { %19034 = vmatprep.subr.bf16.mxu1 %v20840_v16  ;;  %14785 = vmatprep.mubr.bf16.mxu0 %v1414_v1  ;;  %v20882_v16 = vld [vmem:[%s21865_s7 + $0x1a18] sm:$0xff]   ;;  %v20909_v1 = vld [vmem:[%s21865_s7 + $0x1b50] sm:$0xff]  }
 0x3af   : > { %14825 = vmatprep.mubr.bf16.mxu1 %v1416_v6  ;;  %v20914_v6 = vld [vmem:[%s21865_s7 + $0x1bd8] sm:$0xff]  }
 0x3b0   : > { %19013 = vmatpush3.bf16.msra.mxu0 %v20841_v17  ;;  %v20883_v17 = vld [vmem:[%s21865_s7 + $0x1a98] sm:$0xff]  }
 0x3b1   : > { %19014 = vmatprep.subr.bf16.mxu0 %v20843_v19  ;;  %19035 = vmatpush3.bf16.msra.mxu1 %v20842_v18  ;;  %v20884_v18 = vld [vmem:[%s21865_s7 + $0x1a60] sm:$0xff]  }
 0x3b2   : > { %19036 = vmatprep.subr.bf16.mxu1 %v20844_v20  ;;  %v20885_v19 = vld [vmem:[%s21865_s7 + $0x1ae0] sm:$0xff]  }
 0x3b3   : > { %v20886_v20 = vld [vmem:[%s21865_s7 + $0x1a20] sm:$0xff]  }
 0x3b4   : > { %19015 = vmatpush3.bf16.msra.mxu0 %v20845_v21  ;;  %v20887_v21 = vld [vmem:[%s21865_s7 + $0x1aa0] sm:$0xff]  }
 0x3b5   : > { %19016 = vmatprep.subr.bf16.mxu0 %v20847_v23  ;;  %19037 = vmatpush3.bf16.msra.mxu1 %v20846_v22  ;;  %v20888_v22 = vld [vmem:[%s21865_s7 + $0x1a68] sm:$0xff]  }
 0x3b6   : > { %19038 = vmatprep.subr.bf16.mxu1 %v20848_v24  ;;  %v20889_v24 = vld [vmem:[%s21865_s7 + $0x1ae8] sm:$0xff]  }
 0x3b8   : > { %19017 = vmatpush3.bf16.msra.mxu0 %v20849_v25 }
 0x3b9   : > { %19018 = vmatprep.subr.bf16.mxu0 %v20851_v27  ;;  %19039 = vmatpush3.bf16.msra.mxu1 %v20850_v26  ;;  %v20890_v26 = vld [vmem:[%s21865_s7 + $0x1a28] sm:$0xff]  }
 0x3ba   : > { %19040 = vmatprep.subr.bf16.mxu1 %v20852_v28 }
 0x3bc   : > { %19019 = vmatpush3.bf16.msra.mxu0 %v20853_v29 }
 0x3bd   : > { %19020 = vmatprep.subr.bf16.mxu0 %v20855_v31  ;;  %19041 = vmatpush3.bf16.msra.mxu1 %v20854_v30  ;;  %v20891_v31 = vld [vmem:[%s21865_s7 + $0x1aa8] sm:$0xff]  }
 0x3be   : > { %v18718_v32 = vpop.f32.mrb[72].mxu0  ;;  %19042 = vmatprep.subr.bf16.mxu1 %v20856_v33  ;;  %v20892_v33 = vld [vmem:[%s21865_s7 + $0x1a70] sm:$0xff]  }
 0x3bf   : > { %v18719_v34 = vpop.f32.mrb[73].mxu0  ;;  %v18740_v36 = vpop.f32.mrb[72].mxu1 }
 0x3c0   : > { %v18720_v37 = vadd.f32 %v18719_v34, %v18718_v32  ;;  %v18721_v38 = vpop.f32.mrb[74].mxu0  ;;  %v18741_v41 = vpop.f32.mrb[73].mxu1  ;;  %19021 = vmatpush3.bf16.msra.mxu0 %v20857_v35 }
 0x3c1   : > { %v18722_v43 = vpop.f32.mrb[75].mxu0  ;;  %v18742_v45 = vadd.f32 %v18741_v41, %v18740_v36  ;;  %v18743_v46 = vpop.f32.mrb[74].mxu1  ;;  %19022 = vmatprep.subr.bf16.mxu0 %v20859_v40  ;;  %19043 = vmatpush3.bf16.msra.mxu1 %v20858_v39  ;;  %v20894_v39 = vld [vmem:[%s21865_s7 + $0x1a30] sm:$0xff]   ;;  %v20896_v41 = vld [vmem:[%s21865_s7 + $0x1a78] sm:$0xff]  }
 0x3c2   : > { %v14228_v44 = vadd.f32 %v18720_v37, %v22807_v59  ;;  %v18744_v48 = vpop.f32.mrb[75].mxu1  ;;  %19044 = vmatprep.subr.bf16.mxu1 %v20860_v47  ;;  %v20868_v59 = vld [vmem:[%s21865_s7 + $0x1a40] sm:$0xff]   ;;  %v20893_v37 = vld [vmem:[%s21865_s7 + $0x1af0] sm:$0xff]  }
 0x3c3   : > { %v20895_v43 = vld [vmem:[%s21865_s7 + $0x1ab0] sm:$0xff]  }
 0x3c4   : > { %v22845_v50 = vadd.f32 %v18742_v45, %v14228_v44  ;;  %19023 = vmatpush3.bf16.msra.mxu0 %v20861_v49  ;;  %v20897_v44 = vld [vmem:[%s21865_s7 + $0x1af8] sm:$0xff]   ;;  %v327_v46 = vld [vmem:[%s21883_s27 + $0xd0] sm:$0xff]  ;;  %v20901_v49 = vld [vmem:[%s21865_s7 + $0x1b40] sm:$0xff]  }
 0x3c5   : > { %19024 = vmatprep.subr.bf16.mxu0 %v20863_v52  ;;  %19045 = vmatpush3.bf16.msra.mxu1 %v20862_v51  ;;  %v20898_v45 = vld [vmem:[%s21865_s7 + $0x1a38] sm:$0xff]   ;;  %v838_v47 = vrot.slane %v327_v46, %v21922_v42  ;;  %v831_v48 = vcombine.high %v327_v46, %v327_v46  ;;  %v20936_v46 = vld [vmem:[%s21865_s7 + $0x1c00] sm:$0xff]  }
 0x3c6   : > { %19046 = vmatprep.subr.bf16.mxu1 %v20864_v53  ;;  %v20902_v53 = vld [vmem:[%s21865_s7 + $0x1bc0] sm:$0xff]  }
 0x3c7   : > { %v846_v51 = vcombine.high %v838_v47, %v838_v47  ;;  %v845_v52 = vrot.slane %v831_v48, %v21922_v42 }
 0x3c8   : > { %19025 = vmatpush3.bf16.msra.mxu0 %v20865_v54  ;;  %v1417_v54 = vpack.c.bf16 %v838_v47, %v838_v47 }
 0x3c9   : > { %19054 = vmatprep.subr.bf16.mxu0 %v20868_v59  ;;  %19047 = vmatpush3.bf16.msra.mxu1 %v20866_v56  ;;  %v1418_v56 = vpack.c.bf16 %v846_v51, %v846_v51  ;;  %v847_v57 = vcombine.high %v845_v52, %v845_v52  ;;  %v1419_v59 = vpack.c.bf16 %v845_v52, %v845_v52  ;;  %v20938_v51 = vld [vmem:[%s21865_s7 + $0x1c48] sm:$0xff]  }
 0x3ca   : > { %19076 = vmatprep.subr.bf16.mxu1 %v20869_v62  ;;  %v20906_v62 = vld [vmem:[%s21865_s7 + $0x1bc8] sm:$0xff]  }
 0x3cb   : > { %14786 = vmatmul.mubr.bf16.vlgmr.msra.gmra.mrb[100].mxu0 %v1413_v63  ;;  %v1420_v61 = vpack.c.bf16 %v847_v57, %v847_v57  ;;  %v20907_v63 = vld [vmem:[%s21865_s7 + $0x1b08] sm:$0xff]   ;;  %v20943_v57 = vld [vmem:[%s21865_s7 + $0x1cd0] sm:$0xff]  }
 0x3cc   : > { %19055 = vmatpush3.bf16.msra.mxu0 %v20870_v0  ;;  %14826 = vmatmul.mubr.bf16.vlgmr.msra.gmra.mrb[100].mxu1 %v1415_v4  ;;  %v20908_v0 = vld [vmem:[%s21865_s7 + $0x1b88] sm:$0xff]   ;;  %v20912_v4 = vld [vmem:[%s21865_s7 + $0x1b90] sm:$0xff]  }
 0x3cd   : > { %19056 = vmatprep.subr.bf16.mxu0 %v20872_v5  ;;  %19077 = vmatpush3.bf16.msra.mxu1 %v20871_v3  ;;  %v20911_v3 = vld [vmem:[%s21865_s7 + $0x1b10] sm:$0xff]   ;;  %v20913_v5 = vld [vmem:[%s21865_s7 + $0x1b58] sm:$0xff]  }
 0x3ce   : > { %19078 = vmatprep.subr.bf16.mxu1 %v20873_v7  ;;  %14865 = vmatprep.mubr.bf16.mxu0 %v1418_v56  ;;  %v20915_v7 = vld [vmem:[%s21865_s7 + $0x1b18] sm:$0xff]   ;;  %v20942_v56 = vld [vmem:[%s21865_s7 + $0x1c50] sm:$0xff]  }
 0x3cf   : > { %14905 = vmatprep.mubr.bf16.mxu1 %v1420_v61  ;;  %v20947_v61 = vld [vmem:[%s21865_s7 + $0x1cd8] sm:$0xff]  }
 0x3d0   : > { %19057 = vmatpush3.bf16.msra.mxu0 %v20874_v8  ;;  %v20916_v8 = vld [vmem:[%s21865_s7 + $0x1b98] sm:$0xff]  }
 0x3d1   : > { %19058 = vmatprep.subr.bf16.mxu0 %v20876_v10  ;;  %19079 = vmatpush3.bf16.msra.mxu1 %v20875_v9  ;;  %v20917_v9 = vld [vmem:[%s21865_s7 + $0x1b60] sm:$0xff]  }
 0x3d2   : > { %19080 = vmatprep.subr.bf16.mxu1 %v20877_v11  ;;  %v20918_v10 = vld [vmem:[%s21865_s7 + $0x1be0] sm:$0xff]  }
 0x3d3   : > { %v20919_v11 = vld [vmem:[%s21865_s7 + $0x1b20] sm:$0xff]  }
 0x3d4   : > { %19059 = vmatpush3.bf16.msra.mxu0 %v20878_v12  ;;  %v20920_v12 = vld [vmem:[%s21865_s7 + $0x1ba0] sm:$0xff]  }
 0x3d5   : > { %19060 = vmatprep.subr.bf16.mxu0 %v20880_v14  ;;  %19081 = vmatpush3.bf16.msra.mxu1 %v20879_v13  ;;  %v20921_v13 = vld [vmem:[%s21865_s7 + $0x1b68] sm:$0xff]  }
 0x3d6   : > { %19082 = vmatprep.subr.bf16.mxu1 %v20881_v15  ;;  %v20922_v15 = vld [vmem:[%s21865_s7 + $0x1be8] sm:$0xff]  }
 0x3d8   : > { %19061 = vmatpush3.bf16.msra.mxu0 %v20882_v16 }
 0x3d9   : > { %19062 = vmatprep.subr.bf16.mxu0 %v20884_v18  ;;  %19083 = vmatpush3.bf16.msra.mxu1 %v20883_v17  ;;  %v20923_v17 = vld [vmem:[%s21865_s7 + $0x1b28] sm:$0xff]  }
 0x3da   : > { %19084 = vmatprep.subr.bf16.mxu1 %v20885_v19 }
 0x3dc   : > { %19063 = vmatpush3.bf16.msra.mxu0 %v20886_v20 }
 0x3dd   : > { %19064 = vmatprep.subr.bf16.mxu0 %v20888_v22  ;;  %19085 = vmatpush3.bf16.msra.mxu1 %v20887_v21  ;;  %v20924_v21 = vld [vmem:[%s21865_s7 + $0x1ba8] sm:$0xff]   ;;  %v20925_v22 = vld [vmem:[%s21865_s7 + $0x1b70] sm:$0xff]  }
 0x3de   : > { %v18762_v23 = vpop.f32.mrb[76].mxu0  ;;  %19086 = vmatprep.subr.bf16.mxu1 %v20889_v24 }
 0x3df   : > { %v18763_v25 = vpop.f32.mrb[77].mxu0  ;;  %v18784_v27 = vpop.f32.mrb[76].mxu1 }
 0x3e0   : > { %v18764_v28 = vadd.f32 %v18763_v25, %v18762_v23  ;;  %v18765_v29 = vpop.f32.mrb[78].mxu0  ;;  %v18785_v30 = vpop.f32.mrb[77].mxu1  ;;  %19065 = vmatpush3.bf16.msra.mxu0 %v20890_v26 }
 0x3e1   : > { %v18766_v32 = vpop.f32.mrb[79].mxu0  ;;  %v18786_v35 = vadd.f32 %v18785_v30, %v18784_v27  ;;  %v18787_v36 = vpop.f32.mrb[78].mxu1  ;;  %19066 = vmatprep.subr.bf16.mxu0 %v20892_v33  ;;  %19087 = vmatpush3.bf16.msra.mxu1 %v20891_v31  ;;  %v20927_v30 = vld [vmem:[%s21865_s7 + $0x1b30] sm:$0xff]   ;;  %v20929_v33 = vld [vmem:[%s21865_s7 + $0x1b78] sm:$0xff]  }
 0x3e2   : > { %v14308_v34 = vadd.f32 %v18764_v28, %v22845_v50  ;;  %v18788_v38 = vpop.f32.mrb[79].mxu1  ;;  %19088 = vmatprep.subr.bf16.mxu1 %v20893_v37  ;;  %v20899_v50 = vld [vmem:[%s21865_s7 + $0x1ab8] sm:$0xff]   ;;  %v20926_v28 = vld [vmem:[%s21865_s7 + $0x1bf0] sm:$0xff]  }
 0x3e3   : > { %v20928_v32 = vld [vmem:[%s21865_s7 + $0x1bb0] sm:$0xff]  }
 0x3e4   : > { %v22883_v40 = vadd.f32 %v18786_v35, %v14308_v34  ;;  %19067 = vmatpush3.bf16.msra.mxu0 %v20894_v39  ;;  %v20930_v34 = vld [vmem:[%s21865_s7 + $0x1bf8] sm:$0xff]   ;;  %v20934_v39 = vld [vmem:[%s21865_s7 + $0x1c40] sm:$0xff]  }
 0x3e5   : > { %19068 = vmatprep.subr.bf16.mxu0 %v20896_v41  ;;  %19089 = vmatpush3.bf16.msra.mxu1 %v20895_v43  ;;  %v20931_v35 = vld [vmem:[%s21865_s7 + $0x1b38] sm:$0xff]  }
 0x3e6   : > { %19090 = vmatprep.subr.bf16.mxu1 %v20897_v44  ;;  %v328_v36 = vld [vmem:[%s21883_s27 + $0xd8] sm:$0xff]  ;;  %v20935_v44 = vld [vmem:[%s21865_s7 + $0x1cc0] sm:$0xff]  }
 0x3e7   : > { %v855_v37 = vrot.slane %v328_v36, %v21922_v42  ;;  %v848_v38 = vcombine.high %v328_v36, %v328_v36  ;;  %v20969_v36 = vld [vmem:[%s21865_s7 + $0x1d00] sm:$0xff]  }
 0x3e8   : > { %19069 = vmatpush3.bf16.msra.mxu0 %v20898_v45 }
 0x3e9   : > { %19098 = vmatprep.subr.bf16.mxu0 %v20901_v49  ;;  %19091 = vmatpush3.bf16.msra.mxu1 %v20899_v50  ;;  %v863_v41 = vcombine.high %v855_v37, %v855_v37  ;;  %v862_v43 = vrot.slane %v848_v38, %v21922_v42  ;;  %v1421_v45 = vpack.c.bf16 %v855_v37, %v855_v37  ;;  %v20937_v49 = vld [vmem:[%s21865_s7 + $0x1c80] sm:$0xff]  }
 0x3ea   : > { %19120 = vmatprep.subr.bf16.mxu1 %v20902_v53  ;;  %v20939_v53 = vld [vmem:[%s21865_s7 + $0x1cc8] sm:$0xff]  }
 0x3eb   : > { %14866 = vmatmul.mubr.bf16.vlgmr.msra.gmra.mrb[104].mxu0 %v1417_v54  ;;  %v1422_v47 = vpack.c.bf16 %v863_v41, %v863_v41  ;;  %v864_v48 = vcombine.high %v862_v43, %v862_v43  ;;  %v1423_v50 = vpack.c.bf16 %v862_v43, %v862_v43  ;;  %v20940_v54 = vld [vmem:[%s21865_s7 + $0x1c08] sm:$0xff]  }
 0x3ec   : > { %19099 = vmatpush3.bf16.msra.mxu0 %v20903_v55  ;;  %14906 = vmatmul.mubr.bf16.vlgmr.msra.gmra.mrb[104].mxu1 %v1419_v59  ;;  %v20941_v55 = vld [vmem:[%s21865_s7 + $0x1c88] sm:$0xff]   ;;  %v20945_v59 = vld [vmem:[%s21865_s7 + $0x1c90] sm:$0xff]  }
 0x3ed   : > { %19100 = vmatprep.subr.bf16.mxu0 %v20905_v60  ;;  %19121 = vmatpush3.bf16.msra.mxu1 %v20904_v58  ;;  %v1424_v52 = vpack.c.bf16 %v864_v48, %v864_v48  ;;  %v20944_v58 = vld [vmem:[%s21865_s7 + $0x1c10] sm:$0xff]   ;;  %v20946_v60 = vld [vmem:[%s21865_s7 + $0x1c58] sm:$0xff]   ;;  %v20971_v41 = vld [vmem:[%s21865_s7 + $0x1d48] sm:$0xff]  }
 0x3ee   : > { %19122 = vmatprep.subr.bf16.mxu1 %v20906_v62  ;;  %14945 = vmatprep.mubr.bf16.mxu0 %v1422_v47  ;;  %v20948_v62 = vld [vmem:[%s21865_s7 + $0x1c18] sm:$0xff]   ;;  %v20975_v47 = vld [vmem:[%s21865_s7 + $0x1d50] sm:$0xff]  }
 0x3ef   : > { %14985 = vmatprep.mubr.bf16.mxu1 %v1424_v52  ;;  %v20976_v48 = vld [vmem:[%s21865_s7 + $0x1dd0] sm:$0xff]   ;;  %v20980_v52 = vld [vmem:[%s21865_s7 + $0x1dd8] sm:$0xff]  }
 0x3f0   : > { %19101 = vmatpush3.bf16.msra.mxu0 %v20907_v63  ;;  %v20949_v63 = vld [vmem:[%s21865_s7 + $0x1c98] sm:$0xff]  }
 0x3f1   : > { %19102 = vmatprep.subr.bf16.mxu0 %v20909_v1  ;;  %19123 = vmatpush3.bf16.msra.mxu1 %v20908_v0  ;;  %v20950_v0 = vld [vmem:[%s21865_s7 + $0x1c60] sm:$0xff]  }
 0x3f2   : > { %19124 = vmatprep.subr.bf16.mxu1 %v20910_v2  ;;  %v20951_v1 = vld [vmem:[%s21865_s7 + $0x1ce0] sm:$0xff]  }
 0x3f3   : > { %v20952_v2 = vld [vmem:[%s21865_s7 + $0x1c20] sm:$0xff]  }
 0x3f4   : > { %19103 = vmatpush3.bf16.msra.mxu0 %v20911_v3  ;;  %v20953_v3 = vld [vmem:[%s21865_s7 + $0x1ca0] sm:$0xff]  }
 0x3f5   : > { %19104 = vmatprep.subr.bf16.mxu0 %v20913_v5  ;;  %19125 = vmatpush3.bf16.msra.mxu1 %v20912_v4  ;;  %v20954_v4 = vld [vmem:[%s21865_s7 + $0x1c68] sm:$0xff]  }
 0x3f6   : > { %19126 = vmatprep.subr.bf16.mxu1 %v20914_v6  ;;  %v20955_v6 = vld [vmem:[%s21865_s7 + $0x1ce8] sm:$0xff]  }
 0x3f8   : > { %19105 = vmatpush3.bf16.msra.mxu0 %v20915_v7 }
 0x3f9   : > { %19106 = vmatprep.subr.bf16.mxu0 %v20917_v9  ;;  %19127 = vmatpush3.bf16.msra.mxu1 %v20916_v8  ;;  %v20956_v8 = vld [vmem:[%s21865_s7 + $0x1c28] sm:$0xff]  }
 0x3fa   : > { %19128 = vmatprep.subr.bf16.mxu1 %v20918_v10 }
 0x3fc   : > { %19107 = vmatpush3.bf16.msra.mxu0 %v20919_v11 }
 0x3fd   : > { %19108 = vmatprep.subr.bf16.mxu0 %v20921_v13  ;;  %19129 = vmatpush3.bf16.msra.mxu1 %v20920_v12  ;;  %v20957_v12 = vld [vmem:[%s21865_s7 + $0x1ca8] sm:$0xff]   ;;  %v20958_v13 = vld [vmem:[%s21865_s7 + $0x1c70] sm:$0xff]  }
 0x3fe   : > { %v18806_v14 = vpop.f32.mrb[80].mxu0  ;;  %19130 = vmatprep.subr.bf16.mxu1 %v20922_v15 }
 0x3ff   : > { %v18807_v16 = vpop.f32.mrb[81].mxu0  ;;  %v18828_v18 = vpop.f32.mrb[80].mxu1 }
 0x400   : > { %v18808_v19 = vadd.f32 %v18807_v16, %v18806_v14  ;;  %v18809_v20 = vpop.f32.mrb[82].mxu0  ;;  %v18829_v23 = vpop.f32.mrb[81].mxu1  ;;  %19109 = vmatpush3.bf16.msra.mxu0 %v20923_v17 }
 0x401   : > { %v18810_v24 = vpop.f32.mrb[83].mxu0  ;;  %v18830_v26 = vadd.f32 %v18829_v23, %v18828_v18  ;;  %v18831_v27 = vpop.f32.mrb[82].mxu1  ;;  %19110 = vmatprep.subr.bf16.mxu0 %v20925_v22  ;;  %19131 = vmatpush3.bf16.msra.mxu1 %v20924_v21  ;;  %v20960_v21 = vld [vmem:[%s21865_s7 + $0x1c30] sm:$0xff]  }
 0x402   : > { %v14388_v25 = vadd.f32 %v18808_v19, %v22883_v40  ;;  %v18832_v29 = vpop.f32.mrb[83].mxu1  ;;  %19132 = vmatprep.subr.bf16.mxu1 %v20926_v28  ;;  %v20932_v40 = vld [vmem:[%s21865_s7 + $0x1bb8] sm:$0xff]   ;;  %v20959_v19 = vld [vmem:[%s21865_s7 + $0x1cf0] sm:$0xff]  }
 0x403   : > { %v20961_v23 = vld [vmem:[%s21865_s7 + $0x1cb0] sm:$0xff]   ;;  %v20962_v24 = vld [vmem:[%s21865_s7 + $0x1c78] sm:$0xff]  }
 0x404   : > { %v22921_v31 = vadd.f32 %v18830_v26, %v14388_v25  ;;  %19111 = vmatpush3.bf16.msra.mxu0 %v20927_v30  ;;  %v20963_v25 = vld [vmem:[%s21865_s7 + $0x1cf8] sm:$0xff]  }
 0x405   : > { %19112 = vmatprep.subr.bf16.mxu0 %v20929_v33  ;;  %19133 = vmatpush3.bf16.msra.mxu1 %v20928_v32  ;;  %v20964_v26 = vld [vmem:[%s21865_s7 + $0x1c38] sm:$0xff]  }
 0x406   : > { %19134 = vmatprep.subr.bf16.mxu1 %v20930_v34  ;;  %v329_v27 = vld [vmem:[%s21883_s27 + $0xe0] sm:$0xff] }
 0x407   : > { %v20965_v28 = vld [vmem:[%s21865_s7 + $0x1cb8] sm:$0xff]   ;;  %v872_v29 = vrot.slane %v329_v27, %v21922_v42  ;;  %v865_v30 = vcombine.high %v329_v27, %v329_v27  ;;  %v20968_v34 = vld [vmem:[%s21865_s7 + $0x1dc0] sm:$0xff]  }
 0x408   : > { %19113 = vmatpush3.bf16.msra.mxu0 %v20931_v35  ;;  %v21002_v27 = vld [vmem:[%s21865_s7 + $0x1e00] sm:$0xff]  }
 0x409   : > { %19142 = vmatprep.subr.bf16.mxu0 %v20934_v39  ;;  %19135 = vmatpush3.bf16.msra.mxu1 %v20932_v40  ;;  %v880_v32 = vcombine.high %v872_v29, %v872_v29  ;;  %v879_v33 = vrot.slane %v865_v30, %v21922_v42  ;;  %v1425_v35 = vpack.c.bf16 %v872_v29, %v872_v29  ;;  %v20970_v39 = vld [vmem:[%s21865_s7 + $0x1d80] sm:$0xff]  }
 0x40a   : > { %19164 = vmatprep.subr.bf16.mxu1 %v20935_v44  ;;  %v20972_v44 = vld [vmem:[%s21865_s7 + $0x1dc8] sm:$0xff]   ;;  %v21003_v30 = vld [vmem:[%s21865_s7 + $0x1e80] sm:$0xff]  }
 0x40b   : > { %14946 = vmatmul.mubr.bf16.vlgmr.msra.gmra.mrb[108].mxu0 %v1421_v45  ;;  %v1426_v37 = vpack.c.bf16 %v880_v32, %v880_v32  ;;  %v881_v38 = vcombine.high %v879_v33, %v879_v33  ;;  %v1427_v40 = vpack.c.bf16 %v879_v33, %v879_v33  ;;  %v20973_v45 = vld [vmem:[%s21865_s7 + $0x1d08] sm:$0xff]  }
 0x40c   : > { %19143 = vmatpush3.bf16.msra.mxu0 %v20936_v46  ;;  %14986 = vmatmul.mubr.bf16.vlgmr.msra.gmra.mrb[108].mxu1 %v1423_v50  ;;  %v20974_v46 = vld [vmem:[%s21865_s7 + $0x1d88] sm:$0xff]   ;;  %v20978_v50 = vld [vmem:[%s21865_s7 + $0x1d90] sm:$0xff]  }
 0x40d   : > { %19144 = vmatprep.subr.bf16.mxu0 %v20938_v51  ;;  %19165 = vmatpush3.bf16.msra.mxu1 %v20937_v49  ;;  %v1428_v43 = vpack.c.bf16 %v881_v38, %v881_v38  ;;  %v20977_v49 = vld [vmem:[%s21865_s7 + $0x1d10] sm:$0xff]   ;;  %v20979_v51 = vld [vmem:[%s21865_s7 + $0x1d58] sm:$0xff]   ;;  %v21004_v32 = vld [vmem:[%s21865_s7 + $0x1e48] sm:$0xff]  }
 0x40e   : > { %19166 = vmatprep.subr.bf16.mxu1 %v20939_v53  ;;  %15025 = vmatprep.mubr.bf16.mxu0 %v1426_v37  ;;  %v20981_v53 = vld [vmem:[%s21865_s7 + $0x1d18] sm:$0xff]   ;;  %v21008_v37 = vld [vmem:[%s21865_s7 + $0x1e50] sm:$0xff]  }
 0x40f   : > { %15065 = vmatprep.mubr.bf16.mxu1 %v1428_v43  ;;  %v21009_v38 = vld [vmem:[%s21865_s7 + $0x1ed0] sm:$0xff]   ;;  %v21013_v43 = vld [vmem:[%s21865_s7 + $0x1ed8] sm:$0xff]  }
 0x410   : > { %19145 = vmatpush3.bf16.msra.mxu0 %v20940_v54  ;;  %v20982_v54 = vld [vmem:[%s21865_s7 + $0x1d98] sm:$0xff]  }
 0x411   : > { %19146 = vmatprep.subr.bf16.mxu0 %v20942_v56  ;;  %19167 = vmatpush3.bf16.msra.mxu1 %v20941_v55  ;;  %v20983_v55 = vld [vmem:[%s21865_s7 + $0x1d60] sm:$0xff]  }
 0x412   : > { %19168 = vmatprep.subr.bf16.mxu1 %v20943_v57  ;;  %v20984_v56 = vld [vmem:[%s21865_s7 + $0x1de0] sm:$0xff]  }
 0x413   : > { %v20985_v57 = vld [vmem:[%s21865_s7 + $0x1d20] sm:$0xff]  }
 0x414   : > { %19147 = vmatpush3.bf16.msra.mxu0 %v20944_v58  ;;  %v20986_v58 = vld [vmem:[%s21865_s7 + $0x1da0] sm:$0xff]  }
 0x415   : > { %19148 = vmatprep.subr.bf16.mxu0 %v20946_v60  ;;  %19169 = vmatpush3.bf16.msra.mxu1 %v20945_v59  ;;  %v20987_v59 = vld [vmem:[%s21865_s7 + $0x1d68] sm:$0xff]  }
 0x416   : > { %19170 = vmatprep.subr.bf16.mxu1 %v20947_v61  ;;  %v20988_v61 = vld [vmem:[%s21865_s7 + $0x1de8] sm:$0xff]  }
 0x418   : > { %19149 = vmatpush3.bf16.msra.mxu0 %v20948_v62 }
 0x419   : > { %19150 = vmatprep.subr.bf16.mxu0 %v20950_v0  ;;  %19171 = vmatpush3.bf16.msra.mxu1 %v20949_v63  ;;  %v20989_v63 = vld [vmem:[%s21865_s7 + $0x1d28] sm:$0xff]  }
 0x41a   : > { %19172 = vmatprep.subr.bf16.mxu1 %v20951_v1 }
 0x41c   : > { %19151 = vmatpush3.bf16.msra.mxu0 %v20952_v2 }
 0x41d   : > { %19152 = vmatprep.subr.bf16.mxu0 %v20954_v4  ;;  %19173 = vmatpush3.bf16.msra.mxu1 %v20953_v3  ;;  %v20990_v4 = vld [vmem:[%s21865_s7 + $0x1da8] sm:$0xff]  }
 0x41e   : > { %v18850_v5 = vpop.f32.mrb[84].mxu0  ;;  %19174 = vmatprep.subr.bf16.mxu1 %v20955_v6  ;;  %v20991_v6 = vld [vmem:[%s21865_s7 + $0x1d70] sm:$0xff]  }
 0x41f   : > { %v18851_v7 = vpop.f32.mrb[85].mxu0  ;;  %v18872_v9 = vpop.f32.mrb[84].mxu1 }
 0x420   : > { %v18852_v10 = vadd.f32 %v18851_v7, %v18850_v5  ;;  %v18853_v11 = vpop.f32.mrb[86].mxu0  ;;  %v18873_v14 = vpop.f32.mrb[85].mxu1  ;;  %19153 = vmatpush3.bf16.msra.mxu0 %v20956_v8 }
 0x421   : > { %v18854_v15 = vpop.f32.mrb[87].mxu0  ;;  %v18874_v17 = vadd.f32 %v18873_v14, %v18872_v9  ;;  %v18875_v18 = vpop.f32.mrb[86].mxu1  ;;  %19154 = vmatprep.subr.bf16.mxu0 %v20958_v13  ;;  %19175 = vmatpush3.bf16.msra.mxu1 %v20957_v12  ;;  %v20993_v12 = vld [vmem:[%s21865_s7 + $0x1d30] sm:$0xff]   ;;  %v20995_v14 = vld [vmem:[%s21865_s7 + $0x1d78] sm:$0xff]  }
 0x422   : > { %v14468_v16 = vadd.f32 %v18852_v10, %v22921_v31  ;;  %v18876_v20 = vpop.f32.mrb[87].mxu1  ;;  %19176 = vmatprep.subr.bf16.mxu1 %v20959_v19  ;;  %v20967_v31 = vld [vmem:[%s21865_s7 + $0x1d40] sm:$0xff]   ;;  %v20992_v10 = vld [vmem:[%s21865_s7 + $0x1df0] sm:$0xff]  }
 0x423   : > { %v20994_v15 = vld [vmem:[%s21865_s7 + $0x1db0] sm:$0xff]   ;;  %v330_v18 = vld [vmem:[%s21883_s27 + $0xe8] sm:$0xff] }
 0x424   : > { %v22959_v22 = vadd.f32 %v18874_v17, %v14468_v16  ;;  %19155 = vmatpush3.bf16.msra.mxu0 %v20960_v21  ;;  %v20996_v16 = vld [vmem:[%s21865_s7 + $0x1df8] sm:$0xff]   ;;  %v889_v19 = vrot.slane %v330_v18, %v21922_v42  ;;  %v882_v20 = vcombine.high %v330_v18, %v330_v18  ;;  %v21000_v21 = vld [vmem:[%s21865_s7 + $0x1e40] sm:$0xff]  }
 0x425   : > { %19156 = vmatprep.subr.bf16.mxu0 %v20962_v24  ;;  %19177 = vmatpush3.bf16.msra.mxu1 %v20961_v23  ;;  %v20997_v17 = vld [vmem:[%s21865_s7 + $0x1d38] sm:$0xff]   ;;  %v21035_v18 = vld [vmem:[%s21865_s7 + $0x1f00] sm:$0xff]  }
 0x426   : > { %19178 = vmatprep.subr.bf16.mxu1 %v20963_v25  ;;  %v897_v23 = vcombine.high %v889_v19, %v889_v19  ;;  %v896_v24 = vrot.slane %v882_v20, %v21922_v42  ;;  %v21001_v25 = vld [vmem:[%s21865_s7 + $0x1ec0] sm:$0xff]  }
 0x428   : > { %19157 = vmatpush3.bf16.msra.mxu0 %v20964_v26  ;;  %v1429_v26 = vpack.c.bf16 %v889_v19, %v889_v19  ;;  %v898_v29 = vcombine.high %v896_v24, %v896_v24 }
 0x429   : > { %19186 = vmatprep.subr.bf16.mxu0 %v20967_v31  ;;  %19179 = vmatpush3.bf16.msra.mxu1 %v20965_v28  ;;  %v1430_v28 = vpack.c.bf16 %v897_v23, %v897_v23  ;;  %v1431_v31 = vpack.c.bf16 %v896_v24, %v896_v24  ;;  %v21037_v23 = vld [vmem:[%s21865_s7 + $0x1f48] sm:$0xff]  }
 0x42a   : > { %19208 = vmatprep.subr.bf16.mxu1 %v20968_v34  ;;  %v1432_v33 = vpack.c.bf16 %v898_v29, %v898_v29  ;;  %v21005_v34 = vld [vmem:[%s21865_s7 + $0x1ec8] sm:$0xff]   ;;  %v21042_v29 = vld [vmem:[%s21865_s7 + $0x1fd0] sm:$0xff]  }
 0x42b   : > { %15026 = vmatmul.mubr.bf16.vlgmr.msra.gmra.mrb[112].mxu0 %v1425_v35  ;;  %v21006_v35 = vld [vmem:[%s21865_s7 + $0x1e08] sm:$0xff]  }
 0x42c   : > { %19187 = vmatpush3.bf16.msra.mxu0 %v20969_v36  ;;  %15066 = vmatmul.mubr.bf16.vlgmr.msra.gmra.mrb[112].mxu1 %v1427_v40  ;;  %v21007_v36 = vld [vmem:[%s21865_s7 + $0x1e88] sm:$0xff]   ;;  %v21011_v40 = vld [vmem:[%s21865_s7 + $0x1e90] sm:$0xff]  }
 0x42d   : > { %19188 = vmatprep.subr.bf16.mxu0 %v20971_v41  ;;  %19209 = vmatpush3.bf16.msra.mxu1 %v20970_v39  ;;  %v21010_v39 = vld [vmem:[%s21865_s7 + $0x1e10] sm:$0xff]   ;;  %v21012_v41 = vld [vmem:[%s21865_s7 + $0x1e58] sm:$0xff]  }
 0x42e   : > { %19210 = vmatprep.subr.bf16.mxu1 %v20972_v44  ;;  %15105 = vmatprep.mubr.bf16.mxu0 %v1430_v28  ;;  %v21014_v44 = vld [vmem:[%s21865_s7 + $0x1e18] sm:$0xff]   ;;  %v21041_v28 = vld [vmem:[%s21865_s7 + $0x1f50] sm:$0xff]  }
 0x42f   : > { %15145 = vmatprep.mubr.bf16.mxu1 %v1432_v33  ;;  %v21046_v33 = vld [vmem:[%s21865_s7 + $0x1fd8] sm:$0xff]  }
 0x430   : > { %19189 = vmatpush3.bf16.msra.mxu0 %v20973_v45  ;;  %v21015_v45 = vld [vmem:[%s21865_s7 + $0x1e98] sm:$0xff]  }
 0x431   : > { %19190 = vmatprep.subr.bf16.mxu0 %v20975_v47  ;;  %19211 = vmatpush3.bf16.msra.mxu1 %v20974_v46  ;;  %v21016_v46 = vld [vmem:[%s21865_s7 + $0x1e60] sm:$0xff]  }
 0x432   : > { %19212 = vmatprep.subr.bf16.mxu1 %v20976_v48  ;;  %v21017_v47 = vld [vmem:[%s21865_s7 + $0x1ee0] sm:$0xff]  }
 0x433   : > { %v21018_v48 = vld [vmem:[%s21865_s7 + $0x1e20] sm:$0xff]  }
 0x434   : > { %19191 = vmatpush3.bf16.msra.mxu0 %v20977_v49  ;;  %v21019_v49 = vld [vmem:[%s21865_s7 + $0x1ea0] sm:$0xff]  }
 0x435   : > { %19192 = vmatprep.subr.bf16.mxu0 %v20979_v51  ;;  %19213 = vmatpush3.bf16.msra.mxu1 %v20978_v50  ;;  %v21020_v50 = vld [vmem:[%s21865_s7 + $0x1e68] sm:$0xff]  }
 0x436   : > { %19214 = vmatprep.subr.bf16.mxu1 %v20980_v52  ;;  %v21021_v52 = vld [vmem:[%s21865_s7 + $0x1ee8] sm:$0xff]  }
 0x438   : > { %19193 = vmatpush3.bf16.msra.mxu0 %v20981_v53 }
 0x439   : > { %19194 = vmatprep.subr.bf16.mxu0 %v20983_v55  ;;  %19215 = vmatpush3.bf16.msra.mxu1 %v20982_v54  ;;  %v21022_v54 = vld [vmem:[%s21865_s7 + $0x1e28] sm:$0xff]  }
 0x43a   : > { %19216 = vmatprep.subr.bf16.mxu1 %v20984_v56 }
 0x43c   : > { %19195 = vmatpush3.bf16.msra.mxu0 %v20985_v57 }
 0x43d   : > { %19196 = vmatprep.subr.bf16.mxu0 %v20987_v59  ;;  %19217 = vmatpush3.bf16.msra.mxu1 %v20986_v58  ;;  %v21023_v58 = vld [vmem:[%s21865_s7 + $0x1ea8] sm:$0xff]   ;;  %v21024_v59 = vld [vmem:[%s21865_s7 + $0x1e70] sm:$0xff]  }
 0x43e   : > { %v18894_v60 = vpop.f32.mrb[88].mxu0  ;;  %19218 = vmatprep.subr.bf16.mxu1 %v20988_v61 }
 0x43f   : > { %v18895_v62 = vpop.f32.mrb[89].mxu0  ;;  %v18916_v0 = vpop.f32.mrb[88].mxu1 }
 0x440   : > { %v18896_v1 = vadd.f32 %v18895_v62, %v18894_v60  ;;  %v18897_v2 = vpop.f32.mrb[90].mxu0  ;;  %v18917_v3 = vpop.f32.mrb[89].mxu1  ;;  %19197 = vmatpush3.bf16.msra.mxu0 %v20989_v63 }
 0x441   : > { %v18898_v5 = vpop.f32.mrb[91].mxu0  ;;  %v18918_v8 = vadd.f32 %v18917_v3, %v18916_v0  ;;  %v18919_v9 = vpop.f32.mrb[90].mxu1  ;;  %19198 = vmatprep.subr.bf16.mxu0 %v20991_v6  ;;  %19219 = vmatpush3.bf16.msra.mxu1 %v20990_v4  ;;  %v21026_v3 = vld [vmem:[%s21865_s7 + $0x1e30] sm:$0xff]   ;;  %v21028_v6 = vld [vmem:[%s21865_s7 + $0x1e78] sm:$0xff]  }
 0x442   : > { %v14548_v7 = vadd.f32 %v18896_v1, %v22959_v22  ;;  %v18920_v11 = vpop.f32.mrb[91].mxu1  ;;  %19220 = vmatprep.subr.bf16.mxu1 %v20992_v10  ;;  %v20998_v22 = vld [vmem:[%s21865_s7 + $0x1db8] sm:$0xff]   ;;  %v21025_v1 = vld [vmem:[%s21865_s7 + $0x1ef0] sm:$0xff]  }
 0x443   : > { %v21027_v5 = vld [vmem:[%s21865_s7 + $0x1eb0] sm:$0xff]  }
 0x444   : > { %v22997_v13 = vadd.f32 %v18918_v8, %v14548_v7  ;;  %19199 = vmatpush3.bf16.msra.mxu0 %v20993_v12  ;;  %v21029_v7 = vld [vmem:[%s21865_s7 + $0x1ef8] sm:$0xff]   ;;  %v331_v9 = vld [vmem:[%s21883_s27 + $0xf0] sm:$0xff]  ;;  %v21033_v12 = vld [vmem:[%s21865_s7 + $0x1f40] sm:$0xff]  }
 0x445   : > { %19200 = vmatprep.subr.bf16.mxu0 %v20995_v14  ;;  %19221 = vmatpush3.bf16.msra.mxu1 %v20994_v15  ;;  %v21030_v8 = vld [vmem:[%s21865_s7 + $0x1e38] sm:$0xff]   ;;  %v906_v10 = vrot.slane %v331_v9, %v21922_v42  ;;  %v899_v11 = vcombine.high %v331_v9, %v331_v9  ;;  %v21068_v9 = vld [vmem:[%s21865_s7 + $0x2000] sm:$0xff]  }
 0x446   : > { %19222 = vmatprep.subr.bf16.mxu1 %v20996_v16  ;;  %v21034_v16 = vld [vmem:[%s21865_s7 + $0x1fc0] sm:$0xff]  }
 0x447   : > { %v914_v14 = vcombine.high %v906_v10, %v906_v10  ;;  %v913_v15 = vrot.slane %v899_v11, %v21922_v42 }
 0x448   : > { %19201 = vmatpush3.bf16.msra.mxu0 %v20997_v17  ;;  %v1433_v17 = vpack.c.bf16 %v906_v10, %v906_v10 }
 0x449   : > { %19230 = vmatprep.subr.bf16.mxu0 %v21000_v21  ;;  %19223 = vmatpush3.bf16.msra.mxu1 %v20998_v22  ;;  %v1434_v19 = vpack.c.bf16 %v914_v14, %v914_v14  ;;  %v915_v20 = vcombine.high %v913_v15, %v913_v15  ;;  %v21036_v21 = vld [vmem:[%s21865_s7 + $0x1f80] sm:$0xff]   ;;  %v1435_v22 = vpack.c.bf16 %v913_v15, %v913_v15  ;;  %v21070_v14 = vld [vmem:[%s21865_s7 + $0x2048] sm:$0xff]  }
 0x44a   : > { %19252 = vmatprep.subr.bf16.mxu1 %v21001_v25  ;;  %v21038_v25 = vld [vmem:[%s21865_s7 + $0x1fc8] sm:$0xff]  }
 0x44b   : > { %15106 = vmatmul.mubr.bf16.vlgmr.msra.gmra.mrb[116].mxu0 %v1429_v26  ;;  %v1436_v24 = vpack.c.bf16 %v915_v20, %v915_v20  ;;  %v21039_v26 = vld [vmem:[%s21865_s7 + $0x1f08] sm:$0xff]   ;;  %v21075_v20 = vld [vmem:[%s21865_s7 + $0x20d0] sm:$0xff]  }
 0x44c   : > { %19231 = vmatpush3.bf16.msra.mxu0 %v21002_v27  ;;  %15146 = vmatmul.mubr.bf16.vlgmr.msra.gmra.mrb[116].mxu1 %v1431_v31  ;;  %v21040_v27 = vld [vmem:[%s21865_s7 + $0x1f88] sm:$0xff]   ;;  %v21044_v31 = vld [vmem:[%s21865_s7 + $0x1f90] sm:$0xff]  }
 0x44d   : > { %19232 = vmatprep.subr.bf16.mxu0 %v21004_v32  ;;  %19253 = vmatpush3.bf16.msra.mxu1 %v21003_v30  ;;  %v21043_v30 = vld [vmem:[%s21865_s7 + $0x1f10] sm:$0xff]   ;;  %v21045_v32 = vld [vmem:[%s21865_s7 + $0x1f58] sm:$0xff]  }
 0x44e   : > { %19254 = vmatprep.subr.bf16.mxu1 %v21005_v34  ;;  %15185 = vmatprep.mubr.bf16.mxu0 %v1434_v19  ;;  %v21047_v34 = vld [vmem:[%s21865_s7 + $0x1f18] sm:$0xff]   ;;  %v21074_v19 = vld [vmem:[%s21865_s7 + $0x2050] sm:$0xff]  }
 0x44f   : > { %15225 = vmatprep.mubr.bf16.mxu1 %v1436_v24  ;;  %v21079_v24 = vld [vmem:[%s21865_s7 + $0x20d8] sm:$0xff]  }
 0x450   : > { %19233 = vmatpush3.bf16.msra.mxu0 %v21006_v35  ;;  %v21048_v35 = vld [vmem:[%s21865_s7 + $0x1f98] sm:$0xff]  }
 0x451   : > { %19234 = vmatprep.subr.bf16.mxu0 %v21008_v37  ;;  %19255 = vmatpush3.bf16.msra.mxu1 %v21007_v36  ;;  %v21049_v36 = vld [vmem:[%s21865_s7 + $0x1f60] sm:$0xff]  }
 0x452   : > { %19256 = vmatprep.subr.bf16.mxu1 %v21009_v38  ;;  %v21050_v37 = vld [vmem:[%s21865_s7 + $0x1fe0] sm:$0xff]  }
 0x453   : > { %v21051_v38 = vld [vmem:[%s21865_s7 + $0x1f20] sm:$0xff]  }
 0x454   : > { %19235 = vmatpush3.bf16.msra.mxu0 %v21010_v39  ;;  %v21052_v39 = vld [vmem:[%s21865_s7 + $0x1fa0] sm:$0xff]  }
 0x455   : > { %19236 = vmatprep.subr.bf16.mxu0 %v21012_v41  ;;  %19257 = vmatpush3.bf16.msra.mxu1 %v21011_v40  ;;  %v21053_v40 = vld [vmem:[%s21865_s7 + $0x1f68] sm:$0xff]  }
 0x456   : > { %19258 = vmatprep.subr.bf16.mxu1 %v21013_v43  ;;  %v21054_v43 = vld [vmem:[%s21865_s7 + $0x1fe8] sm:$0xff]  }
 0x458   : > { %19237 = vmatpush3.bf16.msra.mxu0 %v21014_v44 }
 0x459   : > { %19238 = vmatprep.subr.bf16.mxu0 %v21016_v46  ;;  %19259 = vmatpush3.bf16.msra.mxu1 %v21015_v45  ;;  %v21055_v45 = vld [vmem:[%s21865_s7 + $0x1f28] sm:$0xff]  }
 0x45a   : > { %19260 = vmatprep.subr.bf16.mxu1 %v21017_v47 }
 0x45c   : > { %19239 = vmatpush3.bf16.msra.mxu0 %v21018_v48 }
 0x45d   : > { %19240 = vmatprep.subr.bf16.mxu0 %v21020_v50  ;;  %19261 = vmatpush3.bf16.msra.mxu1 %v21019_v49  ;;  %v21056_v49 = vld [vmem:[%s21865_s7 + $0x1fa8] sm:$0xff]   ;;  %v21057_v50 = vld [vmem:[%s21865_s7 + $0x1f70] sm:$0xff]  }
 0x45e   : > { %v18938_v51 = vpop.f32.mrb[92].mxu0  ;;  %19262 = vmatprep.subr.bf16.mxu1 %v21021_v52 }
 0x45f   : > { %v18939_v53 = vpop.f32.mrb[93].mxu0  ;;  %v18960_v55 = vpop.f32.mrb[92].mxu1 }
 0x460   : > { %v18940_v56 = vadd.f32 %v18939_v53, %v18938_v51  ;;  %v18941_v57 = vpop.f32.mrb[94].mxu0  ;;  %v18961_v60 = vpop.f32.mrb[93].mxu1  ;;  %19241 = vmatpush3.bf16.msra.mxu0 %v21022_v54 }
 0x461   : > { %v18942_v61 = vpop.f32.mrb[95].mxu0  ;;  %v18962_v63 = vadd.f32 %v18961_v60, %v18960_v55  ;;  %v18963_v0 = vpop.f32.mrb[94].mxu1  ;;  %19242 = vmatprep.subr.bf16.mxu0 %v21024_v59  ;;  %19263 = vmatpush3.bf16.msra.mxu1 %v21023_v58  ;;  %v21059_v58 = vld [vmem:[%s21865_s7 + $0x1f30] sm:$0xff]  }
 0x462   : > { %v14628_v62 = vadd.f32 %v18940_v56, %v22997_v13  ;;  %v18964_v2 = vpop.f32.mrb[95].mxu1  ;;  %19264 = vmatprep.subr.bf16.mxu1 %v21025_v1  ;;  %v21031_v13 = vld [vmem:[%s21865_s7 + $0x1eb8] sm:$0xff]   ;;  %v21058_v56 = vld [vmem:[%s21865_s7 + $0x1ff0] sm:$0xff]  }
 0x463   : > { %v21060_v60 = vld [vmem:[%s21865_s7 + $0x1fb0] sm:$0xff]   ;;  %v21061_v61 = vld [vmem:[%s21865_s7 + $0x1f78] sm:$0xff]  }
 0x464   : > { %v23035_v4 = vadd.f32 %v18962_v63, %v14628_v62  ;;  %19243 = vmatpush3.bf16.msra.mxu0 %v21026_v3  ;;  %v21062_v62 = vld [vmem:[%s21865_s7 + $0x1ff8] sm:$0xff]  }
 0x465   : > { %19244 = vmatprep.subr.bf16.mxu0 %v21028_v6  ;;  %19265 = vmatpush3.bf16.msra.mxu1 %v21027_v5  ;;  %v21063_v63 = vld [vmem:[%s21865_s7 + $0x1f38] sm:$0xff]  }
 0x466   : > { %19266 = vmatprep.subr.bf16.mxu1 %v21029_v7  ;;  %v332_v0 = vld [vmem:[%s21883_s27 + $0xf8] sm:$0xff]  ;;  %v21067_v7 = vld [vmem:[%s21865_s7 + $0x20c0] sm:$0xff]  }
 0x467   : > { %v21064_v1 = vld [vmem:[%s21865_s7 + $0x1fb8] sm:$0xff]   ;;  %v923_v2 = vrot.slane %v332_v0, %v21922_v42  ;;  %v916_v3 = vcombine.high %v332_v0, %v332_v0  ;;  %v21101_v0 = vld [vmem:[%s21865_s7 + $0x2100] sm:$0xff]  }
 0x468   : > { %19245 = vmatpush3.bf16.msra.mxu0 %v21030_v8 }
 0x469   : > { %19274 = vmatprep.subr.bf16.mxu0 %v21033_v12  ;;  %19267 = vmatpush3.bf16.msra.mxu1 %v21031_v13  ;;  %v931_v5 = vcombine.high %v923_v2, %v923_v2  ;;  %v930_v6 = vrot.slane %v916_v3, %v21922_v42  ;;  %v1437_v8 = vpack.c.bf16 %v923_v2, %v923_v2  ;;  %v21069_v12 = vld [vmem:[%s21865_s7 + $0x2080] sm:$0xff]  }
 0x46a   : > { %19296 = vmatprep.subr.bf16.mxu1 %v21034_v16  ;;  %v21071_v16 = vld [vmem:[%s21865_s7 + $0x20c8] sm:$0xff]   ;;  %v21102_v3 = vld [vmem:[%s21865_s7 + $0x2180] sm:$0xff]  }
 0x46b   : > { %15186 = vmatmul.mubr.bf16.vlgmr.msra.gmra.mrb[120].mxu0 %v1433_v17  ;;  %v1438_v10 = vpack.c.bf16 %v931_v5, %v931_v5  ;;  %v932_v11 = vcombine.high %v930_v6, %v930_v6  ;;  %v1439_v13 = vpack.c.bf16 %v930_v6, %v930_v6  ;;  %v21072_v17 = vld [vmem:[%s21865_s7 + $0x2008] sm:$0xff]  }
 0x46c   : > { %19275 = vmatpush3.bf16.msra.mxu0 %v21035_v18  ;;  %15226 = vmatmul.mubr.bf16.vlgmr.msra.gmra.mrb[120].mxu1 %v1435_v22  ;;  %v21073_v18 = vld [vmem:[%s21865_s7 + $0x2088] sm:$0xff]   ;;  %v21077_v22 = vld [vmem:[%s21865_s7 + $0x2090] sm:$0xff]  }
 0x46d   : > { %19276 = vmatprep.subr.bf16.mxu0 %v21037_v23  ;;  %19297 = vmatpush3.bf16.msra.mxu1 %v21036_v21  ;;  %v1440_v15 = vpack.c.bf16 %v932_v11, %v932_v11  ;;  %v21076_v21 = vld [vmem:[%s21865_s7 + $0x2010] sm:$0xff]   ;;  %v21078_v23 = vld [vmem:[%s21865_s7 + $0x2058] sm:$0xff]   ;;  %v21103_v5 = vld [vmem:[%s21865_s7 + $0x2148] sm:$0xff]  }
 0x46e   : > { %19298 = vmatprep.subr.bf16.mxu1 %v21038_v25  ;;  %15265 = vmatprep.mubr.bf16.mxu0 %v1438_v10  ;;  %v21080_v25 = vld [vmem:[%s21865_s7 + $0x2018] sm:$0xff]   ;;  %v21107_v10 = vld [vmem:[%s21865_s7 + $0x2150] sm:$0xff]  }
 0x46f   : > { %15305 = vmatprep.mubr.bf16.mxu1 %v1440_v15  ;;  %v21108_v11 = vld [vmem:[%s21865_s7 + $0x21d0] sm:$0xff]   ;;  %v21112_v15 = vld [vmem:[%s21865_s7 + $0x21d8] sm:$0xff]  }
 0x470   : > { %19277 = vmatpush3.bf16.msra.mxu0 %v21039_v26  ;;  %v21081_v26 = vld [vmem:[%s21865_s7 + $0x2098] sm:$0xff]  }
 0x471   : > { %19278 = vmatprep.subr.bf16.mxu0 %v21041_v28  ;;  %19299 = vmatpush3.bf16.msra.mxu1 %v21040_v27  ;;  %v21082_v27 = vld [vmem:[%s21865_s7 + $0x2060] sm:$0xff]  }
 0x472   : > { %19300 = vmatprep.subr.bf16.mxu1 %v21042_v29  ;;  %v21083_v28 = vld [vmem:[%s21865_s7 + $0x20e0] sm:$0xff]  }
 0x473   : > { %v21084_v29 = vld [vmem:[%s21865_s7 + $0x2020] sm:$0xff]  }
 0x474   : > { %19279 = vmatpush3.bf16.msra.mxu0 %v21043_v30  ;;  %v21085_v30 = vld [vmem:[%s21865_s7 + $0x20a0] sm:$0xff]  }
 0x475   : > { %19280 = vmatprep.subr.bf16.mxu0 %v21045_v32  ;;  %19301 = vmatpush3.bf16.msra.mxu1 %v21044_v31  ;;  %v21086_v31 = vld [vmem:[%s21865_s7 + $0x2068] sm:$0xff]  }
 0x476   : > { %19302 = vmatprep.subr.bf16.mxu1 %v21046_v33  ;;  %v21087_v33 = vld [vmem:[%s21865_s7 + $0x20e8] sm:$0xff]  }
 0x478   : > { %19281 = vmatpush3.bf16.msra.mxu0 %v21047_v34 }
 0x479   : > { %19282 = vmatprep.subr.bf16.mxu0 %v21049_v36  ;;  %19303 = vmatpush3.bf16.msra.mxu1 %v21048_v35  ;;  %v21088_v35 = vld [vmem:[%s21865_s7 + $0x2028] sm:$0xff]  }
 0x47a   : > { %19304 = vmatprep.subr.bf16.mxu1 %v21050_v37 }
 0x47c   : > { %19283 = vmatpush3.bf16.msra.mxu0 %v21051_v38 }
 0x47d   : > { %19284 = vmatprep.subr.bf16.mxu0 %v21053_v40  ;;  %19305 = vmatpush3.bf16.msra.mxu1 %v21052_v39  ;;  %v21089_v40 = vld [vmem:[%s21865_s7 + $0x20a8] sm:$0xff]  }
 0x47e   : > { %v18982_v41 = vpop.f32.mrb[96].mxu0  ;;  %19306 = vmatprep.subr.bf16.mxu1 %v21054_v43  ;;  %v21090_v43 = vld [vmem:[%s21865_s7 + $0x2070] sm:$0xff]  }
 0x47f   : > { %v18983_v44 = vpop.f32.mrb[97].mxu0  ;;  %v19004_v46 = vpop.f32.mrb[96].mxu1 }
 0x480   : > { %v18984_v47 = vadd.f32 %v18983_v44, %v18982_v41  ;;  %v18985_v48 = vpop.f32.mrb[98].mxu0  ;;  %v19005_v51 = vpop.f32.mrb[97].mxu1  ;;  %19285 = vmatpush3.bf16.msra.mxu0 %v21055_v45 }
 0x481   : > { %v18986_v52 = vpop.f32.mrb[99].mxu0  ;;  %v19006_v54 = vadd.f32 %v19005_v51, %v19004_v46  ;;  %v19007_v55 = vpop.f32.mrb[98].mxu1  ;;  %19286 = vmatprep.subr.bf16.mxu0 %v21057_v50  ;;  %19307 = vmatpush3.bf16.msra.mxu1 %v21056_v49  ;;  %v21092_v49 = vld [vmem:[%s21865_s7 + $0x2030] sm:$0xff]   ;;  %v21094_v51 = vld [vmem:[%s21865_s7 + $0x2078] sm:$0xff]  }
 0x482   : > { %v14708_v53 = vadd.f32 %v18984_v47, %v23035_v4  ;;  %v19008_v57 = vpop.f32.mrb[99].mxu1  ;;  %19308 = vmatprep.subr.bf16.mxu1 %v21058_v56  ;;  %v21066_v4 = vld [vmem:[%s21865_s7 + $0x2040] sm:$0xff]   ;;  %v21091_v47 = vld [vmem:[%s21865_s7 + $0x20f0] sm:$0xff]  }
 0x483   : > { %v21093_v52 = vld [vmem:[%s21865_s7 + $0x20b0] sm:$0xff]   ;;  %v333_v55 = vld [vmem:[%s21883_s27 + $0x100] sm:$0xff] }
 0x484   : > { %v23073_v59 = vadd.f32 %v19006_v54, %v14708_v53  ;;  %19287 = vmatpush3.bf16.msra.mxu0 %v21059_v58  ;;  %v21095_v53 = vld [vmem:[%s21865_s7 + $0x20f8] sm:$0xff]   ;;  %v940_v56 = vrot.slane %v333_v55, %v21922_v42  ;;  %v933_v57 = vcombine.high %v333_v55, %v333_v55  ;;  %v21099_v58 = vld [vmem:[%s21865_s7 + $0x2140] sm:$0xff]  }
 0x485   : > { %19288 = vmatprep.subr.bf16.mxu0 %v21061_v61  ;;  %19309 = vmatpush3.bf16.msra.mxu1 %v21060_v60  ;;  %v21096_v54 = vld [vmem:[%s21865_s7 + $0x2038] sm:$0xff]   ;;  %v21134_v55 = vld [vmem:[%s21865_s7 + $0x2200] sm:$0xff]  }
 0x486   : > { %19310 = vmatprep.subr.bf16.mxu1 %v21062_v62  ;;  %v948_v60 = vcombine.high %v940_v56, %v940_v56  ;;  %v947_v61 = vrot.slane %v933_v57, %v21922_v42  ;;  %v21100_v62 = vld [vmem:[%s21865_s7 + $0x21c0] sm:$0xff]  }
 0x488   : > { %19289 = vmatpush3.bf16.msra.mxu0 %v21063_v63  ;;  %v1441_v63 = vpack.c.bf16 %v940_v56, %v940_v56  ;;  %v949_v2 = vcombine.high %v947_v61, %v947_v61 }
 0x489   : > { %19318 = vmatprep.subr.bf16.mxu0 %v21066_v4  ;;  %19311 = vmatpush3.bf16.msra.mxu1 %v21064_v1  ;;  %v1442_v1 = vpack.c.bf16 %v948_v60, %v948_v60  ;;  %v1443_v4 = vpack.c.bf16 %v947_v61, %v947_v61  ;;  %v21136_v60 = vld [vmem:[%s21865_s7 + $0x2248] sm:$0xff]  }
 0x48a   : > { %19340 = vmatprep.subr.bf16.mxu1 %v21067_v7  ;;  %v1444_v6 = vpack.c.bf16 %v949_v2, %v949_v2  ;;  %v21104_v7 = vld [vmem:[%s21865_s7 + $0x21c8] sm:$0xff]   ;;  %v21141_v2 = vld [vmem:[%s21865_s7 + $0x22d0] sm:$0xff]  }
 0x48b   : > { %15266 = vmatmul.mubr.bf16.vlgmr.msra.gmra.mrb[124].mxu0 %v1437_v8  ;;  %v21105_v8 = vld [vmem:[%s21865_s7 + $0x2108] sm:$0xff]  }
 0x48c   : > { %19319 = vmatpush3.bf16.msra.mxu0 %v21068_v9  ;;  %15306 = vmatmul.mubr.bf16.vlgmr.msra.gmra.mrb[124].mxu1 %v1439_v13  ;;  %v21106_v9 = vld [vmem:[%s21865_s7 + $0x2188] sm:$0xff]   ;;  %v21110_v13 = vld [vmem:[%s21865_s7 + $0x2190] sm:$0xff]  }
 0x48d   : > { %19320 = vmatprep.subr.bf16.mxu0 %v21070_v14  ;;  %19341 = vmatpush3.bf16.msra.mxu1 %v21069_v12  ;;  %v21109_v12 = vld [vmem:[%s21865_s7 + $0x2110] sm:$0xff]   ;;  %v21111_v14 = vld [vmem:[%s21865_s7 + $0x2158] sm:$0xff]  }
 0x48e   : > { %19342 = vmatprep.subr.bf16.mxu1 %v21071_v16  ;;  %15345 = vmatprep.mubr.bf16.mxu0 %v1442_v1  ;;  %v21113_v16 = vld [vmem:[%s21865_s7 + $0x2118] sm:$0xff]   ;;  %v21140_v1 = vld [vmem:[%s21865_s7 + $0x2250] sm:$0xff]  }
 0x48f   : > { %15385 = vmatprep.mubr.bf16.mxu1 %v1444_v6  ;;  %v21145_v6 = vld [vmem:[%s21865_s7 + $0x22d8] sm:$0xff]  }
 0x490   : > { %19321 = vmatpush3.bf16.msra.mxu0 %v21072_v17  ;;  %v21114_v17 = vld [vmem:[%s21865_s7 + $0x2198] sm:$0xff]  }
 0x491   : > { %19322 = vmatprep.subr.bf16.mxu0 %v21074_v19  ;;  %19343 = vmatpush3.bf16.msra.mxu1 %v21073_v18  ;;  %v21115_v18 = vld [vmem:[%s21865_s7 + $0x2160] sm:$0xff]  }
 0x492   : > { %19344 = vmatprep.subr.bf16.mxu1 %v21075_v20  ;;  %v21116_v19 = vld [vmem:[%s21865_s7 + $0x21e0] sm:$0xff]  }
 0x493   : > { %v21117_v20 = vld [vmem:[%s21865_s7 + $0x2120] sm:$0xff]  }
 0x494   : > { %19323 = vmatpush3.bf16.msra.mxu0 %v21076_v21  ;;  %v21118_v21 = vld [vmem:[%s21865_s7 + $0x21a0] sm:$0xff]  }
 0x495   : > { %19324 = vmatprep.subr.bf16.mxu0 %v21078_v23  ;;  %19345 = vmatpush3.bf16.msra.mxu1 %v21077_v22  ;;  %v21119_v22 = vld [vmem:[%s21865_s7 + $0x2168] sm:$0xff]  }
 0x496   : > { %19346 = vmatprep.subr.bf16.mxu1 %v21079_v24  ;;  %v21120_v24 = vld [vmem:[%s21865_s7 + $0x21e8] sm:$0xff]  }
 0x498   : > { %19325 = vmatpush3.bf16.msra.mxu0 %v21080_v25 }
 0x499   : > { %19326 = vmatprep.subr.bf16.mxu0 %v21082_v27  ;;  %19347 = vmatpush3.bf16.msra.mxu1 %v21081_v26  ;;  %v21121_v26 = vld [vmem:[%s21865_s7 + $0x2128] sm:$0xff]  }
 0x49a   : > { %19348 = vmatprep.subr.bf16.mxu1 %v21083_v28 }
 0x49c   : > { %19327 = vmatpush3.bf16.msra.mxu0 %v21084_v29 }
 0x49d   : > { %19328 = vmatprep.subr.bf16.mxu0 %v21086_v31  ;;  %19349 = vmatpush3.bf16.msra.mxu1 %v21085_v30  ;;  %v21122_v30 = vld [vmem:[%s21865_s7 + $0x21a8] sm:$0xff]   ;;  %v21123_v31 = vld [vmem:[%s21865_s7 + $0x2170] sm:$0xff]  }
 0x49e   : > { %v19026_v32 = vpop.f32.mrb[100].mxu0  ;;  %19350 = vmatprep.subr.bf16.mxu1 %v21087_v33 }
 0x49f   : > { %v19027_v34 = vpop.f32.mrb[101].mxu0  ;;  %v19048_v36 = vpop.f32.mrb[100].mxu1 }
 0x4a0   : > { %v19028_v37 = vadd.f32 %v19027_v34, %v19026_v32  ;;  %v19029_v38 = vpop.f32.mrb[102].mxu0  ;;  %v19049_v39 = vpop.f32.mrb[101].mxu1  ;;  %19329 = vmatpush3.bf16.msra.mxu0 %v21088_v35 }
 0x4a1   : > { %v19030_v41 = vpop.f32.mrb[103].mxu0  ;;  %v19050_v45 = vadd.f32 %v19049_v39, %v19048_v36  ;;  %v19051_v46 = vpop.f32.mrb[102].mxu1  ;;  %19330 = vmatprep.subr.bf16.mxu0 %v21090_v43  ;;  %19351 = vmatpush3.bf16.msra.mxu1 %v21089_v40  ;;  %v21125_v39 = vld [vmem:[%s21865_s7 + $0x2130] sm:$0xff]   ;;  %v21127_v43 = vld [vmem:[%s21865_s7 + $0x2178] sm:$0xff]  }
 0x4a2   : > { %v14788_v44 = vadd.f32 %v19028_v37, %v23073_v59  ;;  %v19052_v48 = vpop.f32.mrb[103].mxu1  ;;  %19352 = vmatprep.subr.bf16.mxu1 %v21091_v47  ;;  %v21097_v59 = vld [vmem:[%s21865_s7 + $0x20b8] sm:$0xff]   ;;  %v21124_v37 = vld [vmem:[%s21865_s7 + $0x21f0] sm:$0xff]   ;;  %v334_v46 = vld [vmem:[%s21883_s27 + $0x108] sm:$0xff] }
 0x4a3   : > { %v21126_v41 = vld [vmem:[%s21865_s7 + $0x21b0] sm:$0xff]   ;;  %v957_v47 = vrot.slane %v334_v46, %v21922_v42  ;;  %v950_v48 = vcombine.high %v334_v46, %v334_v46  ;;  %v21167_v46 = vld [vmem:[%s21865_s7 + $0x2300] sm:$0xff]  }
 0x4a4   : > { %v23111_v50 = vadd.f32 %v19050_v45, %v14788_v44  ;;  %19331 = vmatpush3.bf16.msra.mxu0 %v21092_v49  ;;  %v21128_v44 = vld [vmem:[%s21865_s7 + $0x21f8] sm:$0xff]   ;;  %v21132_v49 = vld [vmem:[%s21865_s7 + $0x2240] sm:$0xff]  }
 0x4a5   : > { %19332 = vmatprep.subr.bf16.mxu0 %v21094_v51  ;;  %19353 = vmatpush3.bf16.msra.mxu1 %v21093_v52  ;;  %v21129_v45 = vld [vmem:[%s21865_s7 + $0x2138] sm:$0xff]   ;;  %v965_v51 = vcombine.high %v957_v47, %v957_v47  ;;  %v964_v52 = vrot.slane %v950_v48, %v21922_v42 }
 0x4a6   : > { %19354 = vmatprep.subr.bf16.mxu1 %v21095_v53  ;;  %v21133_v53 = vld [vmem:[%s21865_s7 + $0x22c0] sm:$0xff]  }
 0x4a7   : > { %v1446_v56 = vpack.c.bf16 %v965_v51, %v965_v51  ;;  %v966_v57 = vcombine.high %v964_v52, %v964_v52  ;;  %v21169_v51 = vld [vmem:[%s21865_s7 + $0x2348] sm:$0xff]  }
 0x4a8   : > { %19333 = vmatpush3.bf16.msra.mxu0 %v21096_v54  ;;  %v1445_v54 = vpack.c.bf16 %v957_v47, %v957_v47 }
 0x4a9   : > { %19362 = vmatprep.subr.bf16.mxu0 %v21099_v58  ;;  %19355 = vmatpush3.bf16.msra.mxu1 %v21097_v59  ;;  %v21135_v58 = vld [vmem:[%s21865_s7 + $0x2280] sm:$0xff]   ;;  %v1447_v59 = vpack.c.bf16 %v964_v52, %v964_v52  ;;  %v1448_v61 = vpack.c.bf16 %v966_v57, %v966_v57  ;;  %v21174_v57 = vld [vmem:[%s21865_s7 + $0x23d0] sm:$0xff]  }
 0x4aa   : > { %19384 = vmatprep.subr.bf16.mxu1 %v21100_v62  ;;  %v21137_v62 = vld [vmem:[%s21865_s7 + $0x22c8] sm:$0xff]  }
 0x4ab   : > { %15346 = vmatmul.mubr.bf16.vlgmr.msra.gmra.mrb[128].mxu0 %v1441_v63  ;;  %v21138_v63 = vld [vmem:[%s21865_s7 + $0x2208] sm:$0xff]  }
 0x4ac   : > { %19363 = vmatpush3.bf16.msra.mxu0 %v21101_v0  ;;  %15386 = vmatmul.mubr.bf16.vlgmr.msra.gmra.mrb[128].mxu1 %v1443_v4  ;;  %v21139_v0 = vld [vmem:[%s21865_s7 + $0x2288] sm:$0xff]   ;;  %v21143_v4 = vld [vmem:[%s21865_s7 + $0x2290] sm:$0xff]  }
 0x4ad   : > { %19364 = vmatprep.subr.bf16.mxu0 %v21103_v5  ;;  %19385 = vmatpush3.bf16.msra.mxu1 %v21102_v3  ;;  %v21142_v3 = vld [vmem:[%s21865_s7 + $0x2210] sm:$0xff]   ;;  %v21144_v5 = vld [vmem:[%s21865_s7 + $0x2258] sm:$0xff]  }
 0x4ae   : > { %19386 = vmatprep.subr.bf16.mxu1 %v21104_v7  ;;  %15425 = vmatprep.mubr.bf16.mxu0 %v1446_v56  ;;  %v21146_v7 = vld [vmem:[%s21865_s7 + $0x2218] sm:$0xff]   ;;  %v21173_v56 = vld [vmem:[%s21865_s7 + $0x2350] sm:$0xff]  }
 0x4af   : > { %15465 = vmatprep.mubr.bf16.mxu1 %v1448_v61  ;;  %v21178_v61 = vld [vmem:[%s21865_s7 + $0x23d8] sm:$0xff]  }
 0x4b0   : > { %19365 = vmatpush3.bf16.msra.mxu0 %v21105_v8  ;;  %v21147_v8 = vld [vmem:[%s21865_s7 + $0x2298] sm:$0xff]  }
 0x4b1   : > { %19366 = vmatprep.subr.bf16.mxu0 %v21107_v10  ;;  %19387 = vmatpush3.bf16.msra.mxu1 %v21106_v9  ;;  %v21148_v9 = vld [vmem:[%s21865_s7 + $0x2260] sm:$0xff]  }
 0x4b2   : > { %19388 = vmatprep.subr.bf16.mxu1 %v21108_v11  ;;  %v21149_v10 = vld [vmem:[%s21865_s7 + $0x22e0] sm:$0xff]  }
 0x4b3   : > { %v21150_v11 = vld [vmem:[%s21865_s7 + $0x2220] sm:$0xff]  }
 0x4b4   : > { %19367 = vmatpush3.bf16.msra.mxu0 %v21109_v12  ;;  %v21151_v12 = vld [vmem:[%s21865_s7 + $0x22a0] sm:$0xff]  }
 0x4b5   : > { %19368 = vmatprep.subr.bf16.mxu0 %v21111_v14  ;;  %19389 = vmatpush3.bf16.msra.mxu1 %v21110_v13  ;;  %v21152_v13 = vld [vmem:[%s21865_s7 + $0x2268] sm:$0xff]  }
 0x4b6   : > { %19390 = vmatprep.subr.bf16.mxu1 %v21112_v15  ;;  %v21153_v15 = vld [vmem:[%s21865_s7 + $0x22e8] sm:$0xff]  }
 0x4b8   : > { %19369 = vmatpush3.bf16.msra.mxu0 %v21113_v16 }
 0x4b9   : > { %19370 = vmatprep.subr.bf16.mxu0 %v21115_v18  ;;  %19391 = vmatpush3.bf16.msra.mxu1 %v21114_v17  ;;  %v21154_v17 = vld [vmem:[%s21865_s7 + $0x2228] sm:$0xff]  }
 0x4ba   : > { %19392 = vmatprep.subr.bf16.mxu1 %v21116_v19 }
 0x4bc   : > { %19371 = vmatpush3.bf16.msra.mxu0 %v21117_v20 }
 0x4bd   : > { %19372 = vmatprep.subr.bf16.mxu0 %v21119_v22  ;;  %19393 = vmatpush3.bf16.msra.mxu1 %v21118_v21  ;;  %v21155_v21 = vld [vmem:[%s21865_s7 + $0x22a8] sm:$0xff]   ;;  %v21156_v22 = vld [vmem:[%s21865_s7 + $0x2270] sm:$0xff]  }
 0x4be   : > { %v19070_v23 = vpop.f32.mrb[104].mxu0  ;;  %19394 = vmatprep.subr.bf16.mxu1 %v21120_v24 }
 0x4bf   : > { %v19071_v25 = vpop.f32.mrb[105].mxu0  ;;  %v19092_v27 = vpop.f32.mrb[104].mxu1 }
 0x4c0   : > { %v19072_v28 = vadd.f32 %v19071_v25, %v19070_v23  ;;  %v19073_v29 = vpop.f32.mrb[106].mxu0  ;;  %v19093_v32 = vpop.f32.mrb[105].mxu1  ;;  %19373 = vmatpush3.bf16.msra.mxu0 %v21121_v26 }
 0x4c1   : > { %v19074_v33 = vpop.f32.mrb[107].mxu0  ;;  %v19094_v35 = vadd.f32 %v19093_v32, %v19092_v27  ;;  %v19095_v36 = vpop.f32.mrb[106].mxu1  ;;  %19374 = vmatprep.subr.bf16.mxu0 %v21123_v31  ;;  %19395 = vmatpush3.bf16.msra.mxu1 %v21122_v30  ;;  %v21158_v30 = vld [vmem:[%s21865_s7 + $0x2230] sm:$0xff]  }
 0x4c2   : > { %v14868_v34 = vadd.f32 %v19072_v28, %v23111_v50  ;;  %v19096_v38 = vpop.f32.mrb[107].mxu1  ;;  %19396 = vmatprep.subr.bf16.mxu1 %v21124_v37  ;;  %v21130_v50 = vld [vmem:[%s21865_s7 + $0x21b8] sm:$0xff]   ;;  %v21157_v28 = vld [vmem:[%s21865_s7 + $0x22f0] sm:$0xff]  }
 0x4c3   : > { %v21159_v32 = vld [vmem:[%s21865_s7 + $0x22b0] sm:$0xff]   ;;  %v21160_v33 = vld [vmem:[%s21865_s7 + $0x2278] sm:$0xff]  }
 0x4c4   : > { %v23149_v40 = vadd.f32 %v19094_v35, %v14868_v34  ;;  %19375 = vmatpush3.bf16.msra.mxu0 %v21125_v39  ;;  %v21161_v34 = vld [vmem:[%s21865_s7 + $0x22f8] sm:$0xff]   ;;  %v335_v36 = vld [vmem:[%s21883_s27 + $0x110] sm:$0xff] }
 0x4c5   : > { %19376 = vmatprep.subr.bf16.mxu0 %v21127_v43  ;;  %19397 = vmatpush3.bf16.msra.mxu1 %v21126_v41  ;;  %v21162_v35 = vld [vmem:[%s21865_s7 + $0x2238] sm:$0xff]   ;;  %v974_v38 = vrot.slane %v335_v36, %v21922_v42  ;;  %v967_v39 = vcombine.high %v335_v36, %v335_v36  ;;  %v21200_v36 = vld [vmem:[%s21865_s7 + $0x2400] sm:$0xff]  }
 0x4c6   : > { %19398 = vmatprep.subr.bf16.mxu1 %v21128_v44  ;;  %v21163_v37 = vld [vmem:[%s21865_s7 + $0x22b8] sm:$0xff]   ;;  %v21166_v44 = vld [vmem:[%s21865_s7 + $0x23c0] sm:$0xff]  }
 0x4c7   : > { %v982_v41 = vcombine.high %v974_v38, %v974_v38  ;;  %v981_v43 = vrot.slane %v967_v39, %v21922_v42  ;;  %v21201_v39 = vld [vmem:[%s21865_s7 + $0x2480] sm:$0xff]  }
 0x4c8   : > { %19377 = vmatpush3.bf16.msra.mxu0 %v21129_v45  ;;  %v1449_v45 = vpack.c.bf16 %v974_v38, %v974_v38 }
 0x4c9   : > { %19406 = vmatprep.subr.bf16.mxu0 %v21132_v49  ;;  %19399 = vmatpush3.bf16.msra.mxu1 %v21130_v50  ;;  %v1450_v47 = vpack.c.bf16 %v982_v41, %v982_v41  ;;  %v983_v48 = vcombine.high %v981_v43, %v981_v43  ;;  %v21168_v49 = vld [vmem:[%s21865_s7 + $0x2380] sm:$0xff]   ;;  %v1451_v50 = vpack.c.bf16 %v981_v43, %v981_v43  ;;  %v21202_v41 = vld [vmem:[%s21865_s7 + $0x2448] sm:$0xff]  }
 0x4ca   : > { %19428 = vmatprep.subr.bf16.mxu1 %v21133_v53  ;;  %v21170_v53 = vld [vmem:[%s21865_s7 + $0x23c8] sm:$0xff]  }
 0x4cb   : > { %15426 = vmatmul.mubr.bf16.vlgmr.msra.gmra.mrb[132].mxu0 %v1445_v54  ;;  %v1452_v52 = vpack.c.bf16 %v983_v48, %v983_v48  ;;  %v21171_v54 = vld [vmem:[%s21865_s7 + $0x2308] sm:$0xff]   ;;  %v21207_v48 = vld [vmem:[%s21865_s7 + $0x24d0] sm:$0xff]  }
 0x4cc   : > { %19407 = vmatpush3.bf16.msra.mxu0 %v21134_v55  ;;  %15466 = vmatmul.mubr.bf16.vlgmr.msra.gmra.mrb[132].mxu1 %v1447_v59  ;;  %v21172_v55 = vld [vmem:[%s21865_s7 + $0x2388] sm:$0xff]   ;;  %v21176_v59 = vld [vmem:[%s21865_s7 + $0x2390] sm:$0xff]  }
 0x4cd   : > { %19408 = vmatprep.subr.bf16.mxu0 %v21136_v60  ;;  %19429 = vmatpush3.bf16.msra.mxu1 %v21135_v58  ;;  %v21175_v58 = vld [vmem:[%s21865_s7 + $0x2310] sm:$0xff]   ;;  %v21177_v60 = vld [vmem:[%s21865_s7 + $0x2358] sm:$0xff]  }
 0x4ce   : > { %19430 = vmatprep.subr.bf16.mxu1 %v21137_v62  ;;  %15505 = vmatprep.mubr.bf16.mxu0 %v1450_v47  ;;  %v21179_v62 = vld [vmem:[%s21865_s7 + $0x2318] sm:$0xff]   ;;  %v21206_v47 = vld [vmem:[%s21865_s7 + $0x2450] sm:$0xff]  }
 0x4cf   : > { %15545 = vmatprep.mubr.bf16.mxu1 %v1452_v52  ;;  %v21211_v52 = vld [vmem:[%s21865_s7 + $0x24d8] sm:$0xff]  }
 0x4d0   : > { %19409 = vmatpush3.bf16.msra.mxu0 %v21138_v63  ;;  %v21180_v63 = vld [vmem:[%s21865_s7 + $0x2398] sm:$0xff]  }
 0x4d1   : > { %19410 = vmatprep.subr.bf16.mxu0 %v21140_v1  ;;  %19431 = vmatpush3.bf16.msra.mxu1 %v21139_v0  ;;  %v21181_v0 = vld [vmem:[%s21865_s7 + $0x2360] sm:$0xff]  }
 0x4d2   : > { %19432 = vmatprep.subr.bf16.mxu1 %v21141_v2  ;;  %v21182_v1 = vld [vmem:[%s21865_s7 + $0x23e0] sm:$0xff]  }
 0x4d3   : > { %v21183_v2 = vld [vmem:[%s21865_s7 + $0x2320] sm:$0xff]  }
 0x4d4   : > { %19411 = vmatpush3.bf16.msra.mxu0 %v21142_v3  ;;  %v21184_v3 = vld [vmem:[%s21865_s7 + $0x23a0] sm:$0xff]  }
 0x4d5   : > { %19412 = vmatprep.subr.bf16.mxu0 %v21144_v5  ;;  %19433 = vmatpush3.bf16.msra.mxu1 %v21143_v4  ;;  %v21185_v4 = vld [vmem:[%s21865_s7 + $0x2368] sm:$0xff]  }
 0x4d6   : > { %19434 = vmatprep.subr.bf16.mxu1 %v21145_v6  ;;  %v21186_v6 = vld [vmem:[%s21865_s7 + $0x23e8] sm:$0xff]  }
 0x4d8   : > { %19413 = vmatpush3.bf16.msra.mxu0 %v21146_v7 }
 0x4d9   : > { %19414 = vmatprep.subr.bf16.mxu0 %v21148_v9  ;;  %19435 = vmatpush3.bf16.msra.mxu1 %v21147_v8  ;;  %v21187_v8 = vld [vmem:[%s21865_s7 + $0x2328] sm:$0xff]  }
 0x4da   : > { %19436 = vmatprep.subr.bf16.mxu1 %v21149_v10 }
 0x4dc   : > { %19415 = vmatpush3.bf16.msra.mxu0 %v21150_v11 }
 0x4dd   : > { %19416 = vmatprep.subr.bf16.mxu0 %v21152_v13  ;;  %19437 = vmatpush3.bf16.msra.mxu1 %v21151_v12  ;;  %v21188_v13 = vld [vmem:[%s21865_s7 + $0x23a8] sm:$0xff]  }
 0x4de   : > { %v19114_v14 = vpop.f32.mrb[108].mxu0  ;;  %19438 = vmatprep.subr.bf16.mxu1 %v21153_v15  ;;  %v21189_v15 = vld [vmem:[%s21865_s7 + $0x2370] sm:$0xff]  }
 0x4df   : > { %v19115_v16 = vpop.f32.mrb[109].mxu0  ;;  %v19136_v18 = vpop.f32.mrb[108].mxu1 }
 0x4e0   : > { %v19116_v19 = vadd.f32 %v19115_v16, %v19114_v14  ;;  %v19117_v20 = vpop.f32.mrb[110].mxu0  ;;  %v19137_v23 = vpop.f32.mrb[109].mxu1  ;;  %19417 = vmatpush3.bf16.msra.mxu0 %v21154_v17 }
 0x4e1   : > { %v19118_v24 = vpop.f32.mrb[111].mxu0  ;;  %v19138_v26 = vadd.f32 %v19137_v23, %v19136_v18  ;;  %v19139_v27 = vpop.f32.mrb[110].mxu1  ;;  %19418 = vmatprep.subr.bf16.mxu0 %v21156_v22  ;;  %19439 = vmatpush3.bf16.msra.mxu1 %v21155_v21  ;;  %v21191_v21 = vld [vmem:[%s21865_s7 + $0x2330] sm:$0xff]   ;;  %v21193_v23 = vld [vmem:[%s21865_s7 + $0x2378] sm:$0xff]  }
 0x4e2   : > { %v14948_v25 = vadd.f32 %v19116_v19, %v23149_v40  ;;  %v19140_v29 = vpop.f32.mrb[111].mxu1  ;;  %19440 = vmatprep.subr.bf16.mxu1 %v21157_v28  ;;  %v21165_v40 = vld [vmem:[%s21865_s7 + $0x2340] sm:$0xff]   ;;  %v21190_v19 = vld [vmem:[%s21865_s7 + $0x23f0] sm:$0xff]  }
 0x4e3   : > { %v21192_v24 = vld [vmem:[%s21865_s7 + $0x23b0] sm:$0xff]  }
 0x4e4   : > { %v23187_v31 = vadd.f32 %v19138_v26, %v14948_v25  ;;  %19419 = vmatpush3.bf16.msra.mxu0 %v21158_v30  ;;  %v21194_v25 = vld [vmem:[%s21865_s7 + $0x23f8] sm:$0xff]   ;;  %v21198_v30 = vld [vmem:[%s21865_s7 + $0x2440] sm:$0xff]  }
 0x4e5   : > { %19420 = vmatprep.subr.bf16.mxu0 %v21160_v33  ;;  %19441 = vmatpush3.bf16.msra.mxu1 %v21159_v32  ;;  %v21195_v26 = vld [vmem:[%s21865_s7 + $0x2338] sm:$0xff]  }
 0x4e6   : > { %19442 = vmatprep.subr.bf16.mxu1 %v21161_v34  ;;  %v336_v27 = vld [vmem:[%s21883_s27 + $0x118] sm:$0xff]  ;;  %v21199_v34 = vld [vmem:[%s21865_s7 + $0x24c0] sm:$0xff]  }
 0x4e7   : > { %v991_v28 = vrot.slane %v336_v27, %v21922_v42  ;;  %v984_v29 = vcombine.high %v336_v27, %v336_v27  ;;  %v21233_v27 = vld [vmem:[%s21865_s7 + $0x2500] sm:$0xff]  }
 0x4e8   : > { %19421 = vmatpush3.bf16.msra.mxu0 %v21162_v35 }
 0x4e9   : > { %19450 = vmatprep.subr.bf16.mxu0 %v21165_v40  ;;  %19443 = vmatpush3.bf16.msra.mxu1 %v21163_v37  ;;  %v999_v32 = vcombine.high %v991_v28, %v991_v28  ;;  %v998_v33 = vrot.slane %v984_v29, %v21922_v42  ;;  %v1453_v35 = vpack.c.bf16 %v991_v28, %v991_v28 }
 0x4ea   : > { %19472 = vmatprep.subr.bf16.mxu1 %v21166_v44  ;;  %v21203_v44 = vld [vmem:[%s21865_s7 + $0x24c8] sm:$0xff]  }
 0x4eb   : > { %15506 = vmatmul.mubr.bf16.vlgmr.msra.gmra.mrb[136].mxu0 %v1449_v45  ;;  %v1454_v37 = vpack.c.bf16 %v999_v32, %v999_v32  ;;  %v1000_v38 = vcombine.high %v998_v33, %v998_v33  ;;  %v1455_v40 = vpack.c.bf16 %v998_v33, %v998_v33  ;;  %v21204_v45 = vld [vmem:[%s21865_s7 + $0x2408] sm:$0xff]  }
 0x4ec   : > { %19451 = vmatpush3.bf16.msra.mxu0 %v21167_v46  ;;  %15546 = vmatmul.mubr.bf16.vlgmr.msra.gmra.mrb[136].mxu1 %v1451_v50  ;;  %v21205_v46 = vld [vmem:[%s21865_s7 + $0x2488] sm:$0xff]   ;;  %v21209_v50 = vld [vmem:[%s21865_s7 + $0x2490] sm:$0xff]  }
 0x4ed   : > { %19452 = vmatprep.subr.bf16.mxu0 %v21169_v51  ;;  %19473 = vmatpush3.bf16.msra.mxu1 %v21168_v49  ;;  %v1456_v43 = vpack.c.bf16 %v1000_v38, %v1000_v38  ;;  %v21208_v49 = vld [vmem:[%s21865_s7 + $0x2410] sm:$0xff]   ;;  %v21210_v51 = vld [vmem:[%s21865_s7 + $0x2458] sm:$0xff]   ;;  %v21235_v32 = vld [vmem:[%s21865_s7 + $0x2548] sm:$0xff]  }
 0x4ee   : > { %19474 = vmatprep.subr.bf16.mxu1 %v21170_v53  ;;  %15585 = vmatprep.mubr.bf16.mxu0 %v1454_v37  ;;  %v21212_v53 = vld [vmem:[%s21865_s7 + $0x2418] sm:$0xff]   ;;  %v21239_v37 = vld [vmem:[%s21865_s7 + $0x2550] sm:$0xff]  }
 0x4ef   : > { %15625 = vmatprep.mubr.bf16.mxu1 %v1456_v43  ;;  %v21240_v38 = vld [vmem:[%s21865_s7 + $0x25d0] sm:$0xff]   ;;  %v21244_v43 = vld [vmem:[%s21865_s7 + $0x25d8] sm:$0xff]  }
 0x4f0   : > { %19453 = vmatpush3.bf16.msra.mxu0 %v21171_v54  ;;  %v21213_v54 = vld [vmem:[%s21865_s7 + $0x2498] sm:$0xff]  }
 0x4f1   : > { %19454 = vmatprep.subr.bf16.mxu0 %v21173_v56  ;;  %19475 = vmatpush3.bf16.msra.mxu1 %v21172_v55  ;;  %v21214_v55 = vld [vmem:[%s21865_s7 + $0x2460] sm:$0xff]  }
 0x4f2   : > { %19476 = vmatprep.subr.bf16.mxu1 %v21174_v57  ;;  %v21215_v56 = vld [vmem:[%s21865_s7 + $0x24e0] sm:$0xff]  }
 0x4f3   : > { %v21216_v57 = vld [vmem:[%s21865_s7 + $0x2420] sm:$0xff]  }
 0x4f4   : > { %19455 = vmatpush3.bf16.msra.mxu0 %v21175_v58  ;;  %v21217_v58 = vld [vmem:[%s21865_s7 + $0x24a0] sm:$0xff]  }
 0x4f5   : > { %19456 = vmatprep.subr.bf16.mxu0 %v21177_v60  ;;  %19477 = vmatpush3.bf16.msra.mxu1 %v21176_v59  ;;  %v21218_v59 = vld [vmem:[%s21865_s7 + $0x2468] sm:$0xff]  }
 0x4f6   : > { %19478 = vmatprep.subr.bf16.mxu1 %v21178_v61  ;;  %v21219_v61 = vld [vmem:[%s21865_s7 + $0x24e8] sm:$0xff]  }
 0x4f8   : > { %19457 = vmatpush3.bf16.msra.mxu0 %v21179_v62 }
 0x4f9   : > { %19458 = vmatprep.subr.bf16.mxu0 %v21181_v0  ;;  %19479 = vmatpush3.bf16.msra.mxu1 %v21180_v63  ;;  %v21220_v63 = vld [vmem:[%s21865_s7 + $0x2428] sm:$0xff]  }
 0x4fa   : > { %19480 = vmatprep.subr.bf16.mxu1 %v21182_v1 }
 0x4fc   : > { %19459 = vmatpush3.bf16.msra.mxu0 %v21183_v2 }
 0x4fd   : > { %19460 = vmatprep.subr.bf16.mxu0 %v21185_v4  ;;  %19481 = vmatpush3.bf16.msra.mxu1 %v21184_v3  ;;  %v21221_v3 = vld [vmem:[%s21865_s7 + $0x24a8] sm:$0xff]   ;;  %v21222_v4 = vld [vmem:[%s21865_s7 + $0x2470] sm:$0xff]  }
 0x4fe   : > { %v19158_v5 = vpop.f32.mrb[112].mxu0  ;;  %19482 = vmatprep.subr.bf16.mxu1 %v21186_v6 }
 0x4ff   : > { %v19159_v7 = vpop.f32.mrb[113].mxu0  ;;  %v19180_v9 = vpop.f32.mrb[112].mxu1 }
 0x500   : > { %v19160_v10 = vadd.f32 %v19159_v7, %v19158_v5  ;;  %v19161_v11 = vpop.f32.mrb[114].mxu0  ;;  %v19181_v12 = vpop.f32.mrb[113].mxu1  ;;  %19461 = vmatpush3.bf16.msra.mxu0 %v21187_v8 }
 0x501   : > { %v19162_v14 = vpop.f32.mrb[115].mxu0  ;;  %v19182_v17 = vadd.f32 %v19181_v12, %v19180_v9  ;;  %v19183_v18 = vpop.f32.mrb[114].mxu1  ;;  %19462 = vmatprep.subr.bf16.mxu0 %v21189_v15  ;;  %19483 = vmatpush3.bf16.msra.mxu1 %v21188_v13  ;;  %v21224_v12 = vld [vmem:[%s21865_s7 + $0x2430] sm:$0xff]   ;;  %v21226_v15 = vld [vmem:[%s21865_s7 + $0x2478] sm:$0xff]  }
 0x502   : > { %v15028_v16 = vadd.f32 %v19160_v10, %v23187_v31  ;;  %v19184_v20 = vpop.f32.mrb[115].mxu1  ;;  %19484 = vmatprep.subr.bf16.mxu1 %v21190_v19  ;;  %v21196_v31 = vld [vmem:[%s21865_s7 + $0x23b8] sm:$0xff]   ;;  %v21223_v10 = vld [vmem:[%s21865_s7 + $0x24f0] sm:$0xff]  }
 0x503   : > { %v21225_v14 = vld [vmem:[%s21865_s7 + $0x24b0] sm:$0xff]   ;;  %v337_v18 = vld [vmem:[%s21883_s27 + $0x120] sm:$0xff] }
 0x504   : > { %v23225_v22 = vadd.f32 %v19182_v17, %v15028_v16  ;;  %19463 = vmatpush3.bf16.msra.mxu0 %v21191_v21  ;;  %v21227_v16 = vld [vmem:[%s21865_s7 + $0x24f8] sm:$0xff]   ;;  %v1008_v19 = vrot.slane %v337_v18, %v21922_v42  ;;  %v1001_v20 = vcombine.high %v337_v18, %v337_v18  ;;  %v21231_v21 = vld [vmem:[%s21865_s7 + $0x2540] sm:$0xff]  }
 0x505   : > { %19464 = vmatprep.subr.bf16.mxu0 %v21193_v23  ;;  %19485 = vmatpush3.bf16.msra.mxu1 %v21192_v24  ;;  %v21228_v17 = vld [vmem:[%s21865_s7 + $0x2438] sm:$0xff]   ;;  %v21266_v18 = vld [vmem:[%s21865_s7 + $0x2600] sm:$0xff]  }
 0x506   : > { %19486 = vmatprep.subr.bf16.mxu1 %v21194_v25  ;;  %v1016_v23 = vcombine.high %v1008_v19, %v1008_v19  ;;  %v1015_v24 = vrot.slane %v1001_v20, %v21922_v42  ;;  %v21232_v25 = vld [vmem:[%s21865_s7 + $0x25c0] sm:$0xff]  }
 0x508   : > { %19465 = vmatpush3.bf16.msra.mxu0 %v21195_v26  ;;  %v1457_v26 = vpack.c.bf16 %v1008_v19, %v1008_v19  ;;  %v1458_v28 = vpack.c.bf16 %v1016_v23, %v1016_v23  ;;  %v1017_v29 = vcombine.high %v1015_v24, %v1015_v24  ;;  %v21268_v23 = vld [vmem:[%s21865_s7 + $0x2648] sm:$0xff]  }
 0x509   : > { %19494 = vmatprep.subr.bf16.mxu0 %v21198_v30  ;;  %19487 = vmatpush3.bf16.msra.mxu1 %v21196_v31  ;;  %v21234_v30 = vld [vmem:[%s21865_s7 + $0x2580] sm:$0xff]   ;;  %v1459_v31 = vpack.c.bf16 %v1015_v24, %v1015_v24 }
 0x50a   : > { %19516 = vmatprep.subr.bf16.mxu1 %v21199_v34  ;;  %v1460_v33 = vpack.c.bf16 %v1017_v29, %v1017_v29  ;;  %v21236_v34 = vld [vmem:[%s21865_s7 + $0x25c8] sm:$0xff]   ;;  %v21273_v29 = vld [vmem:[%s21865_s7 + $0x26d0] sm:$0xff]  }
 0x50b   : > { %15586 = vmatmul.mubr.bf16.vlgmr.msra.gmra.mrb[140].mxu0 %v1453_v35  ;;  %v21237_v35 = vld [vmem:[%s21865_s7 + $0x2508] sm:$0xff]  }
 0x50c   : > { %19495 = vmatpush3.bf16.msra.mxu0 %v21200_v36  ;;  %15626 = vmatmul.mubr.bf16.vlgmr.msra.gmra.mrb[140].mxu1 %v1455_v40  ;;  %v21238_v36 = vld [vmem:[%s21865_s7 + $0x2588] sm:$0xff]   ;;  %v21242_v40 = vld [vmem:[%s21865_s7 + $0x2590] sm:$0xff]  }
 0x50d   : > { %19496 = vmatprep.subr.bf16.mxu0 %v21202_v41  ;;  %19517 = vmatpush3.bf16.msra.mxu1 %v21201_v39  ;;  %v21241_v39 = vld [vmem:[%s21865_s7 + $0x2510] sm:$0xff]   ;;  %v21243_v41 = vld [vmem:[%s21865_s7 + $0x2558] sm:$0xff]  }
 0x50e   : > { %19518 = vmatprep.subr.bf16.mxu1 %v21203_v44  ;;  %15665 = vmatprep.mubr.bf16.mxu0 %v1458_v28  ;;  %v21245_v44 = vld [vmem:[%s21865_s7 + $0x2518] sm:$0xff]   ;;  %v21272_v28 = vld [vmem:[%s21865_s7 + $0x2650] sm:$0xff]  }
 0x50f   : > { %15705 = vmatprep.mubr.bf16.mxu1 %v1460_v33  ;;  %v21277_v33 = vld [vmem:[%s21865_s7 + $0x26d8] sm:$0xff]  }
 0x510   : > { %19497 = vmatpush3.bf16.msra.mxu0 %v21204_v45  ;;  %v21246_v45 = vld [vmem:[%s21865_s7 + $0x2598] sm:$0xff]  }
 0x511   : > { %19498 = vmatprep.subr.bf16.mxu0 %v21206_v47  ;;  %19519 = vmatpush3.bf16.msra.mxu1 %v21205_v46  ;;  %v21247_v46 = vld [vmem:[%s21865_s7 + $0x2560] sm:$0xff]  }
 0x512   : > { %19520 = vmatprep.subr.bf16.mxu1 %v21207_v48  ;;  %v21248_v47 = vld [vmem:[%s21865_s7 + $0x25e0] sm:$0xff]  }
 0x513   : > { %v21249_v48 = vld [vmem:[%s21865_s7 + $0x2520] sm:$0xff]  }
 0x514   : > { %19499 = vmatpush3.bf16.msra.mxu0 %v21208_v49  ;;  %v21250_v49 = vld [vmem:[%s21865_s7 + $0x25a0] sm:$0xff]  }
 0x515   : > { %19500 = vmatprep.subr.bf16.mxu0 %v21210_v51  ;;  %19521 = vmatpush3.bf16.msra.mxu1 %v21209_v50  ;;  %v21251_v50 = vld [vmem:[%s21865_s7 + $0x2568] sm:$0xff]  }
 0x516   : > { %19522 = vmatprep.subr.bf16.mxu1 %v21211_v52  ;;  %v21252_v52 = vld [vmem:[%s21865_s7 + $0x25e8] sm:$0xff]  }
 0x518   : > { %19501 = vmatpush3.bf16.msra.mxu0 %v21212_v53 }
 0x519   : > { %19502 = vmatprep.subr.bf16.mxu0 %v21214_v55  ;;  %19523 = vmatpush3.bf16.msra.mxu1 %v21213_v54  ;;  %v21253_v54 = vld [vmem:[%s21865_s7 + $0x2528] sm:$0xff]  }
 0x51a   : > { %19524 = vmatprep.subr.bf16.mxu1 %v21215_v56 }
 0x51c   : > { %19503 = vmatpush3.bf16.msra.mxu0 %v21216_v57 }
 0x51d   : > { %19504 = vmatprep.subr.bf16.mxu0 %v21218_v59  ;;  %19525 = vmatpush3.bf16.msra.mxu1 %v21217_v58  ;;  %v21254_v58 = vld [vmem:[%s21865_s7 + $0x25a8] sm:$0xff]   ;;  %v21255_v59 = vld [vmem:[%s21865_s7 + $0x2570] sm:$0xff]  }
 0x51e   : > { %v19202_v60 = vpop.f32.mrb[116].mxu0  ;;  %19526 = vmatprep.subr.bf16.mxu1 %v21219_v61 }
 0x51f   : > { %v19203_v62 = vpop.f32.mrb[117].mxu0  ;;  %v19224_v0 = vpop.f32.mrb[116].mxu1 }
 0x520   : > { %v19204_v1 = vadd.f32 %v19203_v62, %v19202_v60  ;;  %v19205_v2 = vpop.f32.mrb[118].mxu0  ;;  %v19225_v5 = vpop.f32.mrb[117].mxu1  ;;  %19505 = vmatpush3.bf16.msra.mxu0 %v21220_v63 }
 0x521   : > { %v19206_v6 = vpop.f32.mrb[119].mxu0  ;;  %v19226_v8 = vadd.f32 %v19225_v5, %v19224_v0  ;;  %v19227_v9 = vpop.f32.mrb[118].mxu1  ;;  %19506 = vmatprep.subr.bf16.mxu0 %v21222_v4  ;;  %19527 = vmatpush3.bf16.msra.mxu1 %v21221_v3  ;;  %v21257_v3 = vld [vmem:[%s21865_s7 + $0x2530] sm:$0xff]  }
 0x522   : > { %v15108_v7 = vadd.f32 %v19204_v1, %v23225_v22  ;;  %v19228_v11 = vpop.f32.mrb[119].mxu1  ;;  %19528 = vmatprep.subr.bf16.mxu1 %v21223_v10  ;;  %v21229_v22 = vld [vmem:[%s21865_s7 + $0x24b8] sm:$0xff]   ;;  %v21256_v1 = vld [vmem:[%s21865_s7 + $0x25f0] sm:$0xff]   ;;  %v338_v9 = vld [vmem:[%s21883_s27 + $0x128] sm:$0xff] }
 0x523   : > { %v21258_v5 = vld [vmem:[%s21865_s7 + $0x25b0] sm:$0xff]   ;;  %v21259_v6 = vld [vmem:[%s21865_s7 + $0x2578] sm:$0xff]   ;;  %v1025_v11 = vrot.slane %v338_v9, %v21922_v42 }
 0x524   : > { %v23263_v13 = vadd.f32 %v19226_v8, %v15108_v7  ;;  %19507 = vmatpush3.bf16.msra.mxu0 %v21224_v12  ;;  %v21260_v7 = vld [vmem:[%s21865_s7 + $0x25f8] sm:$0xff]   ;;  %v1018_v12 = vcombine.high %v338_v9, %v338_v9  ;;  %v21299_v9 = vld [vmem:[%s21865_s7 + $0x2700] sm:$0xff]  }
 0x525   : > { %19508 = vmatprep.subr.bf16.mxu0 %v21226_v15  ;;  %19529 = vmatpush3.bf16.msra.mxu1 %v21225_v14  ;;  %v21261_v8 = vld [vmem:[%s21865_s7 + $0x2538] sm:$0xff]   ;;  %v1033_v14 = vcombine.high %v1025_v11, %v1025_v11 }
 0x526   : > { %19530 = vmatprep.subr.bf16.mxu1 %v21227_v16  ;;  %v21262_v10 = vld [vmem:[%s21865_s7 + $0x25b8] sm:$0xff]   ;;  %v1032_v15 = vrot.slane %v1018_v12, %v21922_v42  ;;  %v21265_v16 = vld [vmem:[%s21865_s7 + $0x26c0] sm:$0xff]  }
 0x527   : > { %v1462_v19 = vpack.c.bf16 %v1033_v14, %v1033_v14  ;;  %v21300_v12 = vld [vmem:[%s21865_s7 + $0x2780] sm:$0xff]   ;;  %v21301_v14 = vld [vmem:[%s21865_s7 + $0x2748] sm:$0xff]  }
 0x528   : > { %19509 = vmatpush3.bf16.msra.mxu0 %v21228_v17  ;;  %v1461_v17 = vpack.c.bf16 %v1025_v11, %v1025_v11  ;;  %v1034_v20 = vcombine.high %v1032_v15, %v1032_v15 }
 0x529   : > { %19538 = vmatprep.subr.bf16.mxu0 %v21231_v21  ;;  %19531 = vmatpush3.bf16.msra.mxu1 %v21229_v22  ;;  %v21267_v21 = vld [vmem:[%s21865_s7 + $0x2680] sm:$0xff]   ;;  %v1463_v22 = vpack.c.bf16 %v1032_v15, %v1032_v15 }
 0x52a   : > { %19560 = vmatprep.subr.bf16.mxu1 %v21232_v25  ;;  %v1464_v24 = vpack.c.bf16 %v1034_v20, %v1034_v20  ;;  %v21269_v25 = vld [vmem:[%s21865_s7 + $0x26c8] sm:$0xff]   ;;  %v21306_v20 = vld [vmem:[%s21865_s7 + $0x27d0] sm:$0xff]  }
 0x52b   : > { %15666 = vmatmul.mubr.bf16.vlgmr.msra.gmra.mrb[144].mxu0 %v1457_v26  ;;  %v21270_v26 = vld [vmem:[%s21865_s7 + $0x2608] sm:$0xff]  }
 0x52c   : > { %19539 = vmatpush3.bf16.msra.mxu0 %v21233_v27  ;;  %15706 = vmatmul.mubr.bf16.vlgmr.msra.gmra.mrb[144].mxu1 %v1459_v31  ;;  %v21271_v27 = vld [vmem:[%s21865_s7 + $0x2688] sm:$0xff]   ;;  %v21275_v31 = vld [vmem:[%s21865_s7 + $0x2690] sm:$0xff]  }
 0x52d   : > { %19540 = vmatprep.subr.bf16.mxu0 %v21235_v32  ;;  %19561 = vmatpush3.bf16.msra.mxu1 %v21234_v30  ;;  %v21274_v30 = vld [vmem:[%s21865_s7 + $0x2610] sm:$0xff]   ;;  %v21276_v32 = vld [vmem:[%s21865_s7 + $0x2658] sm:$0xff]  }
 0x52e   : > { %19562 = vmatprep.subr.bf16.mxu1 %v21236_v34  ;;  %15745 = vmatprep.mubr.bf16.mxu0 %v1462_v19  ;;  %v21278_v34 = vld [vmem:[%s21865_s7 + $0x2618] sm:$0xff]   ;;  %v21305_v19 = vld [vmem:[%s21865_s7 + $0x2750] sm:$0xff]  }
 0x52f   : > { %15785 = vmatprep.mubr.bf16.mxu1 %v1464_v24  ;;  %v21310_v24 = vld [vmem:[%s21865_s7 + $0x27d8] sm:$0xff]  }
 0x530   : > { %19541 = vmatpush3.bf16.msra.mxu0 %v21237_v35  ;;  %v21279_v35 = vld [vmem:[%s21865_s7 + $0x2698] sm:$0xff]  }
 0x531   : > { %19542 = vmatprep.subr.bf16.mxu0 %v21239_v37  ;;  %19563 = vmatpush3.bf16.msra.mxu1 %v21238_v36  ;;  %v21280_v36 = vld [vmem:[%s21865_s7 + $0x2660] sm:$0xff]  }
 0x532   : > { %19564 = vmatprep.subr.bf16.mxu1 %v21240_v38  ;;  %v21281_v37 = vld [vmem:[%s21865_s7 + $0x26e0] sm:$0xff]  }
 0x533   : > { %v21282_v38 = vld [vmem:[%s21865_s7 + $0x2620] sm:$0xff]  }
 0x534   : > { %19543 = vmatpush3.bf16.msra.mxu0 %v21241_v39  ;;  %v21283_v39 = vld [vmem:[%s21865_s7 + $0x26a0] sm:$0xff]  }
 0x535   : > { %19544 = vmatprep.subr.bf16.mxu0 %v21243_v41  ;;  %19565 = vmatpush3.bf16.msra.mxu1 %v21242_v40  ;;  %v21284_v40 = vld [vmem:[%s21865_s7 + $0x2668] sm:$0xff]  }
 0x536   : > { %19566 = vmatprep.subr.bf16.mxu1 %v21244_v43  ;;  %v21285_v43 = vld [vmem:[%s21865_s7 + $0x26e8] sm:$0xff]  }
 0x538   : > { %19545 = vmatpush3.bf16.msra.mxu0 %v21245_v44 }
 0x539   : > { %19546 = vmatprep.subr.bf16.mxu0 %v21247_v46  ;;  %19567 = vmatpush3.bf16.msra.mxu1 %v21246_v45  ;;  %v21286_v45 = vld [vmem:[%s21865_s7 + $0x2628] sm:$0xff]  }
 0x53a   : > { %19568 = vmatprep.subr.bf16.mxu1 %v21248_v47 }
 0x53c   : > { %19547 = vmatpush3.bf16.msra.mxu0 %v21249_v48 }
 0x53d   : > { %19548 = vmatprep.subr.bf16.mxu0 %v21251_v50  ;;  %19569 = vmatpush3.bf16.msra.mxu1 %v21250_v49  ;;  %v21287_v50 = vld [vmem:[%s21865_s7 + $0x26a8] sm:$0xff]  }
 0x53e   : > { %v19246_v51 = vpop.f32.mrb[120].mxu0  ;;  %19570 = vmatprep.subr.bf16.mxu1 %v21252_v52  ;;  %v21288_v52 = vld [vmem:[%s21865_s7 + $0x2670] sm:$0xff]  }
 0x53f   : > { %v19247_v53 = vpop.f32.mrb[121].mxu0  ;;  %v19268_v55 = vpop.f32.mrb[120].mxu1 }
 0x540   : > { %v19248_v56 = vadd.f32 %v19247_v53, %v19246_v51  ;;  %v19249_v57 = vpop.f32.mrb[122].mxu0  ;;  %v19269_v60 = vpop.f32.mrb[121].mxu1  ;;  %19549 = vmatpush3.bf16.msra.mxu0 %v21253_v54 }
 0x541   : > { %v19250_v61 = vpop.f32.mrb[123].mxu0  ;;  %v19270_v63 = vadd.f32 %v19269_v60, %v19268_v55  ;;  %v19271_v0 = vpop.f32.mrb[122].mxu1  ;;  %19550 = vmatprep.subr.bf16.mxu0 %v21255_v59  ;;  %19571 = vmatpush3.bf16.msra.mxu1 %v21254_v58  ;;  %v21290_v58 = vld [vmem:[%s21865_s7 + $0x2630] sm:$0xff]   ;;  %v21292_v60 = vld [vmem:[%s21865_s7 + $0x2678] sm:$0xff]  }
 0x542   : > { %v15188_v62 = vadd.f32 %v19248_v56, %v23263_v13  ;;  %v19272_v2 = vpop.f32.mrb[123].mxu1  ;;  %19572 = vmatprep.subr.bf16.mxu1 %v21256_v1  ;;  %v21264_v13 = vld [vmem:[%s21865_s7 + $0x2640] sm:$0xff]   ;;  %v21289_v56 = vld [vmem:[%s21865_s7 + $0x26f0] sm:$0xff]  }
 0x543   : > { %v21291_v61 = vld [vmem:[%s21865_s7 + $0x26b0] sm:$0xff]  }
 0x544   : > { %v23301_v4 = vadd.f32 %v19270_v63, %v15188_v62  ;;  %19551 = vmatpush3.bf16.msra.mxu0 %v21257_v3  ;;  %v21293_v62 = vld [vmem:[%s21865_s7 + $0x26f8] sm:$0xff]   ;;  %v339_v0 = vld [vmem:[%s21883_s27 + $0x130] sm:$0xff]  ;;  %v21297_v3 = vld [vmem:[%s21865_s7 + $0x2740] sm:$0xff]  }
 0x545   : > { %19552 = vmatprep.subr.bf16.mxu0 %v21259_v6  ;;  %19573 = vmatpush3.bf16.msra.mxu1 %v21258_v5  ;;  %v21294_v63 = vld [vmem:[%s21865_s7 + $0x2638] sm:$0xff]   ;;  %v1042_v1 = vrot.slane %v339_v0, %v21922_v42  ;;  %v1035_v2 = vcombine.high %v339_v0, %v339_v0  ;;  %v21332_v0 = vld [vmem:[%s21865_s7 + $0x2800] sm:$0xff]  }
 0x546   : > { %19574 = vmatprep.subr.bf16.mxu1 %v21260_v7  ;;  %v21298_v7 = vld [vmem:[%s21865_s7 + $0x27c0] sm:$0xff]  }
 0x547   : > { %v1050_v5 = vcombine.high %v1042_v1, %v1042_v1  ;;  %v1049_v6 = vrot.slane %v1035_v2, %v21922_v42 }
 0x548   : > { %19553 = vmatpush3.bf16.msra.mxu0 %v21261_v8  ;;  %v1465_v8 = vpack.c.bf16 %v1042_v1, %v1042_v1 }
 0x549   : > { %19582 = vmatprep.subr.bf16.mxu0 %v21264_v13  ;;  %19575 = vmatpush3.bf16.msra.mxu1 %v21262_v10  ;;  %v1466_v10 = vpack.c.bf16 %v1050_v5, %v1050_v5  ;;  %v1051_v11 = vcombine.high %v1049_v6, %v1049_v6  ;;  %v1467_v13 = vpack.c.bf16 %v1049_v6, %v1049_v6  ;;  %v21334_v5 = vld [vmem:[%s21865_s7 + $0x2848] sm:$0xff]  }
 0x54a   : > { %19604 = vmatprep.subr.bf16.mxu1 %v21265_v16  ;;  %v21302_v16 = vld [vmem:[%s21865_s7 + $0x27c8] sm:$0xff]  }
 0x54b   : > { %15746 = vmatmul.mubr.bf16.vlgmr.msra.gmra.mrb[148].mxu0 %v1461_v17  ;;  %v1468_v15 = vpack.c.bf16 %v1051_v11, %v1051_v11  ;;  %v21303_v17 = vld [vmem:[%s21865_s7 + $0x2708] sm:$0xff]   ;;  %v21339_v11 = vld [vmem:[%s21865_s7 + $0x28d0] sm:$0xff]  }
 0x54c   : > { %19583 = vmatpush3.bf16.msra.mxu0 %v21266_v18  ;;  %15786 = vmatmul.mubr.bf16.vlgmr.msra.gmra.mrb[148].mxu1 %v1463_v22  ;;  %v21304_v18 = vld [vmem:[%s21865_s7 + $0x2788] sm:$0xff]   ;;  %v21308_v22 = vld [vmem:[%s21865_s7 + $0x2790] sm:$0xff]  }
 0x54d   : > { %19584 = vmatprep.subr.bf16.mxu0 %v21268_v23  ;;  %19605 = vmatpush3.bf16.msra.mxu1 %v21267_v21  ;;  %v21307_v21 = vld [vmem:[%s21865_s7 + $0x2710] sm:$0xff]   ;;  %v21309_v23 = vld [vmem:[%s21865_s7 + $0x2758] sm:$0xff]  }
 0x54e   : > { %19606 = vmatprep.subr.bf16.mxu1 %v21269_v25  ;;  %15825 = vmatprep.mubr.bf16.mxu0 %v1466_v10  ;;  %v21311_v25 = vld [vmem:[%s21865_s7 + $0x2718] sm:$0xff]   ;;  %v21338_v10 = vld [vmem:[%s21865_s7 + $0x2850] sm:$0xff]  }
 0x54f   : > { %15865 = vmatprep.mubr.bf16.mxu1 %v1468_v15  ;;  %v21343_v15 = vld [vmem:[%s21865_s7 + $0x28d8] sm:$0xff]  }
 0x550   : > { %19585 = vmatpush3.bf16.msra.mxu0 %v21270_v26  ;;  %v21312_v26 = vld [vmem:[%s21865_s7 + $0x2798] sm:$0xff]  }
 0x551   : > { %19586 = vmatprep.subr.bf16.mxu0 %v21272_v28  ;;  %19607 = vmatpush3.bf16.msra.mxu1 %v21271_v27  ;;  %v21313_v27 = vld [vmem:[%s21865_s7 + $0x2760] sm:$0xff]  }
 0x552   : > { %19608 = vmatprep.subr.bf16.mxu1 %v21273_v29  ;;  %v21314_v28 = vld [vmem:[%s21865_s7 + $0x27e0] sm:$0xff]  }
 0x553   : > { %v21315_v29 = vld [vmem:[%s21865_s7 + $0x2720] sm:$0xff]  }
 0x554   : > { %19587 = vmatpush3.bf16.msra.mxu0 %v21274_v30  ;;  %v21316_v30 = vld [vmem:[%s21865_s7 + $0x27a0] sm:$0xff]  }
 0x555   : > { %19588 = vmatprep.subr.bf16.mxu0 %v21276_v32  ;;  %19609 = vmatpush3.bf16.msra.mxu1 %v21275_v31  ;;  %v21317_v31 = vld [vmem:[%s21865_s7 + $0x2768] sm:$0xff]  }
 0x556   : > { %19610 = vmatprep.subr.bf16.mxu1 %v21277_v33  ;;  %v21318_v33 = vld [vmem:[%s21865_s7 + $0x27e8] sm:$0xff]  }
 0x558   : > { %19589 = vmatpush3.bf16.msra.mxu0 %v21278_v34 }
 0x559   : > { %19590 = vmatprep.subr.bf16.mxu0 %v21280_v36  ;;  %19611 = vmatpush3.bf16.msra.mxu1 %v21279_v35  ;;  %v21319_v35 = vld [vmem:[%s21865_s7 + $0x2728] sm:$0xff]  }
 0x55a   : > { %19612 = vmatprep.subr.bf16.mxu1 %v21281_v37 }
 0x55c   : > { %19591 = vmatpush3.bf16.msra.mxu0 %v21282_v38 }
 0x55d   : > { %19592 = vmatprep.subr.bf16.mxu0 %v21284_v40  ;;  %19613 = vmatpush3.bf16.msra.mxu1 %v21283_v39  ;;  %v21320_v39 = vld [vmem:[%s21865_s7 + $0x27a8] sm:$0xff]   ;;  %v21321_v40 = vld [vmem:[%s21865_s7 + $0x2770] sm:$0xff]  }
 0x55e   : > { %v19290_v41 = vpop.f32.mrb[124].mxu0  ;;  %19614 = vmatprep.subr.bf16.mxu1 %v21285_v43 }
 0x55f   : > { %v19291_v44 = vpop.f32.mrb[125].mxu0  ;;  %v19312_v46 = vpop.f32.mrb[124].mxu1 }
 0x560   : > { %v19292_v47 = vadd.f32 %v19291_v44, %v19290_v41  ;;  %v19293_v48 = vpop.f32.mrb[126].mxu0  ;;  %v19313_v49 = vpop.f32.mrb[125].mxu1  ;;  %19593 = vmatpush3.bf16.msra.mxu0 %v21286_v45 }
 0x561   : > { %v19294_v51 = vpop.f32.mrb[127].mxu0  ;;  %v19314_v54 = vadd.f32 %v19313_v49, %v19312_v46  ;;  %v19315_v55 = vpop.f32.mrb[126].mxu1  ;;  %19594 = vmatprep.subr.bf16.mxu0 %v21288_v52  ;;  %19615 = vmatpush3.bf16.msra.mxu1 %v21287_v50  ;;  %v21323_v49 = vld [vmem:[%s21865_s7 + $0x2730] sm:$0xff]   ;;  %v21325_v52 = vld [vmem:[%s21865_s7 + $0x2778] sm:$0xff]  }
 0x562   : > { %v15268_v53 = vadd.f32 %v19292_v47, %v23301_v4  ;;  %v19316_v57 = vpop.f32.mrb[127].mxu1  ;;  %19616 = vmatprep.subr.bf16.mxu1 %v21289_v56  ;;  %v21295_v4 = vld [vmem:[%s21865_s7 + $0x26b8] sm:$0xff]   ;;  %v21322_v47 = vld [vmem:[%s21865_s7 + $0x27f0] sm:$0xff]  }
 0x563   : > { %v21324_v51 = vld [vmem:[%s21865_s7 + $0x27b0] sm:$0xff]  }
 0x564   : > { %v23339_v59 = vadd.f32 %v19314_v54, %v15268_v53  ;;  %19595 = vmatpush3.bf16.msra.mxu0 %v21290_v58  ;;  %v21326_v53 = vld [vmem:[%s21865_s7 + $0x27f8] sm:$0xff]   ;;  %v21330_v58 = vld [vmem:[%s21865_s7 + $0x2840] sm:$0xff]  }
 0x565   : > { %19596 = vmatprep.subr.bf16.mxu0 %v21292_v60  ;;  %19617 = vmatpush3.bf16.msra.mxu1 %v21291_v61  ;;  %v21327_v54 = vld [vmem:[%s21865_s7 + $0x2738] sm:$0xff]  }
 0x566   : > { %19618 = vmatprep.subr.bf16.mxu1 %v21293_v62  ;;  %v340_v55 = vld [vmem:[%s21883_s27 + $0x138] sm:$0xff]  ;;  %v21331_v62 = vld [vmem:[%s21865_s7 + $0x28c0] sm:$0xff]  }
 0x567   : > { %v1059_v56 = vrot.slane %v340_v55, %v21922_v42  ;;  %v1052_v57 = vcombine.high %v340_v55, %v340_v55  ;;  %v21365_v55 = vld [vmem:[%s21865_s7 + $0x2900] sm:$0xff]  }
 0x568   : > { %19597 = vmatpush3.bf16.msra.mxu0 %v21294_v63 }
 0x569   : > { %19626 = vmatprep.subr.bf16.mxu0 %v21297_v3  ;;  %19619 = vmatpush3.bf16.msra.mxu1 %v21295_v4  ;;  %v1067_v60 = vcombine.high %v1059_v56, %v1059_v56  ;;  %v1066_v61 = vrot.slane %v1052_v57, %v21922_v42  ;;  %v1469_v63 = vpack.c.bf16 %v1059_v56, %v1059_v56  ;;  %v21333_v3 = vld [vmem:[%s21865_s7 + $0x2880] sm:$0xff]  }
 0x56a   : > { %19648 = vmatprep.subr.bf16.mxu1 %v21298_v7  ;;  %v21335_v7 = vld [vmem:[%s21865_s7 + $0x28c8] sm:$0xff]  }
 0x56b   : > { %15826 = vmatmul.mubr.bf16.vlgmr.msra.gmra.mrb[152].mxu0 %v1465_v8  ;;  %v1470_v1 = vpack.c.bf16 %v1067_v60, %v1067_v60  ;;  %v1068_v2 = vcombine.high %v1066_v61, %v1066_v61  ;;  %v1471_v4 = vpack.c.bf16 %v1066_v61, %v1066_v61  ;;  %v21336_v8 = vld [vmem:[%s21865_s7 + $0x2808] sm:$0xff]  }
 0x56c   : > { %19627 = vmatpush3.bf16.msra.mxu0 %v21299_v9  ;;  %15866 = vmatmul.mubr.bf16.vlgmr.msra.gmra.mrb[152].mxu1 %v1467_v13  ;;  %v21337_v9 = vld [vmem:[%s21865_s7 + $0x2888] sm:$0xff]   ;;  %v21341_v13 = vld [vmem:[%s21865_s7 + $0x2890] sm:$0xff]  }
 0x56d   : > { %19628 = vmatprep.subr.bf16.mxu0 %v21301_v14  ;;  %19649 = vmatpush3.bf16.msra.mxu1 %v21300_v12  ;;  %v1472_v6 = vpack.c.bf16 %v1068_v2, %v1068_v2  ;;  %v21340_v12 = vld [vmem:[%s21865_s7 + $0x2810] sm:$0xff]   ;;  %v21342_v14 = vld [vmem:[%s21865_s7 + $0x2858] sm:$0xff]   ;;  %v21367_v60 = vld [vmem:[%s21865_s7 + $0x2948] sm:$0xff]  }
 0x56e   : > { %19650 = vmatprep.subr.bf16.mxu1 %v21302_v16  ;;  %15905 = vmatprep.mubr.bf16.mxu0 %v1470_v1  ;;  %v21344_v16 = vld [vmem:[%s21865_s7 + $0x2818] sm:$0xff]   ;;  %v21371_v1 = vld [vmem:[%s21865_s7 + $0x2950] sm:$0xff]  }
 0x56f   : > { %15945 = vmatprep.mubr.bf16.mxu1 %v1472_v6  ;;  %v21372_v2 = vld [vmem:[%s21865_s7 + $0x29d0] sm:$0xff]   ;;  %v21376_v6 = vld [vmem:[%s21865_s7 + $0x29d8] sm:$0xff]  }
 0x570   : > { %19629 = vmatpush3.bf16.msra.mxu0 %v21303_v17  ;;  %v21345_v17 = vld [vmem:[%s21865_s7 + $0x2898] sm:$0xff]  }
 0x571   : > { %19630 = vmatprep.subr.bf16.mxu0 %v21305_v19  ;;  %19651 = vmatpush3.bf16.msra.mxu1 %v21304_v18  ;;  %v21346_v18 = vld [vmem:[%s21865_s7 + $0x2860] sm:$0xff]  }
 0x572   : > { %19652 = vmatprep.subr.bf16.mxu1 %v21306_v20  ;;  %v21347_v19 = vld [vmem:[%s21865_s7 + $0x28e0] sm:$0xff]  }
 0x573   : > { %v21348_v20 = vld [vmem:[%s21865_s7 + $0x2820] sm:$0xff]  }
 0x574   : > { %19631 = vmatpush3.bf16.msra.mxu0 %v21307_v21  ;;  %v21349_v21 = vld [vmem:[%s21865_s7 + $0x28a0] sm:$0xff]  }
 0x575   : > { %19632 = vmatprep.subr.bf16.mxu0 %v21309_v23  ;;  %19653 = vmatpush3.bf16.msra.mxu1 %v21308_v22  ;;  %v21350_v22 = vld [vmem:[%s21865_s7 + $0x2868] sm:$0xff]  }
 0x576   : > { %19654 = vmatprep.subr.bf16.mxu1 %v21310_v24  ;;  %v21351_v24 = vld [vmem:[%s21865_s7 + $0x28e8] sm:$0xff]  }
 0x578   : > { %19633 = vmatpush3.bf16.msra.mxu0 %v21311_v25 }
 0x579   : > { %19634 = vmatprep.subr.bf16.mxu0 %v21313_v27  ;;  %19655 = vmatpush3.bf16.msra.mxu1 %v21312_v26  ;;  %v21352_v26 = vld [vmem:[%s21865_s7 + $0x2828] sm:$0xff]  }
 0x57a   : > { %19656 = vmatprep.subr.bf16.mxu1 %v21314_v28 }
 0x57c   : > { %19635 = vmatpush3.bf16.msra.mxu0 %v21315_v29 }
 0x57d   : > { %19636 = vmatprep.subr.bf16.mxu0 %v21317_v31  ;;  %19657 = vmatpush3.bf16.msra.mxu1 %v21316_v30  ;;  %v21353_v30 = vld [vmem:[%s21865_s7 + $0x28a8] sm:$0xff]   ;;  %v21354_v31 = vld [vmem:[%s21865_s7 + $0x2870] sm:$0xff]  }
 0x57e   : > { %v19334_v32 = vpop.f32.mrb[128].mxu0  ;;  %19658 = vmatprep.subr.bf16.mxu1 %v21318_v33 }
 0x57f   : > { %v19335_v34 = vpop.f32.mrb[129].mxu0  ;;  %v19356_v36 = vpop.f32.mrb[128].mxu1 }
 0x580   : > { %v19336_v37 = vadd.f32 %v19335_v34, %v19334_v32  ;;  %v19337_v38 = vpop.f32.mrb[130].mxu0  ;;  %v19357_v41 = vpop.f32.mrb[129].mxu1  ;;  %19637 = vmatpush3.bf16.msra.mxu0 %v21319_v35 }
 0x581   : > { %v19338_v43 = vpop.f32.mrb[131].mxu0  ;;  %v19358_v45 = vadd.f32 %v19357_v41, %v19356_v36  ;;  %v19359_v46 = vpop.f32.mrb[130].mxu1  ;;  %19638 = vmatprep.subr.bf16.mxu0 %v21321_v40  ;;  %19659 = vmatpush3.bf16.msra.mxu1 %v21320_v39  ;;  %v21356_v39 = vld [vmem:[%s21865_s7 + $0x2830] sm:$0xff]  }
 0x582   : > { %v15348_v44 = vadd.f32 %v19336_v37, %v23339_v59  ;;  %v19360_v48 = vpop.f32.mrb[131].mxu1  ;;  %19660 = vmatprep.subr.bf16.mxu1 %v21322_v47  ;;  %v21328_v59 = vld [vmem:[%s21865_s7 + $0x27b8] sm:$0xff]   ;;  %v21355_v37 = vld [vmem:[%s21865_s7 + $0x28f0] sm:$0xff]  }
 0x583   : > { %v21357_v41 = vld [vmem:[%s21865_s7 + $0x28b0] sm:$0xff]   ;;  %v21358_v43 = vld [vmem:[%s21865_s7 + $0x2878] sm:$0xff]  }
 0x584   : > { %v23377_v50 = vadd.f32 %v19358_v45, %v15348_v44  ;;  %19639 = vmatpush3.bf16.msra.mxu0 %v21323_v49  ;;  %v21359_v44 = vld [vmem:[%s21865_s7 + $0x28f8] sm:$0xff]  }
 0x585   : > { %19640 = vmatprep.subr.bf16.mxu0 %v21325_v52  ;;  %19661 = vmatpush3.bf16.msra.mxu1 %v21324_v51  ;;  %v21360_v45 = vld [vmem:[%s21865_s7 + $0x2838] sm:$0xff]  }
 0x586   : > { %19662 = vmatprep.subr.bf16.mxu1 %v21326_v53  ;;  %v341_v46 = vld [vmem:[%s21883_s27 + $0x140] sm:$0xff] }
 0x587   : > { %v21361_v47 = vld [vmem:[%s21865_s7 + $0x28b8] sm:$0xff]   ;;  %v1076_v48 = vrot.slane %v341_v46, %v21922_v42  ;;  %v1069_v49 = vcombine.high %v341_v46, %v341_v46  ;;  %v21364_v53 = vld [vmem:[%s21865_s7 + $0x29c0] sm:$0xff]  }
 0x588   : > { %19641 = vmatpush3.bf16.msra.mxu0 %v21327_v54  ;;  %v21398_v46 = vld [vmem:[%s21865_s7 + $0x2a00] sm:$0xff]  }
 0x589   : > { %19670 = vmatprep.subr.bf16.mxu0 %v21330_v58  ;;  %19663 = vmatpush3.bf16.msra.mxu1 %v21328_v59  ;;  %v1084_v51 = vcombine.high %v1076_v48, %v1076_v48  ;;  %v1083_v52 = vrot.slane %v1069_v49, %v21922_v42  ;;  %v1473_v54 = vpack.c.bf16 %v1076_v48, %v1076_v48  ;;  %v21366_v58 = vld [vmem:[%s21865_s7 + $0x2980] sm:$0xff]  }
 0x58a   : > { %19692 = vmatprep.subr.bf16.mxu1 %v21331_v62  ;;  %v21368_v62 = vld [vmem:[%s21865_s7 + $0x29c8] sm:$0xff]   ;;  %v21399_v49 = vld [vmem:[%s21865_s7 + $0x2a80] sm:$0xff]  }
 0x58b   : > { %15906 = vmatmul.mubr.bf16.vlgmr.msra.gmra.mrb[156].mxu0 %v1469_v63  ;;  %v1474_v56 = vpack.c.bf16 %v1084_v51, %v1084_v51  ;;  %v1085_v57 = vcombine.high %v1083_v52, %v1083_v52  ;;  %v1475_v59 = vpack.c.bf16 %v1083_v52, %v1083_v52  ;;  %v21369_v63 = vld [vmem:[%s21865_s7 + $0x2908] sm:$0xff]  }
 0x58c   : > { %19671 = vmatpush3.bf16.msra.mxu0 %v21332_v0  ;;  %15946 = vmatmul.mubr.bf16.vlgmr.msra.gmra.mrb[156].mxu1 %v1471_v4  ;;  %v21370_v0 = vld [vmem:[%s21865_s7 + $0x2988] sm:$0xff]   ;;  %v21374_v4 = vld [vmem:[%s21865_s7 + $0x2990] sm:$0xff]  }
 0x58d   : > { %19672 = vmatprep.subr.bf16.mxu0 %v21334_v5  ;;  %19693 = vmatpush3.bf16.msra.mxu1 %v21333_v3  ;;  %v1476_v61 = vpack.c.bf16 %v1085_v57, %v1085_v57  ;;  %v21373_v3 = vld [vmem:[%s21865_s7 + $0x2910] sm:$0xff]   ;;  %v21375_v5 = vld [vmem:[%s21865_s7 + $0x2958] sm:$0xff]   ;;  %v21400_v51 = vld [vmem:[%s21865_s7 + $0x2a48] sm:$0xff]  }
 0x58e   : > { %19694 = vmatprep.subr.bf16.mxu1 %v21335_v7  ;;  %15985 = vmatprep.mubr.bf16.mxu0 %v1474_v56  ;;  %v21377_v7 = vld [vmem:[%s21865_s7 + $0x2918] sm:$0xff]   ;;  %v21404_v56 = vld [vmem:[%s21865_s7 + $0x2a50] sm:$0xff]  }
 0x58f   : > { %16025 = vmatprep.mubr.bf16.mxu1 %v1476_v61  ;;  %v21405_v57 = vld [vmem:[%s21865_s7 + $0x2ad0] sm:$0xff]   ;;  %v21409_v61 = vld [vmem:[%s21865_s7 + $0x2ad8] sm:$0xff]  }
 0x590   : > { %19673 = vmatpush3.bf16.msra.mxu0 %v21336_v8  ;;  %v21378_v8 = vld [vmem:[%s21865_s7 + $0x2998] sm:$0xff]  }
 0x591   : > { %19674 = vmatprep.subr.bf16.mxu0 %v21338_v10  ;;  %19695 = vmatpush3.bf16.msra.mxu1 %v21337_v9  ;;  %v21379_v9 = vld [vmem:[%s21865_s7 + $0x2960] sm:$0xff]  }
 0x592   : > { %19696 = vmatprep.subr.bf16.mxu1 %v21339_v11  ;;  %v21380_v10 = vld [vmem:[%s21865_s7 + $0x29e0] sm:$0xff]  }
 0x593   : > { %v21381_v11 = vld [vmem:[%s21865_s7 + $0x2920] sm:$0xff]  }
 0x594   : > { %19675 = vmatpush3.bf16.msra.mxu0 %v21340_v12  ;;  %v21382_v12 = vld [vmem:[%s21865_s7 + $0x29a0] sm:$0xff]  }
 0x595   : > { %19676 = vmatprep.subr.bf16.mxu0 %v21342_v14  ;;  %19697 = vmatpush3.bf16.msra.mxu1 %v21341_v13  ;;  %v21383_v13 = vld [vmem:[%s21865_s7 + $0x2968] sm:$0xff]  }
 0x596   : > { %19698 = vmatprep.subr.bf16.mxu1 %v21343_v15  ;;  %v21384_v15 = vld [vmem:[%s21865_s7 + $0x29e8] sm:$0xff]  }
 0x598   : > { %19677 = vmatpush3.bf16.msra.mxu0 %v21344_v16 }
 0x599   : > { %19678 = vmatprep.subr.bf16.mxu0 %v21346_v18  ;;  %19699 = vmatpush3.bf16.msra.mxu1 %v21345_v17  ;;  %v21385_v17 = vld [vmem:[%s21865_s7 + $0x2928] sm:$0xff]  }
 0x59a   : > { %19700 = vmatprep.subr.bf16.mxu1 %v21347_v19 }
 0x59c   : > { %19679 = vmatpush3.bf16.msra.mxu0 %v21348_v20 }
 0x59d   : > { %19680 = vmatprep.subr.bf16.mxu0 %v21350_v22  ;;  %19701 = vmatpush3.bf16.msra.mxu1 %v21349_v21  ;;  %v21386_v22 = vld [vmem:[%s21865_s7 + $0x29a8] sm:$0xff]  }
 0x59e   : > { %v19378_v23 = vpop.f32.mrb[132].mxu0  ;;  %19702 = vmatprep.subr.bf16.mxu1 %v21351_v24  ;;  %v21387_v24 = vld [vmem:[%s21865_s7 + $0x2970] sm:$0xff]  }
 0x59f   : > { %v19379_v25 = vpop.f32.mrb[133].mxu0  ;;  %v19400_v27 = vpop.f32.mrb[132].mxu1 }
 0x5a0   : > { %v19380_v28 = vadd.f32 %v19379_v25, %v19378_v23  ;;  %v19381_v29 = vpop.f32.mrb[134].mxu0  ;;  %v19401_v32 = vpop.f32.mrb[133].mxu1  ;;  %19681 = vmatpush3.bf16.msra.mxu0 %v21352_v26 }
 0x5a1   : > { %v19382_v33 = vpop.f32.mrb[135].mxu0  ;;  %v19402_v35 = vadd.f32 %v19401_v32, %v19400_v27  ;;  %v19403_v36 = vpop.f32.mrb[134].mxu1  ;;  %19682 = vmatprep.subr.bf16.mxu0 %v21354_v31  ;;  %19703 = vmatpush3.bf16.msra.mxu1 %v21353_v30  ;;  %v21389_v30 = vld [vmem:[%s21865_s7 + $0x2930] sm:$0xff]   ;;  %v21391_v32 = vld [vmem:[%s21865_s7 + $0x2978] sm:$0xff]  }
 0x5a2   : > { %v15428_v34 = vadd.f32 %v19380_v28, %v23377_v50  ;;  %v19404_v38 = vpop.f32.mrb[135].mxu1  ;;  %19704 = vmatprep.subr.bf16.mxu1 %v21355_v37  ;;  %v21363_v50 = vld [vmem:[%s21865_s7 + $0x2940] sm:$0xff]   ;;  %v21388_v28 = vld [vmem:[%s21865_s7 + $0x29f0] sm:$0xff]  }
 0x5a3   : > { %v21390_v33 = vld [vmem:[%s21865_s7 + $0x29b0] sm:$0xff]   ;;  %v342_v36 = vld [vmem:[%s21883_s27 + $0x148] sm:$0xff] }
 0x5a4   : > { %v23415_v40 = vadd.f32 %v19402_v35, %v15428_v34  ;;  %19683 = vmatpush3.bf16.msra.mxu0 %v21356_v39  ;;  %v21392_v34 = vld [vmem:[%s21865_s7 + $0x29f8] sm:$0xff]   ;;  %v1093_v37 = vrot.slane %v342_v36, %v21922_v42  ;;  %v1086_v38 = vcombine.high %v342_v36, %v342_v36  ;;  %v21396_v39 = vld [vmem:[%s21865_s7 + $0x2a40] sm:$0xff]  }
 0x5a5   : > { %19684 = vmatprep.subr.bf16.mxu0 %v21358_v43  ;;  %19705 = vmatpush3.bf16.msra.mxu1 %v21357_v41  ;;  %v21393_v35 = vld [vmem:[%s21865_s7 + $0x2938] sm:$0xff]  }
 0x5a6   : > { %19706 = vmatprep.subr.bf16.mxu1 %v21359_v44  ;;  %v1101_v41 = vcombine.high %v1093_v37, %v1093_v37  ;;  %v1100_v43 = vrot.slane %v1086_v38, %v21922_v42  ;;  %v21397_v44 = vld [vmem:[%s21865_s7 + $0x2ac0] sm:$0xff]  }
 0x5a7   : > { %v21431_v38 = vld [vmem:[%s21865_s7 + $0x2b00] sm:$0xff]  }
 0x5a8   : > { %19685 = vmatpush3.bf16.msra.mxu0 %v21360_v45  ;;  %v1477_v45 = vpack.c.bf16 %v1093_v37, %v1093_v37  ;;  %v1102_v48 = vcombine.high %v1100_v43, %v1100_v43 }
 0x5a9   : > { %19714 = vmatprep.subr.bf16.mxu0 %v21363_v50  ;;  %19707 = vmatpush3.bf16.msra.mxu1 %v21361_v47  ;;  %v1478_v47 = vpack.c.bf16 %v1101_v41, %v1101_v41  ;;  %v1479_v50 = vpack.c.bf16 %v1100_v43, %v1100_v43  ;;  %v21432_v43 = vld [vmem:[%s21865_s7 + $0x2b80] sm:$0xff]  }
 0x5aa   : > { %19736 = vmatprep.subr.bf16.mxu1 %v21364_v53  ;;  %v1480_v52 = vpack.c.bf16 %v1102_v48, %v1102_v48  ;;  %v21401_v53 = vld [vmem:[%s21865_s7 + $0x2ac8] sm:$0xff]   ;;  %v21438_v48 = vld [vmem:[%s21865_s7 + $0x2bd0] sm:$0xff]  }
 0x5ab   : > { %15986 = vmatmul.mubr.bf16.vlgmr.msra.gmra.mrb[160].mxu0 %v1473_v54  ;;  %v21402_v54 = vld [vmem:[%s21865_s7 + $0x2a08] sm:$0xff]  }
 0x5ac   : > { %19715 = vmatpush3.bf16.msra.mxu0 %v21365_v55  ;;  %16026 = vmatmul.mubr.bf16.vlgmr.msra.gmra.mrb[160].mxu1 %v1475_v59  ;;  %v21403_v55 = vld [vmem:[%s21865_s7 + $0x2a88] sm:$0xff]   ;;  %v21407_v59 = vld [vmem:[%s21865_s7 + $0x2a90] sm:$0xff]  }
 0x5ad   : > { %19716 = vmatprep.subr.bf16.mxu0 %v21367_v60  ;;  %19737 = vmatpush3.bf16.msra.mxu1 %v21366_v58  ;;  %v21406_v58 = vld [vmem:[%s21865_s7 + $0x2a10] sm:$0xff]   ;;  %v21408_v60 = vld [vmem:[%s21865_s7 + $0x2a58] sm:$0xff]  }
 0x5ae   : > { %19738 = vmatprep.subr.bf16.mxu1 %v21368_v62  ;;  %16065 = vmatprep.mubr.bf16.mxu0 %v1478_v47  ;;  %v21410_v62 = vld [vmem:[%s21865_s7 + $0x2a18] sm:$0xff]   ;;  %v21436_v47 = vld [vmem:[%s21865_s7 + $0x2b88] sm:$0xff]  }
 0x5af   : > { %16105 = vmatprep.mubr.bf16.mxu1 %v1480_v52  ;;  %v21442_v52 = vld [vmem:[%s21865_s7 + $0x2bd8] sm:$0xff]  }
 0x5b0   : > { %19717 = vmatpush3.bf16.msra.mxu0 %v21369_v63  ;;  %v21411_v63 = vld [vmem:[%s21865_s7 + $0x2a98] sm:$0xff]  }
 0x5b1   : > { %19718 = vmatprep.subr.bf16.mxu0 %v21371_v1  ;;  %19739 = vmatpush3.bf16.msra.mxu1 %v21370_v0  ;;  %v21412_v0 = vld [vmem:[%s21865_s7 + $0x2a60] sm:$0xff]  }
 0x5b2   : > { %19740 = vmatprep.subr.bf16.mxu1 %v21372_v2  ;;  %v21413_v1 = vld [vmem:[%s21865_s7 + $0x2ae0] sm:$0xff]  }
 0x5b3   : > { %v21414_v2 = vld [vmem:[%s21865_s7 + $0x2a20] sm:$0xff]  }
 0x5b4   : > { %19719 = vmatpush3.bf16.msra.mxu0 %v21373_v3  ;;  %v21415_v3 = vld [vmem:[%s21865_s7 + $0x2aa0] sm:$0xff]  }
 0x5b5   : > { %19720 = vmatprep.subr.bf16.mxu0 %v21375_v5  ;;  %19741 = vmatpush3.bf16.msra.mxu1 %v21374_v4  ;;  %v21416_v4 = vld [vmem:[%s21865_s7 + $0x2a68] sm:$0xff]  }
 0x5b6   : > { %19742 = vmatprep.subr.bf16.mxu1 %v21376_v6  ;;  %v21417_v6 = vld [vmem:[%s21865_s7 + $0x2ae8] sm:$0xff]  }
 0x5b8   : > { %19721 = vmatpush3.bf16.msra.mxu0 %v21377_v7 }
 0x5b9   : > { %19722 = vmatprep.subr.bf16.mxu0 %v21379_v9  ;;  %19743 = vmatpush3.bf16.msra.mxu1 %v21378_v8  ;;  %v21418_v8 = vld [vmem:[%s21865_s7 + $0x2a28] sm:$0xff]  }
 0x5ba   : > { %19744 = vmatprep.subr.bf16.mxu1 %v21380_v10 }
 0x5bc   : > { %19723 = vmatpush3.bf16.msra.mxu0 %v21381_v11 }
 0x5bd   : > { %19724 = vmatprep.subr.bf16.mxu0 %v21383_v13  ;;  %19745 = vmatpush3.bf16.msra.mxu1 %v21382_v12  ;;  %v21419_v12 = vld [vmem:[%s21865_s7 + $0x2aa8] sm:$0xff]   ;;  %v21420_v13 = vld [vmem:[%s21865_s7 + $0x2a70] sm:$0xff]  }
 0x5be   : > { %v19422_v14 = vpop.f32.mrb[136].mxu0  ;;  %19746 = vmatprep.subr.bf16.mxu1 %v21384_v15 }
 0x5bf   : > { %v19423_v16 = vpop.f32.mrb[137].mxu0  ;;  %v19444_v18 = vpop.f32.mrb[136].mxu1 }
 0x5c0   : > { %v19424_v19 = vadd.f32 %v19423_v16, %v19422_v14  ;;  %v19425_v20 = vpop.f32.mrb[138].mxu0  ;;  %v19445_v21 = vpop.f32.mrb[137].mxu1  ;;  %19725 = vmatpush3.bf16.msra.mxu0 %v21385_v17 }
 0x5c1   : > { %v19426_v23 = vpop.f32.mrb[139].mxu0  ;;  %v19446_v26 = vadd.f32 %v19445_v21, %v19444_v18  ;;  %v19447_v27 = vpop.f32.mrb[138].mxu1  ;;  %19726 = vmatprep.subr.bf16.mxu0 %v21387_v24  ;;  %19747 = vmatpush3.bf16.msra.mxu1 %v21386_v22  ;;  %v21422_v21 = vld [vmem:[%s21865_s7 + $0x2a30] sm:$0xff]   ;;  %v21424_v24 = vld [vmem:[%s21865_s7 + $0x2a78] sm:$0xff]  }
 0x5c2   : > { %v15508_v25 = vadd.f32 %v19424_v19, %v23415_v40  ;;  %v19448_v29 = vpop.f32.mrb[139].mxu1  ;;  %19748 = vmatprep.subr.bf16.mxu1 %v21388_v28  ;;  %v21394_v40 = vld [vmem:[%s21865_s7 + $0x29b8] sm:$0xff]   ;;  %v21421_v19 = vld [vmem:[%s21865_s7 + $0x2af0] sm:$0xff]  }
 0x5c3   : > { %v21423_v23 = vld [vmem:[%s21865_s7 + $0x2ab0] sm:$0xff]  }
 0x5c4   : > { %v23453_v31 = vadd.f32 %v19446_v26, %v15508_v25  ;;  %19727 = vmatpush3.bf16.msra.mxu0 %v21389_v30  ;;  %v21425_v25 = vld [vmem:[%s21865_s7 + $0x2af8] sm:$0xff]   ;;  %v343_v27 = vld [vmem:[%s21883_s27 + $0x150] sm:$0xff]  ;;  %v21429_v30 = vld [vmem:[%s21865_s7 + $0x2b40] sm:$0xff]  }
 0x5c5   : > { %19728 = vmatprep.subr.bf16.mxu0 %v21391_v32  ;;  %19749 = vmatpush3.bf16.msra.mxu1 %v21390_v33  ;;  %v21426_v26 = vld [vmem:[%s21865_s7 + $0x2a38] sm:$0xff]   ;;  %v1110_v28 = vrot.slane %v343_v27, %v21922_v42  ;;  %v1103_v29 = vcombine.high %v343_v27, %v343_v27 }
 0x5c6   : > { %19750 = vmatprep.subr.bf16.mxu1 %v21392_v34  ;;  %v21430_v34 = vld [vmem:[%s21865_s7 + $0x2bc0] sm:$0xff]  }
 0x5c7   : > { %v1118_v32 = vcombine.high %v1110_v28, %v1110_v28  ;;  %v1117_v33 = vrot.slane %v1103_v29, %v21922_v42 }
 0x5c8   : > { %19729 = vmatpush3.bf16.msra.mxu0 %v21393_v35  ;;  %v1481_v35 = vpack.c.bf16 %v1110_v28, %v1110_v28 }
 0x5c9   : > { %19758 = vmatprep.subr.bf16.mxu0 %v21396_v39  ;;  %19751 = vmatpush3.bf16.msra.mxu1 %v21394_v40  ;;  %v1482_v36 = vpack.c.bf16 %v1118_v32, %v1118_v32  ;;  %v1119_v37 = vcombine.high %v1117_v33, %v1117_v33  ;;  %v1483_v39 = vpack.c.bf16 %v1117_v33, %v1117_v33  ;;  %v21433_v40 = vld [vmem:[%s21865_s7 + $0x2b48] sm:$0xff]  }
 0x5ca   : > { %19780 = vmatprep.subr.bf16.mxu1 %v21397_v44  ;;  %v21434_v44 = vld [vmem:[%s21865_s7 + $0x2bc8] sm:$0xff]  }
 0x5cb   : > { %16066 = vmatmul.mubr.bf16.vlgmr.msra.gmra.mrb[164].mxu0 %v1477_v45  ;;  %v1484_v41 = vpack.c.bf16 %v1119_v37, %v1119_v37  ;;  %v21435_v45 = vld [vmem:[%s21865_s7 + $0x2b08] sm:$0xff]  }
 0x5cc   : > { %19759 = vmatpush3.bf16.msra.mxu0 %v21398_v46  ;;  %16106 = vmatmul.mubr.bf16.vlgmr.msra.gmra.mrb[164].mxu1 %v1479_v50  ;;  %v21437_v46 = vld [vmem:[%s21865_s7 + $0x2b50] sm:$0xff]   ;;  %v21441_v50 = vld [vmem:[%s21865_s7 + $0x2b58] sm:$0xff]  }
 0x5cd   : > { %19760 = vmatprep.subr.bf16.mxu0 %v21400_v51  ;;  %19781 = vmatpush3.bf16.msra.mxu1 %v21399_v49  ;;  %v21439_v49 = vld [vmem:[%s21865_s7 + $0x2b10] sm:$0xff]  }
 0x5ce   : > { %19782 = vmatprep.subr.bf16.mxu1 %v21401_v53  ;;  %16145 = vmatprep.mubr.bf16.mxu0 %v1482_v36  ;;  %v21440_v51 = vld [vmem:[%s21865_s7 + $0x2b90] sm:$0xff]   ;;  %v21443_v53 = vld [vmem:[%s21865_s7 + $0x2b18] sm:$0xff]  }
 0x5cf   : > { %16185 = vmatprep.mubr.bf16.mxu1 %v1484_v41 }
 0x5d0   : > { %19761 = vmatpush3.bf16.msra.mxu0 %v21402_v54  ;;  %v21445_v54 = vld [vmem:[%s21865_s7 + $0x2b60] sm:$0xff]  }
 0x5d1   : > { %19762 = vmatprep.subr.bf16.mxu0 %v21404_v56  ;;  %19783 = vmatpush3.bf16.msra.mxu1 %v21403_v55  ;;  %v21444_v55 = vld [vmem:[%s21865_s7 + $0x2b98] sm:$0xff]   ;;  %v21446_v56 = vld [vmem:[%s21865_s7 + $0x2be0] sm:$0xff]  }
 0x5d2   : > { %19784 = vmatprep.subr.bf16.mxu1 %v21405_v57  ;;  %v21447_v57 = vld [vmem:[%s21865_s7 + $0x2b20] sm:$0xff]  }
 0x5d4   : > { %19763 = vmatpush3.bf16.msra.mxu0 %v21406_v58  ;;  %v21449_v58 = vld [vmem:[%s21865_s7 + $0x2b68] sm:$0xff]  }
 0x5d5   : > { %19764 = vmatprep.subr.bf16.mxu0 %v21408_v60  ;;  %19785 = vmatpush3.bf16.msra.mxu1 %v21407_v59  ;;  %v21448_v59 = vld [vmem:[%s21865_s7 + $0x2ba0] sm:$0xff]  }
 0x5d6   : > { %19786 = vmatprep.subr.bf16.mxu1 %v21409_v61 }
 0x5d8   : > { %19765 = vmatpush3.bf16.msra.mxu0 %v21410_v62  ;;  %v21450_v62 = vld [vmem:[%s21865_s7 + $0x2be8] sm:$0xff]  }
 0x5d9   : > { %19766 = vmatprep.subr.bf16.mxu0 %v21412_v0  ;;  %19787 = vmatpush3.bf16.msra.mxu1 %v21411_v63 }
 0x5da   : > { %19788 = vmatprep.subr.bf16.mxu1 %v21413_v1 }
 0x5dc   : > { %19767 = vmatpush3.bf16.msra.mxu0 %v21414_v2  ;;  %v21451_v2 = vld [vmem:[%s21865_s7 + $0x2b28] sm:$0xff]  }
 0x5dd   : > { %19768 = vmatprep.subr.bf16.mxu0 %v21416_v4  ;;  %19789 = vmatpush3.bf16.msra.mxu1 %v21415_v3  ;;  %v21453_v3 = vld [vmem:[%s21865_s7 + $0x2b70] sm:$0xff]  }
 0x5de   : > { %v19466_v5 = vpop.f32.mrb[140].mxu0  ;;  %19790 = vmatprep.subr.bf16.mxu1 %v21417_v6 }
 0x5df   : > { %v19467_v7 = vpop.f32.mrb[141].mxu0  ;;  %v19488_v9 = vpop.f32.mrb[140].mxu1 }
 0x5e0   : > { %v19468_v10 = vadd.f32 %v19467_v7, %v19466_v5  ;;  %v19469_v11 = vpop.f32.mrb[142].mxu0  ;;  %v19489_v14 = vpop.f32.mrb[141].mxu1  ;;  %19769 = vmatpush3.bf16.msra.mxu0 %v21418_v8 }
 0x5e1   : > { %v19470_v15 = vpop.f32.mrb[143].mxu0  ;;  %v19490_v17 = vadd.f32 %v19489_v14, %v19488_v9  ;;  %v19491_v18 = vpop.f32.mrb[142].mxu1  ;;  %19770 = vmatprep.subr.bf16.mxu0 %v21420_v13  ;;  %19791 = vmatpush3.bf16.msra.mxu1 %v21419_v12  ;;  %v21452_v9 = vld [vmem:[%s21865_s7 + $0x2ba8] sm:$0xff]   ;;  %v21454_v11 = vld [vmem:[%s21865_s7 + $0x2bf0] sm:$0xff]   ;;  %v21457_v14 = vld [vmem:[%s21865_s7 + $0x2b78] sm:$0xff]  }
 0x5e2   : > { %v15588_v16 = vadd.f32 %v19468_v10, %v23453_v31  ;;  %v19492_v20 = vpop.f32.mrb[143].mxu1  ;;  %19792 = vmatprep.subr.bf16.mxu1 %v21421_v19  ;;  %v21427_v31 = vld [vmem:[%s21865_s7 + $0x2ab8] sm:$0xff]   ;;  %v21455_v13 = vld [vmem:[%s21865_s7 + $0x2b30] sm:$0xff]  }
 0x5e3   : > { %v21456_v15 = vld [vmem:[%s21865_s7 + $0x2bb0] sm:$0xff]   ;;  %v21459_v18 = vld [vmem:[%s21865_s7 + $0x2b38] sm:$0xff]  }
 0x5e4   : > { %v23491_v22 = vadd.f32 %v19490_v17, %v15588_v16  ;;  %19771 = vmatpush3.bf16.msra.mxu0 %v21422_v21  ;;  %v21458_v16 = vld [vmem:[%s21865_s7 + $0x2bf8] sm:$0xff]  }
 0x5e5   : > { %19772 = vmatprep.subr.bf16.mxu0 %v21424_v24  ;;  %19793 = vmatpush3.bf16.msra.mxu1 %v21423_v23  ;;  %v344_v17 = vld [vmem:[%s21883_s27 + $0x158] sm:$0xff] }
 0x5e6   : > { %19794 = vmatprep.subr.bf16.mxu1 %v21425_v25  ;;  %v1127_v19 = vrot.slane %v344_v17, %v21922_v42  ;;  %v1120_v20 = vcombine.high %v344_v17, %v344_v17  ;;  %v21460_v21 = vld [vmem:[%s21865_s7 + $0x2bb8] sm:$0xff]  }
 0x5e8   : > { %19773 = vmatpush3.bf16.msra.mxu0 %v21426_v26  ;;  %v1134_v23 = vrot.slane %v1120_v20, %v21922_v42  ;;  %v1485_v24 = vpack.c.bf16 %v1127_v19, %v1127_v19 }
 0x5e9   : > { %19802 = vmatprep.subr.bf16.mxu0 %v21429_v30  ;;  %19795 = vmatpush3.bf16.msra.mxu1 %v21427_v31 }
 0x5ea   : > { %19824 = vmatprep.subr.bf16.mxu1 %v21430_v34  ;;  %v1136_v26 = vcombine.high %v1134_v23, %v1134_v23  ;;  %v1487_v27 = vpack.c.bf16 %v1134_v23, %v1134_v23 }
 0x5eb   : > { %16146 = vmatmul.mubr.bf16.vlgmr.msra.gmra.mrb[168].mxu0 %v1481_v35 }
 0x5ec   : > { %19803 = vmatpush3.bf16.msra.mxu0 %v21431_v38  ;;  %16186 = vmatmul.mubr.bf16.vlgmr.msra.gmra.mrb[168].mxu1 %v1483_v39  ;;  %v1488_v28 = vpack.c.bf16 %v1136_v26, %v1136_v26 }
 0x5ed   : > { %19804 = vmatprep.subr.bf16.mxu0 %v21433_v40  ;;  %19825 = vmatpush3.bf16.msra.mxu1 %v21432_v43 }
 0x5ee   : > { %19826 = vmatprep.subr.bf16.mxu1 %v21434_v44  ;;  %16265 = vmatprep.mubr.bf16.mxu1 %v1488_v28 }
 0x5f0   : > { %19805 = vmatpush3.bf16.msra.mxu0 %v21435_v45 }
 0x5f1   : > { %19806 = vmatprep.subr.bf16.mxu0 %v21437_v46  ;;  %19827 = vmatpush3.bf16.msra.mxu1 %v21436_v47 }
 0x5f2   : > { %19828 = vmatprep.subr.bf16.mxu1 %v21438_v48 }
 0x5f4   : > { %19807 = vmatpush3.bf16.msra.mxu0 %v21439_v49 }
 0x5f5   : > { %19808 = vmatprep.subr.bf16.mxu0 %v21441_v50  ;;  %19829 = vmatpush3.bf16.msra.mxu1 %v21440_v51 }
 0x5f6   : > { %19830 = vmatprep.subr.bf16.mxu1 %v21442_v52 }
 0x5f8   : > { %19809 = vmatpush3.bf16.msra.mxu0 %v21443_v53 }
 0x5f9   : > { %19810 = vmatprep.subr.bf16.mxu0 %v21445_v54  ;;  %19831 = vmatpush3.bf16.msra.mxu1 %v21444_v55 }
 0x5fa   : > { %19832 = vmatprep.subr.bf16.mxu1 %v21446_v56 }
 0x5fc   : > { %19811 = vmatpush3.bf16.msra.mxu0 %v21447_v57 }
 0x5fd   : > { %19812 = vmatprep.subr.bf16.mxu0 %v21449_v58  ;;  %19833 = vmatpush3.bf16.msra.mxu1 %v21448_v59 }
 0x5fe   : > { %v19510_v60 = vpop.f32.mrb[144].mxu0  ;;  %19834 = vmatprep.subr.bf16.mxu1 %v21450_v62 }
 0x5ff   : > { %v19511_v61 = vpop.f32.mrb[145].mxu0  ;;  %v19532_v63 = vpop.f32.mrb[144].mxu1 }
 0x600   : > { %v19512_v0 = vadd.f32 %v19511_v61, %v19510_v60  ;;  %v19513_v1 = vpop.f32.mrb[146].mxu0  ;;  %v19533_v4 = vpop.f32.mrb[145].mxu1  ;;  %19813 = vmatpush3.bf16.msra.mxu0 %v21451_v2 }
 0x601   : > { %v19514_v5 = vpop.f32.mrb[147].mxu0  ;;  %v19534_v7 = vadd.f32 %v19533_v4, %v19532_v63  ;;  %v19535_v8 = vpop.f32.mrb[146].mxu1  ;;  %19814 = vmatprep.subr.bf16.mxu0 %v21453_v3  ;;  %19835 = vmatpush3.bf16.msra.mxu1 %v21452_v9 }
 0x602   : > { %v15668_v6 = vadd.f32 %v19512_v0, %v23491_v22  ;;  %v19536_v10 = vpop.f32.mrb[147].mxu1  ;;  %19836 = vmatprep.subr.bf16.mxu1 %v21454_v11  ;;  %v1135_v22 = vcombine.high %v1127_v19, %v1127_v19 }
 0x604   : > { %v15708_v12 = vadd.f32 %v19534_v7, %v15668_v6  ;;  %19815 = vmatpush3.bf16.msra.mxu0 %v21455_v13  ;;  %v1486_v25 = vpack.c.bf16 %v1135_v22, %v1135_v22 }
 0x605   : > { %19816 = vmatprep.subr.bf16.mxu0 %v21457_v14  ;;  %19837 = vmatpush3.bf16.msra.mxu1 %v21456_v15 }
 0x606   : > { %19838 = vmatprep.subr.bf16.mxu1 %v21458_v16  ;;  %16225 = vmatprep.mubr.bf16.mxu0 %v1486_v25 }
 0x608   : > { %19817 = vmatpush3.bf16.msra.mxu0 %v21459_v18 }
 0x609   : > { %19839 = vmatpush3.bf16.msra.mxu1 %v21460_v21 }
 0x60b   : > { %16226 = vmatmul.mubr.bf16.vlgmr.msra.gmra.mrb[172].mxu0 %v1485_v24 }
 0x60c   : > { %16266 = vmatmul.mubr.bf16.vlgmr.msra.gmra.mrb[172].mxu1 %v1487_v27 }
 0x61e   : > { %v19554_v29 = vpop.f32.mrb[148].mxu0 }
 0x61f   : > { %v19555_v30 = vpop.f32.mrb[149].mxu0  ;;  %v19576_v31 = vpop.f32.mrb[148].mxu1 }
 0x620   : > { %v19556_v32 = vadd.f32 %v19555_v30, %v19554_v29  ;;  %v19557_v33 = vpop.f32.mrb[150].mxu0  ;;  %v19577_v34 = vpop.f32.mrb[149].mxu1 }
 0x621   : > { %v19558_v35 = vpop.f32.mrb[151].mxu0  ;;  %v19578_v36 = vadd.f32 %v19577_v34, %v19576_v31  ;;  %v19579_v37 = vpop.f32.mrb[150].mxu1 }
 0x622   : > { %v15748_v42 = vadd.f32 %v19556_v32, %v15708_v12  ;;  %v19580_v38 = vpop.f32.mrb[151].mxu1 }
 0x624   : > { %v15788_v39 = vadd.f32 %v19578_v36, %v15748_v42 }
 0x63e   : > { %v19598_v40 = vpop.f32.mrb[152].mxu0 }
 0x63f   : > { %v19599_v41 = vpop.f32.mrb[153].mxu0  ;;  %v19620_v43 = vpop.f32.mrb[152].mxu1 }
 0x640   : > { %v19600_v44 = vadd.f32 %v19599_v41, %v19598_v40  ;;  %v19601_v45 = vpop.f32.mrb[154].mxu0  ;;  %v19621_v46 = vpop.f32.mrb[153].mxu1 }
 0x641   : > { %v19602_v47 = vpop.f32.mrb[155].mxu0  ;;  %v19622_v49 = vadd.f32 %v19621_v46, %v19620_v43  ;;  %v19623_v50 = vpop.f32.mrb[154].mxu1 }
 0x642   : > { %v15828_v48 = vadd.f32 %v19600_v44, %v15788_v39  ;;  %v19624_v51 = vpop.f32.mrb[155].mxu1  ;;  %v300_v47 = vld [vmem:[#allocation2] sm:$0x3] }
 0x643   : > { %v16289_v51 = vld [vmem:[#allocation8] sm:$0xff] (!%p17902_p1) }
 0x644   : > { %v15868_v52 = vadd.f32 %v19622_v49, %v15828_v48 }
 0x65e   : > { %v19642_v53 = vpop.f32.mrb[156].mxu0 }
 0x65f   : > { %v19643_v54 = vpop.f32.mrb[157].mxu0  ;;  %v19664_v55 = vpop.f32.mrb[156].mxu1 }
 0x660   : > { %v19644_v56 = vadd.f32 %v19643_v54, %v19642_v53  ;;  %v19645_v57 = vpop.f32.mrb[158].mxu0  ;;  %v19665_v58 = vpop.f32.mrb[157].mxu1  ;;  %v16291_v53 = vld [vmem:[#allocation8 + $0x10] sm:$0xff] (!%p17902_p1)  ;;  %v21660_v54 = vmov (!%p17902_p1), 0.0|0.0  }
 0x661   : > { %v19646_v59 = vpop.f32.mrb[159].mxu0  ;;  %v19666_v61 = vadd.f32 %v19665_v58, %v19664_v55  ;;  %v19667_v62 = vpop.f32.mrb[158].mxu1  ;;  %19898 = vmatprep.subr.bf16.mxu0 (!%p17902_p1), %v21660_v54  ;;  %v21662_v57 = vmov (!%p17902_p1), 0.0  }
 0x662   : > { %v15908_v60 = vadd.f32 %v19644_v56, %v15868_v52  ;;  %v19668_v63 = vpop.f32.mrb[159].mxu1  ;;  %v16290_v52 = vld [vmem:[#allocation8 + $0x8] sm:$0xff] (!%p17902_p1)  ;;  %v16292_v56 = vld [vmem:[#allocation8 + $0x18] sm:$0xff] (!%p17902_p1)  ;;  %19895 = vmatprep.mubr.msk.f32.mxu0 (!%p17902_p1), %vm21661_vm0, %v21662_v57  ;;  %v16293_v59 = vld [vmem:[#allocation8 + $0x20] sm:$0xff] (!%p17902_p1) }
 0x663   : > { %v19899_v55 = vpack.c.bf16 (!%p17902_p1), %v16290_v52, %v16289_v51  ;;  %v19902_v58 = vpack.c.bf16 (!%p17902_p1), %v16292_v56, %v16291_v53  ;;  %v16295_v62 = vld [vmem:[#allocation8 + $0x30] sm:$0xff] (!%p17902_p1)  ;;  %v16296_v63 = vld [vmem:[#allocation8 + $0x38] sm:$0xff] (!%p17902_p1) }
 0x664   : > { %v15948_v0 = vadd.f32 %v19666_v61, %v15908_v60  ;;  %v16294_v60 = vld [vmem:[#allocation8 + $0x28] sm:$0xff] (!%p17902_p1) }
 0x665   : > { %19900 = vmatpush3.bf16.msra.mxu0 (!%p17902_p1), %v19899_v55  ;;  %v19905_v61 = vpack.c.bf16 (!%p17902_p1), %v16294_v60, %v16293_v59 }
 0x666   : > { %19901 = vmatprep.subr.bf16.mxu0 (!%p17902_p1), %v21660_v54 }
 0x669   : > { %19903 = vmatpush3.bf16.msra.mxu0 (!%p17902_p1), %v19902_v58 }
 0x66a   : > { %19904 = vmatprep.subr.bf16.mxu0 (!%p17902_p1), %v21660_v54 }
 0x66d   : > { %19906 = vmatpush3.bf16.msra.mxu0 (!%p17902_p1), %v19905_v61 }
 0x66e   : > { %19907 = vmatprep.subr.bf16.mxu0 (!%p17902_p1), %v21660_v54 }
 0x67e   : > { %v19686_v1 = vpop.f32.mrb[160].mxu0 }
 0x67f   : > { %v19687_v2 = vpop.f32.mrb[161].mxu0  ;;  %v19708_v3 = vpop.f32.mrb[160].mxu1 }
 0x680   : > { %v19688_v4 = vadd.f32 %v19687_v2, %v19686_v1  ;;  %v19689_v5 = vpop.f32.mrb[162].mxu0  ;;  %v19709_v6 = vpop.f32.mrb[161].mxu1  ;;  %v16297_v1 = vld [vmem:[#allocation8 + $0x40] sm:$0xff] (!%p17902_p1)  ;;  %v16298_v2 = vld [vmem:[#allocation8 + $0x48] sm:$0xff] (!%p17902_p1) }
 0x681   : > { %v19690_v7 = vpop.f32.mrb[163].mxu0  ;;  %v19710_v9 = vadd.f32 %v19709_v6, %v19708_v3  ;;  %v19711_v10 = vpop.f32.mrb[162].mxu1  ;;  %v19911_v3 = vpack.c.bf16 (!%p17902_p1), %v16298_v2, %v16297_v1  ;;  %v16300_v5 = vld [vmem:[#allocation8 + $0x58] sm:$0xff] (!%p17902_p1) }
 0x682   : > { %v15988_v8 = vadd.f32 %v19688_v4, %v15948_v0  ;;  %v19712_v11 = vpop.f32.mrb[163].mxu1  ;;  %v19908_v0 = vpack.c.bf16 (!%p17902_p1), %v16296_v63, %v16295_v62  ;;  %v16299_v4 = vld [vmem:[#allocation8 + $0x50] sm:$0xff] (!%p17902_p1)  ;;  %v16301_v7 = vld [vmem:[#allocation8 + $0x60] sm:$0xff] (!%p17902_p1) }
 0x683   : > { %v19914_v6 = vpack.c.bf16 (!%p17902_p1), %v16300_v5, %v16299_v4  ;;  %v17903_v11 = vld [vmem:[#allocation6] ss:$0 sm:$0xff] (!%p17902_p1) }
 0x684   : > { %v16028_v12 = vadd.f32 %v19710_v9, %v15988_v8  ;;  %19909 = vmatpush3.bf16.msra.mxu0 (!%p17902_p1), %v19908_v0  ;;  %v16302_v8 = vld [vmem:[#allocation8 + $0x68] sm:$0xff] (!%p17902_p1) }
 0x685   : > { %19910 = vmatprep.subr.bf16.mxu0 (!%p17902_p1), %v21660_v54  ;;  %v19917_v9 = vpack.c.bf16 (!%p17902_p1), %v16302_v8, %v16301_v7 }
 0x688   : > { %19912 = vmatpush3.bf16.msra.mxu0 (!%p17902_p1), %v19911_v3 }
 0x689   : > { %19913 = vmatprep.subr.bf16.mxu0 (!%p17902_p1), %v21660_v54 }
 0x68c   : > { %19915 = vmatpush3.bf16.msra.mxu0 (!%p17902_p1), %v19914_v6 }
 0x68d   : > { %19916 = vmatprep.subr.bf16.mxu0 (!%p17902_p1), %v21660_v54 }
 0x690   : > { %19918 = vmatpush3.bf16.msra.mxu0 (!%p17902_p1), %v19917_v9 }
 0x691   : > { %19919 = vmatprep.subr.bf16.mxu0 (!%p17902_p1), %v21660_v54 }
 0x69e   : > { %v19730_v13 = vpop.f32.mrb[164].mxu0 }
 0x69f   : > { %v19731_v14 = vpop.f32.mrb[165].mxu0  ;;  %v19752_v15 = vpop.f32.mrb[164].mxu1 }
 0x6a0   : > { %v19732_v16 = vadd.f32 %v19731_v14, %v19730_v13  ;;  %v19733_v17 = vpop.f32.mrb[166].mxu0  ;;  %v19753_v18 = vpop.f32.mrb[165].mxu1  ;;  %v16304_v13 = vld [vmem:[#allocation8 + $0x78] sm:$0xff] (!%p17902_p1) }
 0x6a1   : > { %v19734_v19 = vpop.f32.mrb[167].mxu0  ;;  %v19754_v21 = vadd.f32 %v19753_v18, %v19752_v15  ;;  %v19755_v22 = vpop.f32.mrb[166].mxu1  ;;  %v17904_v17 = vld [vmem:[#allocation9] ss:$0 sm:$0xff] (!%p17902_p1) }
 0x6a2   : > { %v16068_v20 = vadd.f32 %v19732_v16, %v16028_v12  ;;  %v19756_v23 = vpop.f32.mrb[167].mxu1  ;;  %v16303_v12 = vld [vmem:[#allocation8 + $0x70] sm:$0xff] (!%p17902_p1) }
 0x6a3   : > { %v19920_v15 = vpack.c.bf16 (!%p17902_p1), %v16304_v13, %v16303_v12 }
 0x6a4   : > { %v16108_v24 = vadd.f32 %v19754_v21, %v16068_v20 }
 0x6a5   : > { %19921 = vmatpush3.bf16.msra.mxu0 (!%p17902_p1), %v19920_v15 }
 0x6be   : > { %v19774_v25 = vpop.f32.mrb[168].mxu0 }
 0x6bf   : > { %v19775_v26 = vpop.f32.mrb[169].mxu0  ;;  %v19796_v27 = vpop.f32.mrb[168].mxu1 }
 0x6c0   : > { %v19776_v28 = vadd.f32 %v19775_v26, %v19774_v25  ;;  %v19777_v29 = vpop.f32.mrb[170].mxu0  ;;  %v19797_v30 = vpop.f32.mrb[169].mxu1 }
 0x6c1   : > { %v19778_v31 = vpop.f32.mrb[171].mxu0  ;;  %v19798_v33 = vadd.f32 %v19797_v30, %v19796_v27  ;;  %v19799_v34 = vpop.f32.mrb[170].mxu1 }
 0x6c2   : > { %v16148_v32 = vadd.f32 %v19776_v28, %v16108_v24  ;;  %v19800_v35 = vpop.f32.mrb[171].mxu1 }
 0x6c4   : > { %v16188_v42 = vadd.f32 %v19798_v33, %v16148_v32 }
 0x6de   : > { %v19818_v36 = vpop.f32.mrb[172].mxu0 }
 0x6df   : > { %v19819_v37 = vpop.f32.mrb[173].mxu0  ;;  %v19840_v38 = vpop.f32.mrb[172].mxu1 }
 0x6e0   : > { %v19820_v39 = vadd.f32 %v19819_v37, %v19818_v36  ;;  %v19821_v40 = vpop.f32.mrb[174].mxu0  ;;  %v19841_v41 = vpop.f32.mrb[173].mxu1 }
 0x6e1   : > { %v19822_v43 = vpop.f32.mrb[175].mxu0  ;;  %v19842_v45 = vadd.f32 %v19841_v41, %v19840_v38  ;;  %v19843_v46 = vpop.f32.mrb[174].mxu1 }
 0x6e2   : > { %v16228_v44 = vadd.f32 %v19820_v39, %v16188_v42  ;;  %v19844_v48 = vpop.f32.mrb[175].mxu1  ;;  %16278 = sbr.rel (%p17902_p1) target bundleno = 1995 (0x7cb), region = 64 }
 0x6e4   : > { %v16268_v49 = vadd.f32 %v19842_v45, %v16228_v44 }
 0x6e6   : > { %v16273_v50 = vadd.f32 %v16268_v49, %v300_v47 }
 0x6e8   : > { %16274 = vst [vmem:[#allocation2] sm:$0x3] %v16273_v50 }
 0x6ef   : > { %v16279_v10 = vld [vmem:[#allocation2] sm:$0x3] }
 0x6f0   : > { %v16287_v14 = vadd.f32 %v17903_v11, %v16279_v10 }
 0x6f2   : > { %v16288_v16 = vmax.f32 %v16287_v14, 0.0 }
 0x6f4   : > { %19896 = vmatmul.mubr.f32.vlgmr.msra.gmra.mrb[0].mxu0 %v16288_v16 }
 0x7c7   : > { %v16378_v18 = vpop.f32.mrb[0].mxu0 }
 0x7c8   : > { %v16379_v19 = vadd.f32 %v17904_v17, %v16378_v18  ;;  %v19897_v20 = vpop.f32.mrb[1].mxu0 }
 0x7ca   : > { %16382 = vst [vmem:[#allocation11] sm:$0x3] %v16379_v19 }
 0x7cb PF: > { %p19963_p4 = scmp.eq.s32.totalorder %s21713_s22, 1  ;;  %s21663_s21 = smov [#allocation11]  }
 0x7cc   : > { %s16390_s8 = sshll.u32 %s21663_s21, 4  ;;  %s16391_s8 = int_to_ptr.vmem [resolvable:$true] %s16390_s8 }
 0x7cd   : > { %s21576_s28 = scalar_lea.vmem %s16391_s8, 32  ;;  %p21583_p2 = scmp.lt.s32.totalorder %s16391_s8, %s16391_s8 }
 0x7ce   : > { %p21577_p8 = scmp.ne.s32.totalorder %s16391_s8, %s21576_s28  ;;  %p21584_p6 = scmp.lt.s32.totalorder %s21576_s28, %s21576_s28 }
 0x7d0   : > { %p21578_p12 = pnand %p21577_p8, %p19963_p4  ;;  %p21585_p13 = por %p21584_p6, %p21583_p2 }
 0x7d2   : > { %p21579_p0 = pneg %p21578_p12 }
 0x7d4   : > { %p21586_p3 = pnand %p21585_p13, %p21579_p0 }
 0x7d6   : > { %21589 = shalt.err (!%p21586_p3)
}
 0x7d7   : > { %s21590_s26 = scalar_lea.hbm %s23579_s5, 32 }
 0x7d8   : > { %p21591_p5 = scmp.ne.s32.totalorder %s23579_s5, %s21590_s26  ;;  %p21596_p9 = scmp.lt.u32.totalorder %s21590_s26, %s23579_s5 }
 0x7da   : > { %p21592_p7 = pnand %p21591_p5, %p19963_p4 }
 0x7dc   : > { %p21593_p10 = pneg %p21592_p7 }
 0x7de   : > { %p21598_p11 = pnand %p21596_p9, %p21593_p10 }
 0x7e0   : > { %21601 = shalt.err (!%p21598_p11)
}
 0x7e1   : > { %19939 = dma.vmem_to_hbm [thread:$0]  (%p19963_p4), %s16391_s8, 32, %s23579_s5, [#allocation5]  }
 0x7e2   : > { %21631 = dma.done.wait (%p19963_p4), [#allocation5], 32  }
 0x7e3   : > { %21633 = vsyncadd (%p19963_p4), [#allocation5], 4294967264 }
 0x7e4 PF: > { %p18_p1 = scmp.ge.s32.totalorder %s21809_s12, 4   ;;  %s23595_s18 = smov %s21640_s19 }
 0x7e5   : > { %s23596_s19 = smov %s21644_s20  ;;  %s23597_s20 = smov %s21819_s29 }
 0x7e6   : > { %s23598_s21 = smov %s21809_s12  ;;  %20 = sbr.rel (!%p18_p1) target bundleno = 6 (0x6), region = 100 }
 0x7ed   :  { %16403 = vsyncpa [#allocation4], 1 }
 0x7ee   :  { %16405 = vsyncpa [#allocation4 + $0x1], 1 }
 0x7ef   :  { %16406 = vsyncpa [#allocation7], 1 }
 0x7f0   :  { %16407 = vsyncpa [#allocation10], 1 }
 0x7f1   :  { %16408 = vsyncpa [#allocation5], 1 }
 0x7f2   :  { %16410 = vsyncpa [#allocation5 + $0x1], 1 }

</bundles_post_ra>
